<compile_context>
chip_gen: v7x
topology: tpu7x:2x2x1
jax: 0.10.0
libtpu: 0.0.40
codegen_flags: <defaults>
</compile_context>

<pallas_src>
import functools

import jax
import jax.numpy as jnp
from jax import lax
from jax.experimental import pallas as pl
from jax.experimental.pallas import tpu as pltpu

LN_EPS = 1e-6   # LayerNorm eps used by ConvNeXtBlock
KS = 7          # depthwise kernel size
PAD = 3         # padding=3 -> 'same'


def _round_up(a, b):
    return (a + b - 1) // b * b


def _pick_h_tile(H, W, target_tokens):
    """Largest divisor of H so that one row tile holds <= target_tokens tokens."""
    best = 1
    for ht in range(1, H + 1):
        if H % ht == 0 and ht * W <= max(target_tokens, W):
            best = ht
    return best


def _erf(x):
    """erf via Abramowitz & Stegun 7.1.26 (max abs err ~1.5e-7).

    exp/mul/add/where only (guaranteed Mosaic lowering); the divide is an
    approximate reciprocal so it runs on the otherwise-idle EUP slot.
    """
    a1, a2, a3 = 0.254829592, -0.284496736, 1.421413741
    a4, a5, p = -1.453152027, 1.061405429, 0.3275911
    ax = jnp.abs(x)
    t = pl.reciprocal(1.0 + p * ax, approx=True)
    poly = ((((a5 * t + a4) * t + a3) * t + a2) * t + a1) * t
    e = 1.0 - poly * jnp.exp(-ax * ax)
    return jnp.where(x >= 0.0, e, -e)


def _gelu_exact(x):
    # nn.GELU() default = exact erf formulation: 0.5*x*(1+erf(x/sqrt(2)))
    return 0.5 * x * (1.0 + _erf(x * 0.7071067811865476))


def convnext_block_kernel(x_ref, dww_ref, pvec_ref, b1_ref, w1_ref, w2_ref,
                          o_ref, xpad_ref, *, h_tile):
    """One batch element per grid step; fused, row-tiled, intermediates VMEM-resident."""
    _, H, W, C = o_ref.shape
    Wp = xpad_ref.shape[1]
    f32 = jnp.float32
    bf16 = jnp.bfloat16

    # ---- per-channel vectors: one packed (5, C) load, hoisted above the tile loop ----
    pvec = pvec_ref[...]                       # rows: dw bias, ln w, ln b, b2, gamma
    dwb = pvec[0:1, :]
    lnw = pvec[1:2, :]
    lnb = pvec[2:3, :]
    b2 = pvec[3:4, :]
    gamma = pvec[4:5, :]
    b1 = b1_ref[...]                           # (1, 4*C) f32

    # ---- stage input into the zero-padded VMEM slab ----------------------------------
    # Interior is fully overwritten every grid step; only the 3-wide halo needs zeros.
    # Halo is re-zeroed per step (cheap) so the kernel stays correct under megacore
    # sharding of the "parallel" batch axis (each core has a private scratch).
    xpad_ref[0:PAD, :, :] = jnp.zeros((PAD, Wp, C), f32)
    xpad_ref[PAD + H:PAD + H + PAD, :, :] = jnp.zeros((PAD, Wp, C), f32)
    xpad_ref[PAD:PAD + H, 0:PAD, :] = jnp.zeros((H, PAD, C), f32)
    xpad_ref[PAD:PAD + H, PAD + W:PAD + W + PAD, :] = jnp.zeros((H, PAD, C), f32)
    xpad_ref[PAD:PAD + H, PAD:PAD + W, :] = x_ref[0].astype(f32)   # x never kept live

    n_tiles = H // h_tile
    T = h_tile * W

    def tile_body(t, carry):
        h0 = t * h_tile

        # ---- 7x7 depthwise conv on this row tile ------------------------------------
        # 7 full-width row-band loads (one per dy); the 7 dx shifts are taken
        # in-register so the vld slot is no longer the bottleneck.
        dww = dww_ref[...]                                   # (49, C), tile-local live range
        acc = jnp.zeros((h_tile, W, C), f32)
        for dy in range(KS):
            band = xpad_ref[pl.ds(h0 + dy, h_tile), :, :]    # (h_tile, Wp, C)
            for dx in range(KS):
                tap = dww[dy * KS + dx].reshape(1, 1, C)
                acc = acc + band[:, dx:dx + W, :] * tap
        y = acc.reshape(T, C) + dwb                          # (T, C) + bias

        # ---- LayerNorm over channels (channels_last, eps=1e-6, biased variance) -----
        mu = jnp.mean(y, axis=-1, keepdims=True)
        d = y - mu
        var = jnp.mean(d * d, axis=-1, keepdims=True)
        yn = d * lax.rsqrt(var + LN_EPS) * lnw + lnb

        # ---- pwconv1 -> GELU -> pwconv2 on the MXU (bf16 operands, f32 accumulate) --
        h = jnp.dot(yn.astype(bf16), w1_ref[...], preferred_element_type=f32) + b1
        h = _gelu_exact(h)
        z = jnp.dot(h.astype(bf16), w2_ref[...], preferred_element_type=f32) + b2

        # ---- layer scale (gamma) + residual (residual re-read, never held live) -----
        z = z * gamma
        xres = xpad_ref[pl.ds(h0 + PAD, h_tile), PAD:PAD + W, :]
        out = xres.reshape(T, C) + z
        # TODO(synk): drop_path > 0 (stochastic depth) not implemented; the module
        # default drop_path=0.0 (identity) is what is computed here.
        o_ref[0, pl.ds(h0, h_tile), :, :] = out.reshape(h_tile, W, C).astype(o_ref.dtype)
        return carry

    lax.fori_loop(0, n_tiles, tile_body, 0)


def _const_spec(shape):
    """BlockSpec for a weight/bias operand: constant index map, single-buffered."""
    idx = lambda n: (0,) * len(shape)
    try:
        return pl.BlockSpec(shape, idx, pipeline_mode=pl.Buffered(buffer_count=1))
    except (TypeError, AttributeError):
        # Older JAX without pipeline_mode: fall back to default double-buffering.
        return pl.BlockSpec(shape, idx)


def convnext_block(x_nchw, params, *, row_tile_tokens=512):
    """Forward pass of ConvNeXtBlock. x_nchw: (N, C, H, W) like PyTorch."""
    dw_w, dw_b, ln_w, ln_b, w1, b1, w2, b2, gamma = params
    N, C, H, W = x_nchw.shape
    hid = w1.shape[1]
    f32 = jnp.float32
    bf16 = jnp.bfloat16

    if gamma is None:                      # layer_scale_init_value <= 0 -> no layer scale
        gamma = jnp.ones((C,), f32)

    # NHWC inside the kernel so channels sit on the 128-lane axis (wrapper glue only).
    x = jnp.transpose(x_nchw, (0, 2, 3, 1)).astype(f32)

    dww = dw_w.reshape(KS * KS, C).astype(f32)                         # (49, C): [dy*7+dx, c]
    pvec = jnp.stack([dw_b, ln_w, ln_b, b2, gamma]).astype(f32)        # (5, C) packed vectors
    b1r = b1.reshape(1, hid).astype(f32)
    w1bf = w1.astype(bf16)                                             # MXU-native weights
    w2bf = w2.astype(bf16)

    ht = _pick_h_tile(H, W, row_tile_tokens)          # row-tile height (divides H)
    Wp = _round_up(W + 2 * PAD, 8)                    # sublane-aligned padded width

    operands = (x, dww, pvec, b1r, w1bf, w2bf)
    in_specs = [pl.BlockSpec((1, H, W, C), lambda n: (n, 0, 0, 0))]
    in_specs += [_const_spec(a.shape) for a in operands[1:]]

    # Rough VMEM budget; only raise the scoped limit when the 32 MiB default would be
    # exceeded (large C / large images).
    vmem_bytes = int(
        (H + 2 * PAD) * Wp * C * 4            # padded input slab (scratch)
        + 2 * 2 * H * W * C * 4               # x-in + out, double buffered
        + 2 * (C * hid + hid * C) * 2         # bf16 weights (worst case 2 buffers)
        + 2 * ((KS * KS + 5) * C * 4 + hid * 4)
        + 4 * ht * W * (C + hid) * 4          # live row-tile intermediates headroom
    )
    compiler_params = pltpu.CompilerParams(
        # TODO(synk): for N==1 on v7x a halo-tiled spatial "parallel" axis would keep the
        # second TensorCore busy; here only the batch axis is parallel.
        dimension_semantics=("parallel",),
        vmem_limit_bytes=vmem_bytes if vmem_bytes > (32 << 20) else None,
    )

    out_nhwc = pl.pallas_call(
        functools.partial(convnext_block_kernel, h_tile=ht),
        out_shape=jax.ShapeDtypeStruct((N, H, W, C), f32),
        grid_spec=pltpu.PrefetchScalarGridSpec(
            num_scalar_prefetch=0,
            grid=(N,),
            in_specs=in_specs,
            out_specs=pl.BlockSpec((1, H, W, C), lambda n: (n, 0, 0, 0)),
            scratch_shapes=[pltpu.VMEM((H + 2 * PAD, Wp, C), f32)],
        ),
        compiler_params=compiler_params,
    )(*operands)

    return jnp.transpose(out_nhwc, (0, 3, 1, 2)).astype(x_nchw.dtype)   # back to NCHW


def _ref_forward(x, params):
    """Pure-JAX reference matching the PyTorch ConvNeXtBlock forward."""
    dw_w, dw_b, ln_w, ln_b, w1, b1, w2, b2, gamma = params
    N, C, H, W = x.shape
    y = lax.conv_general_dilated(
        x, dw_w.reshape(KS, KS, 1, C),
        window_strides=(1, 1), padding=((PAD, PAD), (PAD, PAD)),
        dimension_numbers=("NCHW", "HWIO", "NCHW"),
        feature_group_count=C)
    y = y + dw_b.reshape(1, C, 1, 1)
    t = jnp.transpose(y, (0, 2, 3, 1))                      # NHWC
    mu = jnp.mean(t, axis=-1, keepdims=True)
    var = jnp.mean((t - mu) ** 2, axis=-1, keepdims=True)
    t = (t - mu) / jnp.sqrt(var + LN_EPS) * ln_w + ln_b
    t = t @ w1 + b1
    t = jax.nn.gelu(t, approximate=False)
    t = t @ w2 + b2
    t = t * gamma
    return x + jnp.transpose(t, (0, 3, 1, 2))               # drop_path=0 -> identity


if __name__ == "__main__":
    key = jax.random.PRNGKey(0)
    ks = jax.random.split(key, 10)

    N, C, H, W = 2, 64, 16, 16
    hid = 4 * C

    x = jax.random.normal(ks[0], (N, C, H, W), jnp.float32)
    # dw_w[kh, kw, c] corresponds to torch dwconv.weight[c, 0, kh, kw]
    dw_w = 0.1 * jax.random.normal(ks[1], (KS, KS, C), jnp.float32)
    dw_b = 0.1 * jax.random.normal(ks[2], (C,), jnp.float32)
    ln_w = 1.0 + 0.1 * jax.random.normal(ks[3], (C,), jnp.float32)
    ln_b = 0.1 * jax.random.normal(ks[4], (C,), jnp.float32)
    w1 = 0.1 * jax.random.normal(ks[5], (C, hid), jnp.float32)   # pwconv1 weight^T
    b1 = 0.1 * jax.random.normal(ks[6], (hid,), jnp.float32)
    w2 = 0.05 * jax.random.normal(ks[7], (hid, C), jnp.float32)  # pwconv2 weight^T
    b2 = 0.1 * jax.random.normal(ks[8], (C,), jnp.float32)
    # module init is layer_scale_init_value*ones; random values make the branch
    # actually contribute to the correctness check (semantics identical either way)
    gamma = 0.5 * jax.random.normal(ks[9], (C,), jnp.float32)
    params = (dw_w, dw_b, ln_w, ln_b, w1, b1, w2, b2, gamma)

    # row_tile_tokens=128 -> 2 row tiles at this size, exercising the in-kernel tiling loop
    out = jax.block_until_ready(convnext_block(x, params, row_tile_tokens=128))
    ref = jax.block_until_ready(_ref_forward(x, params))

    assert out.shape == (N, C, H, W)
    max_err = float(jnp.max(jnp.abs(out - ref)))
    assert jnp.allclose(out, ref, atol=2e-2, rtol=2e-2), max_err
    print("KERNEL_OK")
</pallas_src>

<mosaic_0001>
module attributes {stable_mosaic.version = 11 : i64} {
  func.func @convnext_block_kernel(%arg0: i32, %arg1: memref<1x16x16x64xf32, #tpu.memory_space<vmem>>, %arg2: memref<49x64xf32, #tpu.memory_space<vmem>>, %arg3: memref<5x64xf32, #tpu.memory_space<vmem>>, %arg4: memref<1x256xf32, #tpu.memory_space<vmem>>, %arg5: memref<64x256xbf16, #tpu.memory_space<vmem>>, %arg6: memref<256x64xbf16, #tpu.memory_space<vmem>>, %arg7: memref<1x16x16x64xf32, #tpu.memory_space<vmem>>, %arg8: memref<22x24x64xf32, #tpu.memory_space<vmem>>) attributes {dimension_semantics = [#tpu.dimension_semantics<parallel>], iteration_bounds = array<i64: 2>, scalar_prefetch = 0 : i64, scratch_operands = 1 : i64, tpu.core_type = #tpu.core_type<tc>, window_params = [{transform_indices = @transform_0, window_bounds = array<i64: 1, 16, 16, 64>}, {pipeline_mode = #tpu.pipeline_mode<synchronous>, transform_indices = @transform_1, window_bounds = array<i64: 49, 64>}, {pipeline_mode = #tpu.pipeline_mode<synchronous>, transform_indices = @transform_2, window_bounds = array<i64: 5, 64>}, {pipeline_mode = #tpu.pipeline_mode<synchronous>, transform_indices = @transform_3, window_bounds = array<i64: 1, 256>}, {pipeline_mode = #tpu.pipeline_mode<synchronous>, transform_indices = @transform_4, window_bounds = array<i64: 64, 256>}, {pipeline_mode = #tpu.pipeline_mode<synchronous>, transform_indices = @transform_5, window_bounds = array<i64: 256, 64>}, {transform_indices = @transform_6, window_bounds = array<i64: 1, 16, 16, 64>}]} {
    %c0 = arith.constant 0 : index
    %c0_0 = arith.constant 0 : index
    %0 = vector.load %arg3[%c0, %c0_0] : memref<5x64xf32, #tpu.memory_space<vmem>>, vector<5x64xf32>
    %1 = vector.extract_strided_slice %0 {offsets = [0, 0], sizes = [1, 64], strides = [1, 1]} : vector<5x64xf32> to vector<1x64xf32>
    %2 = vector.extract_strided_slice %0 {offsets = [1, 0], sizes = [1, 64], strides = [1, 1]} : vector<5x64xf32> to vector<1x64xf32>
    %3 = vector.extract_strided_slice %0 {offsets = [2, 0], sizes = [1, 64], strides = [1, 1]} : vector<5x64xf32> to vector<1x64xf32>
    %4 = vector.extract_strided_slice %0 {offsets = [3, 0], sizes = [1, 64], strides = [1, 1]} : vector<5x64xf32> to vector<1x64xf32>
    %5 = vector.extract_strided_slice %0 {offsets = [4, 0], sizes = [1, 64], strides = [1, 1]} : vector<5x64xf32> to vector<1x64xf32>
    %c0_1 = arith.constant 0 : index
    %c0_2 = arith.constant 0 : index
    %6 = vector.load %arg4[%c0_1, %c0_2] : memref<1x256xf32, #tpu.memory_space<vmem>>, vector<1x256xf32>
    %cst = arith.constant 0.000000e+00 : f32
    %7 = vector.broadcast %cst : f32 to vector<3x24x64xf32>
    %c0_3 = arith.constant 0 : index
    %c0_4 = arith.constant 0 : index
    %c0_5 = arith.constant 0 : index
    %8 = vector.load %arg8[%c0_3, %c0_4, %c0_5] : memref<22x24x64xf32, #tpu.memory_space<vmem>>, vector<3x24x64xf32>
    tpu.vector_store %arg8[%c0_3, %c0_4, %c0_5], %7 {strides = array<i32>} : memref<22x24x64xf32, #tpu.memory_space<vmem>>, vector<3x24x64xf32>,
    %cst_6 = arith.constant 0.000000e+00 : f32
    %9 = vector.broadcast %cst_6 : f32 to vector<3x24x64xf32>
    %c19 = arith.constant 19 : index
    %c0_7 = arith.constant 0 : index
    %c0_8 = arith.constant 0 : index
    %10 = vector.load %arg8[%c19, %c0_7, %c0_8] : memref<22x24x64xf32, #tpu.memory_space<vmem>>, vector<3x24x64xf32>
    tpu.vector_store %arg8[%c19, %c0_7, %c0_8], %9 {strides = array<i32>} : memref<22x24x64xf32, #tpu.memory_space<vmem>>, vector<3x24x64xf32>,
    %cst_9 = arith.constant 0.000000e+00 : f32
    %11 = vector.broadcast %cst_9 : f32 to vector<16x3x64xf32>
    %c3 = arith.constant 3 : index
    %c0_10 = arith.constant 0 : index
    %c0_11 = arith.constant 0 : index
    %12 = vector.load %arg8[%c3, %c0_10, %c0_11] : memref<22x24x64xf32, #tpu.memory_space<vmem>>, vector<16x3x64xf32>
    tpu.vector_store %arg8[%c3, %c0_10, %c0_11], %11 {strides = array<i32>} : memref<22x24x64xf32, #tpu.memory_space<vmem>>, vector<16x3x64xf32>,
    %cst_12 = arith.constant 0.000000e+00 : f32
    %13 = vector.broadcast %cst_12 : f32 to vector<16x3x64xf32>
    %c3_13 = arith.constant 3 : index
    %c19_14 = arith.constant 19 : index
    %c0_15 = arith.constant 0 : index
    %14 = vector.load %arg8[%c3_13, %c19_14, %c0_15] : memref<22x24x64xf32, #tpu.memory_space<vmem>>, vector<16x3x64xf32>
    tpu.vector_store %arg8[%c3_13, %c19_14, %c0_15], %13 {strides = array<i32>} : memref<22x24x64xf32, #tpu.memory_space<vmem>>, vector<16x3x64xf32>,
    %c0_16 = arith.constant 0 : index
    %c0_17 = arith.constant 0 : index
    %c0_18 = arith.constant 0 : index
    %c0_19 = arith.constant 0 : index
    %15 = vector.load %arg1[%c0_16, %c0_17, %c0_18, %c0_19] : memref<1x16x16x64xf32, #tpu.memory_space<vmem>>, vector<1x16x16x64xf32>
    %16 = vector.shape_cast %15 : vector<1x16x16x64xf32> to vector<16x16x64xf32>
    %c3_20 = arith.constant 3 : index
    %c3_21 = arith.constant 3 : index
    %c0_22 = arith.constant 0 : index
    %17 = vector.load %arg8[%c3_20, %c3_21, %c0_22] : memref<22x24x64xf32, #tpu.memory_space<vmem>>, vector<16x16x64xf32>
    tpu.vector_store %arg8[%c3_20, %c3_21, %c0_22], %16 {strides = array<i32>} : memref<22x24x64xf32, #tpu.memory_space<vmem>>, vector<16x16x64xf32>,
    %c0_i32 = arith.constant 0 : i32
    %c2_i32 = arith.constant 2 : i32
    %18 = arith.addi %c0_i32, %c2_i32 : i32
    %c1_i32 = arith.constant 1 : i32
    scf.for %arg9 = %c0_i32 to %18 step %c1_i32  : i32 {
      %c8_i32 = arith.constant 8 : i32
      %19 = arith.muli %arg9, %c8_i32 : i32
      %c0_24 = arith.constant 0 : index
      %c0_25 = arith.constant 0 : index
      %20 = vector.load %arg2[%c0_24, %c0_25] : memref<49x64xf32, #tpu.memory_space<vmem>>, vector<49x64xf32>
      %cst_26 = arith.constant 0.000000e+00 : f32
      %21 = vector.broadcast %cst_26 : f32 to vector<8x16x64xf32>
      %c0_i32_27 = arith.constant 0 : i32
      %22 = arith.addi %19, %c0_i32_27 : i32
      %23 = arith.index_cast %22 : i32 to index
      %c0_28 = arith.constant 0 : index
      %c0_29 = arith.constant 0 : index
      %24 = vector.load %arg8[%23, %c0_28, %c0_29] : memref<22x24x64xf32, #tpu.memory_space<vmem>>, vector<8x24x64xf32>
      %25 = vector.extract_strided_slice %20 {offsets = [0, 0], sizes = [1, 64], strides = [1, 1]} : vector<49x64xf32> to vector<1x64xf32>
      %26 = vector.shape_cast %25 : vector<1x64xf32> to vector<64xf32>
      %27 = vector.shape_cast %26 : vector<64xf32> to vector<1x1x64xf32>
      %28 = vector.extract_strided_slice %24 {offsets = [0, 0, 0], sizes = [8, 16, 64], strides = [1, 1, 1]} : vector<8x24x64xf32> to vector<8x16x64xf32>
      %29 = vector.broadcast %27 : vector<1x1x64xf32> to vector<8x16x64xf32>
      %30 = arith.mulf %28, %29 : vector<8x16x64xf32>
      %31 = arith.addf %21, %30 : vector<8x16x64xf32>
      %32 = vector.extract_strided_slice %20 {offsets = [1, 0], sizes = [1, 64], strides = [1, 1]} : vector<49x64xf32> to vector<1x64xf32>
      %33 = vector.shape_cast %32 : vector<1x64xf32> to vector<64xf32>
      %34 = vector.shape_cast %33 : vector<64xf32> to vector<1x1x64xf32>
      %35 = vector.extract_strided_slice %24 {offsets = [0, 1, 0], sizes = [8, 16, 64], strides = [1, 1, 1]} : vector<8x24x64xf32> to vector<8x16x64xf32>
      %36 = vector.broadcast %34 : vector<1x1x64xf32> to vector<8x16x64xf32>
      %37 = arith.mulf %35, %36 : vector<8x16x64xf32>
      %38 = arith.addf %31, %37 : vector<8x16x64xf32>
      %39 = vector.extract_strided_slice %20 {offsets = [2, 0], sizes = [1, 64], strides = [1, 1]} : vector<49x64xf32> to vector<1x64xf32>
      %40 = vector.shape_cast %39 : vector<1x64xf32> to vector<64xf32>
      %41 = vector.shape_cast %40 : vector<64xf32> to vector<1x1x64xf32>
      %42 = vector.extract_strided_slice %24 {offsets = [0, 2, 0], sizes = [8, 16, 64], strides = [1, 1, 1]} : vector<8x24x64xf32> to vector<8x16x64xf32>
      %43 = vector.broadcast %41 : vector<1x1x64xf32> to vector<8x16x64xf32>
      %44 = arith.mulf %42, %43 : vector<8x16x64xf32>
      %45 = arith.addf %38, %44 : vector<8x16x64xf32>
      %46 = vector.extract_strided_slice %20 {offsets = [3, 0], sizes = [1, 64], strides = [1, 1]} : vector<49x64xf32> to vector<1x64xf32>
      %47 = vector.shape_cast %46 : vector<1x64xf32> to vector<64xf32>
      %48 = vector.shape_cast %47 : vector<64xf32> to vector<1x1x64xf32>
      %49 = vector.extract_strided_slice %24 {offsets = [0, 3, 0], sizes = [8, 16, 64], strides = [1, 1, 1]} : vector<8x24x64xf32> to vector<8x16x64xf32>
      %50 = vector.broadcast %48 : vector<1x1x64xf32> to vector<8x16x64xf32>
      %51 = arith.mulf %49, %50 : vector<8x16x64xf32>
      %52 = arith.addf %45, %51 : vector<8x16x64xf32>
      %53 = vector.extract_strided_slice %20 {offsets = [4, 0], sizes = [1, 64], strides = [1, 1]} : vector<49x64xf32> to vector<1x64xf32>
      %54 = vector.shape_cast %53 : vector<1x64xf32> to vector<64xf32>
      %55 = vector.shape_cast %54 : vector<64xf32> to vector<1x1x64xf32>
      %56 = vector.extract_strided_slice %24 {offsets = [0, 4, 0], sizes = [8, 16, 64], strides = [1, 1, 1]} : vector<8x24x64xf32> to vector<8x16x64xf32>
      %57 = vector.broadcast %55 : vector<1x1x64xf32> to vector<8x16x64xf32>
      %58 = arith.mulf %56, %57 : vector<8x16x64xf32>
      %59 = arith.addf %52, %58 : vector<8x16x64xf32>
      %60 = vector.extract_strided_slice %20 {offsets = [5, 0], sizes = [1, 64], strides = [1, 1]} : vector<49x64xf32> to vector<1x64xf32>
      %61 = vector.shape_cast %60 : vector<1x64xf32> to vector<64xf32>
      %62 = vector.shape_cast %61 : vector<64xf32> to vector<1x1x64xf32>
      %63 = vector.extract_strided_slice %24 {offsets = [0, 5, 0], sizes = [8, 16, 64], strides = [1, 1, 1]} : vector<8x24x64xf32> to vector<8x16x64xf32>
      %64 = vector.broadcast %62 : vector<1x1x64xf32> to vector<8x16x64xf32>
      %65 = arith.mulf %63, %64 : vector<8x16x64xf32>
      %66 = arith.addf %59, %65 : vector<8x16x64xf32>
      %67 = vector.extract_strided_slice %20 {offsets = [6, 0], sizes = [1, 64], strides = [1, 1]} : vector<49x64xf32> to vector<1x64xf32>
      %68 = vector.shape_cast %67 : vector<1x64xf32> to vector<64xf32>
      %69 = vector.shape_cast %68 : vector<64xf32> to vector<1x1x64xf32>
      %70 = vector.extract_strided_slice %24 {offsets = [0, 6, 0], sizes = [8, 16, 64], strides = [1, 1, 1]} : vector<8x24x64xf32> to vector<8x16x64xf32>
      %71 = vector.broadcast %69 : vector<1x1x64xf32> to vector<8x16x64xf32>
      %72 = arith.mulf %70, %71 : vector<8x16x64xf32>
      %73 = arith.addf %66, %72 : vector<8x16x64xf32>
      %c1_i32_30 = arith.constant 1 : i32
      %74 = arith.addi %19, %c1_i32_30 : i32
      %75 = arith.index_cast %74 : i32 to index
      %c0_31 = arith.constant 0 : index
      %c0_32 = arith.constant 0 : index
      %76 = vector.load %arg8[%75, %c0_31, %c0_32] : memref<22x24x64xf32, #tpu.memory_space<vmem>>, vector<8x24x64xf32>
      %77 = vector.extract_strided_slice %20 {offsets = [7, 0], sizes = [1, 64], strides = [1, 1]} : vector<49x64xf32> to vector<1x64xf32>
      %78 = vector.shape_cast %77 : vector<1x64xf32> to vector<64xf32>
      %79 = vector.shape_cast %78 : vector<64xf32> to vector<1x1x64xf32>
      %80 = vector.extract_strided_slice %76 {offsets = [0, 0, 0], sizes = [8, 16, 64], strides = [1, 1, 1]} : vector<8x24x64xf32> to vector<8x16x64xf32>
      %81 = vector.broadcast %79 : vector<1x1x64xf32> to vector<8x16x64xf32>
      %82 = arith.mulf %80, %81 : vector<8x16x64xf32>
      %83 = arith.addf %73, %82 : vector<8x16x64xf32>
      %84 = vector.extract_strided_slice %20 {offsets = [8, 0], sizes = [1, 64], strides = [1, 1]} : vector<49x64xf32> to vector<1x64xf32>
      %85 = vector.shape_cast %84 : vector<1x64xf32> to vector<64xf32>
      %86 = vector.shape_cast %85 : vector<64xf32> to vector<1x1x64xf32>
      %87 = vector.extract_strided_slice %76 {offsets = [0, 1, 0], sizes = [8, 16, 64], strides = [1, 1, 1]} : vector<8x24x64xf32> to vector<8x16x64xf32>
      %88 = vector.broadcast %86 : vector<1x1x64xf32> to vector<8x16x64xf32>
      %89 = arith.mulf %87, %88 : vector<8x16x64xf32>
      %90 = arith.addf %83, %89 : vector<8x16x64xf32>
      %91 = vector.extract_strided_slice %20 {offsets = [9, 0], sizes = [1, 64], strides = [1, 1]} : vector<49x64xf32> to vector<1x64xf32>
      %92 = vector.shape_cast %91 : vector<1x64xf32> to vector<64xf32>
      %93 = vector.shape_cast %92 : vector<64xf32> to vector<1x1x64xf32>
      %94 = vector.extract_strided_slice %76 {offsets = [0, 2, 0], sizes = [8, 16, 64], strides = [1, 1, 1]} : vector<8x24x64xf32> to vector<8x16x64xf32>
      %95 = vector.broadcast %93 : vector<1x1x64xf32> to vector<8x16x64xf32>
      %96 = arith.mulf %94, %95 : vector<8x16x64xf32>
      %97 = arith.addf %90, %96 : vector<8x16x64xf32>
      %98 = vector.extract_strided_slice %20 {offsets = [10, 0], sizes = [1, 64], strides = [1, 1]} : vector<49x64xf32> to vector<1x64xf32>
      %99 = vector.shape_cast %98 : vector<1x64xf32> to vector<64xf32>
      %100 = vector.shape_cast %99 : vector<64xf32> to vector<1x1x64xf32>
      %101 = vector.extract_strided_slice %76 {offsets = [0, 3, 0], sizes = [8, 16, 64], strides = [1, 1, 1]} : vector<8x24x64xf32> to vector<8x16x64xf32>
      %102 = vector.broadcast %100 : vector<1x1x64xf32> to vector<8x16x64xf32>
      %103 = arith.mulf %101, %102 : vector<8x16x64xf32>
      %104 = arith.addf %97, %103 : vector<8x16x64xf32>
      %105 = vector.extract_strided_slice %20 {offsets = [11, 0], sizes = [1, 64], strides = [1, 1]} : vector<49x64xf32> to vector<1x64xf32>
      %106 = vector.shape_cast %105 : vector<1x64xf32> to vector<64xf32>
      %107 = vector.shape_cast %106 : vector<64xf32> to vector<1x1x64xf32>
      %108 = vector.extract_strided_slice %76 {offsets = [0, 4, 0], sizes = [8, 16, 64], strides = [1, 1, 1]} : vector<8x24x64xf32> to vector<8x16x64xf32>
      %109 = vector.broadcast %107 : vector<1x1x64xf32> to vector<8x16x64xf32>
      %110 = arith.mulf %108, %109 : vector<8x16x64xf32>
      %111 = arith.addf %104, %110 : vector<8x16x64xf32>
      %112 = vector.extract_strided_slice %20 {offsets = [12, 0], sizes = [1, 64], strides = [1, 1]} : vector<49x64xf32> to vector<1x64xf32>
      %113 = vector.shape_cast %112 : vector<1x64xf32> to vector<64xf32>
      %114 = vector.shape_cast %113 : vector<64xf32> to vector<1x1x64xf32>
      %115 = vector.extract_strided_slice %76 {offsets = [0, 5, 0], sizes = [8, 16, 64], strides = [1, 1, 1]} : vector<8x24x64xf32> to vector<8x16x64xf32>
      %116 = vector.broadcast %114 : vector<1x1x64xf32> to vector<8x16x64xf32>
      %117 = arith.mulf %115, %116 : vector<8x16x64xf32>
      %118 = arith.addf %111, %117 : vector<8x16x64xf32>
      %119 = vector.extract_strided_slice %20 {offsets = [13, 0], sizes = [1, 64], strides = [1, 1]} : vector<49x64xf32> to vector<1x64xf32>
      %120 = vector.shape_cast %119 : vector<1x64xf32> to vector<64xf32>
      %121 = vector.shape_cast %120 : vector<64xf32> to vector<1x1x64xf32>
      %122 = vector.extract_strided_slice %76 {offsets = [0, 6, 0], sizes = [8, 16, 64], strides = [1, 1, 1]} : vector<8x24x64xf32> to vector<8x16x64xf32>
      %123 = vector.broadcast %121 : vector<1x1x64xf32> to vector<8x16x64xf32>
      %124 = arith.mulf %122, %123 : vector<8x16x64xf32>
      %125 = arith.addf %118, %124 : vector<8x16x64xf32>
      %c2_i32_33 = arith.constant 2 : i32
      %126 = arith.addi %19, %c2_i32_33 : i32
      %127 = arith.index_cast %126 : i32 to index
      %c0_34 = arith.constant 0 : index
      %c0_35 = arith.constant 0 : index
      %128 = vector.load %arg8[%127, %c0_34, %c0_35] : memref<22x24x64xf32, #tpu.memory_space<vmem>>, vector<8x24x64xf32>
      %129 = vector.extract_strided_slice %20 {offsets = [14, 0], sizes = [1, 64], strides = [1, 1]} : vector<49x64xf32> to vector<1x64xf32>
      %130 = vector.shape_cast %129 : vector<1x64xf32> to vector<64xf32>
      %131 = vector.shape_cast %130 : vector<64xf32> to vector<1x1x64xf32>
      %132 = vector.extract_strided_slice %128 {offsets = [0, 0, 0], sizes = [8, 16, 64], strides = [1, 1, 1]} : vector<8x24x64xf32> to vector<8x16x64xf32>
      %133 = vector.broadcast %131 : vector<1x1x64xf32> to vector<8x16x64xf32>
      %134 = arith.mulf %132, %133 : vector<8x16x64xf32>
      %135 = arith.addf %125, %134 : vector<8x16x64xf32>
      %136 = vector.extract_strided_slice %20 {offsets = [15, 0], sizes = [1, 64], strides = [1, 1]} : vector<49x64xf32> to vector<1x64xf32>
      %137 = vector.shape_cast %136 : vector<1x64xf32> to vector<64xf32>
      %138 = vector.shape_cast %137 : vector<64xf32> to vector<1x1x64xf32>
      %139 = vector.extract_strided_slice %128 {offsets = [0, 1, 0], sizes = [8, 16, 64], strides = [1, 1, 1]} : vector<8x24x64xf32> to vector<8x16x64xf32>
      %140 = vector.broadcast %138 : vector<1x1x64xf32> to vector<8x16x64xf32>
      %141 = arith.mulf %139, %140 : vector<8x16x64xf32>
      %142 = arith.addf %135, %141 : vector<8x16x64xf32>
      %143 = vector.extract_strided_slice %20 {offsets = [16, 0], sizes = [1, 64], strides = [1, 1]} : vector<49x64xf32> to vector<1x64xf32>
      %144 = vector.shape_cast %143 : vector<1x64xf32> to vector<64xf32>
      %145 = vector.shape_cast %144 : vector<64xf32> to vector<1x1x64xf32>
      %146 = vector.extract_strided_slice %128 {offsets = [0, 2, 0], sizes = [8, 16, 64], strides = [1, 1, 1]} : vector<8x24x64xf32> to vector<8x16x64xf32>
      %147 = vector.broadcast %145 : vector<1x1x64xf32> to vector<8x16x64xf32>
      %148 = arith.mulf %146, %147 : vector<8x16x64xf32>
      %149 = arith.addf %142, %148 : vector<8x16x64xf32>
      %150 = vector.extract_strided_slice %20 {offsets = [17, 0], sizes = [1, 64], strides = [1, 1]} : vector<49x64xf32> to vector<1x64xf32>
      %151 = vector.shape_cast %150 : vector<1x64xf32> to vector<64xf32>
      %152 = vector.shape_cast %151 : vector<64xf32> to vector<1x1x64xf32>
      %153 = vector.extract_strided_slice %128 {offsets = [0, 3, 0], sizes = [8, 16, 64], strides = [1, 1, 1]} : vector<8x24x64xf32> to vector<8x16x64xf32>
      %154 = vector.broadcast %152 : vector<1x1x64xf32> to vector<8x16x64xf32>
      %155 = arith.mulf %153, %154 : vector<8x16x64xf32>
      %156 = arith.addf %149, %155 : vector<8x16x64xf32>
      %157 = vector.extract_strided_slice %20 {offsets = [18, 0], sizes = [1, 64], strides = [1, 1]} : vector<49x64xf32> to vector<1x64xf32>
      %158 = vector.shape_cast %157 : vector<1x64xf32> to vector<64xf32>
      %159 = vector.shape_cast %158 : vector<64xf32> to vector<1x1x64xf32>
      %160 = vector.extract_strided_slice %128 {offsets = [0, 4, 0], sizes = [8, 16, 64], strides = [1, 1, 1]} : vector<8x24x64xf32> to vector<8x16x64xf32>
      %161 = vector.broadcast %159 : vector<1x1x64xf32> to vector<8x16x64xf32>
      %162 = arith.mulf %160, %161 : vector<8x16x64xf32>
      %163 = arith.addf %156, %162 : vector<8x16x64xf32>
      %164 = vector.extract_strided_slice %20 {offsets = [19, 0], sizes = [1, 64], strides = [1, 1]} : vector<49x64xf32> to vector<1x64xf32>
      %165 = vector.shape_cast %164 : vector<1x64xf32> to vector<64xf32>
      %166 = vector.shape_cast %165 : vector<64xf32> to vector<1x1x64xf32>
      %167 = vector.extract_strided_slice %128 {offsets = [0, 5, 0], sizes = [8, 16, 64], strides = [1, 1, 1]} : vector<8x24x64xf32> to vector<8x16x64xf32>
      %168 = vector.broadcast %166 : vector<1x1x64xf32> to vector<8x16x64xf32>
      %169 = arith.mulf %167, %168 : vector<8x16x64xf32>
      %170 = arith.addf %163, %169 : vector<8x16x64xf32>
      %171 = vector.extract_strided_slice %20 {offsets = [20, 0], sizes = [1, 64], strides = [1, 1]} : vector<49x64xf32> to vector<1x64xf32>
      %172 = vector.shape_cast %171 : vector<1x64xf32> to vector<64xf32>
      %173 = vector.shape_cast %172 : vector<64xf32> to vector<1x1x64xf32>
      %174 = vector.extract_strided_slice %128 {offsets = [0, 6, 0], sizes = [8, 16, 64], strides = [1, 1, 1]} : vector<8x24x64xf32> to vector<8x16x64xf32>
      %175 = vector.broadcast %173 : vector<1x1x64xf32> to vector<8x16x64xf32>
      %176 = arith.mulf %174, %175 : vector<8x16x64xf32>
      %177 = arith.addf %170, %176 : vector<8x16x64xf32>
      %c3_i32 = arith.constant 3 : i32
      %178 = arith.addi %19, %c3_i32 : i32
      %179 = arith.index_cast %178 : i32 to index
      %c0_36 = arith.constant 0 : index
      %c0_37 = arith.constant 0 : index
      %180 = vector.load %arg8[%179, %c0_36, %c0_37] : memref<22x24x64xf32, #tpu.memory_space<vmem>>, vector<8x24x64xf32>
      %181 = vector.extract_strided_slice %20 {offsets = [21, 0], sizes = [1, 64], strides = [1, 1]} : vector<49x64xf32> to vector<1x64xf32>
      %182 = vector.shape_cast %181 : vector<1x64xf32> to vector<64xf32>
      %183 = vector.shape_cast %182 : vector<64xf32> to vector<1x1x64xf32>
      %184 = vector.extract_strided_slice %180 {offsets = [0, 0, 0], sizes = [8, 16, 64], strides = [1, 1, 1]} : vector<8x24x64xf32> to vector<8x16x64xf32>
      %185 = vector.broadcast %183 : vector<1x1x64xf32> to vector<8x16x64xf32>
      %186 = arith.mulf %184, %185 : vector<8x16x64xf32>
      %187 = arith.addf %177, %186 : vector<8x16x64xf32>
      %188 = vector.extract_strided_slice %20 {offsets = [22, 0], sizes = [1, 64], strides = [1, 1]} : vector<49x64xf32> to vector<1x64xf32>
      %189 = vector.shape_cast %188 : vector<1x64xf32> to vector<64xf32>
      %190 = vector.shape_cast %189 : vector<64xf32> to vector<1x1x64xf32>
      %191 = vector.extract_strided_slice %180 {offsets = [0, 1, 0], sizes = [8, 16, 64], strides = [1, 1, 1]} : vector<8x24x64xf32> to vector<8x16x64xf32>
      %192 = vector.broadcast %190 : vector<1x1x64xf32> to vector<8x16x64xf32>
      %193 = arith.mulf %191, %192 : vector<8x16x64xf32>
      %194 = arith.addf %187, %193 : vector<8x16x64xf32>
      %195 = vector.extract_strided_slice %20 {offsets = [23, 0], sizes = [1, 64], strides = [1, 1]} : vector<49x64xf32> to vector<1x64xf32>
      %196 = vector.shape_cast %195 : vector<1x64xf32> to vector<64xf32>
      %197 = vector.shape_cast %196 : vector<64xf32> to vector<1x1x64xf32>
      %198 = vector.extract_strided_slice %180 {offsets = [0, 2, 0], sizes = [8, 16, 64], strides = [1, 1, 1]} : vector<8x24x64xf32> to vector<8x16x64xf32>
      %199 = vector.broadcast %197 : vector<1x1x64xf32> to vector<8x16x64xf32>
      %200 = arith.mulf %198, %199 : vector<8x16x64xf32>
      %201 = arith.addf %194, %200 : vector<8x16x64xf32>
      %202 = vector.extract_strided_slice %20 {offsets = [24, 0], sizes = [1, 64], strides = [1, 1]} : vector<49x64xf32> to vector<1x64xf32>
      %203 = vector.shape_cast %202 : vector<1x64xf32> to vector<64xf32>
      %204 = vector.shape_cast %203 : vector<64xf32> to vector<1x1x64xf32>
      %205 = vector.extract_strided_slice %180 {offsets = [0, 3, 0], sizes = [8, 16, 64], strides = [1, 1, 1]} : vector<8x24x64xf32> to vector<8x16x64xf32>
      %206 = vector.broadcast %204 : vector<1x1x64xf32> to vector<8x16x64xf32>
      %207 = arith.mulf %205, %206 : vector<8x16x64xf32>
      %208 = arith.addf %201, %207 : vector<8x16x64xf32>
      %209 = vector.extract_strided_slice %20 {offsets = [25, 0], sizes = [1, 64], strides = [1, 1]} : vector<49x64xf32> to vector<1x64xf32>
      %210 = vector.shape_cast %209 : vector<1x64xf32> to vector<64xf32>
      %211 = vector.shape_cast %210 : vector<64xf32> to vector<1x1x64xf32>
      %212 = vector.extract_strided_slice %180 {offsets = [0, 4, 0], sizes = [8, 16, 64], strides = [1, 1, 1]} : vector<8x24x64xf32> to vector<8x16x64xf32>
      %213 = vector.broadcast %211 : vector<1x1x64xf32> to vector<8x16x64xf32>
      %214 = arith.mulf %212, %213 : vector<8x16x64xf32>
      %215 = arith.addf %208, %214 : vector<8x16x64xf32>
      %216 = vector.extract_strided_slice %20 {offsets = [26, 0], sizes = [1, 64], strides = [1, 1]} : vector<49x64xf32> to vector<1x64xf32>
      %217 = vector.shape_cast %216 : vector<1x64xf32> to vector<64xf32>
      %218 = vector.shape_cast %217 : vector<64xf32> to vector<1x1x64xf32>
      %219 = vector.extract_strided_slice %180 {offsets = [0, 5, 0], sizes = [8, 16, 64], strides = [1, 1, 1]} : vector<8x24x64xf32> to vector<8x16x64xf32>
      %220 = vector.broadcast %218 : vector<1x1x64xf32> to vector<8x16x64xf32>
      %221 = arith.mulf %219, %220 : vector<8x16x64xf32>
      %222 = arith.addf %215, %221 : vector<8x16x64xf32>
      %223 = vector.extract_strided_slice %20 {offsets = [27, 0], sizes = [1, 64], strides = [1, 1]} : vector<49x64xf32> to vector<1x64xf32>
      %224 = vector.shape_cast %223 : vector<1x64xf32> to vector<64xf32>
      %225 = vector.shape_cast %224 : vector<64xf32> to vector<1x1x64xf32>
      %226 = vector.extract_strided_slice %180 {offsets = [0, 6, 0], sizes = [8, 16, 64], strides = [1, 1, 1]} : vector<8x24x64xf32> to vector<8x16x64xf32>
      %227 = vector.broadcast %225 : vector<1x1x64xf32> to vector<8x16x64xf32>
      %228 = arith.mulf %226, %227 : vector<8x16x64xf32>
      %229 = arith.addf %222, %228 : vector<8x16x64xf32>
      %c4_i32 = arith.constant 4 : i32
      %230 = arith.addi %19, %c4_i32 : i32
      %231 = arith.index_cast %230 : i32 to index
      %c0_38 = arith.constant 0 : index
      %c0_39 = arith.constant 0 : index
      %232 = vector.load %arg8[%231, %c0_38, %c0_39] : memref<22x24x64xf32, #tpu.memory_space<vmem>>, vector<8x24x64xf32>
      %233 = vector.extract_strided_slice %20 {offsets = [28, 0], sizes = [1, 64], strides = [1, 1]} : vector<49x64xf32> to vector<1x64xf32>
      %234 = vector.shape_cast %233 : vector<1x64xf32> to vector<64xf32>
      %235 = vector.shape_cast %234 : vector<64xf32> to vector<1x1x64xf32>
      %236 = vector.extract_strided_slice %232 {offsets = [0, 0, 0], sizes = [8, 16, 64], strides = [1, 1, 1]} : vector<8x24x64xf32> to vector<8x16x64xf32>
      %237 = vector.broadcast %235 : vector<1x1x64xf32> to vector<8x16x64xf32>
      %238 = arith.mulf %236, %237 : vector<8x16x64xf32>
      %239 = arith.addf %229, %238 : vector<8x16x64xf32>
      %240 = vector.extract_strided_slice %20 {offsets = [29, 0], sizes = [1, 64], strides = [1, 1]} : vector<49x64xf32> to vector<1x64xf32>
      %241 = vector.shape_cast %240 : vector<1x64xf32> to vector<64xf32>
      %242 = vector.shape_cast %241 : vector<64xf32> to vector<1x1x64xf32>
      %243 = vector.extract_strided_slice %232 {offsets = [0, 1, 0], sizes = [8, 16, 64], strides = [1, 1, 1]} : vector<8x24x64xf32> to vector<8x16x64xf32>
      %244 = vector.broadcast %242 : vector<1x1x64xf32> to vector<8x16x64xf32>
      %245 = arith.mulf %243, %244 : vector<8x16x64xf32>
      %246 = arith.addf %239, %245 : vector<8x16x64xf32>
      %247 = vector.extract_strided_slice %20 {offsets = [30, 0], sizes = [1, 64], strides = [1, 1]} : vector<49x64xf32> to vector<1x64xf32>
      %248 = vector.shape_cast %247 : vector<1x64xf32> to vector<64xf32>
      %249 = vector.shape_cast %248 : vector<64xf32> to vector<1x1x64xf32>
      %250 = vector.extract_strided_slice %232 {offsets = [0, 2, 0], sizes = [8, 16, 64], strides = [1, 1, 1]} : vector<8x24x64xf32> to vector<8x16x64xf32>
      %251 = vector.broadcast %249 : vector<1x1x64xf32> to vector<8x16x64xf32>
      %252 = arith.mulf %250, %251 : vector<8x16x64xf32>
      %253 = arith.addf %246, %252 : vector<8x16x64xf32>
      %254 = vector.extract_strided_slice %20 {offsets = [31, 0], sizes = [1, 64], strides = [1, 1]} : vector<49x64xf32> to vector<1x64xf32>
      %255 = vector.shape_cast %254 : vector<1x64xf32> to vector<64xf32>
      %256 = vector.shape_cast %255 : vector<64xf32> to vector<1x1x64xf32>
      %257 = vector.extract_strided_slice %232 {offsets = [0, 3, 0], sizes = [8, 16, 64], strides = [1, 1, 1]} : vector<8x24x64xf32> to vector<8x16x64xf32>
      %258 = vector.broadcast %256 : vector<1x1x64xf32> to vector<8x16x64xf32>
      %259 = arith.mulf %257, %258 : vector<8x16x64xf32>
      %260 = arith.addf %253, %259 : vector<8x16x64xf32>
      %261 = vector.extract_strided_slice %20 {offsets = [32, 0], sizes = [1, 64], strides = [1, 1]} : vector<49x64xf32> to vector<1x64xf32>
      %262 = vector.shape_cast %261 : vector<1x64xf32> to vector<64xf32>
      %263 = vector.shape_cast %262 : vector<64xf32> to vector<1x1x64xf32>
      %264 = vector.extract_strided_slice %232 {offsets = [0, 4, 0], sizes = [8, 16, 64], strides = [1, 1, 1]} : vector<8x24x64xf32> to vector<8x16x64xf32>
      %265 = vector.broadcast %263 : vector<1x1x64xf32> to vector<8x16x64xf32>
      %266 = arith.mulf %264, %265 : vector<8x16x64xf32>
      %267 = arith.addf %260, %266 : vector<8x16x64xf32>
      %268 = vector.extract_strided_slice %20 {offsets = [33, 0], sizes = [1, 64], strides = [1, 1]} : vector<49x64xf32> to vector<1x64xf32>
      %269 = vector.shape_cast %268 : vector<1x64xf32> to vector<64xf32>
      %270 = vector.shape_cast %269 : vector<64xf32> to vector<1x1x64xf32>
      %271 = vector.extract_strided_slice %232 {offsets = [0, 5, 0], sizes = [8, 16, 64], strides = [1, 1, 1]} : vector<8x24x64xf32> to vector<8x16x64xf32>
      %272 = vector.broadcast %270 : vector<1x1x64xf32> to vector<8x16x64xf32>
      %273 = arith.mulf %271, %272 : vector<8x16x64xf32>
      %274 = arith.addf %267, %273 : vector<8x16x64xf32>
      %275 = vector.extract_strided_slice %20 {offsets = [34, 0], sizes = [1, 64], strides = [1, 1]} : vector<49x64xf32> to vector<1x64xf32>
      %276 = vector.shape_cast %275 : vector<1x64xf32> to vector<64xf32>
      %277 = vector.shape_cast %276 : vector<64xf32> to vector<1x1x64xf32>
      %278 = vector.extract_strided_slice %232 {offsets = [0, 6, 0], sizes = [8, 16, 64], strides = [1, 1, 1]} : vector<8x24x64xf32> to vector<8x16x64xf32>
      %279 = vector.broadcast %277 : vector<1x1x64xf32> to vector<8x16x64xf32>
      %280 = arith.mulf %278, %279 : vector<8x16x64xf32>
      %281 = arith.addf %274, %280 : vector<8x16x64xf32>
      %c5_i32 = arith.constant 5 : i32
      %282 = arith.addi %19, %c5_i32 : i32
      %283 = arith.index_cast %282 : i32 to index
      %c0_40 = arith.constant 0 : index
      %c0_41 = arith.constant 0 : index
      %284 = vector.load %arg8[%283, %c0_40, %c0_41] : memref<22x24x64xf32, #tpu.memory_space<vmem>>, vector<8x24x64xf32>
      %285 = vector.extract_strided_slice %20 {offsets = [35, 0], sizes = [1, 64], strides = [1, 1]} : vector<49x64xf32> to vector<1x64xf32>
      %286 = vector.shape_cast %285 : vector<1x64xf32> to vector<64xf32>
      %287 = vector.shape_cast %286 : vector<64xf32> to vector<1x1x64xf32>
      %288 = vector.extract_strided_slice %284 {offsets = [0, 0, 0], sizes = [8, 16, 64], strides = [1, 1, 1]} : vector<8x24x64xf32> to vector<8x16x64xf32>
      %289 = vector.broadcast %287 : vector<1x1x64xf32> to vector<8x16x64xf32>
      %290 = arith.mulf %288, %289 : vector<8x16x64xf32>
      %291 = arith.addf %281, %290 : vector<8x16x64xf32>
      %292 = vector.extract_strided_slice %20 {offsets = [36, 0], sizes = [1, 64], strides = [1, 1]} : vector<49x64xf32> to vector<1x64xf32>
      %293 = vector.shape_cast %292 : vector<1x64xf32> to vector<64xf32>
      %294 = vector.shape_cast %293 : vector<64xf32> to vector<1x1x64xf32>
      %295 = vector.extract_strided_slice %284 {offsets = [0, 1, 0], sizes = [8, 16, 64], strides = [1, 1, 1]} : vector<8x24x64xf32> to vector<8x16x64xf32>
      %296 = vector.broadcast %294 : vector<1x1x64xf32> to vector<8x16x64xf32>
      %297 = arith.mulf %295, %296 : vector<8x16x64xf32>
      %298 = arith.addf %291, %297 : vector<8x16x64xf32>
      %299 = vector.extract_strided_slice %20 {offsets = [37, 0], sizes = [1, 64], strides = [1, 1]} : vector<49x64xf32> to vector<1x64xf32>
      %300 = vector.shape_cast %299 : vector<1x64xf32> to vector<64xf32>
      %301 = vector.shape_cast %300 : vector<64xf32> to vector<1x1x64xf32>
      %302 = vector.extract_strided_slice %284 {offsets = [0, 2, 0], sizes = [8, 16, 64], strides = [1, 1, 1]} : vector<8x24x64xf32> to vector<8x16x64xf32>
      %303 = vector.broadcast %301 : vector<1x1x64xf32> to vector<8x16x64xf32>
      %304 = arith.mulf %302, %303 : vector<8x16x64xf32>
      %305 = arith.addf %298, %304 : vector<8x16x64xf32>
      %306 = vector.extract_strided_slice %20 {offsets = [38, 0], sizes = [1, 64], strides = [1, 1]} : vector<49x64xf32> to vector<1x64xf32>
      %307 = vector.shape_cast %306 : vector<1x64xf32> to vector<64xf32>
      %308 = vector.shape_cast %307 : vector<64xf32> to vector<1x1x64xf32>
      %309 = vector.extract_strided_slice %284 {offsets = [0, 3, 0], sizes = [8, 16, 64], strides = [1, 1, 1]} : vector<8x24x64xf32> to vector<8x16x64xf32>
      %310 = vector.broadcast %308 : vector<1x1x64xf32> to vector<8x16x64xf32>
      %311 = arith.mulf %309, %310 : vector<8x16x64xf32>
      %312 = arith.addf %305, %311 : vector<8x16x64xf32>
      %313 = vector.extract_strided_slice %20 {offsets = [39, 0], sizes = [1, 64], strides = [1, 1]} : vector<49x64xf32> to vector<1x64xf32>
      %314 = vector.shape_cast %313 : vector<1x64xf32> to vector<64xf32>
      %315 = vector.shape_cast %314 : vector<64xf32> to vector<1x1x64xf32>
      %316 = vector.extract_strided_slice %284 {offsets = [0, 4, 0], sizes = [8, 16, 64], strides = [1, 1, 1]} : vector<8x24x64xf32> to vector<8x16x64xf32>
      %317 = vector.broadcast %315 : vector<1x1x64xf32> to vector<8x16x64xf32>
      %318 = arith.mulf %316, %317 : vector<8x16x64xf32>
      %319 = arith.addf %312, %318 : vector<8x16x64xf32>
      %320 = vector.extract_strided_slice %20 {offsets = [40, 0], sizes = [1, 64], strides = [1, 1]} : vector<49x64xf32> to vector<1x64xf32>
      %321 = vector.shape_cast %320 : vector<1x64xf32> to vector<64xf32>
      %322 = vector.shape_cast %321 : vector<64xf32> to vector<1x1x64xf32>
      %323 = vector.extract_strided_slice %284 {offsets = [0, 5, 0], sizes = [8, 16, 64], strides = [1, 1, 1]} : vector<8x24x64xf32> to vector<8x16x64xf32>
      %324 = vector.broadcast %322 : vector<1x1x64xf32> to vector<8x16x64xf32>
      %325 = arith.mulf %323, %324 : vector<8x16x64xf32>
      %326 = arith.addf %319, %325 : vector<8x16x64xf32>
      %327 = vector.extract_strided_slice %20 {offsets = [41, 0], sizes = [1, 64], strides = [1, 1]} : vector<49x64xf32> to vector<1x64xf32>
      %328 = vector.shape_cast %327 : vector<1x64xf32> to vector<64xf32>
      %329 = vector.shape_cast %328 : vector<64xf32> to vector<1x1x64xf32>
      %330 = vector.extract_strided_slice %284 {offsets = [0, 6, 0], sizes = [8, 16, 64], strides = [1, 1, 1]} : vector<8x24x64xf32> to vector<8x16x64xf32>
      %331 = vector.broadcast %329 : vector<1x1x64xf32> to vector<8x16x64xf32>
      %332 = arith.mulf %330, %331 : vector<8x16x64xf32>
      %333 = arith.addf %326, %332 : vector<8x16x64xf32>
      %c6_i32 = arith.constant 6 : i32
      %334 = arith.addi %19, %c6_i32 : i32
      %335 = arith.index_cast %334 : i32 to index
      %c0_42 = arith.constant 0 : index
      %c0_43 = arith.constant 0 : index
      %336 = vector.load %arg8[%335, %c0_42, %c0_43] : memref<22x24x64xf32, #tpu.memory_space<vmem>>, vector<8x24x64xf32>
      %337 = vector.extract_strided_slice %20 {offsets = [42, 0], sizes = [1, 64], strides = [1, 1]} : vector<49x64xf32> to vector<1x64xf32>
      %338 = vector.shape_cast %337 : vector<1x64xf32> to vector<64xf32>
      %339 = vector.shape_cast %338 : vector<64xf32> to vector<1x1x64xf32>
      %340 = vector.extract_strided_slice %336 {offsets = [0, 0, 0], sizes = [8, 16, 64], strides = [1, 1, 1]} : vector<8x24x64xf32> to vector<8x16x64xf32>
      %341 = vector.broadcast %339 : vector<1x1x64xf32> to vector<8x16x64xf32>
      %342 = arith.mulf %340, %341 : vector<8x16x64xf32>
      %343 = arith.addf %333, %342 : vector<8x16x64xf32>
      %344 = vector.extract_strided_slice %20 {offsets = [43, 0], sizes = [1, 64], strides = [1, 1]} : vector<49x64xf32> to vector<1x64xf32>
      %345 = vector.shape_cast %344 : vector<1x64xf32> to vector<64xf32>
      %346 = vector.shape_cast %345 : vector<64xf32> to vector<1x1x64xf32>
      %347 = vector.extract_strided_slice %336 {offsets = [0, 1, 0], sizes = [8, 16, 64], strides = [1, 1, 1]} : vector<8x24x64xf32> to vector<8x16x64xf32>
      %348 = vector.broadcast %346 : vector<1x1x64xf32> to vector<8x16x64xf32>
      %349 = arith.mulf %347, %348 : vector<8x16x64xf32>
      %350 = arith.addf %343, %349 : vector<8x16x64xf32>
      %351 = vector.extract_strided_slice %20 {offsets = [44, 0], sizes = [1, 64], strides = [1, 1]} : vector<49x64xf32> to vector<1x64xf32>
      %352 = vector.shape_cast %351 : vector<1x64xf32> to vector<64xf32>
      %353 = vector.shape_cast %352 : vector<64xf32> to vector<1x1x64xf32>
      %354 = vector.extract_strided_slice %336 {offsets = [0, 2, 0], sizes = [8, 16, 64], strides = [1, 1, 1]} : vector<8x24x64xf32> to vector<8x16x64xf32>
      %355 = vector.broadcast %353 : vector<1x1x64xf32> to vector<8x16x64xf32>
      %356 = arith.mulf %354, %355 : vector<8x16x64xf32>
      %357 = arith.addf %350, %356 : vector<8x16x64xf32>
      %358 = vector.extract_strided_slice %20 {offsets = [45, 0], sizes = [1, 64], strides = [1, 1]} : vector<49x64xf32> to vector<1x64xf32>
      %359 = vector.shape_cast %358 : vector<1x64xf32> to vector<64xf32>
      %360 = vector.shape_cast %359 : vector<64xf32> to vector<1x1x64xf32>
      %361 = vector.extract_strided_slice %336 {offsets = [0, 3, 0], sizes = [8, 16, 64], strides = [1, 1, 1]} : vector<8x24x64xf32> to vector<8x16x64xf32>
      %362 = vector.broadcast %360 : vector<1x1x64xf32> to vector<8x16x64xf32>
      %363 = arith.mulf %361, %362 : vector<8x16x64xf32>
      %364 = arith.addf %357, %363 : vector<8x16x64xf32>
      %365 = vector.extract_strided_slice %20 {offsets = [46, 0], sizes = [1, 64], strides = [1, 1]} : vector<49x64xf32> to vector<1x64xf32>
      %366 = vector.shape_cast %365 : vector<1x64xf32> to vector<64xf32>
      %367 = vector.shape_cast %366 : vector<64xf32> to vector<1x1x64xf32>
      %368 = vector.extract_strided_slice %336 {offsets = [0, 4, 0], sizes = [8, 16, 64], strides = [1, 1, 1]} : vector<8x24x64xf32> to vector<8x16x64xf32>
      %369 = vector.broadcast %367 : vector<1x1x64xf32> to vector<8x16x64xf32>
      %370 = arith.mulf %368, %369 : vector<8x16x64xf32>
      %371 = arith.addf %364, %370 : vector<8x16x64xf32>
      %372 = vector.extract_strided_slice %20 {offsets = [47, 0], sizes = [1, 64], strides = [1, 1]} : vector<49x64xf32> to vector<1x64xf32>
      %373 = vector.shape_cast %372 : vector<1x64xf32> to vector<64xf32>
      %374 = vector.shape_cast %373 : vector<64xf32> to vector<1x1x64xf32>
      %375 = vector.extract_strided_slice %336 {offsets = [0, 5, 0], sizes = [8, 16, 64], strides = [1, 1, 1]} : vector<8x24x64xf32> to vector<8x16x64xf32>
      %376 = vector.broadcast %374 : vector<1x1x64xf32> to vector<8x16x64xf32>
      %377 = arith.mulf %375, %376 : vector<8x16x64xf32>
      %378 = arith.addf %371, %377 : vector<8x16x64xf32>
      %379 = vector.extract_strided_slice %20 {offsets = [48, 0], sizes = [1, 64], strides = [1, 1]} : vector<49x64xf32> to vector<1x64xf32>
      %380 = vector.shape_cast %379 : vector<1x64xf32> to vector<64xf32>
      %381 = vector.shape_cast %380 : vector<64xf32> to vector<1x1x64xf32>
      %382 = vector.extract_strided_slice %336 {offsets = [0, 6, 0], sizes = [8, 16, 64], strides = [1, 1, 1]} : vector<8x24x64xf32> to vector<8x16x64xf32>
      %383 = vector.broadcast %381 : vector<1x1x64xf32> to vector<8x16x64xf32>
      %384 = arith.mulf %382, %383 : vector<8x16x64xf32>
      %385 = arith.addf %378, %384 : vector<8x16x64xf32>
      %386 = vector.shape_cast %385 : vector<8x16x64xf32> to vector<128x64xf32>
      %387 = vector.broadcast %1 : vector<1x64xf32> to vector<128x64xf32>
      %388 = arith.addf %386, %387 : vector<128x64xf32>
      %cst_44 = arith.constant dense<0.000000e+00> : vector<128xf32>
      %389 = vector.multi_reduction <add>, %388, %cst_44 [1] : vector<128x64xf32> to vector<128xf32>
      %390 = vector.shape_cast %389 : vector<128xf32> to vector<128x1xf32>
      %cst_45 = arith.constant 6.400000e+01 : f32
      %391 = vector.broadcast %cst_45 : f32 to vector<128x1xf32>
      %392 = arith.divf %390, %391 : vector<128x1xf32>
      %393 = vector.broadcast %392 : vector<128x1xf32> to vector<128x64xf32>
      %394 = arith.subf %388, %393 : vector<128x64xf32>
      %395 = arith.mulf %394, %394 : vector<128x64xf32>
      %cst_46 = arith.constant dense<0.000000e+00> : vector<128xf32>
      %396 = vector.multi_reduction <add>, %395, %cst_46 [1] : vector<128x64xf32> to vector<128xf32>
      %397 = vector.shape_cast %396 : vector<128xf32> to vector<128x1xf32>
      %cst_47 = arith.constant 6.400000e+01 : f32
      %398 = vector.broadcast %cst_47 : f32 to vector<128x1xf32>
      %399 = arith.divf %397, %398 : vector<128x1xf32>
      %cst_48 = arith.constant 9.99999997E-7 : f32
      %400 = vector.broadcast %cst_48 : f32 to vector<128x1xf32>
      %401 = arith.addf %399, %400 : vector<128x1xf32>
      %402 = math.rsqrt %401 : vector<128x1xf32>
      %403 = vector.broadcast %402 : vector<128x1xf32> to vector<128x64xf32>
      %404 = arith.mulf %394, %403 : vector<128x64xf32>
      %405 = vector.broadcast %2 : vector<1x64xf32> to vector<128x64xf32>
      %406 = arith.mulf %404, %405 : vector<128x64xf32>
      %407 = vector.broadcast %3 : vector<1x64xf32> to vector<128x64xf32>
      %408 = arith.addf %406, %407 : vector<128x64xf32>
      %409 = arith.truncf %408 : vector<128x64xf32> to vector<128x64xbf16>
      %c0_49 = arith.constant 0 : index
      %c0_50 = arith.constant 0 : index
      %410 = vector.load %arg5[%c0_49, %c0_50] : memref<64x256xbf16, #tpu.memory_space<vmem>>, vector<64x256xbf16>
      %cst_51 = arith.constant dense<0.000000e+00> : vector<128x256xf32>
      %411 = tpu.matmul %409, %410, %cst_51 {dimension_numbers = #tpu.dot_dimension_numbers<[1], [0], [0], [1], [0, 0, 1, 1], [], []>} : vector<128x64xbf16>, vector<64x256xbf16>, vector<128x256xf32> -> vector<128x256xf32>
      %412 = vector.broadcast %6 : vector<1x256xf32> to vector<128x256xf32>
      %413 = arith.addf %411, %412 : vector<128x256xf32>
      %cst_52 = arith.constant 5.000000e-01 : f32
      %414 = vector.broadcast %cst_52 : f32 to vector<128x256xf32>
      %415 = arith.mulf %414, %413 : vector<128x256xf32>
      %cst_53 = arith.constant 0.707106769 : f32
      %416 = vector.broadcast %cst_53 : f32 to vector<128x256xf32>
      %417 = arith.mulf %413, %416 : vector<128x256xf32>
      %418 = math.absf %417 : vector<128x256xf32>
      %cst_54 = arith.constant 0.327591091 : f32
      %419 = vector.broadcast %cst_54 : f32 to vector<128x256xf32>
      %420 = arith.mulf %419, %418 : vector<128x256xf32>
      %cst_55 = arith.constant 1.000000e+00 : f32
      %421 = vector.broadcast %cst_55 : f32 to vector<128x256xf32>
      %422 = arith.addf %421, %420 : vector<128x256xf32>
      %423 = tpu.reciprocal %422 {approx = true} : vector<128x256xf32> -> vector<128x256xf32>
      %cst_56 = arith.constant 1.06140542 : f32
      %424 = vector.broadcast %cst_56 : f32 to vector<128x256xf32>
      %425 = arith.mulf %424, %423 : vector<128x256xf32>
      %cst_57 = arith.constant -1.45315206 : f32
      %426 = vector.broadcast %cst_57 : f32 to vector<128x256xf32>
      %427 = arith.addf %425, %426 : vector<128x256xf32>
      %428 = arith.mulf %427, %423 : vector<128x256xf32>
      %cst_58 = arith.constant 1.42141378 : f32
      %429 = vector.broadcast %cst_58 : f32 to vector<128x256xf32>
      %430 = arith.addf %428, %429 : vector<128x256xf32>
      %431 = arith.mulf %430, %423 : vector<128x256xf32>
      %cst_59 = arith.constant -0.284496725 : f32
      %432 = vector.broadcast %cst_59 : f32 to vector<128x256xf32>
      %433 = arith.addf %431, %432 : vector<128x256xf32>
      %434 = arith.mulf %433, %423 : vector<128x256xf32>
      %cst_60 = arith.constant 0.254829586 : f32
      %435 = vector.broadcast %cst_60 : f32 to vector<128x256xf32>
      %436 = arith.addf %434, %435 : vector<128x256xf32>
      %437 = arith.mulf %436, %423 : vector<128x256xf32>
      %cst_61 = arith.constant 0.000000e+00 : f32
      %438 = vector.broadcast %cst_61 : f32 to vector<128x256xf32>
      %439 = arith.subf %438, %418 : vector<128x256xf32>
      %440 = arith.mulf %439, %418 : vector<128x256xf32>
      %441 = math.exp %440 : vector<128x256xf32>
      %442 = arith.mulf %437, %441 : vector<128x256xf32>
      %cst_62 = arith.constant 1.000000e+00 : f32
      %443 = vector.broadcast %cst_62 : f32 to vector<128x256xf32>
      %444 = arith.subf %443, %442 : vector<128x256xf32>
      %cst_63 = arith.constant 0.000000e+00 : f32
      %445 = vector.broadcast %cst_63 : f32 to vector<128x256xf32>
      %446 = arith.cmpf oge, %417, %445 : vector<128x256xf32>
      %cst_64 = arith.constant 0.000000e+00 : f32
      %447 = vector.broadcast %cst_64 : f32 to vector<128x256xf32>
      %448 = arith.subf %447, %444 : vector<128x256xf32>
      %449 = arith.select %446, %444, %448 : vector<128x256xi1>, vector<128x256xf32>
      %cst_65 = arith.constant 1.000000e+00 : f32
      %450 = vector.broadcast %cst_65 : f32 to vector<128x256xf32>
      %451 = arith.addf %450, %449 : vector<128x256xf32>
      %452 = arith.mulf %415, %451 : vector<128x256xf32>
      %453 = arith.truncf %452 : vector<128x256xf32> to vector<128x256xbf16>
      %c0_66 = arith.constant 0 : index
      %c0_67 = arith.constant 0 : index
      %454 = vector.load %arg6[%c0_66, %c0_67] : memref<256x64xbf16, #tpu.memory_space<vmem>>, vector<256x64xbf16>
      %cst_68 = arith.constant dense<0.000000e+00> : vector<128x64xf32>
      %455 = tpu.matmul %453, %454, %cst_68 {dimension_numbers = #tpu.dot_dimension_numbers<[1], [0], [0], [1], [0, 0, 1, 1], [], []>} : vector<128x256xbf16>, vector<256x64xbf16>, vector<128x64xf32> -> vector<128x64xf32>
      %456 = vector.broadcast %4 : vector<1x64xf32> to vector<128x64xf32>
      %457 = arith.addf %455, %456 : vector<128x64xf32>
      %458 = vector.broadcast %5 : vector<1x64xf32> to vector<128x64xf32>
      %459 = arith.mulf %457, %458 : vector<128x64xf32>
      %c3_i32_69 = arith.constant 3 : i32
      %460 = arith.addi %19, %c3_i32_69 : i32
      %461 = arith.index_cast %460 : i32 to index
      %c3_70 = arith.constant 3 : index
      %c0_71 = arith.constant 0 : index
      %462 = vector.load %arg8[%461, %c3_70, %c0_71] : memref<22x24x64xf32, #tpu.memory_space<vmem>>, vector<8x16x64xf32>
      %463 = vector.shape_cast %462 : vector<8x16x64xf32> to vector<128x64xf32>
      %464 = arith.addf %463, %459 : vector<128x64xf32>
      %465 = vector.shape_cast %464 : vector<128x64xf32> to vector<8x16x64xf32>
      %c0_72 = arith.constant 0 : index
      %466 = arith.index_cast %19 : i32 to index
      %c0_73 = arith.constant 0 : index
      %c0_74 = arith.constant 0 : index
      %467 = vector.load %arg7[%c0_72, %466, %c0_73, %c0_74] : memref<1x16x16x64xf32, #tpu.memory_space<vmem>>, vector<1x8x16x64xf32>
      %468 = vector.shape_cast %467 : vector<1x8x16x64xf32> to vector<8x16x64xf32>
      %469 = vector.shape_cast %465 : vector<8x16x64xf32> to vector<1x8x16x64xf32>
      tpu.vector_store %arg7[%c0_72, %466, %c0_73, %c0_74], %469 {strides = array<i32>} : memref<1x16x16x64xf32, #tpu.memory_space<vmem>>, vector<1x8x16x64xf32>,
    }
    %c2_i32_23 = arith.constant 2 : i32
    return
  }
  func.func @transform_0(%arg0: i32) -> (i32, i32, i32, i32) {
    %c0_i32 = arith.constant 0 : i32
    %c0_i32_0 = arith.constant 0 : i32
    %c0_i32_1 = arith.constant 0 : i32
    %c0_i32_2 = arith.constant 0 : i32
    return %arg0, %c0_i32, %c0_i32_0, %c0_i32_1 : i32, i32, i32, i32
  }
  func.func @transform_1(%arg0: i32) -> (i32, i32) {
    %c0_i32 = arith.constant 0 : i32
    %c0_i32_0 = arith.constant 0 : i32
    %c0_i32_1 = arith.constant 0 : i32
    return %c0_i32, %c0_i32_0 : i32, i32
  }
  func.func @transform_2(%arg0: i32) -> (i32, i32) {
    %c0_i32 = arith.constant 0 : i32
    %c0_i32_0 = arith.constant 0 : i32
    %c0_i32_1 = arith.constant 0 : i32
    return %c0_i32, %c0_i32_0 : i32, i32
  }
  func.func @transform_3(%arg0: i32) -> (i32, i32) {
    %c0_i32 = arith.constant 0 : i32
    %c0_i32_0 = arith.constant 0 : i32
    %c0_i32_1 = arith.constant 0 : i32
    return %c0_i32, %c0_i32_0 : i32, i32
  }
  func.func @transform_4(%arg0: i32) -> (i32, i32) {
    %c0_i32 = arith.constant 0 : i32
    %c0_i32_0 = arith.constant 0 : i32
    %c0_i32_1 = arith.constant 0 : i32
    return %c0_i32, %c0_i32_0 : i32, i32
  }
  func.func @transform_5(%arg0: i32) -> (i32, i32) {
    %c0_i32 = arith.constant 0 : i32
    %c0_i32_0 = arith.constant 0 : i32
    %c0_i32_1 = arith.constant 0 : i32
    return %c0_i32, %c0_i32_0 : i32, i32
  }
  func.func @transform_6(%arg0: i32) -> (i32, i32, i32, i32) {
    %c0_i32 = arith.constant 0 : i32
    %c0_i32_0 = arith.constant 0 : i32
    %c0_i32_1 = arith.constant 0 : i32
    %c0_i32_2 = arith.constant 0 : i32
    return %arg0, %c0_i32, %c0_i32_0, %c0_i32_1 : i32, i32, i32, i32
  }
}

</mosaic_0001>

<bundles_post_ra>
// kernel: tpu_custom_call.1
= control target key start
LH: loop header
LB: loop body
LE: loop exit
PB: predicated region body
PF: predicated region fallthrough
CT: control target
= control target key end

     0   :  { %11 = vsyncpa [#allocation4], 0  ;;  %s16583_s0 = inlined_call_operand.hbm [shape: f32[2,16,16,64], index: 0, kind: input, shape index: {}]   ;;  %s16584_s1 = inlined_call_operand.vmem [shape: f32[49,64], index: 1, kind: input, shape index: {}]   ;;  %s16585_s2 = inlined_call_operand.vmem [shape: f32[5,64], index: 2, kind: input, shape index: {}]   ;;  %s16586_s3 = inlined_call_operand.vmem [shape: f32[1,256], index: 3, kind: input, shape index: {}]   ;;  %s16587_s4 = inlined_call_operand.vmem [shape: bf16[64,256], index: 4, kind: input, shape index: {}]   ;;  %s16588_s5 = inlined_call_operand.vmem [shape: bf16[256,64], index: 5, kind: input, shape index: {}]   ;;  %s16589_s6 = inlined_call_operand.hbm [shape: f32[2,16,16,64], index: 6, kind: output, shape index: {}]  }
   0x1   :  { %13 = vsyncpa [#allocation4 + $0x1], 0 }
   0x2   :  { %14 = vsyncpa [#allocation5], 0 }
   0x3   :  { %16 = vsyncpa [#allocation5 + $0x1], 0  ;;  %s8531_s21 = smov 0   ;;  %s8533_s22 = smov 0  }
   0x4   :  { %s8535_s23 = smov 0   ;;  %s8537_s24 = smov 0  }
   0x5 LB: > { %s8552_s25 = sadd.s32 4294967295, %s8482_s24   ;;  %s7799_s26 = sadd.s32 4294967294, %s8482_s24   ;;  %s8482_s24 = sphi %s8537_s24, %s19237_s24   ;;  %s8478_s23 = sphi %s8535_s23, %s19236_s23   ;;  %s8474_s22 = sphi %s8533_s22, %s19235_s22   ;;  %s8470_s21 = sphi %s8531_s21, %s19234_s21  }
   0x6   : > { %s8556_s27 = sadd.s32 1, %s8482_s24   ;;  %s29_s28 = sadd.s32 1, %s8478_s23 }
   0x7   : > { %s26_s29 = ssub.s32 %s8482_s24, %s8556_s27  ;;  %p36_p0 = scmp.ne.s32.totalorder %s8478_s23, %s8474_s22 }
   0x8   : > { %p27_p1 = scmp.eq.s32.totalorder %s26_s29, 0  ;;  %p37_p2 = scmp.eq.s32.totalorder %s8482_s24, 0 }
   0x9   : > { %p42_p3 = scmp.ne.s32.totalorder %s8474_s22, %s8470_s21  ;;  %p43_p4 = scmp.eq.s32.totalorder %s8552_s25, 0 }
   0xa   : > { %s8568_s30 = scalar_select %p27_p1, %s8478_s23, %s29_s28  }
   0xb   : > { %p8570_p5 = por %p37_p2, %p36_p0  ;;  %p8574_p6 = por %p43_p4, %p42_p3 }
   0xc   : > { %p171_p7 = scmp.eq.s32.totalorder %s8552_s25, 1  ;;  %p177_p8 = scmp.eq.s32.totalorder %s7799_s26, 1 }
   0xd   : > { %p8116_p10 = scmp.lt.s32.totalorder %s8482_s24, 2  ;;  %s212_s11 = sand.u32 1, %s8478_s23  }
   0xe   : > { %p8581_p11 = por %p171_p7, %p36_p0  ;;  %p8585_p12 = por %p177_p8, %p42_p3 }
   0xf   : > { %s8021_s12 = sshll.u32 %s8482_s24, 12  ;;  %s7802_s13 = sshll.u32 %s212_s11, 8 }
  0x10   : > { %s17470_s9 = scalar_select %p8581_p11, 1, 0 }
  0x11   : > { %s17471_s10 = scalar_select %p8585_p12, 1, 0 }
  0x12   : > { %s8594_s16 = scalar_lea.hbm %s16583_s0, %s8021_s12  ;;  %s216_s17 = scalar_lea.vmem [#allocation3], %s7802_s13 }
  0x13   : > { %s223_s18 = sshll.u32 %s216_s17, 4  ;;  %p8598_p13 = pnand %p8116_p10, %p8570_p5  ;;  %s8602_s18 = int_to_ptr.vmem [resolvable:$true] %s223_s18 }
  0x14   : > { %s8604_s20 = scalar_lea.sflag [#allocation4], %s212_s11  ;;  %s8382_s26 = scalar_lea.hbm %s8594_s16, 4096 }
  0x15   : > { %p8383_p0 = scmp.ne.s32.totalorder %s8594_s16, %s8382_s26  ;;  %p8384_p1 = pneg %p8598_p13 }
  0x16   : > { %s8387_s7 = scalar_lea.hbm %s16583_s0, 8192  ;;  %p8388_p4 = scmp.lt.u32.totalorder %s8594_s16, %s16583_s0 }
  0x17   : > { %p8385_p2 = pnand %p8384_p1, %p8383_p0  ;;  %p8389_p5 = scmp.lt.u32.totalorder %s8387_s7, %s8382_s26 }
  0x18   : > { %p8391_p8 = scmp.lt.u32.totalorder %s8382_s26, %s8594_s16 }
  0x19   : > { %p8386_p3 = pneg %p8385_p2  ;;  %p8390_p7 = por %p8389_p5, %p8388_p4 }
  0x1b   : > { %p8392_p10 = por %p8391_p8, %p8390_p7 }
  0x1d   : > { %p8393_p9 = pnand %p8392_p10, %p8386_p3 }
  0x1f   : > { %8396 = shalt.err (!%p8393_p9)
}
  0x20   : > { %s8397_s11 = scalar_lea.vmem %s8602_s18, 4096  ;;  %s8488_s14 = smov [#allocation3]  }
  0x21   : > { %p8398_p0 = scmp.ne.s32.totalorder %s8602_s18, %s8397_s11  ;;  %s8402_s15 = sshll.u32 %s8488_s14, 4  ;;  %s8403_s15 = int_to_ptr.vmem [resolvable:$false] %s8402_s15 }
  0x22   : > { %s8404_s17 = scalar_lea.vmem %s8403_s15, 8192  ;;  %p8405_p11 = scmp.lt.s32.totalorder %s8602_s18, %s8403_s15 }
  0x23   : > { %p8400_p2 = pnand %p8398_p0, %p8384_p1  ;;  %p8406_p4 = scmp.lt.s32.totalorder %s8404_s17, %s8397_s11 }
  0x25   : > { %p8401_p12 = pneg %p8400_p2  ;;  %p8407_p5 = por %p8406_p4, %p8405_p11 }
  0x27   : > { %p8408_p7 = pnand %p8407_p5, %p8401_p12 }
  0x29   : > { %8411 = shalt.err (!%p8408_p7)
}
  0x2a   : > { %s8489_s26 = smov 128   ;;  %s8490_s28 = smov 8  }
  0x2b   : > { %8111 = dma.hbm_to_vmem [thread:$0]  (!%p8598_p13), %s8594_s16, 4096, %s8602_s18, %s8604_s20, %s8489_s26, %s8489_s26, %s8490_s28  }
  0x2c   : > { %p7805_p9 = scmp.ge.s32.totalorder %s8482_s24, 1  ;;  %p231_p1 = scmp.lt.s32.totalorder %s8482_s24, 3 }
  0x2e   : > { %p232_p3 = pnand %p7805_p9, %p231_p1 }
  0x30   : > { %235 = sbr.rel (%p232_p3) target bundleno = 2040 (0x7f8), region = 44 }
  0x37   : > { %s8635_s29 = sand.u32 1, %s8474_s22  }
  0x38   : > { %s7806_s7 = sshll.u32 %s8635_s29, 8  ;;  %s238_s12 = scalar_lea.sflag [#allocation4], %s8635_s29 }
  0x39   : > { %s8641_s13 = scalar_lea.vmem [#allocation3], %s7806_s7 }
  0x3a   : > { %8461 = dma.done.wait (%p8574_p6), %s238_s12, 4096  }
  0x3b   : > { %8463 = vsyncadd (%p8574_p6), %s238_s12, 4294963200  ;;  %vm273_vm0 = vcmask 523264   ;;  %vm294_vm1 = vcmask 518144   ;;  %v8491_v0 = vmov 0.0   ;;  %v8700_v1 = vld [vmem:[%s16585_s2] sm:$0x1f] }
  0x3c   : > { %274 = vst.msk [vmem:[#allocation2] sm:$0xff] %vm273_vm0, %v8491_v0  ;;  %275 = vst.msk [vmem:[#allocation2 + $0x8] sm:$0xff] %vm273_vm0, %v8491_v0  ;;  %v8705_v2 = vld [vmem:[%s16586_s3] sm:$0x3]  ;;  %v327_v3 = vld [vmem:[%s8641_s13] sm:$0xff]  ;;  %s8773_s20 = scalar_lea.vmem [#allocation6], %s7806_s7 }
  0x3d   : > { %276 = vst.msk [vmem:[#allocation2 + $0x10] sm:$0xff] %vm273_vm0, %v8491_v0  ;;  %277 = vst.msk [vmem:[#allocation2 + $0x18] sm:$0xff] %vm273_vm0, %v8491_v0  ;;  %v328_v4 = vld [vmem:[%s8641_s13 + $0x8] sm:$0xff]  ;;  %v329_v5 = vld [vmem:[%s8641_s13 + $0x10] sm:$0xff]  ;;  %s8775_s11 = smov 0  }
  0x3e   : > { %278 = vst.msk [vmem:[#allocation2 + $0x20] sm:$0xff] %vm273_vm0, %v8491_v0  ;;  %279 = vst.msk [vmem:[#allocation2 + $0x28] sm:$0xff] %vm273_vm0, %v8491_v0  ;;  %v330_v6 = vld [vmem:[%s8641_s13 + $0x18] sm:$0xff]  ;;  %v331_v7 = vld [vmem:[%s8641_s13 + $0x20] sm:$0xff] }
  0x3f   : > { %280 = vst.msk [vmem:[#allocation2 + $0x30] sm:$0xff] %vm273_vm0, %v8491_v0  ;;  %281 = vst.msk [vmem:[#allocation2 + $0x38] sm:$0xff] %vm273_vm0, %v8491_v0  ;;  %v332_v8 = vld [vmem:[%s8641_s13 + $0x28] sm:$0xff]  ;;  %v333_v9 = vld [vmem:[%s8641_s13 + $0x30] sm:$0xff] }
  0x40   : > { %282 = vst.msk [vmem:[#allocation2 + $0x40] sm:$0xff] %vm273_vm0, %v8491_v0  ;;  %284 = vst.msk [vmem:[#allocation2 + $0x1c8] sm:$0xff] %vm273_vm0, %v8491_v0  ;;  %v334_v10 = vld [vmem:[%s8641_s13 + $0x38] sm:$0xff]  ;;  %v335_v11 = vld [vmem:[%s8641_s13 + $0x40] sm:$0xff] }
  0x41   : > { %285 = vst.msk [vmem:[#allocation2 + $0x1d0] sm:$0xff] %vm273_vm0, %v8491_v0  ;;  %286 = vst.msk [vmem:[#allocation2 + $0x1d8] sm:$0xff] %vm273_vm0, %v8491_v0  ;;  %v336_v12 = vld [vmem:[%s8641_s13 + $0x48] sm:$0xff]  ;;  %v337_v13 = vld [vmem:[%s8641_s13 + $0x50] sm:$0xff] }
  0x42   : > { %287 = vst.msk [vmem:[#allocation2 + $0x1e0] sm:$0xff] %vm273_vm0, %v8491_v0  ;;  %288 = vst.msk [vmem:[#allocation2 + $0x1e8] sm:$0xff] %vm273_vm0, %v8491_v0  ;;  %v338_v14 = vld [vmem:[%s8641_s13 + $0x58] sm:$0xff]  ;;  %v339_v15 = vld [vmem:[%s8641_s13 + $0x60] sm:$0xff] }
  0x43   : > { %289 = vst.msk [vmem:[#allocation2 + $0x1f0] sm:$0xff] %vm273_vm0, %v8491_v0  ;;  %290 = vst.msk [vmem:[#allocation2 + $0x1f8] sm:$0xff] %vm273_vm0, %v8491_v0  ;;  %v340_v16 = vld [vmem:[%s8641_s13 + $0x68] sm:$0xff]  ;;  %v341_v17 = vld [vmem:[%s8641_s13 + $0x70] sm:$0xff] }
  0x44   : > { %291 = vst.msk [vmem:[#allocation2 + $0x200] sm:$0xff] %vm273_vm0, %v8491_v0  ;;  %292 = vst.msk [vmem:[#allocation2 + $0x208] sm:$0xff] %vm273_vm0, %v8491_v0  ;;  %v342_v18 = vld [vmem:[%s8641_s13 + $0x78] sm:$0xff]  ;;  %v343_v19 = vld [vmem:[%s8641_s13 + $0x80] sm:$0xff] }
  0x45   : > { %295 = vst.msk [vmem:[#allocation2 + $0x48] sm:$0x7] %vm294_vm1, %v8491_v0  ;;  %296 = vst.msk [vmem:[#allocation2 + $0x60] sm:$0x7] %vm294_vm1, %v8491_v0  ;;  %v344_v20 = vld [vmem:[%s8641_s13 + $0x88] sm:$0xff]  ;;  %v345_v21 = vld [vmem:[%s8641_s13 + $0x90] sm:$0xff] }
  0x46   : > { %297 = vst.msk [vmem:[#allocation2 + $0x78] sm:$0x7] %vm294_vm1, %v8491_v0  ;;  %298 = vst.msk [vmem:[#allocation2 + $0x90] sm:$0x7] %vm294_vm1, %v8491_v0  ;;  %v346_v22 = vld [vmem:[%s8641_s13 + $0x98] sm:$0xff]  ;;  %v347_v23 = vld [vmem:[%s8641_s13 + $0xa0] sm:$0xff] }
  0x47   : > { %299 = vst.msk [vmem:[#allocation2 + $0xa8] sm:$0x7] %vm294_vm1, %v8491_v0  ;;  %300 = vst.msk [vmem:[#allocation2 + $0xc0] sm:$0x7] %vm294_vm1, %v8491_v0  ;;  %v348_v24 = vld [vmem:[%s8641_s13 + $0xa8] sm:$0xff]  ;;  %v349_v25 = vld [vmem:[%s8641_s13 + $0xb0] sm:$0xff] }
  0x48   : > { %301 = vst.msk [vmem:[#allocation2 + $0xd8] sm:$0x7] %vm294_vm1, %v8491_v0  ;;  %302 = vst.msk [vmem:[#allocation2 + $0xf0] sm:$0x7] %vm294_vm1, %v8491_v0  ;;  %v350_v26 = vld [vmem:[%s8641_s13 + $0xb8] sm:$0xff]  ;;  %v351_v27 = vld [vmem:[%s8641_s13 + $0xc0] sm:$0xff] }
  0x49   : > { %303 = vst.msk [vmem:[#allocation2 + $0x108] sm:$0x7] %vm294_vm1, %v8491_v0  ;;  %304 = vst.msk [vmem:[#allocation2 + $0x120] sm:$0x7] %vm294_vm1, %v8491_v0  ;;  %v352_v28 = vld [vmem:[%s8641_s13 + $0xc8] sm:$0xff]  ;;  %v353_v29 = vld [vmem:[%s8641_s13 + $0xd0] sm:$0xff] }
  0x4a   : > { %305 = vst.msk [vmem:[#allocation2 + $0x138] sm:$0x7] %vm294_vm1, %v8491_v0  ;;  %306 = vst.msk [vmem:[#allocation2 + $0x150] sm:$0x7] %vm294_vm1, %v8491_v0  ;;  %v354_v30 = vld [vmem:[%s8641_s13 + $0xd8] sm:$0xff]  ;;  %v355_v31 = vld [vmem:[%s8641_s13 + $0xe0] sm:$0xff] }
  0x4b   : > { %307 = vst.msk [vmem:[#allocation2 + $0x168] sm:$0x7] %vm294_vm1, %v8491_v0  ;;  %308 = vst.msk [vmem:[#allocation2 + $0x180] sm:$0x7] %vm294_vm1, %v8491_v0  ;;  %v356_v32 = vld [vmem:[%s8641_s13 + $0xe8] sm:$0xff]  ;;  %v357_v33 = vld [vmem:[%s8641_s13 + $0xf0] sm:$0xff] }
  0x4c   : > { %309 = vst.msk [vmem:[#allocation2 + $0x198] sm:$0x7] %vm294_vm1, %v8491_v0  ;;  %310 = vst.msk [vmem:[#allocation2 + $0x1b0] sm:$0x7] %vm294_vm1, %v8491_v0  ;;  %v358_v34 = vld [vmem:[%s8641_s13 + $0xf8] sm:$0xff] }
  0x4d   : > { %311 = vst.msk [vmem:[#allocation2 + $0x5b] sm:$0x7] %vm294_vm1, %v8491_v0  ;;  %312 = vst.msk [vmem:[#allocation2 + $0x73] sm:$0x7] %vm294_vm1, %v8491_v0 }
  0x4e   : > { %313 = vst.msk [vmem:[#allocation2 + $0x8b] sm:$0x7] %vm294_vm1, %v8491_v0  ;;  %314 = vst.msk [vmem:[#allocation2 + $0xa3] sm:$0x7] %vm294_vm1, %v8491_v0 }
  0x4f   : > { %315 = vst.msk [vmem:[#allocation2 + $0xbb] sm:$0x7] %vm294_vm1, %v8491_v0  ;;  %316 = vst.msk [vmem:[#allocation2 + $0xd3] sm:$0x7] %vm294_vm1, %v8491_v0 }
  0x50   : > { %317 = vst.msk [vmem:[#allocation2 + $0xeb] sm:$0x7] %vm294_vm1, %v8491_v0  ;;  %318 = vst.msk [vmem:[#allocation2 + $0x103] sm:$0x7] %vm294_vm1, %v8491_v0 }
  0x51   : > { %319 = vst.msk [vmem:[#allocation2 + $0x11b] sm:$0x7] %vm294_vm1, %v8491_v0  ;;  %320 = vst.msk [vmem:[#allocation2 + $0x133] sm:$0x7] %vm294_vm1, %v8491_v0 }
  0x52   : > { %321 = vst.msk [vmem:[#allocation2 + $0x14b] sm:$0x7] %vm294_vm1, %v8491_v0  ;;  %322 = vst.msk [vmem:[#allocation2 + $0x163] sm:$0x7] %vm294_vm1, %v8491_v0 }
  0x53   : > { %323 = vst.msk [vmem:[#allocation2 + $0x17b] sm:$0x7] %vm294_vm1, %v8491_v0  ;;  %324 = vst.msk [vmem:[#allocation2 + $0x193] sm:$0x7] %vm294_vm1, %v8491_v0 }
  0x54   : > { %325 = vst.msk [vmem:[#allocation2 + $0x1ab] sm:$0x7] %vm294_vm1, %v8491_v0  ;;  %326 = vst.msk [vmem:[#allocation2 + $0x1c3] sm:$0x7] %vm294_vm1, %v8491_v0 }
  0x55   : > { %17473 = vst [vmem:[#allocation9_spill] sm:$0xff] %v8700_v1  ;;  %17474 = vst [vmem:[#allocation10_spill] sm:$0xff] %v8705_v2 }
  0x56   : > { %359 = vst.msk [vmem:[#allocation2 + $0x4b] sm:$0xff] %vm273_vm0, %v327_v3  ;;  %360 = vst.msk [vmem:[#allocation2 + $0x53] sm:$0xff] %vm273_vm0, %v328_v4 }
  0x57   : > { %361 = vst.msk [vmem:[#allocation2 + $0x63] sm:$0xff] %vm273_vm0, %v329_v5  ;;  %362 = vst.msk [vmem:[#allocation2 + $0x6b] sm:$0xff] %vm273_vm0, %v330_v6 }
  0x58   : > { %363 = vst.msk [vmem:[#allocation2 + $0x7b] sm:$0xff] %vm273_vm0, %v331_v7  ;;  %364 = vst.msk [vmem:[#allocation2 + $0x83] sm:$0xff] %vm273_vm0, %v332_v8 }
  0x59   : > { %365 = vst.msk [vmem:[#allocation2 + $0x93] sm:$0xff] %vm273_vm0, %v333_v9  ;;  %366 = vst.msk [vmem:[#allocation2 + $0x9b] sm:$0xff] %vm273_vm0, %v334_v10 }
  0x5a   : > { %367 = vst.msk [vmem:[#allocation2 + $0xab] sm:$0xff] %vm273_vm0, %v335_v11  ;;  %368 = vst.msk [vmem:[#allocation2 + $0xb3] sm:$0xff] %vm273_vm0, %v336_v12 }
  0x5b   : > { %369 = vst.msk [vmem:[#allocation2 + $0xc3] sm:$0xff] %vm273_vm0, %v337_v13  ;;  %370 = vst.msk [vmem:[#allocation2 + $0xcb] sm:$0xff] %vm273_vm0, %v338_v14 }
  0x5c   : > { %371 = vst.msk [vmem:[#allocation2 + $0xdb] sm:$0xff] %vm273_vm0, %v339_v15  ;;  %372 = vst.msk [vmem:[#allocation2 + $0xe3] sm:$0xff] %vm273_vm0, %v340_v16 }
  0x5d   : > { %373 = vst.msk [vmem:[#allocation2 + $0xf3] sm:$0xff] %vm273_vm0, %v341_v17  ;;  %374 = vst.msk [vmem:[#allocation2 + $0xfb] sm:$0xff] %vm273_vm0, %v342_v18 }
  0x5e   : > { %375 = vst.msk [vmem:[#allocation2 + $0x10b] sm:$0xff] %vm273_vm0, %v343_v19  ;;  %376 = vst.msk [vmem:[#allocation2 + $0x113] sm:$0xff] %vm273_vm0, %v344_v20 }
  0x5f   : > { %377 = vst.msk [vmem:[#allocation2 + $0x123] sm:$0xff] %vm273_vm0, %v345_v21  ;;  %378 = vst.msk [vmem:[#allocation2 + $0x12b] sm:$0xff] %vm273_vm0, %v346_v22 }
  0x60   : > { %379 = vst.msk [vmem:[#allocation2 + $0x13b] sm:$0xff] %vm273_vm0, %v347_v23  ;;  %380 = vst.msk [vmem:[#allocation2 + $0x143] sm:$0xff] %vm273_vm0, %v348_v24 }
  0x61   : > { %381 = vst.msk [vmem:[#allocation2 + $0x153] sm:$0xff] %vm273_vm0, %v349_v25  ;;  %382 = vst.msk [vmem:[#allocation2 + $0x15b] sm:$0xff] %vm273_vm0, %v350_v26 }
  0x62   : > { %383 = vst.msk [vmem:[#allocation2 + $0x16b] sm:$0xff] %vm273_vm0, %v351_v27  ;;  %384 = vst.msk [vmem:[#allocation2 + $0x173] sm:$0xff] %vm273_vm0, %v352_v28 }
  0x63   : > { %385 = vst.msk [vmem:[#allocation2 + $0x183] sm:$0xff] %vm273_vm0, %v353_v29  ;;  %386 = vst.msk [vmem:[#allocation2 + $0x18b] sm:$0xff] %vm273_vm0, %v354_v30 }
  0x64   : > { %387 = vst.msk [vmem:[#allocation2 + $0x19b] sm:$0xff] %vm273_vm0, %v355_v31  ;;  %388 = vst.msk [vmem:[#allocation2 + $0x1a3] sm:$0xff] %vm273_vm0, %v356_v32 }
  0x65   : > { %389 = vst.msk [vmem:[#allocation2 + $0x1b3] sm:$0xff] %vm273_vm0, %v357_v33  ;;  %390 = vst.msk [vmem:[#allocation2 + $0x1bb] sm:$0xff] %vm273_vm0, %v358_v34 }
  0x66 LB: >> { %v431_v35 = vlaneseq  ;;  %v398_v36 = vld [vmem:[%s16584_s1] sm:$0xff]  ;;  %s7809_s17 = smul.u32 192, %s8486_s11  ;;  %vm519_vm2 = vcmask 1046528   ;;  %vm644_vm3 = vcmask 1045504   ;;  %vm769_vm4 = vcmask 1044480   ;;  %v8848_v9 = vld [vmem:[%s16584_s1 + $0x8] sm:$0xff]  ;;  %s8486_s11 = sphi %s8775_s11, %s396_s11  }
  0x67   : >> { %vm894_vm5 = vcmask 1043456   ;;  %vm1019_vm6 = vcmask 1042432   ;;  %vm1144_vm7 = vcmask 1041408   ;;  %v17622_v1 = vld [vmem:[#allocation9_spill] sm:$0xff]  ;;  %s8022_s8 = sshll.u32 %s8486_s11, 7  ;;  %s396_s11 = sadd.s32 1, %s8486_s11  }
  0x68   : >> { %v432_v37 = vshrl.u32 %v431_v35, 7  ;;  %s8792_s26 = scalar_lea.vmem [#allocation2], %s7809_s17  ;;  %s16451_s16 = scalar_lea.vmem %s8773_s20, %s8022_s8 [#allocation6] }
  0x69   : >> { %p393_p6 = scmp.ge.s32.totalorder %s396_s11, 2  }
  0x6a   : >> { %v8784_v38 = vsub.s32 0, %v432_v37  ;;  %v8786_v39 = vsub.s32 1, %v432_v37  ;;  %v8788_v40 = vsub.s32 2, %v432_v37  ;;  %v8790_v41 = vsub.s32 3, %v432_v37  ;;  %s8023_s18 = sshll.u32 (%p393_p6), %s8552_s25, 12  ;;  %s7693_s15 = sshll.u32 (%p393_p6), %s8773_s20, 4  ;;  %s16539_s15 = int_to_ptr.vmem [resolvable:$true] %s7693_s15 }
  0x6b   : >> { %v8796_v44 = vsub.s32 4, %v432_v37  ;;  %v8798_v45 = vsub.s32 5, %v432_v37  ;;  %v8800_v46 = vsub.s32 6, %v432_v37  ;;  %v8823_v54 = vsub.s32 7, %v432_v37  ;;  %s16536_s14 = scalar_lea.hbm (%p393_p6), %s16589_s6, %s8023_s18  ;;  %s7680_s17 = scalar_lea.sflag (%p393_p6), [#allocation5], %s8635_s29 }
  0x6c   : >> { %17475 = vst [vmem:[#allocation11_spill] sm:$0xff] %v8784_v38  ;;  %17476 = vst [vmem:[#allocation12_spill] sm:$0xff] %v8786_v39  ;;  %v407_v42 = vld [vmem:[%s8792_s26] sm:$0xff]  ;;  %v408_v43 = vld [vmem:[%s8792_s26 + $0x8] sm:$0xff]  ;;  %v8803_v47 = vrot.slane %v398_v36, %v8784_v38  ;;  %v8806_v48 = vrot.slane %v398_v36, %v8786_v39  ;;  %v8809_v49 = vrot.slane %v398_v36, %v8788_v40  ;;  %s8412_s28 = scalar_lea.vmem (%p393_p6), %s16539_s15, 4096  ;;  %p19231_p12 = scmp.ne.s32.totalorder (%p393_p6), %s17470_s9, 0 }
  0x6d   : >> { %17477 = vst [vmem:[#allocation13_spill] sm:$0xff] %v8788_v40  ;;  %17478 = vst [vmem:[#allocation14_spill] sm:$0xff] %v8790_v41  ;;  %v8812_v50 = vrot.slane %v398_v36, %v8790_v41  ;;  %v8815_v51 = vrot.slane %v398_v36, %v8796_v44  ;;  %v8818_v52 = vrot.slane %v398_v36, %v8798_v45  ;;  %v8870_v23 = vld [vmem:[%s8792_s26 + $0x18] sm:$0xff]  ;;  %v8884_v28 = vld [vmem:[%s8792_s26 + $0x20] sm:$0xff]  ;;  %p8413_p11 = scmp.ne.s32.totalorder (%p393_p6), %s16539_s15, %s8412_s28  ;;  %s8493_s11 = smov (%p393_p6), [#allocation6]  }
  0x6e   : >> { %17479 = vst [vmem:[#allocation15_spill] sm:$0xff] %v8796_v44  ;;  %17480 = vst [vmem:[#allocation16_spill] sm:$0xff] %v8803_v47  ;;  %v8821_v53 = vrot.slane %v398_v36, %v8800_v46  ;;  %v435_v55 = vmul.f32 %v8803_v47, %v407_v42  ;;  %v471_v56 = vmul.f32 %v8806_v48, %v407_v42  ;;  %s8416_s7 = sshll.u32 (%p393_p6), %s8493_s11, 4  ;;  %s8417_s7 = int_to_ptr.vmem [resolvable:$false] %s8416_s7 }
  0x6f   : >> { %17481 = vst [vmem:[#allocation17_spill] sm:$0xff] %v8806_v48  ;;  %17482 = vst [vmem:[#allocation18_spill] sm:$0xff] %v8809_v49  ;;  %v8828_v57 = vmul.f32 %v8806_v48, %v408_v43  ;;  %v596_v58 = vmul.f32 %v8809_v49, %v407_v42  ;;  %v8832_v59 = vmul.f32 %v8809_v49, %v408_v43  ;;  %p8414_p13 = pnand (%p393_p6), %p8413_p11, %p19231_p12  ;;  %s8418_s25 = scalar_lea.vmem (%p393_p6), %s8417_s7, 8192 }
  0x70   : >> { %17483 = vst [vmem:[#allocation19_spill] sm:$0xff] %v8812_v50  ;;  %17484 = vst [vmem:[#allocation20_spill] sm:$0xff] %v8815_v51  ;;  %v721_v60 = vmul.f32 %v8812_v50, %v407_v42  ;;  %v8836_v61 = vmul.f32 %v8812_v50, %v408_v43  ;;  %v846_v62 = vmul.f32 %v8815_v51, %v407_v42  ;;  %v520_v63 = vrot.slane %v471_v56, 1  ;;  %p8419_p10 = scmp.lt.s32.totalorder (%p393_p6), %s16539_s15, %s8417_s7  ;;  %p8420_p0 = scmp.lt.s32.totalorder (%p393_p6), %s8418_s25, %s8412_s28 }
  0x71   : >> { %17485 = vst [vmem:[#allocation21_spill] sm:$0xff] %v8818_v52  ;;  %17486 = vst [vmem:[#allocation22_spill] sm:$0xff] %v8821_v53  ;;  %v16600_v0 = vrot.slane %v8828_v57, 1  ;;  %v645_v3 = vrot.slane %v596_v58, 2  ;;  %v8841_v4 = vmul.f32 %v8815_v51, %v408_v43  ;;  %v16599_v5 = vrot.slane %v8832_v59, 2  ;;  %p8415_p8 = pneg (%p393_p6), %p8414_p13 }
  0x72   : >> { %17487 = vst [vmem:[#allocation23_spill] sm:$0xff] %v8828_v57  ;;  %17488 = vst [vmem:[#allocation24_spill] sm:$0xff] %v8832_v59  ;;  %v770_v6 = vrot.slane %v721_v60, 3  ;;  %v16598_v7 = vrot.slane %v8836_v61, 3  ;;  %v895_v8 = vrot.slane %v846_v62, 4  ;;  %v971_v12 = vmul.f32 %v8818_v52, %v407_v42  ;;  %p8421_p2 = por (%p393_p6), %p8420_p0, %p8419_p10 }
  0x73   : >> { %17489 = vst [vmem:[#allocation25_spill] sm:$0xff] %v8836_v61  ;;  %17490 = vst [vmem:[#allocation26_spill] sm:$0xff] %v8841_v4  ;;  %v522_v10 = vsel %vm519_vm2, %v520_v63, %v16600_v0  ;;  %v16597_v11 = vrot.slane %v8841_v4, 4  ;;  %v8856_v13 = vmul.f32 %v8818_v52, %v408_v43  ;;  %v647_v15 = vsel %vm644_vm3, %v645_v3, %v16599_v5 }
  0x74   : >> { %v576_v14 = vadd.f32 %v522_v10, %v435_v55  ;;  %v1096_v16 = vmul.f32 %v8821_v53, %v407_v42  ;;  %v772_v17 = vsel %vm769_vm4, %v770_v6, %v16598_v7  ;;  %v1020_v18 = vrot.slane %v971_v12, 5  ;;  %p8422_p4 = pnand (%p393_p6), %p8421_p2, %p8415_p8 }
  0x75   : >> { %17491 = vst [vmem:[#allocation27_spill] sm:$0xff] %v8856_v13  ;;  %v16596_v19 = vrot.slane %v8856_v13, 5  ;;  %v8867_v20 = vmul.f32 %v8821_v53, %v408_v43  ;;  %v8873_v24 = vrot.slane %v398_v36, %v8823_v54  ;;  %v8877_v25 = vrot.slane %v8848_v9, %v8784_v38  ;;  %v9074_v13 = vld [vmem:[%s8792_s26 + $0x48] sm:$0xff] }
  0x76   : >> { %v701_v21 = vadd.f32 %v647_v15, %v576_v14  ;;  %v1145_v22 = vrot.slane %v1096_v16, 6  ;;  %v897_v26 = vsel %vm894_vm5, %v895_v8, %v16597_v11  ;;  %v8888_v29 = vrot.slane %v8848_v9, %v8786_v39  ;;  %v8934_v14 = vld [vmem:[%s16584_s1 + $0x10] sm:$0xff] }
  0x77   : >> { %17492 = vst [vmem:[#allocation28_spill] sm:$0xff] %v8867_v20  ;;  %17493 = vst [vmem:[#allocation29_spill] sm:$0xff] %v8873_v24  ;;  %v16594_v27 = vrot.slane %v8867_v20, 6  ;;  %v8892_v30 = vrot.slane %v8848_v9, %v8788_v40  ;;  %v1022_v32 = vsel %vm1019_vm6, %v1020_v18, %v16596_v19  ;;  %v1284_v33 = vmul.f32 %v8870_v23, %v8877_v25 }
  0x78   : >> { %17494 = vst [vmem:[#allocation30_spill] sm:$0xff] %v8877_v25  ;;  %17495 = vst [vmem:[#allocation31_spill] sm:$0xff] %v8888_v29  ;;  %v826_v31 = vadd.f32 %v772_v17, %v701_v21  ;;  %v8901_v34 = vmul.f32 %v8884_v28, %v8877_v25  ;;  %v1248_v35 = vmul.f32 %v8870_v23, %v8873_v24 }
  0x79   : >> { %17496 = vst [vmem:[#allocation32_spill] sm:$0xff] %v8892_v30  ;;  %v1408_v36 = vmul.f32 %v8870_v23, %v8888_v29  ;;  %v8909_v37 = vmul.f32 %v8884_v28, %v8888_v29  ;;  %v1532_v42 = vmul.f32 %v8870_v23, %v8892_v30  ;;  %v1147_v55 = vsel %vm1144_vm7, %v1145_v22, %v16594_v27 }
  0x7a   : >> { %17497 = vst [vmem:[#allocation33_spill] sm:$0xff] %v8901_v34  ;;  %v951_v43 = vadd.f32 %v897_v26, %v826_v31  ;;  %v1332_v56 = vrot.slane %v1284_v33, 1  ;;  %v8918_v58 = vmul.f32 %v8884_v28, %v8892_v30  ;;  %v16593_v60 = vrot.slane %v8901_v34, 1 }
  0x7b   : >> { %17498 = vst [vmem:[#allocation34_spill] sm:$0xff] %v8909_v37  ;;  %v1456_v62 = vrot.slane %v1408_v36, 2  ;;  %v16592_v63 = vrot.slane %v8909_v37, 2  ;;  %v8924_v3 = vrot.slane %v8848_v9, %v8790_v41  ;;  %v1580_v8 = vrot.slane %v1532_v42, 3 }
  0x7c   : >> { %17499 = vst [vmem:[#allocation35_spill] sm:$0xff] %v8918_v58  ;;  %v1076_v6 = vadd.f32 %v1022_v32, %v951_v43  ;;  %v16591_v10 = vrot.slane %v8918_v58, 3  ;;  %v8929_v12 = vrot.slane %v8848_v9, %v8796_v44  ;;  %v8944_v17 = vrot.slane %v8848_v9, %v8798_v45 }
  0x7d   : >> { %17500 = vst [vmem:[#allocation36_spill] sm:$0xff] %v8924_v3  ;;  %v1656_v15 = vmul.f32 %v8870_v23, %v8924_v3  ;;  %v8940_v16 = vmul.f32 %v8884_v28, %v8924_v3  ;;  %v1334_v26 = vsel %vm519_vm2, %v1332_v56, %v16593_v60  ;;  %v1458_v36 = vsel %vm644_vm3, %v1456_v62, %v16592_v63  ;;  %v8974_v62 = vld [vmem:[%s8792_s26 + $0x30] sm:$0xff] }
  0x7e   : >> { %17501 = vst [vmem:[#allocation37_spill] sm:$0xff] %v8929_v12  ;;  %17503 = vst [vmem:[#allocation39_spill] sm:$0xff] %v8944_v17  ;;  %v1201_v18 = vadd.f32 %v1147_v55, %v1076_v6  ;;  %v1780_v21 = vmul.f32 %v8870_v23, %v8929_v12  ;;  %v8950_v22 = vmul.f32 %v8884_v28, %v8929_v12 }
  0x7f   : >> { %17502 = vst [vmem:[#allocation38_spill] sm:$0xff] %v8940_v16  ;;  %v1704_v31 = vrot.slane %v1656_v15, 4  ;;  %v16595_v32 = vrot.slane %v8940_v16, 4  ;;  %v1582_v42 = vsel %vm769_vm4, %v1580_v8, %v16591_v10  ;;  %v1904_v55 = vmul.f32 %v8870_v23, %v8944_v17 }
  0x80   : >> { %17504 = vst [vmem:[#allocation40_spill] sm:$0xff] %v8950_v22  ;;  %v1264_v33 = vadd.f32 %v1248_v35, %v1201_v18  ;;  %v1828_v43 = vrot.slane %v1780_v21, 5  ;;  %v8966_v6 = vmul.f32 %v8884_v28, %v8944_v17  ;;  %v8970_v56 = vrot.slane %v8848_v9, %v8823_v54  ;;  %v8977_v18 = vld [vmem:[%s8792_s26 + $0x38] sm:$0xff] }
  0x81   : >> { %v16604_v15 = vrot.slane %v8950_v22, 5  ;;  %v8981_v8 = vrot.slane %v8848_v9, %v8800_v46  ;;  %v8985_v21 = vrot.slane %v8934_v14, %v8784_v38  ;;  %v1706_v10 = vsel %vm894_vm5, %v1704_v31, %v16595_v32 }
  0x82   : >> { %17505 = vst [vmem:[#allocation41_spill] sm:$0xff] %v8966_v6  ;;  %17506 = vst [vmem:[#allocation42_spill] sm:$0xff] %v8970_v56  ;;  %v1388_v35 = vadd.f32 %v1334_v26, %v1264_v33  ;;  %v2091_v26 = vmul.f32 %v8974_v62, %v8970_v56  ;;  %v8994_v33 = vmul.f32 %v8977_v18, %v8970_v56  ;;  %v1952_v32 = vrot.slane %v1904_v55, 6 }
  0x83   : >> { %17507 = vst [vmem:[#allocation43_spill] sm:$0xff] %v8981_v8  ;;  %17508 = vst [vmem:[#allocation44_spill] sm:$0xff] %v8985_v21  ;;  %v8998_v63 = vrot.slane %v8934_v14, %v8786_v39  ;;  %v2215_v60 = vmul.f32 %v8974_v62, %v8985_v21  ;;  %v9004_v27 = vmul.f32 %v8977_v18, %v8985_v21 }
  0x84   : >> { %17509 = vst [vmem:[#allocation45_spill] sm:$0xff] %v8994_v33  ;;  %v1512_v9 = vadd.f32 %v1458_v36, %v1388_v35  ;;  %v9008_v31 = vrot.slane %v8934_v14, %v8788_v40  ;;  %v1830_v7 = vsel %vm1019_vm6, %v1828_v43, %v16604_v15  ;;  %v2055_v55 = vmul.f32 %v8974_v62, %v8981_v8  ;;  %v9363_v8 = vld [vmem:[%s8792_s26 + $0x90] sm:$0xff] }
  0x85   : >> { %17510 = vst [vmem:[#allocation46_spill] sm:$0xff] %v8998_v63  ;;  %17511 = vst [vmem:[#allocation47_spill] sm:$0xff] %v9004_v27  ;;  %v2339_v11 = vmul.f32 %v8974_v62, %v8998_v63  ;;  %v9015_v36 = vmul.f32 %v8977_v18, %v8998_v63  ;;  %v2139_v0 = vrot.slane %v2091_v26, 1  ;;  %v2263_v58 = vrot.slane %v2215_v60, 2 }
  0x86   : >> { %17512 = vst [vmem:[#allocation48_spill] sm:$0xff] %v9008_v31  ;;  %v1636_v35 = vadd.f32 %v1582_v42, %v1512_v9  ;;  %v2463_v5 = vmul.f32 %v8974_v62, %v9008_v31  ;;  %v9027_v2 = vmul.f32 %v8977_v18, %v9008_v31  ;;  %v9032_v43 = vrot.slane %v8934_v14, %v8790_v41 }
  0x87   : >> { %17513 = vst [vmem:[#allocation49_spill] sm:$0xff] %v9015_v36  ;;  %v17516_v9 = vrot.slane %v8966_v6, 6  ;;  %v2387_v22 = vrot.slane %v2339_v11, 3  ;;  %v9040_v19 = vrot.slane %v8934_v14, %v8796_v44  ;;  %v9045_v42 = vrot.slane %v8934_v14, %v8800_v46  ;;  %v9050_v11 = vld [vmem:[%s16584_s1 + $0x18] sm:$0xff] }
  0x88   : >> { %17514 = vst [vmem:[#allocation50_spill] sm:$0xff] %v9027_v2  ;;  %v1760_v16 = vadd.f32 %v1706_v10, %v1636_v35  ;;  %17515 = vst [vmem:[#allocation51_spill] sm:$0xff] %v9032_v43  ;;  %v2511_v60 = vrot.slane %v2463_v5, 4  ;;  %v17521_v26 = vrot.slane %v9004_v27, 2  ;;  %v17522_v37 = vrot.slane %v9015_v36, 3 }
  0x89   : >> { %v1954_v15 = vsel %vm1144_vm7, %v1952_v32, %v17516_v9  ;;  %17517 = vst [vmem:[#allocation52_spill] sm:$0xff] %v9040_v19  ;;  %17518 = vst [vmem:[#allocation53_spill] sm:$0xff] %v9045_v42  ;;  %v2587_v32 = vmul.f32 %v8974_v62, %v9032_v43  ;;  %v9056_v9 = vmul.f32 %v8977_v18, %v9032_v43 }
  0x8a   : >> { %v1884_v10 = vadd.f32 %v1830_v7, %v1760_v16  ;;  %v2711_v5 = vmul.f32 %v8974_v62, %v9040_v19  ;;  %v17520_v16 = vrot.slane %v8994_v33, 1  ;;  %v2265_v6 = vsel %vm644_vm3, %v2263_v58, %v17521_v26 }
  0x8b   : >> { %17519 = vst [vmem:[#allocation54_spill] sm:$0xff] %v9056_v9  ;;  %v2389_v34 = vsel %vm769_vm4, %v2387_v22, %v17522_v37  ;;  %v9071_v20 = vmul.f32 %v8977_v18, %v9040_v19  ;;  %v17526_v58 = vrot.slane %v9027_v2, 4  ;;  %v9088_v37 = vld [vmem:[%s8792_s26 + $0x50] sm:$0xff]  ;;  %v2898_v22 = vmul.f32 %v9074_v13, %v9045_v42 }
  0x8c   : >> { %v2008_v7 = vadd.f32 %v1954_v15, %v1884_v10  ;;  %v2141_v35 = vsel %vm519_vm2, %v2139_v0, %v17520_v16  ;;  %v9078_v15 = vrot.slane %v8934_v14, %v8798_v45  ;;  %v9082_v0 = vrot.slane %v8934_v14, %v8823_v54 }
  0x8d   : >> { %17523 = vst [vmem:[#allocation55_spill] sm:$0xff] %v9071_v20  ;;  %v2513_v26 = vsel %vm894_vm5, %v2511_v60, %v17526_v58  ;;  %v9094_v16 = vrot.slane %v9050_v11, %v8784_v38  ;;  %v2635_v36 = vrot.slane %v2587_v32, 5  ;;  %v2759_v33 = vrot.slane %v2711_v5, 6 }
  0x8e   : >> { %17524 = vst [vmem:[#allocation56_spill] sm:$0xff] %v9078_v15  ;;  %17525 = vst [vmem:[#allocation57_spill] sm:$0xff] %v9082_v0  ;;  %v2071_v10 = vadd.f32 %v2055_v55, %v2008_v7  ;;  %v9099_v14 = vmul.f32 %v9088_v37, %v9045_v42  ;;  %v3022_v60 = vmul.f32 %v9074_v13, %v9082_v0  ;;  %v2946_v4 = vrot.slane %v2898_v22, 1 }
  0x8f   : >> { %17527 = vst [vmem:[#allocation58_spill] sm:$0xff] %v9094_v16  ;;  %v9105_v7 = vmul.f32 %v9088_v37, %v9082_v0  ;;  %v9109_v58 = vrot.slane %v9050_v11, %v8786_v39  ;;  %v3146_v5 = vmul.f32 %v9074_v13, %v9094_v16  ;;  %v9116_v27 = vmul.f32 %v9088_v37, %v9094_v16 }
  0x90   : >> { %17528 = vst [vmem:[#allocation59_spill] sm:$0xff] %v9099_v14  ;;  %v2195_v55 = vadd.f32 %v2141_v35, %v2071_v10  ;;  %v9120_v35 = vrot.slane %v9050_v11, %v8788_v40  ;;  %v2862_v2 = vmul.f32 %v9074_v13, %v9078_v15  ;;  %v9140_v15 = vrot.slane %v9050_v11, %v8790_v41 }
  0x91   : >> { %17529 = vst [vmem:[#allocation60_spill] sm:$0xff] %v9105_v7  ;;  %17530 = vst [vmem:[#allocation61_spill] sm:$0xff] %v9109_v58  ;;  %v3270_v61 = vmul.f32 %v9074_v13, %v9109_v58  ;;  %v9129_v59 = vmul.f32 %v9088_v37, %v9109_v58  ;;  %v17536_v32 = vrot.slane %v9056_v9, 5  ;;  %v17537_v0 = vrot.slane %v9071_v20, 6  ;;  %v9180_v20 = vld [vmem:[%s8792_s26 + $0x68] sm:$0xff] }
  0x92   : >> { %17531 = vst [vmem:[#allocation62_spill] sm:$0xff] %v9116_v27  ;;  %17532 = vst [vmem:[#allocation63_spill] sm:$0xff] %v9120_v35  ;;  %v2319_v10 = vadd.f32 %v2265_v6, %v2195_v55  ;;  %v3394_v57 = vmul.f32 %v9074_v13, %v9120_v35  ;;  %v9135_v16 = vmul.f32 %v9088_v37, %v9120_v35  ;;  %v3070_v55 = vrot.slane %v3022_v60, 2 }
  0x93   : >> { %17533 = vst [vmem:[#allocation64_spill] sm:$0xff] %v9129_v59  ;;  %17535 = vst [vmem:[#allocation66_spill] sm:$0xff] %v9140_v15  ;;  %v2637_v58 = vsel %vm1019_vm6, %v2635_v36, %v17536_v32  ;;  %v2761_v42 = vsel %vm1144_vm7, %v2759_v33, %v17537_v0  ;;  %v3194_v19 = vrot.slane %v3146_v5, 3  ;;  %v9152_v35 = vrot.slane %v9050_v11, %v8798_v45  ;;  %v9157_v36 = vld [vmem:[%s16584_s1 + $0x20] sm:$0xff] }
  0x94   : >> { %17534 = vst [vmem:[#allocation65_spill] sm:$0xff] %v9135_v16  ;;  %v2443_v6 = vadd.f32 %v2389_v34, %v2319_v10  ;;  %v3318_v10 = vrot.slane %v3270_v61, 4  ;;  %v3442_v32 = vrot.slane %v3394_v57, 5  ;;  %v9162_v0 = vrot.slane %v9050_v11, %v8796_v44  ;;  %v9177_v33 = vld [vmem:[%s8792_s26 + $0x60] sm:$0xff]  ;;  %17544 = vst [vmem:[#allocation71_spill] sm:$0xff] %v9180_v20 }
  0x95   : >> { %17538 = vst [vmem:[#allocation67_spill] sm:$0xff] %v9152_v35  ;;  %v9166_v61 = vrot.slane %v9050_v11, %v8800_v46  ;;  %v17541_v5 = vrot.slane %v9099_v14, 1  ;;  %v17542_v22 = vrot.slane %v9105_v7, 2  ;;  %v3518_v57 = vmul.f32 %v9074_v13, %v9140_v15  ;;  %17543 = vst [vmem:[#allocation70_spill] sm:$0xff] %v9177_v33 }
  0x96   : >> { %v2567_v60 = vadd.f32 %v2513_v26, %v2443_v6  ;;  %17539 = vst [vmem:[#allocation68_spill] sm:$0xff] %v9162_v0  ;;  %v9184_v9 = vmul.f32 %v9088_v37, %v9140_v15  ;;  %v9203_v14 = vrot.slane %v9157_v36, %v8784_v38  ;;  %v17550_v15 = vrot.slane %v9129_v59, 4 }
  0x97   : >> { %17540 = vst [vmem:[#allocation69_spill] sm:$0xff] %v9166_v61  ;;  %v2948_v6 = vsel %vm519_vm2, %v2946_v4, %v17541_v5  ;;  %v3072_v34 = vsel %vm644_vm3, %v3070_v55, %v17542_v22  ;;  %v9190_v4 = vmul.f32 %v9180_v20, %v9152_v35  ;;  %v9194_v55 = vrot.slane %v9050_v11, %v8823_v54 }
  0x98   : >> { %v2691_v26 = vadd.f32 %v2637_v58, %v2567_v60  ;;  %17545 = vst [vmem:[#allocation72_spill] sm:$0xff] %v9184_v9  ;;  %v3705_v58 = vmul.f32 %v9177_v33, %v9152_v35  ;;  %v17548_v60 = vrot.slane %v9116_v27, 3  ;;  %v3829_v7 = vmul.f32 %v9177_v33, %v9166_v61  ;;  %17549 = vst [vmem:[#allocation75_spill] sm:$0xff] %v9203_v14 }
  0x99   : >> { %17546 = vst [vmem:[#allocation73_spill] sm:$0xff] %v9190_v4  ;;  %17547 = vst [vmem:[#allocation74_spill] sm:$0xff] %v9194_v55  ;;  %v3320_v35 = vsel %vm894_vm5, %v3318_v10, %v17550_v15  ;;  %v17551_v43 = vrot.slane %v9135_v16, 5  ;;  %v3953_v27 = vmul.f32 %v9177_v33, %v9194_v55  ;;  %v9221_v59 = vmul.f32 %v9180_v20, %v9194_v55  ;;  %v9283_v15 = vld [vmem:[%s8792_s26 + $0x80] sm:$0xff] }
  0x9a   : >> { %v2815_v22 = vadd.f32 %v2761_v42, %v2691_v26  ;;  %v3196_v5 = vsel %vm769_vm4, %v3194_v19, %v17548_v60  ;;  %v3669_v42 = vmul.f32 %v9177_v33, %v9162_v0  ;;  %v9215_v19 = vmul.f32 %v9180_v20, %v9166_v61  ;;  %17567 = vst [vmem:[#allocation87_spill] sm:$0xff] %v9283_v15 }
  0x9b   : >> { %v3444_v11 = vsel %vm1019_vm6, %v3442_v32, %v17551_v43  ;;  %v3566_v60 = vrot.slane %v3518_v57, 6  ;;  %17553 = vst [vmem:[#allocation77_spill] sm:$0xff] %v9221_v59  ;;  %v3753_v10 = vrot.slane %v3705_v58, 1  ;;  %v9227_v32 = vrot.slane %v9157_v36, %v8786_v39 }
  0x9c   : >> { %17552 = vst [vmem:[#allocation76_spill] sm:$0xff] %v9215_v19  ;;  %v2878_v26 = vadd.f32 %v2862_v2, %v2815_v22  ;;  %v3877_v0 = vrot.slane %v3829_v7, 2  ;;  %v4077_v2 = vmul.f32 %v9177_v33, %v9203_v14  ;;  %v9233_v57 = vmul.f32 %v9180_v20, %v9203_v14 }
  0x9d   : >> { %17554 = vst [vmem:[#allocation78_spill] sm:$0xff] %v9227_v32  ;;  %v4201_v58 = vmul.f32 %v9177_v33, %v9227_v32  ;;  %v9240_v43 = vmul.f32 %v9180_v20, %v9227_v32  ;;  %v9249_v14 = vrot.slane %v9157_v36, %v8796_v44  ;;  %v17559_v22 = vrot.slane %v9184_v9, 6 }
  0x9e   : >> { %v3002_v16 = vadd.f32 %v2948_v6, %v2878_v26  ;;  %17555 = vst [vmem:[#allocation79_spill] sm:$0xff] %v9233_v57  ;;  %v9244_v6 = vrot.slane %v9157_v36, %v8788_v40  ;;  %v4001_v26 = vrot.slane %v3953_v27, 3  ;;  %v17560_v32 = vrot.slane %v9190_v4, 1  ;;  %v9273_v4 = vld [vmem:[%s8792_s26 + $0x78] sm:$0xff] }
  0x9f   : >> { %17556 = vst [vmem:[#allocation80_spill] sm:$0xff] %v9240_v43  ;;  %17558 = vst [vmem:[#allocation82_spill] sm:$0xff] %v9249_v14  ;;  %v3568_v55 = vsel %vm1144_vm7, %v3566_v60, %v17559_v22  ;;  %v9266_v9 = vrot.slane %v9157_v36, %v8790_v41  ;;  %v17563_v60 = vrot.slane %v9215_v19, 2  ;;  %v9287_v19 = vmul.f32 %v9273_v4, %v9249_v14 }
  0xa0   : >> { %17557 = vst [vmem:[#allocation81_spill] sm:$0xff] %v9244_v6  ;;  %v3126_v7 = vadd.f32 %v3072_v34, %v3002_v16  ;;  %v3755_v61 = vsel %vm519_vm2, %v3753_v10, %v17560_v32  ;;  %v4325_v31 = vmul.f32 %v9177_v33, %v9244_v6  ;;  %v9261_v27 = vmul.f32 %v9180_v20, %v9244_v6 }
  0xa1   : >> { %v4125_v34 = vrot.slane %v4077_v2, 4  ;;  %17562 = vst [vmem:[#allocation84_spill] sm:$0xff] %v9266_v9  ;;  %v3879_v22 = vsel %vm644_vm3, %v3877_v0, %v17563_v60  ;;  %v4249_v10 = vrot.slane %v4201_v58, 5  ;;  %17564 = vst [vmem:[#allocation85_spill] sm:$0xff] %v9273_v4  ;;  %v9277_v6 = vrot.slane %v9157_v36, %v8798_v45  ;;  %v403_v58 = vld [vmem:[%s16584_s1 + $0x28] sm:$0xff] }
  0xa2   : >> { %17561 = vst [vmem:[#allocation83_spill] sm:$0xff] %v9261_v27  ;;  %v3250_v16 = vadd.f32 %v3196_v5, %v3126_v7  ;;  %v17566_v2 = vrot.slane %v9221_v59, 3  ;;  %v9291_v0 = vrot.slane %v9157_v36, %v8800_v46  ;;  %v4373_v60 = vrot.slane %v4325_v31, 6 }
  0xa3   : >> { %17565 = vst [vmem:[#allocation86_spill] sm:$0xff] %v9277_v6  ;;  %v17571_v32 = vrot.slane %v9233_v57, 4  ;;  %v9310_v20 = vmul.f32 %v9273_v4, %v9266_v9  ;;  %v4636_v31 = vmul.f32 %v9273_v4, %v9277_v6 }
  0xa4   : >> { %v3374_v5 = vadd.f32 %v3320_v35, %v3250_v16  ;;  %v4003_v7 = vsel %vm769_vm4, %v4001_v26, %v17566_v2  ;;  %17568 = vst [vmem:[#allocation88_spill] sm:$0xff] %v9291_v0  ;;  %v9299_v26 = vmul.f32 %v9283_v15, %v9249_v14  ;;  %v9303_v16 = vrot.slane %v9157_v36, %v8823_v54 }
  0xa5   : >> { %v4127_v59 = vsel %vm894_vm5, %v4125_v34, %v17571_v32  ;;  %v17572_v35 = vrot.slane %v9240_v43, 5  ;;  %v9319_v36 = vmul.f32 %v9283_v15, %v9277_v6  ;;  %v9325_v34 = vmul.f32 %v9283_v15, %v9291_v0 }
  0xa6   : >> { %17569 = vst [vmem:[#allocation89_spill] sm:$0xff] %v9299_v26  ;;  %17570 = vst [vmem:[#allocation90_spill] sm:$0xff] %v9303_v16  ;;  %v3498_v2 = vadd.f32 %v3444_v11, %v3374_v5  ;;  %v4760_v11 = vmul.f32 %v9273_v4, %v9291_v0  ;;  %v4560_v5 = vrot.slane %v9287_v19, 1  ;;  %v4884_v57 = vmul.f32 %v9273_v4, %v9303_v16 }
  0xa7   : >> { %v4251_v14 = vsel %vm1019_vm6, %v4249_v10, %v17572_v35  ;;  %17573 = vst [vmem:[#allocation91_spill] sm:$0xff] %v9319_v36  ;;  %17574 = vst [vmem:[#allocation92_spill] sm:$0xff] %v9325_v34  ;;  %v9331_v43 = vrot.slane %v403_v58, %v8784_v38  ;;  %v17576_v10 = vrot.slane %v9261_v27, 6  ;;  %v9339_v9 = vmul.f32 %v9283_v15, %v9303_v16 }
  0xa8   : >> { %v3622_v32 = vadd.f32 %v3568_v55, %v3498_v2  ;;  %v9342_v55 = vrot.slane %v403_v58, %v8786_v39  ;;  %v4684_v2 = vrot.slane %v4636_v31, 2  ;;  %v4932_v33 = vrot.slane %v4884_v57, 4 }
  0xa9   : >> { %17575 = vst [vmem:[#allocation93_spill] sm:$0xff] %v9331_v43  ;;  %v4375_v35 = vsel %vm1144_vm7, %v4373_v60, %v17576_v10  ;;  %17577 = vst [vmem:[#allocation94_spill] sm:$0xff] %v9339_v9  ;;  %v5008_v0 = vmul.f32 %v9273_v4, %v9331_v43  ;;  %v9348_v27 = vmul.f32 %v9283_v15, %v9331_v43  ;;  %v4808_v10 = vrot.slane %v4760_v11, 3  ;;  %v9366_v11 = vld [vmem:[%s8792_s26 + $0x98] sm:$0xff] }
  0xaa   : >> { %17578 = vst [vmem:[#allocation95_spill] sm:$0xff] %v9342_v55  ;;  %v3685_v19 = vadd.f32 %v3669_v42, %v3622_v32  ;;  %v5132_v16 = vmul.f32 %v9273_v4, %v9342_v55  ;;  %v9356_v42 = vmul.f32 %v9283_v15, %v9342_v55  ;;  %v9359_v31 = vrot.slane %v403_v58, %v8790_v41 }
  0xab   : >> { %17579 = vst [vmem:[#allocation96_spill] sm:$0xff] %v9348_v27  ;;  %v5056_v43 = vrot.slane %v5008_v0, 5  ;;  %17582 = vst [vmem:[#allocation99_spill] sm:$0xff] %v9366_v11  ;;  %v9369_v6 = vrot.slane %v403_v58, %v8788_v40  ;;  %v9392_v55 = vrot.slane %v403_v58, %v8800_v46 }
  0xac   : >> { %v3809_v39 = vadd.f32 %v3755_v61, %v3685_v19  ;;  %17580 = vst [vmem:[#allocation97_spill] sm:$0xff] %v9356_v42  ;;  %17581 = vst [vmem:[#allocation98_spill] sm:$0xff] %v9359_v31  ;;  %v9372_v61 = vrot.slane %v403_v58, %v8796_v44  ;;  %v5319_v60 = vmul.f32 %v9363_v8, %v9359_v31  ;;  %v5180_v0 = vrot.slane %v5132_v16, 6 }
  0xad   : >> { %17583 = vst [vmem:[#allocation100_spill] sm:$0xff] %v9369_v6  ;;  %v9379_v32 = vmul.f32 %v9366_v11, %v9359_v31  ;;  %v9388_v44 = vrot.slane %v403_v58, %v8798_v45  ;;  %17588 = vst [vmem:[#allocation105_spill] sm:$0xff] %v9392_v55  ;;  %v9408_v46 = vmul.f32 %v9366_v11, %v9392_v55  ;;  %v17594_v45 = vrot.slane %v9319_v36, 2 }
  0xae   : >> { %17584 = vst [vmem:[#allocation101_spill] sm:$0xff] %v9372_v61  ;;  %v3933_v57 = vadd.f32 %v3879_v22, %v3809_v39  ;;  %v5443_v41 = vmul.f32 %v9363_v8, %v9372_v61  ;;  %v9385_v40 = vmul.f32 %v9366_v11, %v9372_v61  ;;  %v5367_v19 = vrot.slane %v5319_v60, 1 }
  0xaf   : >> { %17585 = vst [vmem:[#allocation102_spill] sm:$0xff] %v9379_v32  ;;  %17587 = vst [vmem:[#allocation104_spill] sm:$0xff] %v9388_v44  ;;  %v5567_v15 = vmul.f32 %v9363_v8, %v9388_v44  ;;  %v9399_v61 = vmul.f32 %v9366_v11, %v9388_v44  ;;  %v9415_v22 = vrot.slane %v403_v58, %v8823_v54  ;;  %v17597_v54 = vrot.slane %v9348_v27, 5 }
  0xb0   : >> { %17586 = vst [vmem:[#allocation103_spill] sm:$0xff] %v9385_v40  ;;  %v4057_v39 = vadd.f32 %v4003_v7, %v3933_v57  ;;  %v5491_v16 = vrot.slane %v5443_v41, 2  ;;  %v9404_v7 = vmul.f32 %v9363_v8, %v9392_v55  ;;  %17590 = vst [vmem:[#allocation107_spill] sm:$0xff] %v9408_v46  ;;  %v17591_v41 = vrot.slane %v9299_v26, 1 }
  0xb1   : >> { %17589 = vst [vmem:[#allocation106_spill] sm:$0xff] %v9399_v61  ;;  %v5615_v57 = vrot.slane %v5567_v15, 3  ;;  %17592 = vst [vmem:[#allocation108_spill] sm:$0xff] %v9415_v22  ;;  %v4686_v55 = vsel %vm644_vm3, %v4684_v2, %v17594_v45  ;;  %v17595_v26 = vrot.slane %v9325_v34, 3  ;;  %v17596_v15 = vrot.slane %v9339_v9, 4 }
  0xb2   : >> { %v4181_v4 = vadd.f32 %v4127_v59, %v4057_v39  ;;  %v4562_v60 = vsel %vm519_vm2, %v4560_v5, %v17591_v41  ;;  %v9420_v59 = vld [vmem:[%s16584_s1 + $0x30] ss:$0 sm:$0xff]  ;;  %v5058_v58 = vsel %vm1019_vm6, %v5056_v43, %v17597_v54  ;;  %v17598_v31 = vrot.slane %v9356_v42, 6 }
  0xb3   : >> { %17593 = vst [vmem:[#allocation109_spill] sm:$0xff] %v9420_v59  ;;  %v4810_v5 = vsel %vm769_vm4, %v4808_v10, %v17595_v26  ;;  %v4934_v41 = vsel %vm894_vm5, %v4932_v33, %v17596_v15  ;;  %v17599_v2 = vrot.slane %v9379_v32, 1  ;;  %v17600_v33 = vrot.slane %v9385_v40, 2 }
  0xb4   : >> { %v4305_v39 = vadd.f32 %v4251_v14, %v4181_v4  ;;  %v5182_v14 = vsel %vm1144_vm7, %v5180_v0, %v17598_v31  ;;  %v9439_v4 = vmul.f32 %v9363_v8, %v9369_v6  ;;  %v17601_v31 = vrot.slane %v9399_v61, 3 }
  0xb5   : >> { %v9444_v26 = vsel %vm519_vm2, %v5367_v19, %v17599_v2  ;;  %v9449_v45 = vsel %vm644_vm3, %v5491_v16, %v17600_v33  ;;  %v9460_v54 = vmul.f32 %v9363_v8, %v9415_v22  ;;  %v9468_v19 = vmul.f32 %v9420_v59, %v9363_v8 }
  0xb6   : >> { %v4429_v10 = vadd.f32 %v4375_v35, %v4305_v39  ;;  %v9456_v0 = vsel %vm769_vm4, %v5615_v57, %v17601_v31  ;;  %v9464_v35 = vmul.f32 %v9366_v11, %v9415_v22  ;;  %v474_v39 = vmul.f32 %v8870_v23, %v8806_v48 }
  0xb7   : >> { %v9475_v57 = vmul.f32 %v8884_v28, %v8806_v48  ;;  %v599_v2 = vmul.f32 %v8870_v23, %v8809_v49  ;;  %v9481_v33 = vmul.f32 %v9420_v59, %v9366_v11  ;;  %v437_v31 = vmul.f32 %v8870_v23, %v8803_v47 }
  0xb8   : >> { %17602 = vst [vmem:[#allocation110_spill] sm:$0xff] %v9464_v35  ;;  %v4492_v16 = vadd.f32 %v9310_v20, %v4429_v10  ;;  %v9487_v20 = vmul.f32 %v8884_v28, %v8809_v49  ;;  %v724_v10 = vmul.f32 %v8870_v23, %v8812_v50  ;;  %v525_v15 = vrot.slane %v474_v39, 1 }
  0xb9   : >> { %17603 = vst [vmem:[#allocation111_spill] sm:$0xff] %v9475_v57  ;;  %17604 = vst [vmem:[#allocation112_spill] sm:$0xff] %v9481_v33  ;;  %v16713_v61 = vrot.slane %v9475_v57, 1  ;;  %v650_v40 = vrot.slane %v599_v2, 2  ;;  %v9495_v42 = vmul.f32 %v8884_v28, %v8812_v50  ;;  %v849_v9 = vmul.f32 %v8870_v23, %v8815_v51 }
  0xba   : >> { %17605 = vst [vmem:[#allocation113_spill] sm:$0xff] %v9487_v20  ;;  %v4616_v43 = vadd.f32 %v4562_v60, %v4492_v16  ;;  %v16719_v32 = vrot.slane %v9487_v20, 2  ;;  %v775_v27 = vrot.slane %v724_v10, 3  ;;  %v9504_v60 = vmul.f32 %v8884_v28, %v8815_v51 }
  0xbb   : >> { %17606 = vst [vmem:[#allocation114_spill] sm:$0xff] %v9495_v42  ;;  %v527_v36 = vsel %vm519_vm2, %v525_v15, %v16713_v61  ;;  %v974_v16 = vmul.f32 %v8870_v23, %v8818_v52  ;;  %v16715_v10 = vrot.slane %v9495_v42, 3  ;;  %v900_v59 = vrot.slane %v849_v9, 4  ;;  %v17669_v42 = vld [vmem:[#allocation68_spill] sm:$0xff] }
  0xbc   : >> { %v4740_v34 = vadd.f32 %v4686_v55, %v4616_v43  ;;  %17607 = vst [vmem:[#allocation115_spill] sm:$0xff] %v9504_v60  ;;  %v578_v39 = vadd.f32 %v527_v36, %v437_v31  ;;  %v652_v2 = vsel %vm644_vm3, %v650_v40, %v16719_v32  ;;  %v16717_v43 = vrot.slane %v9504_v60, 4 }
  0xbd   : >> { %v9515_v15 = vmul.f32 %v8884_v28, %v8818_v52  ;;  %v1025_v61 = vrot.slane %v974_v16, 5  ;;  %v777_v36 = vsel %vm769_vm4, %v775_v27, %v16715_v10  ;;  %v1099_v31 = vmul.f32 %v8870_v23, %v8821_v53 }
  0xbe   : >> { %v4864_v55 = vadd.f32 %v4810_v5, %v4740_v34  ;;  %v703_v57 = vadd.f32 %v652_v2, %v578_v39  ;;  %v9524_v40 = vmul.f32 %v8884_v28, %v8821_v53  ;;  %v5863_v34 = vrot.slane %v9460_v54, 5 }
  0xbf   : >> { %17608 = vst [vmem:[#allocation116_spill] sm:$0xff] %v9515_v15  ;;  %v902_v5 = vsel %vm894_vm5, %v900_v59, %v16717_v43  ;;  %v16716_v16 = vrot.slane %v9515_v15, 5  ;;  %v1150_v2 = vrot.slane %v1099_v31, 6  ;;  %v1287_v23 = vmul.f32 %v8974_v62, %v8877_v25 }
  0xc0   : >> { %17609 = vst [vmem:[#allocation117_spill] sm:$0xff] %v9524_v40  ;;  %v4988_v9 = vadd.f32 %v4934_v41, %v4864_v55  ;;  %v828_v39 = vadd.f32 %v777_v36, %v703_v57  ;;  %v16718_v27 = vrot.slane %v9524_v40, 6  ;;  %v9539_v41 = vmul.f32 %v8977_v18, %v8877_v25 }
  0xc1   : >> { %v1027_v28 = vsel %vm1019_vm6, %v1025_v61, %v16716_v16  ;;  %v1411_v59 = vmul.f32 %v8974_v62, %v8888_v29  ;;  %v1337_v55 = vrot.slane %v1287_v23, 1  ;;  %v9546_v36 = vmul.f32 %v8977_v18, %v8888_v29 }
  0xc2   : >> { %v5112_v10 = vadd.f32 %v5058_v58, %v4988_v9  ;;  %17610 = vst [vmem:[#allocation118_spill] sm:$0xff] %v9539_v41  ;;  %v953_v57 = vadd.f32 %v902_v5, %v828_v39  ;;  %v1152_v61 = vsel %vm1144_vm7, %v1150_v2, %v16718_v27  ;;  %v16721_v31 = vrot.slane %v9539_v41, 1 }
  0xc3   : >> { %17611 = vst [vmem:[#allocation119_spill] sm:$0xff] %v9546_v36  ;;  %v1535_v9 = vmul.f32 %v8974_v62, %v8892_v30  ;;  %v1250_v43 = vmul.f32 %v8974_v62, %v8873_v24  ;;  %v9558_v5 = vmul.f32 %v8977_v18, %v8892_v30  ;;  %v1461_v39 = vrot.slane %v1411_v59, 2 }
  0xc4   : >> { %v5236_v58 = vadd.f32 %v5182_v14, %v5112_v10  ;;  %v1078_v16 = vadd.f32 %v1027_v28, %v953_v57  ;;  %v1659_v14 = vmul.f32 %v8974_v62, %v8924_v3  ;;  %v16722_v2 = vrot.slane %v9546_v36, 2 }
  0xc5   : >> { %17612 = vst [vmem:[#allocation120_spill] sm:$0xff] %v9558_v5  ;;  %v9566_v23 = vmul.f32 %v8977_v18, %v8924_v3  ;;  %v1339_v57 = vsel %vm519_vm2, %v1337_v55, %v16721_v31  ;;  %v1585_v27 = vrot.slane %v1535_v9, 3  ;;  %v16724_v32 = vrot.slane %v9558_v5, 3 }
  0xc6   : >> { %v5299_v10 = vadd.f32 %v9439_v4, %v5236_v58  ;;  %v1203_v28 = vadd.f32 %v1152_v61, %v1078_v16  ;;  %v1709_v40 = vrot.slane %v1659_v14, 4  ;;  %v1783_v4 = vmul.f32 %v8974_v62, %v8929_v12 }
  0xc7   : >> { %17613 = vst [vmem:[#allocation121_spill] sm:$0xff] %v9566_v23  ;;  %v9577_v59 = vmul.f32 %v8977_v18, %v8929_v12  ;;  %v1907_v61 = vmul.f32 %v8974_v62, %v8944_v17  ;;  %v9584_v55 = vmul.f32 %v8977_v18, %v8944_v17  ;;  %v17616_v9 = vrot.slane %v9408_v46, 4 }
  0xc8   : >> { %v5423_v54 = vadd.f32 %v9444_v26, %v5299_v10  ;;  %v1266_v58 = vadd.f32 %v1250_v43, %v1203_v28  ;;  %v17617_v14 = vrot.slane %v9404_v7, 4  ;;  %v1463_v43 = vsel %vm644_vm3, %v1461_v39, %v16722_v2 }
  0xc9   : >> { %17614 = vst [vmem:[#allocation122_spill] sm:$0xff] %v9577_v59  ;;  %17615 = vst [vmem:[#allocation123_spill] sm:$0xff] %v9584_v55  ;;  %v17618_v28 = vrot.slane %v9464_v35, 5  ;;  %v5987_v31 = vrot.slane %v9468_v19, 6  ;;  %v16726_v18 = vrot.slane %v9481_v33, 6  ;;  %v1587_v7 = vsel %vm769_vm4, %v1585_v27, %v16724_v32 }
  0xca   : >> { %v5547_v26 = vadd.f32 %v9449_v45, %v5423_v54  ;;  %v5741_v10 = vsel %vm894_vm5, %v17617_v14, %v17616_v9  ;;  %v1390_v16 = vadd.f32 %v1339_v57, %v1266_v58  ;;  %v1833_v54 = vrot.slane %v1783_v4, 5 }
  0xcb   : >> { %v5865_v62 = vsel %vm1019_vm6, %v5863_v34, %v17618_v28  ;;  %v16723_v9 = vrot.slane %v9577_v59, 5  ;;  %v17619_v39 = vrot.slane %v9566_v23, 4  ;;  %v1957_v34 = vrot.slane %v1907_v61, 6  ;;  %v17640_v23 = vld [vmem:[#allocation58_spill] sm:$0xff] }
  0xcc   : >> { %v5671_v45 = vadd.f32 %v9456_v0, %v5547_v26  ;;  %v1514_v14 = vadd.f32 %v1463_v43, %v1390_v16  ;;  %v16725_v19 = vrot.slane %v9584_v55, 6  ;;  %v2094_v57 = vmul.f32 %v9074_v13, %v8970_v56  ;;  %v17633_v55 = vld [vmem:[#allocation53_spill] sm:$0xff] }
  0xcd   : >> { %v1711_v2 = vsel %vm894_vm5, %v1709_v40, %v17619_v39  ;;  %v9613_v0 = vmul.f32 %v9088_v37, %v8970_v56  ;;  %v2218_v27 = vmul.f32 %v9074_v13, %v8985_v21  ;;  %v5989_v4 = vsel %vm1144_vm7, %v5987_v31, %v16726_v18 }
  0xce   : >> { %v5795_v28 = vadd.f32 %v5741_v10, %v5671_v45  ;;  %v1638_v58 = vadd.f32 %v1587_v7, %v1514_v14  ;;  %v9622_v40 = vmul.f32 %v9088_v37, %v8985_v21  ;;  %v9626_v61 = vrot.slane %v17622_v1, %v8784_v38  ;;  %v17624_v45 = vld [vmem:[#allocation43_spill] sm:$0xff] }
  0xcf   : >> { %17620 = vst [vmem:[#allocation124_spill] sm:$0xff] %v9613_v0  ;;  %v1835_v26 = vsel %vm1019_vm6, %v1833_v54, %v16723_v9  ;;  %v2342_v10 = vmul.f32 %v9074_v13, %v8998_v63  ;;  %v1959_v31 = vsel %vm1144_vm7, %v1957_v34, %v16725_v19  ;;  %v2057_v7 = vmul.f32 %v9074_v13, %v17624_v45 }
  0xd0   : >> { %17621 = vst [vmem:[#allocation125_spill] sm:$0xff] %v9622_v40  ;;  %v5919_v16 = vadd.f32 %v5865_v62, %v5795_v28  ;;  %17623 = vst [vmem:[#allocation126_spill] sm:$0xff] %v9626_v61  ;;  %v1762_v43 = vadd.f32 %v1711_v2, %v1638_v58  ;;  %v9640_v62 = vmul.f32 %v9088_v37, %v8998_v63  ;;  %v2144_v39 = vrot.slane %v2094_v57, 1  ;;  %v17626_v2 = vld [vmem:[#allocation48_spill] sm:$0xff] }
  0xd1   : >> { %v16733_v28 = vrot.slane %v9613_v0, 1  ;;  %v2268_v54 = vrot.slane %v2218_v27, 2  ;;  %v16734_v32 = vrot.slane %v9622_v40, 2  ;;  %v2466_v58 = vmul.f32 %v9074_v13, %v17626_v2  ;;  %v17634_v0 = vld [vmem:[#allocation70_spill] sm:$0xff]  ;;  %v17643_v40 = vld [vmem:[#allocation56_spill] sm:$0xff] }
  0xd2   : >> { %17625 = vst [vmem:[#allocation127_spill] sm:$0xff] %v9640_v62  ;;  %v6043_v14 = vadd.f32 %v5989_v4, %v5919_v16  ;;  %v1886_v9 = vadd.f32 %v1835_v26, %v1762_v43  ;;  %v9648_v34 = vmul.f32 %v9088_v37, %v17626_v2  ;;  %v2392_v18 = vrot.slane %v2342_v10, 3  ;;  %v17629_v4 = vld [vmem:[#allocation51_spill] sm:$0xff] }
  0xd3   : >> { %v2590_v27 = vmul.f32 %v9074_v13, %v17629_v4  ;;  %v9658_v16 = vmul.f32 %v9088_v37, %v17629_v4  ;;  %v2146_v43 = vsel %vm519_vm2, %v2144_v39, %v16733_v28  ;;  %v2270_v57 = vsel %vm644_vm3, %v2268_v54, %v16734_v32  ;;  %v17635_v39 = vld [vmem:[#allocation71_spill] sm:$0xff] }
  0xd4   : >> { %17627 = vst [vmem:[#allocation128_spill] sm:$0xff] %v9648_v34  ;;  %v9651_v19 = vadd.f32 %v9626_v61, %v6043_v14  ;;  %v2010_v38 = vadd.f32 %v1959_v31, %v1886_v9  ;;  %v17631_v14 = vld [vmem:[#allocation52_spill] sm:$0xff]  ;;  %v2516_v1 = vrot.slane %v2466_v58, 4  ;;  %v2901_v59 = vmul.f32 %v17634_v0, %v17633_v55  ;;  %v17661_v61 = vld [vmem:[#allocation75_spill] sm:$0xff] }
  0xd5   : >> { %17630 = vst [vmem:[#allocation130_spill] sm:$0xff] %v9658_v16  ;;  %v2714_v10 = vmul.f32 %v9074_v13, %v17631_v14  ;;  %v9669_v9 = vmul.f32 %v9088_v37, %v17631_v14  ;;  %v9679_v28 = vmul.f32 %v17635_v39, %v17633_v55  ;;  %v17637_v13 = vld [vmem:[#allocation57_spill] sm:$0xff]  ;;  %v17639_v54 = vrot.slane %v9640_v62, 3 }
  0xd6   : >> { %17628 = vst [vmem:[#allocation129_spill] sm:$0xff] %v9651_v19  ;;  %v6079_v26 = vsel %vm273_vm0, %v9651_v19, 0.0  ;;  %v2073_v31 = vadd.f32 %v2057_v7, %v2010_v38  ;;  %v3025_v37 = vmul.f32 %v17634_v0, %v17637_v13  ;;  %v9685_v38 = vmul.f32 %v17635_v39, %v17637_v13 }
  0xd7   : >> { %17632 = vst [vmem:[#allocation131_spill] sm:$0xff] %v9669_v9  ;;  %6080 = vadd.xlane.f32.xlu0 %v6079_v26  ;;  %17636 = vst [vmem:[#allocation70_spill] sm:$0xff] %v9679_v28  ;;  %v2394_v58 = vsel %vm769_vm4, %v2392_v18, %v17639_v54  ;;  %v2640_v26 = vrot.slane %v2590_v27, 5  ;;  %v2764_v19 = vrot.slane %v2714_v10, 6  ;;  %v3149_v5 = vmul.f32 %v17634_v0, %v17640_v23 }
  0xd8   : >> { %17638 = vst [vmem:[#allocation71_spill] sm:$0xff] %v9685_v38  ;;  %v2197_v7 = vadd.f32 %v2146_v43, %v2073_v31  ;;  %v9696_v36 = vmul.f32 %v17635_v39, %v17640_v23  ;;  %v17642_v43 = vrot.slane %v9648_v34, 4  ;;  %v2951_v62 = vrot.slane %v2901_v59, 1 }
  0xd9   : >> { %v16747_v18 = vrot.slane %v9679_v28, 1  ;;  %v3075_v27 = vrot.slane %v3025_v37, 2  ;;  %v2864_v32 = vmul.f32 %v17634_v0, %v17643_v40  ;;  %v17644_v35 = vrot.slane %v9658_v16, 5  ;;  %v17654_v28 = vld [vmem:[#allocation85_spill] sm:$0xff] }
  0xda   : >> { %17641 = vst [vmem:[#allocation132_spill] sm:$0xff] %v9696_v36  ;;  %v2321_v33 = vadd.f32 %v2270_v57, %v2197_v7  ;;  %v2518_v31 = vsel %vm894_vm5, %v2516_v1, %v17642_v43  ;;  %v17645_v57 = vrot.slane %v9669_v9, 6  ;;  %v3199_v34 = vrot.slane %v3149_v5, 3  ;;  %v17646_v43 = vld [vmem:[#allocation61_spill] sm:$0xff]  ;;  %v17653_v9 = vld [vmem:[#allocation67_spill] sm:$0xff] }
  0xdb   : >> { %v2642_v41 = vsel %vm1019_vm6, %v2640_v26, %v17644_v35  ;;  %v3273_v37 = vmul.f32 %v17634_v0, %v17646_v43  ;;  %v2953_v35 = vsel %vm519_vm2, %v2951_v62, %v16747_v18  ;;  %v3708_v16 = vmul.f32 %v17654_v28, %v17653_v9  ;;  %v17655_v62 = vld [vmem:[#allocation87_spill] sm:$0xff] }
  0xdc   : >> { %v2445_v54 = vadd.f32 %v2394_v58, %v2321_v33  ;;  %v2766_v7 = vsel %vm1144_vm7, %v2764_v19, %v17645_v57  ;;  %v9716_v33 = vmul.f32 %v17635_v39, %v17646_v43  ;;  %v17648_v58 = vld [vmem:[#allocation63_spill] sm:$0xff]  ;;  %v17649_v19 = vrot.slane %v9685_v38, 2  ;;  %v17664_v43 = vld [vmem:[#allocation78_spill] sm:$0xff] }
  0xdd   : >> { %v3397_v10 = vmul.f32 %v17634_v0, %v17648_v58  ;;  %v9728_v26 = vmul.f32 %v17635_v39, %v17648_v58  ;;  %v9740_v18 = vmul.f32 %v17655_v62, %v17653_v9  ;;  %v3323_v46 = vrot.slane %v3273_v37, 4 }
  0xde   : >> { %v2569_v59 = vadd.f32 %v2518_v31, %v2445_v54  ;;  %17647 = vst [vmem:[#allocation133_spill] sm:$0xff] %v9716_v33  ;;  %v3077_v5 = vsel %vm644_vm3, %v3075_v27, %v17649_v19  ;;  %v17651_v31 = vld [vmem:[#allocation66_spill] sm:$0xff]  ;;  %v17657_v27 = vld [vmem:[#allocation69_spill] sm:$0xff]  ;;  %v4080_v9 = vmul.f32 %v17654_v28, %v17661_v61  ;;  %v17663_v15 = vrot.slane %v9696_v36, 3 }
  0xdf   : >> { %17650 = vst [vmem:[#allocation134_spill] sm:$0xff] %v9728_v26  ;;  %v3521_v54 = vmul.f32 %v17634_v0, %v17651_v31  ;;  %v9734_v1 = vmul.f32 %v17635_v39, %v17651_v31  ;;  %17656 = vst [vmem:[#allocation85_spill] sm:$0xff] %v9740_v18  ;;  %v3832_v19 = vmul.f32 %v17654_v28, %v17657_v27  ;;  %v17659_v0 = vld [vmem:[#allocation74_spill] sm:$0xff]  ;;  %v3447_v60 = vrot.slane %v3397_v10, 5 }
  0xe0   : >> { %v2693_v57 = vadd.f32 %v2642_v41, %v2569_v59  ;;  %v9746_v38 = vmul.f32 %v17655_v62, %v17657_v27  ;;  %v3956_v41 = vmul.f32 %v17654_v28, %v17659_v0  ;;  %v9752_v39 = vmul.f32 %v17655_v62, %v17659_v0 }
  0xe1   : >> { %17652 = vst [vmem:[#allocation135_spill] sm:$0xff] %v9734_v1  ;;  %v3571_v20 = vrot.slane %v3521_v54, 6  ;;  %v9760_v27 = vmul.f32 %v17655_v62, %v17661_v61  ;;  %v16766_v31 = vrot.slane %v9734_v1, 6  ;;  %v3758_v0 = vrot.slane %v3708_v16, 1  ;;  %v17673_v1 = vld [vmem:[#allocation84_spill] sm:$0xff] }
  0xe2   : >> { %17658 = vst [vmem:[#allocation136_spill] sm:$0xff] %v9746_v38  ;;  %17660 = vst [vmem:[#allocation137_spill] sm:$0xff] %v9752_v39  ;;  %v2817_v59 = vadd.f32 %v2766_v7, %v2693_v57  ;;  %v16765_v7 = vrot.slane %v9740_v18, 1  ;;  %v3882_v37 = vrot.slane %v3832_v19, 2  ;;  %v4006_v10 = vrot.slane %v3956_v41, 3  ;;  %v17666_v19 = vld [vmem:[#allocation81_spill] sm:$0xff] }
  0xe3   : >> { %17662 = vst [vmem:[#allocation138_spill] sm:$0xff] %v9760_v27  ;;  %v3201_v58 = vsel %vm769_vm4, %v3199_v34, %v17663_v15  ;;  %v4204_v61 = vmul.f32 %v17654_v28, %v17664_v43  ;;  %v9774_v16 = vmul.f32 %v17655_v62, %v17664_v43  ;;  %v4328_v41 = vmul.f32 %v17654_v28, %v17666_v19  ;;  %v17683_v18 = vld [vmem:[#allocation93_spill] sm:$0xff]  ;;  %v17689_v43 = vld [vmem:[#allocation98_spill] sm:$0xff] }
  0xe4   : >> { %v2880_v40 = vadd.f32 %v2864_v32, %v2817_v59  ;;  %v4130_v32 = vrot.slane %v4080_v9, 4  ;;  %v17668_v15 = vrot.slane %v9728_v26, 5  ;;  %v3671_v9 = vmul.f32 %v17654_v28, %v17669_v42 }
  0xe5   : >> { %17665 = vst [vmem:[#allocation139_spill] sm:$0xff] %v9774_v16  ;;  %v3573_v59 = vsel %vm1144_vm7, %v3571_v20, %v16766_v31  ;;  %v3760_v36 = vsel %vm519_vm2, %v3758_v0, %v16765_v7  ;;  %v9800_v28 = vmul.f32 %v17655_v62, %v17666_v19  ;;  %v9804_v20 = vmul.f32 %v9363_v8, %v17673_v1  ;;  %v17675_v31 = vld [vmem:[#allocation82_spill] sm:$0xff]  ;;  %v9858_v19 = vld [vmem:[%s8792_s26 + $0xb0] sm:$0xff] }
  0xe6   : >> { %v3004_v54 = vadd.f32 %v2953_v35, %v2880_v40  ;;  %v17667_v40 = vrot.slane %v9716_v33, 4  ;;  %v3449_v34 = vsel %vm1019_vm6, %v3447_v60, %v17668_v15  ;;  %v4254_v15 = vrot.slane %v4204_v61, 5  ;;  %17688 = vst [vmem:[#allocation147_spill] sm:$0xff] %v9858_v19 }
  0xe7   : >> { %17672 = vst [vmem:[#allocation140_spill] sm:$0xff] %v9800_v28  ;;  %v17674_v0 = vrot.slane %v9760_v27, 4  ;;  %v5011_v26 = vmul.f32 %v9363_v8, %v17683_v18  ;;  %v9841_v33 = vmul.f32 %v9366_v11, %v17683_v18  ;;  %v17685_v62 = vrot.slane %v9774_v16, 5 }
  0xe8   : >> { %v3128_v57 = vadd.f32 %v3077_v5, %v3004_v54  ;;  %v3325_v35 = vsel %vm894_vm5, %v3323_v46, %v17667_v40  ;;  %v17670_v5 = vrot.slane %v9746_v38, 2  ;;  %v17671_v46 = vrot.slane %v9752_v39, 3 }
  0xe9   : >> { %v9809_v7 = vsel %vm894_vm5, %v4130_v32, %v17674_v0  ;;  %v17679_v32 = vld [vmem:[#allocation88_spill] sm:$0xff]  ;;  %17684 = vst [vmem:[#allocation145_spill] sm:$0xff] %v9841_v33  ;;  %v4256_v1 = vsel %vm1019_vm6, %v4254_v15, %v17685_v62  ;;  %v9868_v18 = vmul.f32 %v9858_v19, %v17689_v43 }
  0xea   : >> { %v3884_v54 = vsel %vm644_vm3, %v3882_v37, %v17670_v5  ;;  %v4008_v40 = vsel %vm769_vm4, %v4006_v10, %v17671_v46  ;;  %v3252_v60 = vadd.f32 %v3201_v58, %v3128_v57  ;;  %v4378_v5 = vrot.slane %v4328_v41, 6  ;;  %v17677_v10 = vld [vmem:[#allocation86_spill] sm:$0xff] }
  0xeb   : >> { %v4515_v58 = vmul.f32 %v9363_v8, %v17675_v31  ;;  %v9816_v57 = vmul.f32 %v9366_v11, %v17675_v31  ;;  %v4639_v46 = vmul.f32 %v9363_v8, %v17677_v10  ;;  %v9822_v27 = vmul.f32 %v9366_v11, %v17677_v10  ;;  %17690 = vst [vmem:[#allocation148_spill] sm:$0xff] %v9868_v18 }
  0xec   : >> { %v3376_v61 = vadd.f32 %v3325_v35, %v3252_v60  ;;  %v4763_v0 = vmul.f32 %v9363_v8, %v17679_v32  ;;  %v9828_v41 = vmul.f32 %v9366_v11, %v17679_v32  ;;  %v17681_v35 = vld [vmem:[#allocation90_spill] sm:$0xff]  ;;  %v17686_v32 = vld [vmem:[#allocation95_spill] sm:$0xff] }
  0xed   : >> { %17676 = vst [vmem:[#allocation141_spill] sm:$0xff] %v9816_v57  ;;  %17678 = vst [vmem:[#allocation142_spill] sm:$0xff] %v9822_v27  ;;  %v4887_v60 = vmul.f32 %v9363_v8, %v17681_v35  ;;  %v9834_v37 = vmul.f32 %v9366_v11, %v17681_v35  ;;  %v4565_v42 = vrot.slane %v4515_v58, 1  ;;  %v5135_v10 = vmul.f32 %v9363_v8, %v17686_v32 }
  0xee   : >> { %17680 = vst [vmem:[#allocation143_spill] sm:$0xff] %v9828_v41  ;;  %v3500_v39 = vadd.f32 %v3449_v34, %v3376_v61  ;;  %v9850_v34 = vmul.f32 %v9366_v11, %v17686_v32  ;;  %v9853_v61 = vld [vmem:[%s8792_s26 + $0xa8] sm:$0xff]  ;;  %v16788_v35 = vrot.slane %v9816_v57, 1  ;;  %v4689_v31 = vrot.slane %v4639_v46, 2 }
  0xef   : >> { %17682 = vst [vmem:[#allocation144_spill] sm:$0xff] %v9834_v37  ;;  %v4813_v16 = vrot.slane %v4763_v0, 3  ;;  %v4937_v15 = vrot.slane %v4887_v60, 4  ;;  %v16787_v8 = vrot.slane %v9834_v37, 4  ;;  %v5061_v11 = vrot.slane %v5011_v26, 5  ;;  %v17691_v0 = vld [vmem:[#allocation101_spill] sm:$0xff] }
  0xf0   : >> { %17687 = vst [vmem:[#allocation146_spill] sm:$0xff] %v9850_v34  ;;  %v3624_v38 = vadd.f32 %v3573_v59, %v3500_v39  ;;  %v5322_v39 = vmul.f32 %v9853_v61, %v17689_v43  ;;  %v5185_v59 = vrot.slane %v5135_v10, 6  ;;  %v5446_v60 = vmul.f32 %v9853_v61, %v17691_v0 }
  0xf1   : >> { %v9881_v10 = vmul.f32 %v9853_v61, %v9388_v44  ;;  %v4567_v46 = vsel %vm519_vm2, %v4565_v42, %v16788_v35  ;;  %v17694_v32 = vrot.slane %v9822_v27, 2  ;;  %v17696_v57 = vrot.slane %v9841_v33, 5 }
  0xf2   : >> { %v3687_v58 = vadd.f32 %v3671_v9, %v3624_v38  ;;  %v17692_v38 = vrot.slane %v9800_v28, 6  ;;  %v9877_v9 = vmul.f32 %v9858_v19, %v17691_v0  ;;  %v409_v28 = vld [vmem:[%s8792_s26 + $0x10] sm:$0xff] }
  0xf3   : >> { %v9903_v42 = vsel %vm1019_vm6, %v5061_v11, %v17696_v57  ;;  %v5620_v57 = vrot.slane %v9881_v10, 3  ;;  %v473_v35 = vmul.f32 %v8806_v48, %v409_v28  ;;  %v973_v10 = vmul.f32 %v8818_v52, %v409_v28 }
  0xf4   : >> { %v3811_v62 = vadd.f32 %v3760_v36, %v3687_v58  ;;  %v4380_v26 = vsel %vm1144_vm7, %v4378_v5, %v17692_v38  ;;  %17693 = vst [vmem:[#allocation149_spill] sm:$0xff] %v9877_v9  ;;  %v4691_v36 = vsel %vm644_vm3, %v4689_v31, %v17694_v32  ;;  %v17695_v58 = vrot.slane %v9828_v41, 3 }
  0xf5   : >> { %v9897_v38 = vsel %vm894_vm5, %v4937_v15, %v16787_v8  ;;  %v9907_v31 = vmul.f32 %v9853_v61, %v9369_v6  ;;  %v5372_v32 = vrot.slane %v5322_v39, 1  ;;  %v5496_v8 = vrot.slane %v5446_v60, 2  ;;  %v17699_v39 = vld [vmem:[#allocation105_spill] sm:$0xff] }
  0xf6   : >> { %v9892_v5 = vsel %vm769_vm4, %v4813_v16, %v17695_v58  ;;  %v3935_v0 = vadd.f32 %v3884_v54, %v3811_v62  ;;  %v17697_v16 = vrot.slane %v9850_v34, 6  ;;  %v9917_v54 = vmul.f32 %v9858_v19, %v9388_v44 }
  0xf7   : >> { %v9924_v34 = vmul.f32 %v9853_v61, %v17699_v39  ;;  %v598_v60 = vmul.f32 %v8809_v49, %v409_v28  ;;  %v723_v15 = vmul.f32 %v8812_v50, %v409_v28  ;;  %v17700_v11 = vrot.slane %v9868_v18, 1  ;;  %v17702_v50 = vld [vmem:[#allocation23_spill] sm:$0xff] }
  0xf8   : >> { %v9912_v58 = vsel %vm1144_vm7, %v5185_v59, %v17697_v16  ;;  %17698 = vst [vmem:[#allocation150_spill] sm:$0xff] %v9917_v54  ;;  %v4059_v62 = vadd.f32 %v4008_v40, %v3935_v0  ;;  %v8352_v59 = vld [vmem:[%s8792_s26 + $0x8] sm:$0xff]  ;;  %v523_v40 = vrot.slane %v473_v35, 1  ;;  %v848_v0 = vmul.f32 %v8815_v51, %v409_v28 }
  0xf9   : >> { %v436_v16 = vmul.f32 %v8352_v59, %v8803_v47  ;;  %v9936_v37 = vsel %vm519_vm2, %v5372_v32, %v17700_v11  ;;  %v9940_v41 = vmul.f32 %v9858_v19, %v17699_v39  ;;  %v648_v59 = vrot.slane %v598_v60, 2  ;;  %v17704_v32 = vld [vmem:[#allocation24_spill] sm:$0xff] }
  0xfa   : >> { %v4183_v33 = vadd.f32 %v9809_v7, %v4059_v62  ;;  %v773_v27 = vrot.slane %v723_v15, 3  ;;  %v17703_v49 = vrot.slane %v17702_v50, 1  ;;  %v898_v35 = vrot.slane %v848_v0, 4  ;;  %v17710_v0 = vld [vmem:[#allocation26_spill] sm:$0xff] }
  0xfb   : >> { %17701 = vst [vmem:[#allocation151_spill] sm:$0xff] %v9940_v41  ;;  %v1098_v62 = vmul.f32 %v8821_v53, %v409_v28  ;;  %v17705_v11 = vrot.slane %v17704_v32, 2  ;;  %v1023_v39 = vrot.slane %v973_v10, 5  ;;  %v17706_v15 = vrot.slane %v9877_v9, 2 }
  0xfc   : >> { %v4307_v44 = vadd.f32 %v4256_v1, %v4183_v33  ;;  %v524_v7 = vsel %vm519_vm2, %v17703_v49, %v523_v40  ;;  %v5744_v50 = vrot.slane %v9924_v34, 4  ;;  %v17707_v49 = vld [vmem:[#allocation25_spill] sm:$0xff]  ;;  %v9964_v40 = vmul.f32 %v9858_v19, %v9415_v22 }
  0xfd   : >> { %v577_v52 = vadd.f32 %v524_v7, %v436_v16  ;;  %v649_v51 = vsel %vm644_vm3, %v17705_v11, %v648_v59  ;;  %v9953_v1 = vsel %vm644_vm3, %v5496_v8, %v17706_v15  ;;  %v17708_v33 = vrot.slane %v17707_v49, 3  ;;  %v17712_v7 = vld [vmem:[#allocation109_spill] sm:$0xff] }
  0xfe   : >> { %v4431_v43 = vadd.f32 %v4380_v26, %v4307_v44  ;;  %v5818_v16 = vmul.f32 %v9853_v61, %v9415_v22  ;;  %17709 = vst [vmem:[#allocation23_spill] sm:$0xff] %v9964_v40  ;;  %v9967_v26 = vld [vmem:[%s8792_s26 + $0x28] sm:$0xff]  ;;  %v17711_v34 = vrot.slane %v17710_v0, 4  ;;  %v1148_v59 = vrot.slane %v1098_v62, 6 }
  0xff   : >> { %v774_v28 = vsel %vm769_vm4, %v17708_v33, %v773_v27  ;;  %v702_v44 = vadd.f32 %v649_v51, %v577_v52  ;;  %v1286_v27 = vmul.f32 %v9967_v26, %v8877_v25  ;;  %v5942_v32 = vmul.f32 %v17712_v7, %v9853_v61  ;;  %v17714_v52 = vld [vmem:[#allocation27_spill] sm:$0xff] }
 0x100   : >> { %v4494_v8 = vadd.f32 %v9804_v20, %v4431_v43  ;;  %v899_v10 = vsel %vm894_vm5, %v17711_v34, %v898_v35  ;;  %v9979_v11 = vmul.f32 %v17712_v7, %v9858_v19  ;;  %v17715_v15 = vrot.slane %v17714_v52, 5 }
 0x101   : >> { %v827_v51 = vadd.f32 %v774_v28, %v702_v44  ;;  %v1410_v35 = vmul.f32 %v9967_v26, %v8888_v29  ;;  %v1534_v62 = vmul.f32 %v9967_v26, %v8892_v30  ;;  %v1658_v61 = vmul.f32 %v9967_v26, %v8924_v3 }
 0x102   : >> { %17713 = vst [vmem:[#allocation24_spill] sm:$0xff] %v9979_v11  ;;  %v1024_v43 = vsel %vm1019_vm6, %v17715_v15, %v1023_v39  ;;  %v4618_v20 = vadd.f32 %v4567_v46, %v4494_v8  ;;  %v5868_v49 = vrot.slane %v5818_v16, 5  ;;  %v1782_v28 = vmul.f32 %v9967_v26, %v8929_v12  ;;  %v17716_v8 = vld [vmem:[#allocation28_spill] sm:$0xff] }
 0x103   : >> { %v952_v33 = vadd.f32 %v899_v10, %v827_v51  ;;  %v1906_v44 = vmul.f32 %v9967_v26, %v8944_v17  ;;  %v17717_v0 = vrot.slane %v17716_v8, 6  ;;  %v1335_v52 = vrot.slane %v1286_v27, 1  ;;  %v10000_v10 = vld [vmem:[%s8792_s26 + $0x20] sm:$0xff] }
 0x104   : >> { %v4742_v39 = vadd.f32 %v4691_v36, %v4618_v20  ;;  %v5992_v15 = vrot.slane %v5942_v32, 6  ;;  %v1249_v51 = vmul.f32 %v10000_v10, %v8873_v24  ;;  %v1459_v36 = vrot.slane %v1410_v35, 2  ;;  %v17721_v35 = vld [vmem:[#allocation33_spill] sm:$0xff] }
 0x105   : >> { %v1149_v34 = vsel %vm1144_vm7, %v17717_v0, %v1148_v59  ;;  %v1077_v16 = vadd.f32 %v1024_v43, %v952_v33  ;;  %v1583_v20 = vrot.slane %v1534_v62, 3  ;;  %v1707_v46 = vrot.slane %v1658_v61, 4 }
 0x106   : >> { %v4866_v18 = vadd.f32 %v9892_v5, %v4742_v39  ;;  %v17718_v8 = vrot.slane %v9917_v54, 3  ;;  %v1831_v32 = vrot.slane %v1782_v28, 5  ;;  %v1955_v0 = vrot.slane %v1906_v44, 6  ;;  %v17724_v44 = vld [vmem:[#allocation34_spill] sm:$0xff]  ;;  %v17737_v54 = vld [vmem:[#allocation45_spill] sm:$0xff] }
 0x107   : >> { %v1202_v27 = vadd.f32 %v1149_v34, %v1077_v16  ;;  %v17719_v43 = vrot.slane %v9940_v41, 4  ;;  %v17720_v9 = vrot.slane %v9964_v40, 5  ;;  %v17722_v62 = vrot.slane %v17721_v35, 1  ;;  %v17730_v35 = vld [vmem:[#allocation40_spill] sm:$0xff] }
 0x108   : >> { %v5622_v59 = vsel %vm769_vm4, %v5620_v57, %v17718_v8  ;;  %v4990_v60 = vadd.f32 %v9897_v38, %v4866_v18  ;;  %v10021_v57 = vld [vmem:[%s8792_s26 + $0x40] sm:$0xff]  ;;  %v17723_v28 = vrot.slane %v9979_v11, 6  ;;  %v17725_v39 = vrot.slane %v17724_v44, 2  ;;  %v17732_v11 = vld [vmem:[#allocation41_spill] sm:$0xff] }
 0x109   : >> { %v5746_v33 = vsel %vm894_vm5, %v5744_v50, %v17719_v43  ;;  %v10015_v5 = vsel %vm1019_vm6, %v5868_v49, %v17720_v9  ;;  %v1336_v61 = vsel %vm519_vm2, %v17722_v62, %v1335_v52  ;;  %v1265_v38 = vadd.f32 %v1249_v51, %v1202_v27  ;;  %v17726_v52 = vld [vmem:[#allocation35_spill] sm:$0xff] }
 0x10a   : >> { %v10026_v18 = vsel %vm1144_vm7, %v5992_v15, %v17723_v28  ;;  %v2093_v50 = vmul.f32 %v10021_v57, %v8970_v56  ;;  %v2217_v9 = vmul.f32 %v10021_v57, %v8985_v21  ;;  %v5114_v49 = vadd.f32 %v9903_v42, %v4990_v60  ;;  %v17728_v15 = vld [vmem:[#allocation38_spill] sm:$0xff] }
 0x10b   : >> { %v1460_v34 = vsel %vm644_vm3, %v17725_v39, %v1459_v36  ;;  %v17727_v16 = vrot.slane %v17726_v52, 3  ;;  %v17729_v43 = vrot.slane %v17728_v15, 4  ;;  %v1389_v27 = vadd.f32 %v1336_v61, %v1265_v38  ;;  %v10052_v39 = vld [vmem:[%s8792_s26 + $0x38] sm:$0xff] }
 0x10c   : >> { %v17731_v62 = vrot.slane %v17730_v35, 5  ;;  %v17733_v42 = vrot.slane %v17732_v11, 6  ;;  %v2341_v36 = vmul.f32 %v10021_v57, %v8998_v63  ;;  %v5238_v44 = vadd.f32 %v9912_v58, %v5114_v49  ;;  %v10063_v52 = vld [vmem:[%s8792_s26 + $0x58] sm:$0xff] }
 0x10d   : >> { %v1584_v8 = vsel %vm769_vm4, %v17727_v16, %v1583_v20  ;;  %v1708_v51 = vsel %vm894_vm5, %v17729_v43, %v1707_v46  ;;  %v2056_v20 = vmul.f32 %v10052_v39, %v17624_v45  ;;  %v2465_v46 = vmul.f32 %v10021_v57, %v17626_v2 }
 0x10e   : >> { %v1832_v28 = vsel %vm1019_vm6, %v17731_v62, %v1831_v32  ;;  %v1956_v60 = vsel %vm1144_vm7, %v17733_v42, %v1955_v0  ;;  %v2589_v32 = vmul.f32 %v10021_v57, %v17629_v4  ;;  %v1513_v61 = vadd.f32 %v1460_v34, %v1389_v27  ;;  %v17735_v27 = vld [vmem:[#allocation63_spill] sm:$0xff] }
 0x10f   : >> { %v2142_v11 = vrot.slane %v2093_v50, 1  ;;  %v2266_v38 = vrot.slane %v2217_v9, 2  ;;  %v2713_v0 = vmul.f32 %v10021_v57, %v17631_v14  ;;  %v5301_v58 = vadd.f32 %v9907_v31, %v5238_v44  ;;  %v17734_v50 = vld [vmem:[#allocation61_spill] sm:$0xff]  ;;  %v17736_v44 = vld [vmem:[#allocation66_spill] sm:$0xff]  ;;  %v10171_v14 = vld [vmem:[%s8792_s26 + $0x68] sm:$0xff] }
 0x110   : >> { %v2900_v49 = vmul.f32 %v10063_v52, %v17633_v55  ;;  %v3024_v16 = vmul.f32 %v10063_v52, %v17637_v13  ;;  %v3148_v15 = vmul.f32 %v10063_v52, %v17640_v23  ;;  %v1637_v43 = vadd.f32 %v1584_v8, %v1513_v61  ;;  %v17741_v13 = vld [vmem:[#allocation49_spill] sm:$0xff] }
 0x111   : >> { %v2390_v34 = vrot.slane %v2341_v36, 3  ;;  %v3272_v9 = vmul.f32 %v10063_v52, %v17734_v50  ;;  %v3396_v35 = vmul.f32 %v10063_v52, %v17735_v27  ;;  %v5425_v62 = vadd.f32 %v9936_v37, %v5301_v58  ;;  %v17739_v36 = vld [vmem:[#allocation47_spill] sm:$0xff] }
 0x112   : >> { %v2514_v31 = vrot.slane %v2465_v46, 4  ;;  %v2638_v42 = vrot.slane %v2589_v32, 5  ;;  %v3520_v40 = vmul.f32 %v10063_v52, %v17736_v44  ;;  %v1761_v41 = vadd.f32 %v1708_v51, %v1637_v43 }
 0x113   : >> { %v17738_v19 = vrot.slane %v17737_v54, 1  ;;  %v17740_v61 = vrot.slane %v17739_v36, 2  ;;  %v2762_v23 = vrot.slane %v2713_v0, 6  ;;  %v5549_v27 = vadd.f32 %v9953_v1, %v5425_v62  ;;  %v17752_v62 = vld [vmem:[#allocation59_spill] sm:$0xff] }
 0x114   : >> { %v2949_v37 = vrot.slane %v2900_v49, 1  ;;  %v3073_v46 = vrot.slane %v3024_v16, 2  ;;  %v3197_v32 = vrot.slane %v3148_v15, 3  ;;  %v1885_v58 = vadd.f32 %v1832_v28, %v1761_v41  ;;  %v10096_v49 = vld [vmem:[%s8792_s26 + $0x70] sm:$0xff]  ;;  %v17748_v41 = vld [vmem:[#allocation55_spill] sm:$0xff] }
 0x115   : >> { %v2143_v8 = vsel %vm519_vm2, %v17738_v19, %v2142_v11  ;;  %v2267_v50 = vsel %vm644_vm3, %v17740_v61, %v2266_v38  ;;  %v17742_v44 = vrot.slane %v17741_v13, 3  ;;  %v3321_v54 = vrot.slane %v3272_v9, 4  ;;  %v17743_v19 = vld [vmem:[#allocation50_spill] sm:$0xff]  ;;  %17747 = vst [vmem:[#allocation25_spill] sm:$0xff] %v10096_v49  ;;  %v10102_v15 = vld [vmem:[%s8792_s26 + $0x50] sm:$0xff]  ;;  %v17751_v9 = vld [vmem:[#allocation67_spill] sm:$0xff] }
 0x116   : >> { %v3445_v43 = vrot.slane %v3396_v35, 5  ;;  %v5673_v55 = vadd.f32 %v5622_v59, %v5549_v27  ;;  %v17744_v11 = vrot.slane %v17743_v19, 4  ;;  %v17745_v38 = vld [vmem:[#allocation54_spill] sm:$0xff]  ;;  %v3569_v1 = vrot.slane %v3520_v40, 6 }
 0x117   : >> { %v2391_v51 = vsel %vm769_vm4, %v17742_v44, %v2390_v34  ;;  %v17746_v0 = vrot.slane %v17745_v38, 5  ;;  %v2009_v16 = vadd.f32 %v1956_v60, %v1885_v58  ;;  %v17749_v28 = vrot.slane %v17748_v41, 6  ;;  %v17750_v34 = vld [vmem:[#allocation56_spill] sm:$0xff]  ;;  %v17756_v44 = vld [vmem:[#allocation62_spill] sm:$0xff] }
 0x118   : >> { %v2515_v36 = vsel %vm894_vm5, %v17744_v11, %v2514_v31  ;;  %v10106_v59 = vmul.f32 %v10102_v15, %v17750_v34  ;;  %v3707_v27 = vmul.f32 %v10096_v49, %v17751_v9  ;;  %v5797_v35 = vadd.f32 %v5746_v33, %v5673_v55  ;;  %v17754_v60 = vld [vmem:[#allocation60_spill] sm:$0xff]  ;;  %v17760_v33 = vld [vmem:[#allocation65_spill] sm:$0xff]  ;;  %v17775_v9 = vld [vmem:[#allocation126_spill] sm:$0xff] }
 0x119   : >> { %v2639_v61 = vsel %vm1019_vm6, %v17746_v0, %v2638_v42  ;;  %v2763_v13 = vsel %vm1144_vm7, %v17749_v28, %v2762_v23  ;;  %v17753_v31 = vrot.slane %v17752_v62, 1  ;;  %v17755_v42 = vrot.slane %v17754_v60, 2  ;;  %v17758_v38 = vld [vmem:[#allocation64_spill] sm:$0xff]  ;;  %v17762_v28 = vld [vmem:[#allocation69_spill] sm:$0xff] }
 0x11a   : >> { %v17757_v58 = vrot.slane %v17756_v44, 3  ;;  %v2072_v11 = vadd.f32 %v2056_v20, %v2009_v16  ;;  %v17759_v0 = vrot.slane %v17758_v38, 4  ;;  %v17761_v41 = vrot.slane %v17760_v33, 5  ;;  %v17765_v20 = vld [vmem:[#allocation74_spill] sm:$0xff] }
 0x11b   : >> { %v10113_v40 = vsel %vm519_vm2, %v17753_v31, %v2949_v37  ;;  %v10118_v23 = vsel %vm644_vm3, %v17755_v42, %v3073_v46  ;;  %v3831_v46 = vmul.f32 %v10096_v49, %v17762_v28  ;;  %v5921_v62 = vadd.f32 %v10015_v5, %v5797_v35  ;;  %v17763_v31 = vld [vmem:[#allocation72_spill] sm:$0xff]  ;;  %v17770_v33 = vld [vmem:[#allocation82_spill] sm:$0xff]  ;;  %v17774_v28 = vld [vmem:[#allocation93_spill] sm:$0xff] }
 0x11c   : >> { %v10123_v19 = vsel %vm769_vm4, %v17757_v58, %v3197_v32  ;;  %v10128_v55 = vsel %vm894_vm5, %v17759_v0, %v3321_v54  ;;  %v10133_v37 = vsel %vm1019_vm6, %v17761_v41, %v3445_v43  ;;  %v17764_v60 = vrot.slane %v17763_v31, 6  ;;  %v17766_v54 = vld [vmem:[#allocation75_spill] sm:$0xff]  ;;  %v17767_v43 = vld [vmem:[#allocation78_spill] sm:$0xff]  ;;  %v17768_v0 = vld [vmem:[#allocation81_spill] sm:$0xff] }
 0x11d   : >> { %v3955_v16 = vmul.f32 %v10096_v49, %v17765_v20  ;;  %v4079_v42 = vmul.f32 %v10096_v49, %v17766_v54  ;;  %v2196_v44 = vadd.f32 %v2143_v8, %v2072_v11  ;;  %v3756_v58 = vrot.slane %v3707_v27, 1  ;;  %v10152_v35 = vld [vmem:[%s8792_s26 + $0x88] sm:$0xff]  ;;  %v17771_v31 = vld [vmem:[#allocation86_spill] sm:$0xff] }
 0x11e   : >> { %v10141_v32 = vsel %vm1144_vm7, %v17764_v60, %v3569_v1  ;;  %v4203_v38 = vmul.f32 %v10096_v49, %v17767_v43  ;;  %v4327_v5 = vmul.f32 %v10096_v49, %v17768_v0  ;;  %17769 = vst [vmem:[#allocation26_spill] sm:$0xff] %v10152_v35  ;;  %v6045_v1 = vadd.f32 %v10026_v18, %v5921_v62  ;;  %v17772_v54 = vld [vmem:[#allocation88_spill] sm:$0xff]  ;;  %v17773_v43 = vld [vmem:[#allocation90_spill] sm:$0xff] }
 0x11f   : >> { %v4514_v41 = vmul.f32 %v10152_v35, %v17770_v33  ;;  %v4638_v60 = vmul.f32 %v10152_v35, %v17771_v31  ;;  %v4762_v8 = vmul.f32 %v10152_v35, %v17772_v54  ;;  %v2320_v27 = vadd.f32 %v2267_v50, %v2196_v44  ;;  %v17777_v33 = vld [vmem:[#allocation95_spill] sm:$0xff]  ;;  %v17778_v54 = vld [vmem:[#allocation68_spill] sm:$0xff] }
 0x120   : >> { %v3880_v11 = vrot.slane %v3831_v46, 2  ;;  %v4886_v20 = vmul.f32 %v10152_v35, %v17773_v43  ;;  %v5010_v0 = vmul.f32 %v10152_v35, %v17774_v28  ;;  %v10166_v34 = vadd.f32 %v17775_v9, %v6045_v1 }
 0x121   : >> { %v4004_v18 = vrot.slane %v3955_v16, 3  ;;  %v4128_v62 = vrot.slane %v4079_v42, 4  ;;  %v5134_v49 = vmul.f32 %v10152_v35, %v17777_v33  ;;  %v2444_v31 = vadd.f32 %v2391_v51, %v2320_v27  ;;  %v17779_v42 = vld [vmem:[#allocation73_spill] sm:$0xff]  ;;  %v17781_v35 = vld [vmem:[#allocation76_spill] sm:$0xff] }
 0x122   : >> { %17776 = vst [vmem:[#allocation109_spill] sm:$0xff] %v10166_v34  ;;  %v10175_v50 = vmul.f32 %v10171_v14, %v17778_v54  ;;  %v4252_v46 = vrot.slane %v4203_v38, 5  ;;  %v4376_v44 = vrot.slane %v4327_v5, 6  ;;  %v6085_v28 = vsel %vm273_vm0, %v10166_v34, 0.0  ;;  %v17783_v5 = vld [vmem:[#allocation77_spill] sm:$0xff] }
 0x123   : >> { %v4563_v43 = vrot.slane %v4514_v41, 1  ;;  %v4687_v1 = vrot.slane %v4638_v60, 2  ;;  %v4811_v9 = vrot.slane %v4762_v8, 3  ;;  %6086 = vadd.xlane.f32.xlu1 %v6085_v28  ;;  %v2568_v16 = vadd.f32 %v2515_v36, %v2444_v31  ;;  %v17785_v28 = vld [vmem:[#allocation79_spill] sm:$0xff] }
 0x124   : >> { %v17780_v4 = vrot.slane %v17779_v42, 1  ;;  %v4935_v27 = vrot.slane %v4886_v20, 4  ;;  %v5059_v33 = vrot.slane %v5010_v0, 5  ;;  %v17782_v54 = vrot.slane %v17781_v35, 2  ;;  %v17787_v20 = vld [vmem:[#allocation80_spill] sm:$0xff]  ;;  %v17789_v60 = vld [vmem:[#allocation83_spill] sm:$0xff] }
 0x125   : >> { %v17784_v34 = vrot.slane %v17783_v5, 3  ;;  %v17786_v36 = vrot.slane %v17785_v28, 4  ;;  %v17788_v0 = vrot.slane %v17787_v20, 5  ;;  %v17793_v42 = vld [vmem:[#allocation89_spill] sm:$0xff] }
 0x126   : >> { %v10182_v51 = vsel %vm519_vm2, %v17780_v4, %v3756_v58  ;;  %v10187_v38 = vsel %vm644_vm3, %v17782_v54, %v3880_v11  ;;  %v5183_v4 = vrot.slane %v5134_v49, 6  ;;  %v2692_v58 = vadd.f32 %v2639_v61, %v2568_v16  ;;  %v17791_v11 = vld [vmem:[#allocation84_spill] sm:$0xff]  ;;  %v17795_v61 = vld [vmem:[#allocation91_spill] sm:$0xff] }
 0x127   : >> { %v10192_v41 = vsel %vm769_vm4, %v17784_v34, %v4004_v18  ;;  %v10197_v31 = vsel %vm894_vm5, %v17786_v36, %v4128_v62  ;;  %v10202_v35 = vsel %vm1019_vm6, %v17788_v0, %v4252_v46  ;;  %v17790_v54 = vrot.slane %v17789_v60, 6  ;;  %v17792_v34 = vld [vmem:[#allocation87_spill] sm:$0xff]  ;;  %v17797_v46 = vld [vmem:[#allocation92_spill] sm:$0xff]  ;;  %v17799_v0 = vld [vmem:[#allocation94_spill] sm:$0xff] }
 0x128   : >> { %v10211_v18 = vmul.f32 %v17792_v34, %v17791_v11  ;;  %v17794_v5 = vrot.slane %v17793_v42, 1  ;;  %v17796_v49 = vrot.slane %v17795_v61, 2  ;;  %v17798_v28 = vrot.slane %v17797_v46, 3  ;;  %v17817_v11 = vld [vmem:[#allocation105_spill] sm:$0xff] }
 0x129   : >> { %v10207_v8 = vsel %vm1144_vm7, %v17790_v54, %v4376_v44  ;;  %v476_v44 = vmul.f32 %v9967_v26, %v8806_v48  ;;  %v2816_v20 = vadd.f32 %v2763_v13, %v2692_v58  ;;  %v17800_v60 = vrot.slane %v17799_v0, 4  ;;  %v17806_v13 = vld [vmem:[#allocation99_spill] sm:$0xff]  ;;  %v17809_v0 = vld [vmem:[#allocation18_spill] sm:$0xff] }
 0x12a   : >> { %v10216_v62 = vsel %vm519_vm2, %v17794_v5, %v4563_v43  ;;  %v10221_v16 = vsel %vm644_vm3, %v17796_v49, %v4687_v1  ;;  %v10226_v36 = vsel %vm769_vm4, %v17798_v28, %v4811_v9  ;;  %v17801_v43 = vld [vmem:[#allocation96_spill] sm:$0xff]  ;;  %v10241_v1 = vld [vmem:[%s8792_s26 + $0xa0] sm:$0xff]  ;;  %v438_v9 = vmul.f32 %v10000_v10, %v8803_v47  ;;  %v17803_v5 = vld [vmem:[#allocation97_spill] sm:$0xff] }
 0x12b   : >> { %v10233_v54 = vsel %vm894_vm5, %v17800_v60, %v4935_v27  ;;  %v17802_v34 = vrot.slane %v17801_v43, 5  ;;  %v17804_v61 = vrot.slane %v17803_v5, 6  ;;  %v10252_v58 = vmul.f32 %v17806_v13, %v9369_v6  ;;  %v17808_v27 = vld [vmem:[#allocation98_spill] sm:$0xff]  ;;  %v17810_v43 = vld [vmem:[#allocation19_spill] sm:$0xff]  ;;  %v17812_v5 = vld [vmem:[#allocation101_spill] sm:$0xff] }
 0x12c   : >> { %v5321_v46 = vmul.f32 %v10241_v1, %v17808_v27  ;;  %v528_v28 = vrot.slane %v476_v44, 1  ;;  %v601_v60 = vmul.f32 %v9967_v26, %v17809_v0  ;;  %v726_v10 = vmul.f32 %v9967_v26, %v17810_v43  ;;  %v17813_v13 = vld [vmem:[#allocation111_spill] sm:$0xff]  ;;  %v17815_v27 = vld [vmem:[#allocation21_spill] sm:$0xff] }
 0x12d   : >> { %v10238_v42 = vsel %vm1019_vm6, %v17802_v34, %v5059_v33  ;;  %v10248_v49 = vsel %vm1144_vm7, %v17804_v61, %v5183_v4  ;;  %17807 = vst [vmem:[#allocation28_spill] sm:$0xff] %v10252_v58  ;;  %v2879_v33 = vadd.f32 %v10106_v59, %v2816_v20  ;;  %v17811_v34 = vld [vmem:[#allocation20_spill] sm:$0xff]  ;;  %v5445_v61 = vmul.f32 %v10241_v1, %v17812_v5 }
 0x12e   : >> { %17805 = vst [vmem:[#allocation27_spill] sm:$0xff] %v10248_v49  ;;  %v851_v4 = vmul.f32 %v9967_v26, %v17811_v34  ;;  %v17814_v48 = vrot.slane %v17813_v13, 1  ;;  %v976_v44 = vmul.f32 %v9967_v26, %v17815_v27  ;;  %v1101_v59 = vmul.f32 %v9967_v26, %v8821_v53  ;;  %v17816_v58 = vld [vmem:[#allocation104_spill] sm:$0xff]  ;;  %v17818_v27 = vld [vmem:[#allocation113_spill] sm:$0xff] }
 0x12f   : >> { %v3003_v20 = vadd.f32 %v10113_v40, %v2879_v33  ;;  %v653_v43 = vrot.slane %v601_v60, 2  ;;  %v778_v6 = vrot.slane %v726_v10, 3  ;;  %v5569_v34 = vmul.f32 %v10241_v1, %v17816_v58  ;;  %v17820_v40 = vld [vmem:[#allocation114_spill] sm:$0xff] }
 0x130   : >> { %v529_v47 = vsel %vm519_vm2, %v17814_v48, %v528_v28  ;;  %v5693_v5 = vmul.f32 %v10241_v1, %v17817_v11  ;;  %v5817_v48 = vmul.f32 %v10241_v1, %v9415_v22  ;;  %v903_v28 = vrot.slane %v851_v4, 4  ;;  %v17822_v4 = vld [vmem:[#allocation115_spill] sm:$0xff] }
 0x131   : >> { %v579_v0 = vadd.f32 %v529_v47, %v438_v9  ;;  %v3127_v13 = vadd.f32 %v10118_v23, %v3003_v20  ;;  %v17819_v49 = vrot.slane %v17818_v27, 2  ;;  %v17821_v47 = vrot.slane %v17820_v40, 3  ;;  %v17828_v40 = vld [vmem:[#allocation102_spill] sm:$0xff] }
 0x132   : >> { %v1028_v33 = vrot.slane %v976_v44, 5  ;;  %v5370_v60 = vrot.slane %v5321_v46, 1  ;;  %v5494_v10 = vrot.slane %v5445_v61, 2  ;;  %v5941_v11 = vmul.f32 %v17712_v7, %v10241_v1 }
 0x133   : >> { %v654_v26 = vsel %vm644_vm3, %v17819_v49, %v653_v43  ;;  %v779_v9 = vsel %vm769_vm4, %v17821_v47, %v778_v6  ;;  %v3251_v22 = vadd.f32 %v10123_v19, %v3127_v13  ;;  %v17823_v53 = vrot.slane %v17822_v4, 4 }
 0x134   : >> { %v704_v58 = vadd.f32 %v654_v26, %v579_v0  ;;  %v1153_v27 = vrot.slane %v1101_v59, 6  ;;  %v1289_v49 = vmul.f32 %v10021_v57, %v8877_v25  ;;  %v5618_v43 = vrot.slane %v5569_v34, 3  ;;  %v17824_v0 = vld [vmem:[#allocation116_spill] sm:$0xff] }
 0x135   : >> { %v904_v23 = vsel %vm894_vm5, %v17823_v53, %v903_v28  ;;  %v5742_v20 = vrot.slane %v5693_v5, 4  ;;  %v1413_v46 = vmul.f32 %v10021_v57, %v8888_v29  ;;  %v3375_v61 = vadd.f32 %v10128_v55, %v3251_v22  ;;  %v17826_v5 = vld [vmem:[#allocation117_spill] sm:$0xff] }
 0x136   : >> { %v829_v6 = vadd.f32 %v779_v9, %v704_v58  ;;  %v5866_v7 = vrot.slane %v5817_v48, 5  ;;  %v17825_v44 = vrot.slane %v17824_v0, 5  ;;  %v1537_v53 = vmul.f32 %v10021_v57, %v8892_v30 }
 0x137   : >> { %v1661_v28 = vmul.f32 %v10021_v57, %v8924_v3  ;;  %v1785_v58 = vmul.f32 %v10021_v57, %v8929_v12  ;;  %v1909_v34 = vmul.f32 %v10021_v57, %v8944_v17  ;;  %v3499_v22 = vadd.f32 %v10133_v37, %v3375_v61  ;;  %v17832_v61 = vld [vmem:[#allocation106_spill] sm:$0xff] }
 0x138   : >> { %v1029_v19 = vsel %vm1019_vm6, %v17825_v44, %v1028_v33  ;;  %v954_v59 = vadd.f32 %v904_v23, %v829_v6  ;;  %v5990_v55 = vrot.slane %v5941_v11, 6  ;;  %v17827_v48 = vrot.slane %v17826_v5, 6  ;;  %v17830_v6 = vld [vmem:[#allocation103_spill] sm:$0xff] }
 0x139   : >> { %v1340_v26 = vrot.slane %v1289_v49, 1  ;;  %v17829_v47 = vrot.slane %v17828_v40, 1  ;;  %v1251_v4 = vmul.f32 %v10052_v39, %v8873_v24  ;;  %v1464_v23 = vrot.slane %v1413_v46, 2  ;;  %v17834_v46 = vld [vmem:[#allocation107_spill] sm:$0xff]  ;;  %v17838_v40 = vld [vmem:[#allocation110_spill] sm:$0xff] }
 0x13a   : >> { %v1154_v13 = vsel %vm1144_vm7, %v17827_v48, %v1153_v27  ;;  %v1079_v33 = vadd.f32 %v1029_v19, %v954_v59  ;;  %v3623_v57 = vadd.f32 %v10141_v32, %v3499_v22  ;;  %v17831_v37 = vrot.slane %v17830_v6, 2  ;;  %v17836_v22 = vld [vmem:[#allocation118_spill] sm:$0xff] }
 0x13b   : >> { %v10315_v9 = vsel %vm519_vm2, %v17829_v47, %v5370_v60  ;;  %v17833_v27 = vrot.slane %v17832_v61, 3  ;;  %v1588_v0 = vrot.slane %v1537_v53, 3  ;;  %v1712_v44 = vrot.slane %v1661_v28, 4 }
 0x13c   : >> { %v10323_v11 = vsel %vm644_vm3, %v17831_v37, %v5494_v10  ;;  %v1204_v60 = vadd.f32 %v1154_v13, %v1079_v33  ;;  %v1836_v19 = vrot.slane %v1785_v58, 5  ;;  %v1960_v59 = vrot.slane %v1909_v34, 6  ;;  %v17840_v58 = vld [vmem:[#allocation112_spill] sm:$0xff] }
 0x13d   : >> { %v10328_v49 = vsel %vm769_vm4, %v17833_v27, %v5618_v43  ;;  %v3686_v39 = vadd.f32 %v10175_v50, %v3623_v57  ;;  %v17835_v5 = vrot.slane %v17834_v46, 4  ;;  %v17837_v10 = vrot.slane %v17836_v22, 1  ;;  %v17844_v57 = vld [vmem:[#allocation120_spill] sm:$0xff] }
 0x13e   : >> { %v2096_v43 = vmul.f32 %v10063_v52, %v8970_v56  ;;  %v17839_v53 = vrot.slane %v17838_v40, 5  ;;  %v17841_v34 = vrot.slane %v17840_v58, 6  ;;  %v1267_v13 = vadd.f32 %v1251_v4, %v1204_v60  ;;  %v17848_v60 = vld [vmem:[#allocation122_spill] sm:$0xff]  ;;  %v17853_v58 = vld [vmem:[#allocation52_spill] sm:$0xff] }
 0x13f   : >> { %v10334_v32 = vsel %vm894_vm5, %v17835_v5, %v5742_v20  ;;  %v1341_v48 = vsel %vm519_vm2, %v17837_v10, %v1340_v26  ;;  %v17842_v20 = vld [vmem:[#allocation119_spill] sm:$0xff]  ;;  %v3810_v26 = vadd.f32 %v10182_v51, %v3686_v39  ;;  %v17845_v6 = vrot.slane %v17844_v57, 3 }
 0x140   : >> { %v10344_v28 = vsel %vm1019_vm6, %v17839_v53, %v5866_v7  ;;  %v10349_v50 = vsel %vm1144_vm7, %v17841_v34, %v5990_v55  ;;  %v17843_v47 = vrot.slane %v17842_v20, 2  ;;  %v2058_v7 = vmul.f32 %v10102_v15, %v17624_v45  ;;  %v17846_v55 = vld [vmem:[#allocation121_spill] sm:$0xff]  ;;  %v17850_v51 = vld [vmem:[#allocation123_spill] sm:$0xff] }
 0x141   : >> { %v1589_v37 = vsel %vm769_vm4, %v17845_v6, %v1588_v0  ;;  %v2220_v61 = vmul.f32 %v10063_v52, %v8985_v21  ;;  %v1391_v27 = vadd.f32 %v1341_v48, %v1267_v13  ;;  %v17847_v46 = vrot.slane %v17846_v55, 4  ;;  %v17852_v53 = vld [vmem:[#allocation51_spill] sm:$0xff]  ;;  %v17854_v34 = vld [vmem:[#allocation53_spill] sm:$0xff] }
 0x142   : >> { %v1465_v33 = vsel %vm644_vm3, %v17843_v47, %v1464_v23  ;;  %v17849_v5 = vrot.slane %v17848_v60, 5  ;;  %v17851_v39 = vrot.slane %v17850_v51, 6  ;;  %v3934_v0 = vadd.f32 %v10187_v38, %v3810_v26  ;;  %v17855_v13 = vld [vmem:[#allocation25_spill] sm:$0xff]  ;;  %v17857_v26 = vld [vmem:[#allocation58_spill] sm:$0xff]  ;;  %v17859_v55 = vld [vmem:[#allocation63_spill] sm:$0xff] }
 0x143   : >> { %v1713_v4 = vsel %vm894_vm5, %v17847_v46, %v1712_v44  ;;  %v2147_v10 = vrot.slane %v2096_v43, 1  ;;  %v2344_v15 = vmul.f32 %v10063_v52, %v8998_v63  ;;  %v2468_v48 = vmul.f32 %v10063_v52, %v17626_v2  ;;  %v17856_v43 = vld [vmem:[#allocation57_spill] sm:$0xff] }
 0x144   : >> { %v1837_v23 = vsel %vm1019_vm6, %v17849_v5, %v1836_v19  ;;  %v1961_v22 = vsel %vm1144_vm7, %v17851_v39, %v1960_v59  ;;  %v1515_v40 = vadd.f32 %v1465_v33, %v1391_v27  ;;  %v2592_v44 = vmul.f32 %v10063_v52, %v17852_v53  ;;  %v17858_v33 = vld [vmem:[#allocation61_spill] sm:$0xff] }
 0x145   : >> { %v2716_v19 = vmul.f32 %v10063_v52, %v17853_v58  ;;  %v2903_v20 = vmul.f32 %v17855_v13, %v17854_v34  ;;  %v4058_v59 = vadd.f32 %v10192_v41, %v3934_v0  ;;  %v2271_v38 = vrot.slane %v2220_v61, 2  ;;  %v17860_v52 = vld [vmem:[#allocation66_spill] sm:$0xff]  ;;  %v17861_v41 = vld [vmem:[#allocation124_spill] sm:$0xff]  ;;  %v17863_v34 = vld [vmem:[#allocation125_spill] sm:$0xff] }
 0x146   : >> { %v3027_v47 = vmul.f32 %v17855_v13, %v17856_v43  ;;  %v3151_v57 = vmul.f32 %v17855_v13, %v17857_v26  ;;  %v1639_v6 = vadd.f32 %v1589_v37, %v1515_v40  ;;  %v3275_v27 = vmul.f32 %v17855_v13, %v17858_v33 }
 0x147   : >> { %v3399_v46 = vmul.f32 %v17855_v13, %v17859_v55  ;;  %v3523_v60 = vmul.f32 %v17855_v13, %v17860_v52  ;;  %v4182_v5 = vadd.f32 %v10197_v31, %v4058_v59  ;;  %v17862_v61 = vrot.slane %v17861_v41, 1 }
 0x148   : >> { %v2395_v39 = vrot.slane %v2344_v15, 3  ;;  %v2519_v0 = vrot.slane %v2468_v48, 4  ;;  %v1763_v43 = vadd.f32 %v1713_v4, %v1639_v6  ;;  %v2643_v26 = vrot.slane %v2592_v44, 5  ;;  %v17865_v15 = vld [vmem:[#allocation127_spill] sm:$0xff]  ;;  %v17867_v44 = vld [vmem:[#allocation128_spill] sm:$0xff]  ;;  %v17874_v6 = vld [vmem:[#allocation70_spill] sm:$0xff] }
 0x149   : >> { %v2148_v51 = vsel %vm519_vm2, %v17862_v61, %v2147_v10  ;;  %v2767_v37 = vrot.slane %v2716_v19, 6  ;;  %v2954_v40 = vrot.slane %v2903_v20, 1  ;;  %v4306_v33 = vadd.f32 %v10202_v35, %v4182_v5  ;;  %v17880_v61 = vld [vmem:[#allocation67_spill] sm:$0xff] }
 0x14a   : >> { %v17864_v58 = vrot.slane %v17863_v34, 2  ;;  %v3078_v53 = vrot.slane %v3027_v47, 2  ;;  %v3202_v13 = vrot.slane %v3151_v57, 3  ;;  %v1887_v52 = vadd.f32 %v1837_v23, %v1763_v43  ;;  %v17869_v34 = vld [vmem:[#allocation56_spill] sm:$0xff]  ;;  %v17870_v23 = vld [vmem:[#allocation130_spill] sm:$0xff]  ;;  %v17872_v47 = vld [vmem:[#allocation131_spill] sm:$0xff] }
 0x14b   : >> { %v3326_v31 = vrot.slane %v3275_v27, 4  ;;  %v3450_v59 = vrot.slane %v3399_v46, 5  ;;  %v3574_v41 = vrot.slane %v3523_v60, 6  ;;  %v4430_v10 = vadd.f32 %v10207_v8, %v4306_v33  ;;  %v17876_v60 = vld [vmem:[#allocation71_spill] sm:$0xff] }
 0x14c   : >> { %v2272_v55 = vsel %vm644_vm3, %v17864_v58, %v2271_v38  ;;  %v17866_v48 = vrot.slane %v17865_v15, 3  ;;  %v17868_v19 = vrot.slane %v17867_v44, 4  ;;  %v10410_v58 = vmul.f32 %v10171_v14, %v17869_v34  ;;  %v17882_v15 = vld [vmem:[#allocation133_spill] sm:$0xff] }
 0x14d   : >> { %v2011_v20 = vadd.f32 %v1961_v22, %v1887_v52  ;;  %v17871_v38 = vrot.slane %v17870_v23, 5  ;;  %v17873_v8 = vrot.slane %v17872_v47, 6  ;;  %v17875_v33 = vrot.slane %v17874_v6, 1  ;;  %v17878_v22 = vld [vmem:[#allocation132_spill] sm:$0xff] }
 0x14e   : >> { %v2396_v4 = vsel %vm769_vm4, %v17866_v48, %v2395_v39  ;;  %v2520_v35 = vsel %vm894_vm5, %v17868_v19, %v2519_v0  ;;  %v4493_v46 = vadd.f32 %v10211_v18, %v4430_v10  ;;  %v17877_v5 = vrot.slane %v17876_v60, 2  ;;  %v17881_v39 = vld [vmem:[#allocation26_spill] sm:$0xff]  ;;  %v17888_v47 = vld [vmem:[#allocation68_spill] sm:$0xff] }
 0x14f   : >> { %v2644_v43 = vsel %vm1019_vm6, %v17871_v38, %v2643_v26  ;;  %v2768_v57 = vsel %vm1144_vm7, %v17873_v8, %v2767_v37  ;;  %v10421_v27 = vsel %vm519_vm2, %v17875_v33, %v2954_v40  ;;  %v17879_v52 = vrot.slane %v17878_v22, 3  ;;  %v17884_v18 = vld [vmem:[#allocation134_spill] sm:$0xff]  ;;  %v8357_v38 = vld [vmem:[%s8792_s26 + $0x80] sm:$0xff]  ;;  %v17893_v22 = vld [vmem:[#allocation81_spill] sm:$0xff] }
 0x150   : >> { %v10427_v14 = vsel %vm644_vm3, %v17877_v5, %v3078_v53  ;;  %v3710_v0 = vmul.f32 %v17881_v39, %v17880_v61  ;;  %v2074_v37 = vadd.f32 %v2058_v7, %v2011_v20  ;;  %v17883_v48 = vrot.slane %v17882_v15, 4  ;;  %v17886_v53 = vld [vmem:[#allocation135_spill] sm:$0xff]  ;;  %v17889_v20 = vld [vmem:[#allocation69_spill] sm:$0xff]  ;;  %v17890_v8 = vld [vmem:[#allocation74_spill] sm:$0xff] }
 0x151   : >> { %v10432_v26 = vsel %vm769_vm4, %v17879_v52, %v3202_v13  ;;  %v17885_v10 = vrot.slane %v17884_v18, 5  ;;  %v17887_v19 = vrot.slane %v17886_v53, 6  ;;  %v4617_v13 = vadd.f32 %v10216_v62, %v4493_v46  ;;  %v17892_v5 = vld [vmem:[#allocation78_spill] sm:$0xff] }
 0x152   : >> { %v10439_v40 = vsel %vm894_vm5, %v17883_v48, %v3326_v31  ;;  %v10454_v7 = vmul.f32 %v8357_v38, %v17888_v47  ;;  %v3834_v31 = vmul.f32 %v17881_v39, %v17889_v20  ;;  %v3958_v6 = vmul.f32 %v17881_v39, %v17890_v8  ;;  %v17894_v15 = vld [vmem:[#allocation82_spill] sm:$0xff]  ;;  %v17898_v47 = vld [vmem:[#allocation93_spill] sm:$0xff] }
 0x153   : >> { %v10444_v44 = vsel %vm1019_vm6, %v17885_v10, %v3450_v59  ;;  %v10449_v23 = vsel %vm1144_vm7, %v17887_v19, %v3574_v41  ;;  %v2198_v33 = vadd.f32 %v2148_v51, %v2074_v37  ;;  %v17891_v59 = vld [vmem:[#allocation75_spill] sm:$0xff]  ;;  %v4206_v41 = vmul.f32 %v17881_v39, %v17892_v5  ;;  %v17895_v18 = vld [vmem:[#allocation86_spill] sm:$0xff]  ;;  %v17896_v51 = vld [vmem:[#allocation88_spill] sm:$0xff] }
 0x154   : >> { %v4082_v60 = vmul.f32 %v17881_v39, %v17891_v59  ;;  %v4330_v62 = vmul.f32 %v17881_v39, %v17893_v22  ;;  %v4741_v46 = vadd.f32 %v10221_v16, %v4617_v13  ;;  %v3761_v52 = vrot.slane %v3710_v0, 1  ;;  %v17897_v19 = vld [vmem:[#allocation90_spill] sm:$0xff]  ;;  %v17899_v13 = vld [vmem:[#allocation95_spill] sm:$0xff] }
 0x155   : >> { %v4517_v48 = vmul.f32 %v10241_v1, %v17894_v15  ;;  %v4641_v10 = vmul.f32 %v10241_v1, %v17895_v18  ;;  %v2322_v53 = vadd.f32 %v2272_v55, %v2198_v33  ;;  %v4765_v37 = vmul.f32 %v10241_v1, %v17896_v51  ;;  %v17900_v51 = vld [vmem:[#allocation85_spill] sm:$0xff] }
 0x156   : >> { %v4889_v38 = vmul.f32 %v10241_v1, %v17897_v19  ;;  %v5013_v5 = vmul.f32 %v10241_v1, %v17898_v47  ;;  %v4865_v39 = vadd.f32 %v10226_v36, %v4741_v46  ;;  %v3885_v16 = vrot.slane %v3834_v31, 2 }
 0x157   : >> { %v4009_v0 = vrot.slane %v3958_v6, 3  ;;  %v5137_v15 = vmul.f32 %v10241_v1, %v17899_v13  ;;  %v2446_v22 = vadd.f32 %v2396_v4, %v2322_v53  ;;  %v4133_v59 = vrot.slane %v4082_v60, 4  ;;  %v17902_v60 = vld [vmem:[#allocation136_spill] sm:$0xff] }
 0x158   : >> { %v4257_v18 = vrot.slane %v4206_v41, 5  ;;  %v4381_v55 = vrot.slane %v4330_v62, 6  ;;  %v4989_v33 = vadd.f32 %v10233_v54, %v4865_v39  ;;  %v17901_v8 = vrot.slane %v17900_v51, 1  ;;  %v17904_v62 = vld [vmem:[#allocation137_spill] sm:$0xff]  ;;  %v17910_v51 = vld [vmem:[#allocation140_spill] sm:$0xff]  ;;  %v17912_v39 = vld [vmem:[#allocation27_spill] sm:$0xff] }
 0x159   : >> { %v4568_v47 = vrot.slane %v4517_v48, 1  ;;  %v4692_v20 = vrot.slane %v4641_v10, 2  ;;  %v2570_v36 = vadd.f32 %v2520_v35, %v2446_v22  ;;  %v4816_v31 = vrot.slane %v4765_v37, 3  ;;  %v17906_v22 = vld [vmem:[#allocation138_spill] sm:$0xff] }
 0x15a   : >> { %v10484_v19 = vsel %vm519_vm2, %v17901_v8, %v3761_v52  ;;  %v4940_v6 = vrot.slane %v4889_v38, 4  ;;  %v5064_v1 = vrot.slane %v5013_v5, 5  ;;  %v5113_v4 = vadd.f32 %v10238_v42, %v4989_v33  ;;  %v17908_v5 = vld [vmem:[#allocation139_spill] sm:$0xff]  ;;  %v17914_v33 = vld [vmem:[#allocation141_spill] sm:$0xff] }
 0x15b   : >> { %v17903_v41 = vrot.slane %v17902_v60, 2  ;;  %v17905_v46 = vrot.slane %v17904_v62, 3  ;;  %v5188_v52 = vrot.slane %v5137_v15, 6  ;;  %v2694_v35 = vadd.f32 %v2644_v43, %v2570_v36  ;;  %v8358_v15 = vld [vmem:[%s8792_s26 + $0x98] sm:$0xff]  ;;  %v413_v62 = vld [vmem:[%s8792_s26 + $0x30] sm:$0xff] }
 0x15c   : >> { %v17907_v48 = vrot.slane %v17906_v22, 4  ;;  %v17909_v42 = vrot.slane %v17908_v5, 5  ;;  %v17911_v37 = vrot.slane %v17910_v51, 6  ;;  %v17915_v36 = vrot.slane %v17914_v33, 1  ;;  %v17916_v60 = vld [vmem:[#allocation142_spill] sm:$0xff]  ;;  %v17918_v22 = vld [vmem:[#allocation143_spill] sm:$0xff] }
 0x15d   : >> { %v10490_v54 = vsel %vm644_vm3, %v17903_v41, %v3885_v16  ;;  %v10495_v8 = vsel %vm769_vm4, %v17905_v46, %v4009_v0  ;;  %v5237_v16 = vadd.f32 %v17912_v39, %v5113_v4  ;;  %v17913_v0 = vld [vmem:[#allocation84_spill] sm:$0xff]  ;;  %v17917_v41 = vrot.slane %v17916_v60, 2  ;;  %v10529_v46 = vld [vmem:[%s8792_s26 + $0x38] sm:$0xff]  ;;  %v17929_v60 = vld [vmem:[#allocation147_spill] sm:$0xff] }
 0x15e   : >> { %v10500_v10 = vsel %vm894_vm5, %v17907_v48, %v4133_v59  ;;  %v10505_v53 = vsel %vm1019_vm6, %v17909_v42, %v4257_v18  ;;  %v10510_v38 = vsel %vm1144_vm7, %v17911_v37, %v4381_v55  ;;  %v10515_v43 = vmul.f32 %v8358_v15, %v17913_v0  ;;  %v17920_v5 = vld [vmem:[#allocation144_spill] sm:$0xff] }
 0x15f   : >> { %v10520_v59 = vsel %vm519_vm2, %v17915_v36, %v4568_v47  ;;  %v10525_v18 = vsel %vm644_vm3, %v17917_v41, %v4692_v20  ;;  %v2818_v55 = vadd.f32 %v2768_v57, %v2694_v35  ;;  %v17919_v4 = vrot.slane %v17918_v22, 3  ;;  %v17922_v47 = vld [vmem:[#allocation145_spill] sm:$0xff]  ;;  %v10547_v20 = vld [vmem:[%s8792_s26 + $0xb8] sm:$0xff]  ;;  %v17925_v15 = vld [vmem:[#allocation28_spill] sm:$0xff] }
 0x160   : >> { %v17921_v42 = vrot.slane %v17920_v5, 4  ;;  %v17923_v37 = vrot.slane %v17922_v47, 5  ;;  %17924 = vst [vmem:[#allocation33_spill] sm:$0xff] %v10547_v20  ;;  %v5300_v33 = vadd.f32 %v17925_v15, %v5237_v16  ;;  %v17926_v57 = vld [vmem:[#allocation146_spill] sm:$0xff] }
 0x161   : >> { %v10534_v48 = vsel %vm769_vm4, %v17919_v4, %v4816_v31  ;;  %v17927_v35 = vrot.slane %v17926_v57, 6  ;;  %v17928_v31 = vld [vmem:[#allocation100_spill] sm:$0xff] }
 0x162   : >> { %v10539_v51 = vsel %vm894_vm5, %v17921_v42, %v4940_v6  ;;  %v10544_v39 = vsel %vm1019_vm6, %v17923_v37, %v5064_v1  ;;  %v10557_v41 = vmul.f32 %v17929_v60, %v17928_v31  ;;  %v17930_v6 = vld [vmem:[#allocation98_spill] sm:$0xff]  ;;  %v2881_v1 = vadd.f32 %v10410_v58, %v2818_v55  ;;  %v17931_v4 = vld [vmem:[#allocation16_spill] sm:$0xff]  ;;  %v17932_v42 = vld [vmem:[#allocation17_spill] sm:$0xff] }
 0x163   : >> { %v10553_v36 = vsel %vm1144_vm7, %v17927_v35, %v5188_v52  ;;  %v10561_v22 = vmul.f32 %v10547_v20, %v17930_v6  ;;  %v439_v5 = vmul.f32 %v17931_v4, %v413_v62  ;;  %v477_v47 = vmul.f32 %v17932_v42, %v413_v62  ;;  %v17933_v37 = vld [vmem:[#allocation18_spill] sm:$0xff]  ;;  %v17934_v35 = vld [vmem:[#allocation19_spill] sm:$0xff] }
 0x164   : >> { %v10568_v16 = vmul.f32 %v17932_v42, %v10529_v46  ;;  %v5424_v52 = vadd.f32 %v10315_v9, %v5300_v33  ;;  %v602_v15 = vmul.f32 %v17933_v37, %v413_v62  ;;  %v10574_v57 = vmul.f32 %v17933_v37, %v10529_v46 }
 0x165   : >> { %v727_v60 = vmul.f32 %v17934_v35, %v413_v62  ;;  %v3005_v58 = vadd.f32 %v10421_v27, %v2881_v1  ;;  %v530_v55 = vrot.slane %v477_v47, 1  ;;  %v10581_v31 = vmul.f32 %v17934_v35, %v10529_v46  ;;  %v17935_v1 = vld [vmem:[#allocation20_spill] sm:$0xff] }
 0x166   : >> { %v16843_v4 = vrot.slane %v10568_v16, 1  ;;  %v5548_v42 = vadd.f32 %v10323_v11, %v5424_v52  ;;  %v655_v9 = vrot.slane %v602_v15, 2  ;;  %v16836_v33 = vrot.slane %v10574_v57, 2 }
 0x167   : >> { %v780_v0 = vrot.slane %v727_v60, 3  ;;  %v3129_v37 = vadd.f32 %v10427_v14, %v3005_v58  ;;  %v16837_v27 = vrot.slane %v10581_v31, 3  ;;  %v852_v47 = vmul.f32 %v17935_v1, %v413_v62  ;;  %v17936_v58 = vld [vmem:[#allocation21_spill] sm:$0xff] }
 0x168   : >> { %v532_v6 = vsel %vm519_vm2, %v530_v55, %v16843_v4  ;;  %v5672_v13 = vadd.f32 %v10328_v49, %v5548_v42  ;;  %v657_v11 = vsel %vm644_vm3, %v655_v9, %v16836_v33  ;;  %v10597_v52 = vmul.f32 %v17935_v1, %v10529_v46  ;;  %v17948_v4 = vld [vmem:[#allocation104_spill] sm:$0xff] }
 0x169   : >> { %v580_v35 = vadd.f32 %v532_v6, %v439_v5  ;;  %v3253_v14 = vadd.f32 %v10432_v26, %v3129_v37  ;;  %v782_v15 = vsel %vm769_vm4, %v780_v0, %v16837_v27  ;;  %v905_v60 = vrot.slane %v852_v47, 4  ;;  %v17937_v37 = vld [vmem:[#allocation22_spill] sm:$0xff] }
 0x16a   : >> { %v977_v55 = vmul.f32 %v17936_v58, %v413_v62  ;;  %v5796_v49 = vadd.f32 %v10334_v32, %v5672_v13  ;;  %v16840_v5 = vrot.slane %v10597_v52, 4  ;;  %v10608_v42 = vmul.f32 %v17936_v58, %v10529_v46 }
 0x16b   : >> { %v705_v6 = vadd.f32 %v657_v11, %v580_v35  ;;  %v3377_v9 = vadd.f32 %v10439_v40, %v3253_v14  ;;  %v1102_v33 = vmul.f32 %v17937_v37, %v413_v62  ;;  %v10614_v0 = vmul.f32 %v17937_v37, %v10529_v46  ;;  %v10622_v11 = vld [vmem:[%s8792_s26 + $0x48] sm:$0xff] }
 0x16c   : >> { %v1030_v26 = vrot.slane %v977_v55, 5  ;;  %v5920_v47 = vadd.f32 %v10344_v28, %v5796_v49  ;;  %v907_v13 = vsel %vm894_vm5, %v905_v60, %v16840_v5  ;;  %v16839_v35 = vrot.slane %v10608_v42, 5  ;;  %17938 = vst [vmem:[#allocation34_spill] sm:$0xff] %v10622_v11  ;;  %v10633_v60 = vld [vmem:[%s8792_s26 + $0x50] sm:$0xff] }
 0x16d   : >> { %v830_v32 = vadd.f32 %v782_v15, %v705_v6  ;;  %v3501_v40 = vadd.f32 %v10444_v44, %v3377_v9  ;;  %v1155_v14 = vrot.slane %v1102_v33, 6  ;;  %v16838_v62 = vrot.slane %v10614_v0, 6  ;;  %v17940_v9 = vld [vmem:[#allocation126_spill] sm:$0xff] }
 0x16e   : >> { %v1252_v55 = vmul.f32 %v10622_v11, %v8873_v24  ;;  %v6044_v27 = vadd.f32 %v10349_v50, %v5920_v47  ;;  %v1032_v15 = vsel %vm1019_vm6, %v1030_v26, %v16839_v35  ;;  %v1290_v49 = vmul.f32 %v10622_v11, %v8877_v25 }
 0x16f   : >> { %v955_v28 = vadd.f32 %v907_v13, %v830_v32  ;;  %v3625_v44 = vadd.f32 %v10449_v23, %v3501_v40  ;;  %v1157_v33 = vsel %vm1144_vm7, %v1155_v14, %v16838_v62  ;;  %v10643_v6 = vmul.f32 %v10633_v60, %v8877_v25 }
 0x170   : >> { %v1414_v50 = vmul.f32 %v10622_v11, %v8888_v29  ;;  %v10648_v26 = vadd.f32 %v17940_v9, %v6044_v27  ;;  %v1342_v32 = vrot.slane %v1290_v49, 1  ;;  %v10652_v13 = vmul.f32 %v10633_v60, %v8888_v29 }
 0x171   : >> { %17939 = vst [vmem:[#allocation35_spill] sm:$0xff] %v10643_v6  ;;  %v1080_v47 = vadd.f32 %v1032_v15, %v955_v28  ;;  %v3688_v23 = vadd.f32 %v10454_v7, %v3625_v44  ;;  %v16842_v40 = vrot.slane %v10643_v6, 1  ;;  %v1538_v62 = vmul.f32 %v10622_v11, %v8892_v30 }
 0x172   : >> { %17941 = vst [vmem:[#allocation38_spill] sm:$0xff] %v10648_v26  ;;  %17942 = vst [vmem:[#allocation40_spill] sm:$0xff] %v10652_v13  ;;  %v1466_v14 = vrot.slane %v1414_v50, 2  ;;  %v6082_v35 = vsel %vm273_vm0, %v10648_v26, 0.0  ;;  %v16841_v27 = vrot.slane %v10652_v13, 2  ;;  %v10663_v28 = vmul.f32 %v10633_v60, %v8892_v30  ;;  %v17950_v13 = vld [vmem:[#allocation105_spill] sm:$0xff] }
 0x173   : >> { %v1205_v5 = vadd.f32 %v1157_v33, %v1080_v47  ;;  %6083 = vadd.xlane.f32.xlu0 %v6082_v35  ;;  %v3812_v15 = vadd.f32 %v10484_v19, %v3688_v23  ;;  %v1344_v7 = vsel %vm519_vm2, %v1342_v32, %v16842_v40  ;;  %v1590_v49 = vrot.slane %v1538_v62, 3 }
 0x174   : >> { %17943 = vst [vmem:[#allocation41_spill] sm:$0xff] %v10663_v28  ;;  %v1662_v44 = vmul.f32 %v10622_v11, %v8924_v3  ;;  %v1468_v33 = vsel %vm644_vm3, %v1466_v14, %v16841_v27  ;;  %v16844_v47 = vrot.slane %v10663_v28, 3  ;;  %v10677_v35 = vmul.f32 %v10633_v60, %v8924_v3 }
 0x175   : >> { %v1268_v50 = vadd.f32 %v1252_v55, %v1205_v5  ;;  %v3936_v19 = vadd.f32 %v10490_v54, %v3812_v15  ;;  %v1786_v62 = vmul.f32 %v10622_v11, %v8929_v12  ;;  %v10684_v5 = vmul.f32 %v10633_v60, %v8929_v12 }
 0x176   : >> { %17944 = vst [vmem:[#allocation45_spill] sm:$0xff] %v10677_v35  ;;  %v1714_v23 = vrot.slane %v1662_v44, 4  ;;  %v1592_v32 = vsel %vm769_vm4, %v1590_v49, %v16844_v47  ;;  %v16851_v14 = vrot.slane %v10677_v35, 4  ;;  %v1910_v54 = vmul.f32 %v10622_v11, %v8944_v17  ;;  %v10715_v11 = vld [vmem:[%s8792_s26 + $0x68] sm:$0xff] }
 0x177   : >> { %17945 = vst [vmem:[#allocation47_spill] sm:$0xff] %v10684_v5  ;;  %v1392_v55 = vadd.f32 %v1344_v7, %v1268_v50  ;;  %v4060_v15 = vadd.f32 %v10495_v8, %v3936_v19  ;;  %v1838_v44 = vrot.slane %v1786_v62, 5  ;;  %v10696_v40 = vmul.f32 %v10633_v60, %v8944_v17  ;;  %v17947_v7 = vld [vmem:[#allocation101_spill] sm:$0xff]  ;;  %v10710_v19 = vld [vmem:[%s8792_s26 + $0x60] sm:$0xff] }
 0x178   : >> { %v10700_v50 = vmul.f32 %v10547_v20, %v17947_v7  ;;  %v10704_v49 = vmul.f32 %v10547_v20, %v17948_v4  ;;  %v1716_v8 = vsel %vm894_vm5, %v1714_v23, %v16851_v14  ;;  %17949 = vst [vmem:[#allocation50_spill] sm:$0xff] %v10710_v19  ;;  %v1962_v27 = vrot.slane %v1910_v54, 6 }
 0x179   : >> { %17946 = vst [vmem:[#allocation49_spill] sm:$0xff] %v10696_v40  ;;  %v1516_v47 = vadd.f32 %v1468_v33, %v1392_v55  ;;  %v4184_v62 = vadd.f32 %v10500_v10, %v4060_v15  ;;  %v2097_v28 = vmul.f32 %v10710_v19, %v8970_v56  ;;  %v10721_v6 = vmul.f32 %v10547_v20, %v17950_v13 }
 0x17a   : >> { %v17951_v55 = vrot.slane %v10684_v5, 5  ;;  %v10728_v10 = vmul.f32 %v10715_v11, %v8970_v56  ;;  %v2221_v15 = vmul.f32 %v10710_v19, %v8985_v21  ;;  %v10735_v14 = vmul.f32 %v10715_v11, %v8985_v21 }
 0x17b   : >> { %v1640_v33 = vadd.f32 %v1592_v32, %v1516_v47  ;;  %v4308_v54 = vadd.f32 %v10505_v53, %v4184_v62  ;;  %v2345_v47 = vmul.f32 %v10710_v19, %v8998_v63  ;;  %v17953_v32 = vld [vmem:[#allocation108_spill] sm:$0xff]  ;;  %v17954_v62 = vrot.slane %v10696_v40, 6 }
 0x17c   : >> { %v1840_v23 = vsel %vm1019_vm6, %v1838_v44, %v17951_v55  ;;  %17952 = vst [vmem:[#allocation54_spill] sm:$0xff] %v10735_v14  ;;  %v10741_v26 = vmul.f32 %v10547_v20, %v17953_v32  ;;  %v2149_v55 = vrot.slane %v2097_v28, 1  ;;  %v10750_v21 = vmul.f32 %v10715_v11, %v8998_v63 }
 0x17d   : >> { %v1764_v44 = vadd.f32 %v1716_v8, %v1640_v33  ;;  %v4432_v53 = vadd.f32 %v10510_v38, %v4308_v54  ;;  %v1964_v35 = vsel %vm1144_vm7, %v1962_v27, %v17954_v62  ;;  %v2469_v56 = vmul.f32 %v10710_v19, %v17626_v2  ;;  %v10757_v8 = vld [vmem:[%s16584_s1 + $0x30] ss:$0 sm:$0xff] }
 0x17e   : >> { %17955 = vst [vmem:[#allocation55_spill] sm:$0xff] %v10750_v21  ;;  %17956 = vst [vmem:[#allocation59_spill] sm:$0xff] %v10757_v8  ;;  %v10761_v28 = vmul.f32 %v10757_v8, %v10547_v20  ;;  %v2059_v27 = vmul.f32 %v10710_v19, %v17624_v45  ;;  %v10767_v33 = vmul.f32 %v10715_v11, %v17626_v2  ;;  %v2273_v62 = vrot.slane %v2221_v15, 2  ;;  %v17959_v2 = vld [vmem:[#allocation51_spill] sm:$0xff] }
 0x17f   : >> { %v1888_v38 = vadd.f32 %v1840_v23, %v1764_v44  ;;  %v4495_v54 = vadd.f32 %v10515_v43, %v4432_v53  ;;  %v16875_v5 = vrot.slane %v10735_v14, 2  ;;  %v2397_v40 = vrot.slane %v2345_v47, 3  ;;  %v17961_v47 = vld [vmem:[#allocation52_spill] sm:$0xff] }
 0x180   : >> { %17957 = vst [vmem:[#allocation60_spill] sm:$0xff] %v10767_v33  ;;  %v17958_v17 = vrot.slane %v10728_v10, 1  ;;  %v16874_v23 = vrot.slane %v10750_v21, 3  ;;  %v2521_v44 = vrot.slane %v2469_v56, 4  ;;  %v16873_v12 = vrot.slane %v10767_v33, 4 }
 0x181   : >> { %v2012_v63 = vadd.f32 %v1964_v35, %v1888_v38  ;;  %v4619_v45 = vadd.f32 %v10520_v59, %v4495_v54  ;;  %v2593_v3 = vmul.f32 %v10710_v19, %v17959_v2  ;;  %v10781_v43 = vmul.f32 %v10715_v11, %v17959_v2 }
 0x182   : >> { %v2151_v20 = vsel %vm519_vm2, %v2149_v55, %v17958_v17  ;;  %v5375_v35 = vrot.slane %v10561_v22, 1  ;;  %v2717_v17 = vmul.f32 %v10710_v19, %v17961_v47  ;;  %v10788_v56 = vmul.f32 %v10715_v11, %v17961_v47  ;;  %v10807_v19 = vld [vmem:[%s8792_s26 + $0x78] sm:$0xff] }
 0x183   : >> { %17960 = vst [vmem:[#allocation62_spill] sm:$0xff] %v10781_v43  ;;  %v2075_v15 = vadd.f32 %v2059_v27, %v2012_v63  ;;  %v4743_v59 = vadd.f32 %v10525_v18, %v4619_v45  ;;  %v5499_v55 = vrot.slane %v10700_v50, 2  ;;  %v5623_v53 = vrot.slane %v10704_v49, 3  ;;  %17963 = vst [vmem:[#allocation65_spill] sm:$0xff] %v10807_v19  ;;  %v17972_v49 = vld [vmem:[#allocation149_spill] sm:$0xff] }
 0x184   : >> { %17962 = vst [vmem:[#allocation64_spill] sm:$0xff] %v10788_v56  ;;  %v2275_v22 = vsel %vm644_vm3, %v2273_v62, %v16875_v5  ;;  %v5747_v63 = vrot.slane %v10721_v6, 4  ;;  %v5871_v38 = vrot.slane %v10741_v26, 5  ;;  %v2399_v54 = vsel %vm769_vm4, %v2397_v40, %v16874_v23  ;;  %v17971_v26 = vld [vmem:[#allocation58_spill] sm:$0xff] }
 0x185   : >> { %v2199_v27 = vadd.f32 %v2151_v20, %v2075_v15  ;;  %v4867_v45 = vadd.f32 %v10534_v48, %v4743_v59  ;;  %v2523_v18 = vsel %vm894_vm5, %v2521_v44, %v16873_v12  ;;  %v2645_v50 = vrot.slane %v2593_v3, 5  ;;  %v10811_v20 = vld [vmem:[%s8792_s26 + $0x80] sm:$0xff]  ;;  %v17965_v15 = vld [vmem:[#allocation53_spill] sm:$0xff] }
 0x186   : >> { %v2769_v6 = vrot.slane %v2717_v17, 6  ;;  %17964 = vst [vmem:[#allocation72_spill] sm:$0xff] %v10811_v20  ;;  %v2904_v40 = vmul.f32 %v10807_v19, %v17965_v15  ;;  %v10818_v59 = vmul.f32 %v10811_v20, %v17965_v15  ;;  %v17967_v3 = vld [vmem:[#allocation57_spill] sm:$0xff]  ;;  %v17969_v17 = vld [vmem:[#allocation148_spill] sm:$0xff]  ;;  %v5995_v23 = vrot.slane %v10761_v28, 6 }
 0x187   : >> { %v2323_v62 = vadd.f32 %v2275_v22, %v2199_v27  ;;  %v4991_v48 = vadd.f32 %v10539_v51, %v4867_v45  ;;  %v3028_v44 = vmul.f32 %v10807_v19, %v17967_v3  ;;  %v10824_v22 = vmul.f32 %v10811_v20, %v17967_v3 }
 0x188   : >> { %17966 = vst [vmem:[#allocation73_spill] sm:$0xff] %v10818_v59  ;;  %v17970_v27 = vrot.slane %v17969_v17, 1  ;;  %v3152_v51 = vmul.f32 %v10807_v19, %v17971_v26  ;;  %v17973_v33 = vrot.slane %v17972_v49, 2  ;;  %v17974_v14 = vrot.slane %v10781_v43, 5  ;;  %v17987_v43 = vld [vmem:[#allocation23_spill] sm:$0xff] }
 0x189   : >> { %17968 = vst [vmem:[#allocation76_spill] sm:$0xff] %v10824_v22  ;;  %v2447_v5 = vadd.f32 %v2399_v54, %v2323_v62  ;;  %v5115_v45 = vadd.f32 %v10544_v39, %v4991_v48  ;;  %v10841_v17 = vmul.f32 %v10811_v20, %v17971_v26  ;;  %v17976_v28 = vrot.slane %v10788_v56, 6 }
 0x18a   : >> { %v5376_v12 = vsel %vm519_vm2, %v17970_v27, %v5375_v35  ;;  %v5500_v21 = vsel %vm644_vm3, %v17973_v33, %v5499_v55  ;;  %v2647_v3 = vsel %vm1019_vm6, %v2645_v50, %v17974_v14  ;;  %v2866_v39 = vmul.f32 %v10807_v19, %v17869_v34  ;;  %v17977_v27 = vld [vmem:[#allocation61_spill] sm:$0xff]  ;;  %v17983_v14 = vld [vmem:[#allocation66_spill] sm:$0xff] }
 0x18b   : >> { %17975 = vst [vmem:[#allocation77_spill] sm:$0xff] %v10841_v17  ;;  %v2571_v35 = vadd.f32 %v2523_v18, %v2447_v5  ;;  %v2771_v54 = vsel %vm1144_vm7, %v2769_v6, %v17976_v28  ;;  %v2956_v62 = vrot.slane %v2904_v40, 1  ;;  %v5239_v49 = vadd.f32 %v10553_v36, %v5115_v45  ;;  %v17979_v28 = vld [vmem:[#allocation63_spill] sm:$0xff] }
 0x18c   : >> { %v3080_v55 = vrot.slane %v3028_v44, 2  ;;  %v3204_v48 = vrot.slane %v3152_v51, 3  ;;  %v3276_v5 = vmul.f32 %v10807_v19, %v17977_v27  ;;  %v10855_v18 = vmul.f32 %v10811_v20, %v17977_v27  ;;  %v17985_v40 = vld [vmem:[#allocation151_spill] sm:$0xff] }
 0x18d   : >> { %v2695_v50 = vadd.f32 %v2647_v3, %v2571_v35  ;;  %v5302_v6 = vadd.f32 %v10557_v41, %v5239_v49  ;;  %v3400_v36 = vmul.f32 %v10807_v19, %v17979_v28  ;;  %v10863_v44 = vmul.f32 %v10811_v20, %v17979_v28  ;;  %v17981_v3 = vld [vmem:[#allocation150_spill] sm:$0xff] }
 0x18e   : >> { %17978 = vst [vmem:[#allocation79_spill] sm:$0xff] %v10855_v18  ;;  %v17982_v51 = vrot.slane %v17981_v3, 3  ;;  %v3524_v33 = vmul.f32 %v10807_v19, %v17983_v14  ;;  %v10872_v41 = vmul.f32 %v10811_v20, %v17983_v14  ;;  %v17986_v34 = vrot.slane %v17985_v40, 4 }
 0x18f   : >> { %17980 = vst [vmem:[#allocation80_spill] sm:$0xff] %v10863_v44  ;;  %v2819_v35 = vadd.f32 %v2771_v54, %v2695_v50  ;;  %v5426_v49 = vadd.f32 %v5376_v12, %v5302_v6  ;;  %v17988_v28 = vrot.slane %v17987_v43, 5  ;;  %v3328_v20 = vrot.slane %v3276_v5, 4 }
 0x190   : >> { %v5624_v45 = vsel %vm769_vm4, %v17982_v51, %v5623_v53  ;;  %17984 = vst [vmem:[#allocation83_spill] sm:$0xff] %v10872_v41  ;;  %v5748_v56 = vsel %vm894_vm5, %v17986_v34, %v5747_v63  ;;  %v17989_v53 = vrot.slane %v10818_v59, 1  ;;  %v17990_v51 = vrot.slane %v10824_v22, 2  ;;  %v18001_v63 = vld [vmem:[#allocation75_spill] sm:$0xff] }
 0x191   : >> { %v5872_v3 = vsel %vm1019_vm6, %v17988_v28, %v5871_v38  ;;  %v2882_v50 = vadd.f32 %v2866_v39, %v2819_v35  ;;  %v16890_v12 = vrot.slane %v10855_v18, 4  ;;  %v5550_v6 = vadd.f32 %v5500_v21, %v5426_v49  ;;  %v10892_v38 = vld [vmem:[%s8792_s26 + $0x90] sm:$0xff]  ;;  %v10896_v35 = vld [vmem:[%s8792_s26 + $0x98] sm:$0xff] }
 0x192   : >> { %v2958_v54 = vsel %vm519_vm2, %v2956_v62, %v17989_v53  ;;  %v3082_v19 = vsel %vm644_vm3, %v3080_v55, %v17990_v51  ;;  %v17991_v40 = vrot.slane %v10841_v17, 3  ;;  %v3452_v43 = vrot.slane %v3400_v36, 5  ;;  %17992 = vst [vmem:[#allocation87_spill] sm:$0xff] %v10892_v38  ;;  %17993 = vst [vmem:[#allocation89_spill] sm:$0xff] %v10896_v35  ;;  %v17999_v51 = vld [vmem:[#allocation74_spill] sm:$0xff] }
 0x193   : >> { %v3006_v28 = vadd.f32 %v2958_v54, %v2882_v50  ;;  %v3576_v62 = vrot.slane %v3524_v33, 6  ;;  %v3711_v55 = vmul.f32 %v10892_v38, %v17880_v61  ;;  %v5674_v5 = vadd.f32 %v5624_v45, %v5550_v6  ;;  %v17997_v33 = vld [vmem:[#allocation24_spill] sm:$0xff] }
 0x194   : >> { %v3206_v34 = vsel %vm769_vm4, %v3204_v48, %v17991_v40  ;;  %v10902_v21 = vmul.f32 %v10896_v35, %v17880_v61  ;;  %v17995_v48 = vld [vmem:[#allocation69_spill] sm:$0xff]  ;;  %v17998_v53 = vrot.slane %v17997_v33, 6  ;;  %v3959_v40 = vmul.f32 %v10892_v38, %v17999_v51 }
 0x195   : >> { %v3835_v36 = vmul.f32 %v10892_v38, %v17995_v48  ;;  %v10908_v49 = vmul.f32 %v10896_v35, %v17995_v48  ;;  %v3130_v50 = vadd.f32 %v3082_v19, %v3006_v28  ;;  %v10917_v45 = vmul.f32 %v10896_v35, %v17999_v51 }
 0x196   : >> { %17994 = vst [vmem:[#allocation91_spill] sm:$0xff] %v10902_v21  ;;  %v5996_v54 = vsel %vm1144_vm7, %v17998_v53, %v5995_v23  ;;  %v5798_v6 = vadd.f32 %v5748_v56, %v5674_v5  ;;  %v3330_v39 = vsel %vm894_vm5, %v3328_v20, %v16890_v12  ;;  %v4083_v17 = vmul.f32 %v10892_v38, %v18001_v63 }
 0x197   : >> { %17996 = vst [vmem:[#allocation92_spill] sm:$0xff] %v10908_v49  ;;  %18000 = vst [vmem:[#allocation94_spill] sm:$0xff] %v10917_v45  ;;  %v10926_v33 = vmul.f32 %v10896_v35, %v18001_v63  ;;  %v3254_v19 = vadd.f32 %v3206_v34, %v3130_v50  ;;  %v18003_v23 = vrot.slane %v10863_v44, 5  ;;  %v18004_v53 = vrot.slane %v10872_v41, 6  ;;  %v18005_v34 = vld [vmem:[#allocation78_spill] sm:$0xff] }
 0x198   : >> { %v3763_v5 = vrot.slane %v3711_v55, 1  ;;  %v5922_v18 = vadd.f32 %v5872_v3, %v5798_v6  ;;  %v16899_v20 = vrot.slane %v10902_v21, 1  ;;  %v3887_v12 = vrot.slane %v3835_v36, 2  ;;  %v18007_v55 = vld [vmem:[#allocation68_spill] sm:$0xff]  ;;  %v18008_v36 = vld [vmem:[#allocation81_spill] sm:$0xff] }
 0x199   : >> { %18002 = vst [vmem:[#allocation96_spill] sm:$0xff] %v10926_v33  ;;  %v3454_v28 = vsel %vm1019_vm6, %v3452_v43, %v18003_v23  ;;  %v3578_v56 = vsel %vm1144_vm7, %v3576_v62, %v18004_v53  ;;  %v16897_v22 = vrot.slane %v10908_v49, 2  ;;  %v3378_v59 = vadd.f32 %v3330_v39, %v3254_v19  ;;  %v18016_v53 = vld [vmem:[#allocation88_spill] sm:$0xff] }
 0x19a   : >> { %v4011_v51 = vrot.slane %v3959_v40, 3  ;;  %v16896_v63 = vrot.slane %v10917_v45, 3  ;;  %v4207_v50 = vmul.f32 %v10892_v38, %v18005_v34  ;;  %v6046_v44 = vadd.f32 %v5996_v54, %v5922_v18 }
 0x19b   : >> { %v4135_v43 = vrot.slane %v4083_v17, 4  ;;  %v16898_v23 = vrot.slane %v10926_v33, 4  ;;  %v10942_v3 = vmul.f32 %v10896_v35, %v18005_v34  ;;  %v3502_v62 = vadd.f32 %v3454_v28, %v3378_v59  ;;  %v18020_v33 = vld [vmem:[#allocation93_spill] sm:$0xff]  ;;  %v415_v34 = vld [vmem:[%s8792_s26 + $0x40] sm:$0xff] }
 0x19c   : >> { %v3673_v39 = vmul.f32 %v10892_v38, %v18007_v55  ;;  %v4331_v40 = vmul.f32 %v10892_v38, %v18008_v36  ;;  %v10949_v6 = vadd.f32 %v17940_v9, %v6046_v44  ;;  %v3765_v17 = vsel %vm519_vm2, %v3763_v5, %v16899_v20  ;;  %v10971_v5 = vld [vmem:[%s8792_s26 + $0xa8] sm:$0xff] }
 0x19d   : >> { %18006 = vst [vmem:[#allocation97_spill] sm:$0xff] %v10942_v3  ;;  %v3626_v18 = vadd.f32 %v3578_v56, %v3502_v62  ;;  %v3889_v54 = vsel %vm644_vm3, %v3887_v12, %v16897_v22  ;;  %v4013_v59 = vsel %vm769_vm4, %v4011_v51, %v16896_v63  ;;  %v4259_v19 = vrot.slane %v4207_v50, 5  ;;  %18010 = vst [vmem:[#allocation111_spill] sm:$0xff] %v10971_v5  ;;  %v10974_v12 = vld [vmem:[%s8792_s26 + $0xb0] sm:$0xff]  ;;  %v18012_v62 = vld [vmem:[#allocation82_spill] sm:$0xff] }
 0x19e   : >> { %18009 = vst [vmem:[#allocation99_spill] sm:$0xff] %v10949_v6  ;;  %v6088_v28 = vsel %vm273_vm0, %v10949_v6, 0.0  ;;  %v4137_v44 = vsel %vm894_vm5, %v4135_v43, %v16898_v23  ;;  %v10968_v56 = vmul.f32 %v10896_v35, %v18008_v36  ;;  %18011 = vst [vmem:[#allocation113_spill] sm:$0xff] %v10974_v12  ;;  %v4383_v50 = vrot.slane %v4331_v40, 6  ;;  %v18014_v43 = vld [vmem:[#allocation86_spill] sm:$0xff] }
 0x19f   : >> { %6089 = vadd.xlane.f32.xlu1 %v6088_v28  ;;  %v3689_v51 = vadd.f32 %v3673_v39, %v3626_v18  ;;  %v4518_v63 = vmul.f32 %v10971_v5, %v18012_v62  ;;  %v10980_v22 = vmul.f32 %v10974_v12, %v18012_v62  ;;  %v4642_v23 = vmul.f32 %v10971_v5, %v18014_v43  ;;  %v18018_v18 = vld [vmem:[#allocation90_spill] sm:$0xff] }
 0x1a0   : >> { %v10986_v20 = vmul.f32 %v10974_v12, %v18014_v43  ;;  %v4766_v6 = vmul.f32 %v10971_v5, %v18016_v53  ;;  %v10992_v39 = vmul.f32 %v10974_v12, %v18016_v53  ;;  %v4890_v28 = vmul.f32 %v10971_v5, %v18018_v18 }
 0x1a1   : >> { %18013 = vst [vmem:[#allocation114_spill] sm:$0xff] %v10980_v22  ;;  %v3813_v40 = vadd.f32 %v3765_v17, %v3689_v51  ;;  %v10998_v38 = vmul.f32 %v10974_v12, %v18018_v18  ;;  %v5014_v45 = vmul.f32 %v10971_v5, %v18020_v33  ;;  %v18021_v49 = vrot.slane %v10942_v3, 5  ;;  %v18023_v17 = vld [vmem:[#allocation95_spill] sm:$0xff]  ;;  %v11026_v3 = vld [vmem:[%s8792_s26 + $0xc8] sm:$0xff] }
 0x1a2   : >> { %18015 = vst [vmem:[#allocation115_spill] sm:$0xff] %v10986_v20  ;;  %18017 = vst [vmem:[#allocation116_spill] sm:$0xff] %v10992_v39  ;;  %v11007_v35 = vmul.f32 %v10974_v12, %v18020_v33  ;;  %v5138_v51 = vmul.f32 %v10971_v5, %v18023_v17  ;;  %v11013_v55 = vmul.f32 %v10974_v12, %v18023_v17  ;;  %v16924_v53 = vrot.slane %v10968_v56, 6  ;;  %v11021_v17 = vld [vmem:[%s8792_s26 + $0xc0] sm:$0xff]  ;;  %v18028_v33 = vld [vmem:[#allocation84_spill] sm:$0xff] }
 0x1a3   : >> { %18019 = vst [vmem:[#allocation117_spill] sm:$0xff] %v10998_v38  ;;  %v4261_v21 = vsel %vm1019_vm6, %v4259_v19, %v18021_v49  ;;  %v3937_v18 = vadd.f32 %v3889_v54, %v3813_v40  ;;  %v4570_v41 = vrot.slane %v4518_v63, 1  ;;  %v4694_v49 = vrot.slane %v4642_v23, 2  ;;  %18025 = vst [vmem:[#allocation106_spill] sm:$0xff] %v11021_v17  ;;  %v18027_v23 = vld [vmem:[#allocation98_spill] sm:$0xff] }
 0x1a4   : >> { %18022 = vst [vmem:[#allocation102_spill] sm:$0xff] %v11007_v35  ;;  %18024 = vst [vmem:[#allocation103_spill] sm:$0xff] %v11013_v55  ;;  %v4818_v43 = vrot.slane %v4766_v6, 3  ;;  %v4942_v36 = vrot.slane %v4890_v28, 4  ;;  %v5066_v12 = vrot.slane %v5014_v45, 5  ;;  %v5190_v40 = vrot.slane %v5138_v51, 6 }
 0x1a5   : >> { %v4061_v62 = vadd.f32 %v4013_v59, %v3937_v18  ;;  %18026 = vst [vmem:[#allocation107_spill] sm:$0xff] %v11026_v3  ;;  %v5325_v6 = vmul.f32 %v11021_v17, %v18027_v23  ;;  %v4480_v59 = vmul.f32 %v10971_v5, %v18028_v33  ;;  %v11034_v18 = vmul.f32 %v11026_v3, %v18027_v23 }
 0x1a6   : >> { %v5449_v45 = vmul.f32 %v11021_v17, %v17947_v7  ;;  %v4385_v28 = vsel %vm1144_vm7, %v4383_v50, %v16924_v53  ;;  %v18029_v51 = vrot.slane %v10980_v22, 1  ;;  %v11049_v54 = vmul.f32 %v11026_v3, %v17947_v7  ;;  %v18034_v22 = vld [vmem:[#allocation100_spill] sm:$0xff] }
 0x1a7   : >> { %v4185_v19 = vadd.f32 %v4137_v44, %v4061_v62  ;;  %v18030_v44 = vrot.slane %v10986_v20, 2  ;;  %v18032_v23 = vrot.slane %v10992_v39, 3  ;;  %v18033_v50 = vrot.slane %v10998_v38, 4 }
 0x1a8   : >> { %v4572_v63 = vsel %vm519_vm2, %v4570_v41, %v18029_v51  ;;  %18031 = vst [vmem:[#allocation118_spill] sm:$0xff] %v11049_v54  ;;  %v11060_v41 = vmul.f32 %v11021_v17, %v18034_v22 }
 0x1a9   : >> { %v4696_v62 = vsel %vm644_vm3, %v4694_v49, %v18030_v44  ;;  %v4309_v5 = vadd.f32 %v4261_v21, %v4185_v19  ;;  %v4820_v33 = vsel %vm769_vm4, %v4818_v43, %v18032_v23  ;;  %v4944_v53 = vsel %vm894_vm5, %v4942_v36, %v18033_v50  ;;  %v18037_v50 = vld [vmem:[#allocation17_spill] sm:$0xff] }
 0x1aa   : >> { %v18035_v49 = vrot.slane %v11007_v35, 5  ;;  %v18036_v44 = vrot.slane %v11013_v55, 6  ;;  %v5377_v19 = vrot.slane %v5325_v6, 1  ;;  %v5573_v43 = vmul.f32 %v11021_v17, %v17948_v4  ;;  %v18038_v35 = vld [vmem:[#allocation16_spill] sm:$0xff]  ;;  %v18040_v55 = vld [vmem:[#allocation19_spill] sm:$0xff] }
 0x1ab   : >> { %v4433_v23 = vadd.f32 %v4385_v28, %v4309_v5  ;;  %v5501_v36 = vrot.slane %v5449_v45, 2  ;;  %v479_v38 = vmul.f32 %v18037_v50, %v415_v34  ;;  %v440_v20 = vmul.f32 %v18038_v35, %v10529_v46 }
 0x1ac   : >> { %v5068_v51 = vsel %vm1019_vm6, %v5066_v12, %v18035_v49  ;;  %v5192_v21 = vsel %vm1144_vm7, %v5190_v40, %v18036_v44  ;;  %v18039_v12 = vld [vmem:[#allocation18_spill] sm:$0xff]  ;;  %v729_v22 = vmul.f32 %v18040_v55, %v415_v34  ;;  %v854_v44 = vmul.f32 %v17935_v1, %v415_v34 }
 0x1ad   : >> { %v604_v49 = vmul.f32 %v18039_v12, %v415_v34  ;;  %v4496_v40 = vadd.f32 %v4480_v59, %v4433_v23  ;;  %v533_v6 = vrot.slane %v479_v38, 1  ;;  %v979_v5 = vmul.f32 %v17936_v58, %v415_v34 }
 0x1ae   : >> { %v11081_v45 = vmul.f32 %v11026_v3, %v17948_v4  ;;  %v5625_v28 = vrot.slane %v5573_v43, 3  ;;  %v783_v39 = vrot.slane %v729_v22, 3  ;;  %v18042_v46 = vrot.slane %v10568_v16, 1 }
 0x1af   : >> { %v658_v7 = vrot.slane %v604_v49, 2  ;;  %v4620_v50 = vadd.f32 %v4572_v63, %v4496_v40  ;;  %v908_v55 = vrot.slane %v854_v44, 4  ;;  %v1104_v38 = vmul.f32 %v17937_v37, %v415_v34 }
 0x1b0   : >> { %18041 = vst [vmem:[#allocation110_spill] sm:$0xff] %v11081_v45  ;;  %v534_v12 = vsel %vm519_vm2, %v18042_v46, %v533_v6  ;;  %v5697_v59 = vmul.f32 %v11021_v17, %v17950_v13  ;;  %v11091_v23 = vmul.f32 %v11026_v3, %v17950_v13  ;;  %v18044_v43 = vrot.slane %v10574_v57, 2 }
 0x1b1   : >> { %v581_v4 = vadd.f32 %v534_v12, %v440_v20  ;;  %v4744_v63 = vadd.f32 %v4696_v62, %v4620_v50  ;;  %v5821_v16 = vmul.f32 %v11021_v17, %v17953_v32  ;;  %v18045_v49 = vrot.slane %v10581_v31, 3  ;;  %v11109_v62 = vld [vmem:[%s8792_s26 + $0x58] sm:$0xff] }
 0x1b2   : >> { %18043 = vst [vmem:[#allocation112_spill] sm:$0xff] %v11091_v23  ;;  %v659_v22 = vsel %vm644_vm3, %v18044_v43, %v658_v7  ;;  %v1033_v40 = vrot.slane %v979_v5, 5  ;;  %v18046_v6 = vrot.slane %v11034_v18, 1  ;;  %v18047_v46 = vrot.slane %v11049_v54, 2  ;;  %18048 = vst [vmem:[#allocation119_spill] sm:$0xff] %v11109_v62 }
 0x1b3   : >> { %v784_v34 = vsel %vm769_vm4, %v18045_v49, %v783_v39  ;;  %v16935_v57 = vrot.slane %v11081_v45, 3  ;;  %v706_v7 = vadd.f32 %v659_v22, %v581_v4  ;;  %v4868_v50 = vadd.f32 %v4820_v33, %v4744_v63 }
 0x1b4   : >> { %v5379_v44 = vsel %vm519_vm2, %v5377_v19, %v18046_v6  ;;  %v5503_v20 = vsel %vm644_vm3, %v5501_v36, %v18047_v46  ;;  %v18049_v12 = vrot.slane %v10597_v52, 4  ;;  %v1158_v39 = vrot.slane %v1104_v38, 6 }
 0x1b5   : >> { %v1292_v5 = vmul.f32 %v11109_v62, %v8877_v25  ;;  %v5749_v43 = vrot.slane %v5697_v59, 4  ;;  %v11118_v19 = vmul.f32 %v11026_v3, %v17953_v32  ;;  %v831_v36 = vadd.f32 %v784_v34, %v706_v7 }
 0x1b6   : >> { %v909_v31 = vsel %vm894_vm5, %v18049_v12, %v908_v55  ;;  %v1416_v4 = vmul.f32 %v11109_v62, %v8888_v29  ;;  %v4992_v22 = vadd.f32 %v4944_v53, %v4868_v50  ;;  %v16941_v33 = vrot.slane %v11091_v23, 4  ;;  %v18054_v50 = vld [vmem:[#allocation36_spill] sm:$0xff] }
 0x1b7   : >> { %18050 = vst [vmem:[#allocation120_spill] sm:$0xff] %v11118_v19  ;;  %v5873_v63 = vrot.slane %v5821_v16, 5  ;;  %v18051_v52 = vrot.slane %v10608_v42, 5  ;;  %v5945_v38 = vmul.f32 %v10757_v8, %v11021_v17  ;;  %v11130_v59 = vmul.f32 %v10757_v8, %v11026_v3  ;;  %v18061_v23 = vld [vmem:[#allocation40_spill] sm:$0xff]  ;;  %v18072_v8 = vld [vmem:[#allocation47_spill] sm:$0xff] }
 0x1b8   : >> { %v956_v49 = vadd.f32 %v909_v31, %v831_v36  ;;  %v1253_v34 = vmul.f32 %v10633_v60, %v8873_v24  ;;  %v5116_v6 = vadd.f32 %v5068_v51, %v4992_v22  ;;  %v18053_v53 = vrot.slane %v10614_v0, 6  ;;  %v18060_v51 = vld [vmem:[#allocation42_spill] sm:$0xff] }
 0x1b9   : >> { %v1034_v55 = vsel %vm1019_vm6, %v18051_v52, %v1033_v40  ;;  %18052 = vst [vmem:[#allocation121_spill] sm:$0xff] %v11130_v59  ;;  %v1345_v42 = vrot.slane %v1292_v5, 1  ;;  %v1540_v40 = vmul.f32 %v11109_v62, %v8892_v30  ;;  %v1469_v7 = vrot.slane %v1416_v4, 2  ;;  %v18055_v52 = vld [vmem:[#allocation37_spill] sm:$0xff] }
 0x1ba   : >> { %v1159_v16 = vsel %vm1144_vm7, %v18053_v53, %v1158_v39  ;;  %v1081_v46 = vadd.f32 %v1034_v55, %v956_v49  ;;  %v1664_v12 = vmul.f32 %v11109_v62, %v18054_v50  ;;  %v1788_v31 = vmul.f32 %v11109_v62, %v18055_v52  ;;  %v18056_v39 = vld [vmem:[#allocation39_spill] sm:$0xff]  ;;  %v11154_v53 = vld [vmem:[%s8792_s26 + $0x70] sm:$0xff]  ;;  %v18063_v55 = vld [vmem:[#allocation44_spill] sm:$0xff] }
 0x1bb   : >> { %v5240_v36 = vadd.f32 %v5192_v21, %v5116_v6  ;;  %v5627_v0 = vsel %vm769_vm4, %v5625_v28, %v16935_v57  ;;  %v1912_v5 = vmul.f32 %v11109_v62, %v18056_v39  ;;  %v5751_v4 = vsel %vm894_vm5, %v5749_v43, %v16941_v33  ;;  %18057 = vst [vmem:[#allocation122_spill] sm:$0xff] %v11154_v53  ;;  %v18058_v6 = vld [vmem:[#allocation35_spill] sm:$0xff] }
 0x1bc   : >> { %v5997_v22 = vrot.slane %v5945_v38, 6  ;;  %v1206_v49 = vadd.f32 %v1159_v16, %v1081_v46  ;;  %v18059_v17 = vrot.slane %v18058_v6, 1  ;;  %v1593_v57 = vrot.slane %v1540_v40, 3 }
 0x1bd   : >> { %v5303_v21 = vadd.f32 %v11060_v41, %v5240_v36  ;;  %v2099_v62 = vmul.f32 %v11154_v53, %v18060_v51  ;;  %v18062_v54 = vrot.slane %v18061_v23, 2  ;;  %v1717_v38 = vrot.slane %v1664_v12, 4  ;;  %v18064_v36 = vld [vmem:[#allocation46_spill] sm:$0xff] }
 0x1be   : >> { %v1346_v28 = vsel %vm519_vm2, %v18059_v17, %v1345_v42  ;;  %v1269_v45 = vadd.f32 %v1253_v34, %v1206_v49  ;;  %v1841_v33 = vrot.slane %v1788_v31, 5  ;;  %v1965_v46 = vrot.slane %v1912_v5, 6  ;;  %v18066_v34 = vld [vmem:[#allocation48_spill] sm:$0xff] }
 0x1bf   : >> { %v1470_v43 = vsel %vm644_vm3, %v18062_v54, %v1469_v7  ;;  %v5427_v16 = vadd.f32 %v5379_v44, %v5303_v21  ;;  %v2223_v41 = vmul.f32 %v11154_v53, %v18063_v55  ;;  %v2347_v6 = vmul.f32 %v11154_v53, %v18064_v36  ;;  %v18067_v44 = vld [vmem:[#allocation41_spill] sm:$0xff] }
 0x1c0   : >> { %v18065_v17 = vrot.slane %v11118_v19, 5  ;;  %v1393_v40 = vadd.f32 %v1346_v28, %v1269_v45  ;;  %v2471_v23 = vmul.f32 %v11154_v53, %v18066_v34  ;;  %v2595_v54 = vmul.f32 %v11154_v53, %v17959_v2  ;;  %v18070_v28 = vld [vmem:[#allocation45_spill] sm:$0xff] }
 0x1c1   : >> { %v5551_v7 = vadd.f32 %v5503_v20, %v5427_v16  ;;  %v18068_v12 = vrot.slane %v18067_v44, 3  ;;  %v2152_v5 = vrot.slane %v2099_v62, 1  ;;  %v2719_v49 = vmul.f32 %v11154_v53, %v17961_v47  ;;  %v18074_v2 = vld [vmem:[#allocation49_spill] sm:$0xff] }
 0x1c2   : >> { %v5875_v42 = vsel %vm1019_vm6, %v5873_v63, %v18065_v17  ;;  %v18069_v21 = vrot.slane %v11130_v59, 6  ;;  %v1517_v63 = vadd.f32 %v1470_v43, %v1393_v40  ;;  %v18071_v17 = vrot.slane %v18070_v28, 4  ;;  %v18076_v59 = vld [vmem:[#allocation43_spill] sm:$0xff] }
 0x1c3   : >> { %v1594_v31 = vsel %vm769_vm4, %v18068_v12, %v1593_v57  ;;  %v18073_v20 = vrot.slane %v18072_v8, 5  ;;  %v5675_v44 = vadd.f32 %v5627_v0, %v5551_v7  ;;  %v18075_v57 = vrot.slane %v18074_v2, 6 }
 0x1c4   : >> { %v5999_v45 = vsel %vm1144_vm7, %v5997_v22, %v18069_v21  ;;  %v1718_v19 = vsel %vm894_vm5, %v18071_v17, %v1717_v38  ;;  %v2276_v12 = vrot.slane %v2223_v41, 2  ;;  %v2400_v53 = vrot.slane %v2347_v6, 3  ;;  %v11196_v21 = vld [vmem:[%s8792_s26 + $0x88] sm:$0xff]  ;;  %v18079_v41 = vld [vmem:[#allocation57_spill] sm:$0xff] }
 0x1c5   : >> { %v1842_v16 = vsel %vm1019_vm6, %v18073_v20, %v1841_v33  ;;  %v1966_v62 = vsel %vm1144_vm7, %v18075_v57, %v1965_v46  ;;  %v1641_v47 = vadd.f32 %v1594_v31, %v1517_v63  ;;  %v2060_v22 = vmul.f32 %v10715_v11, %v18076_v59  ;;  %18077 = vst [vmem:[#allocation123_spill] sm:$0xff] %v11196_v21  ;;  %v18085_v17 = vld [vmem:[#allocation60_spill] sm:$0xff]  ;;  %v18087_v57 = vld [vmem:[#allocation62_spill] sm:$0xff] }
 0x1c6   : >> { %v2524_v43 = vrot.slane %v2471_v23, 4  ;;  %v2648_v40 = vrot.slane %v2595_v54, 5  ;;  %v5799_v38 = vadd.f32 %v5751_v4, %v5675_v44  ;;  %v18078_v8 = vrot.slane %v10728_v10, 1  ;;  %v18080_v4 = vld [vmem:[#allocation54_spill] sm:$0xff] }
 0x1c7   : >> { %v2772_v0 = vrot.slane %v2719_v49, 6  ;;  %v2906_v2 = vmul.f32 %v11196_v21, %v17965_v15  ;;  %v1765_v46 = vadd.f32 %v1718_v19, %v1641_v47  ;;  %v3030_v6 = vmul.f32 %v11196_v21, %v18079_v41  ;;  %v18084_v47 = vld [vmem:[#allocation63_spill] sm:$0xff] }
 0x1c8   : >> { %v2153_v33 = vsel %vm519_vm2, %v18078_v8, %v2152_v5  ;;  %v3154_v7 = vmul.f32 %v11196_v21, %v17971_v26  ;;  %v3278_v23 = vmul.f32 %v11196_v21, %v17977_v27  ;;  %v5923_v54 = vadd.f32 %v5875_v42, %v5799_v38  ;;  %v18082_v5 = vld [vmem:[#allocation55_spill] sm:$0xff]  ;;  %v18114_v27 = vld [vmem:[#allocation88_spill] sm:$0xff] }
 0x1c9   : >> { %v18081_v31 = vrot.slane %v18080_v4, 2  ;;  %v18083_v49 = vrot.slane %v18082_v5, 3  ;;  %v3402_v19 = vmul.f32 %v11196_v21, %v18084_v47  ;;  %v1889_v28 = vadd.f32 %v1842_v16, %v1765_v46  ;;  %v18089_v4 = vld [vmem:[#allocation64_spill] sm:$0xff] }
 0x1ca   : >> { %v18086_v20 = vrot.slane %v18085_v17, 4  ;;  %v18088_v8 = vrot.slane %v18087_v57, 5  ;;  %v3526_v38 = vmul.f32 %v11196_v21, %v17983_v14  ;;  %v18091_v5 = vld [vmem:[#allocation56_spill] sm:$0xff]  ;;  %v2959_v16 = vrot.slane %v2906_v2, 1  ;;  %v11233_v57 = vld [vmem:[%s8792_s26 + $0xa0] sm:$0xff] }
 0x1cb   : >> { %v2277_v10 = vsel %vm644_vm3, %v18081_v31, %v2276_v12  ;;  %v2401_v63 = vsel %vm769_vm4, %v18083_v49, %v2400_v53  ;;  %v6047_v12 = vadd.f32 %v5999_v45, %v5923_v54  ;;  %v18090_v31 = vrot.slane %v18089_v4, 6  ;;  %v18092_v49 = vld [vmem:[#allocation72_spill] sm:$0xff]  ;;  %18093 = vst [vmem:[#allocation25_spill] sm:$0xff] %v11233_v57  ;;  %v18096_v2 = vld [vmem:[#allocation75_spill] sm:$0xff] }
 0x1cc   : >> { %v2525_v44 = vsel %vm894_vm5, %v18086_v20, %v2524_v43  ;;  %v2649_v42 = vsel %vm1019_vm6, %v18088_v8, %v2648_v40  ;;  %v11230_v47 = vmul.f32 %v18092_v49, %v18091_v5  ;;  %v2013_v46 = vadd.f32 %v1966_v62, %v1889_v28  ;;  %v18107_v14 = vld [vmem:[#allocation79_spill] sm:$0xff] }
 0x1cd   : >> { %v2773_v53 = vsel %vm1144_vm7, %v18090_v31, %v2772_v0  ;;  %v3083_v17 = vrot.slane %v3030_v6, 2  ;;  %v3207_v43 = vrot.slane %v3154_v7, 3  ;;  %v3331_v20 = vrot.slane %v3278_v23, 4  ;;  %v18095_v31 = vld [vmem:[#allocation74_spill] sm:$0xff]  ;;  %v18097_v23 = vld [vmem:[#allocation73_spill] sm:$0xff] }
 0x1ce   : >> { %v11236_v40 = vadd.f32 %v17940_v9, %v6047_v12  ;;  %v3455_v8 = vrot.slane %v3402_v19, 5  ;;  %v3713_v45 = vmul.f32 %v11233_v57, %v17880_v61  ;;  %v3837_v0 = vmul.f32 %v11233_v57, %v17995_v48  ;;  %v18099_v12 = vld [vmem:[#allocation78_spill] sm:$0xff]  ;;  %v18100_v9 = vld [vmem:[#allocation81_spill] sm:$0xff] }
 0x1cf   : >> { %v2076_v54 = vadd.f32 %v2060_v22, %v2013_v46  ;;  %v3579_v4 = vrot.slane %v3526_v38, 6  ;;  %v3961_v62 = vmul.f32 %v11233_v57, %v18095_v31  ;;  %v4085_v6 = vmul.f32 %v11233_v57, %v18096_v2  ;;  %v18101_v46 = vld [vmem:[#allocation76_spill] sm:$0xff]  ;;  %v18103_v2 = vld [vmem:[#allocation77_spill] sm:$0xff] }
 0x1d0   : >> { %18094 = vst [vmem:[#allocation124_spill] sm:$0xff] %v11236_v40  ;;  %v6091_v7 = vsel %vm273_vm0, %v11236_v40, 0.0  ;;  %v18098_v28 = vrot.slane %v18097_v23, 1  ;;  %v4209_v21 = vmul.f32 %v11233_v57, %v18099_v12  ;;  %v4333_v22 = vmul.f32 %v11233_v57, %v18100_v9  ;;  %v18105_v23 = vld [vmem:[#allocation82_spill] sm:$0xff]  ;;  %v18112_v9 = vld [vmem:[#allocation83_spill] sm:$0xff] }
 0x1d1   : >> { %6092 = vadd.xlane.f32.xlu0 %v6091_v7  ;;  %v2200_v38 = vadd.f32 %v2153_v33, %v2076_v54  ;;  %v18102_v31 = vrot.slane %v18101_v46, 2  ;;  %v18104_v61 = vrot.slane %v18103_v2, 3  ;;  %v18108_v12 = vrot.slane %v18107_v14, 4  ;;  %v18109_v7 = vld [vmem:[#allocation80_spill] sm:$0xff] }
 0x1d2   : >> { %v2960_v19 = vsel %vm519_vm2, %v18098_v28, %v2959_v16  ;;  %v18106_v16 = vld [vmem:[#allocation33_spill] sm:$0xff]  ;;  %v18110_v33 = vrot.slane %v18109_v7, 5  ;;  %v4014_v2 = vrot.slane %v3961_v62, 3  ;;  %v4138_v57 = vrot.slane %v4085_v6, 4  ;;  %v18117_v62 = vld [vmem:[#allocation90_spill] sm:$0xff] }
 0x1d3   : >> { %v11258_v48 = vsel %vm644_vm3, %v18102_v31, %v3083_v17  ;;  %v11263_v40 = vsel %vm769_vm4, %v18104_v61, %v3207_v43  ;;  %v4520_v28 = vmul.f32 %v18106_v16, %v18105_v23  ;;  %v11270_v5 = vsel %vm894_vm5, %v18108_v12, %v3331_v20  ;;  %v18111_v61 = vld [vmem:[#allocation86_spill] sm:$0xff] }
 0x1d4   : >> { %v11275_v54 = vsel %vm1019_vm6, %v18110_v33, %v3455_v8  ;;  %v3766_v17 = vrot.slane %v3713_v45, 1  ;;  %v3890_v31 = vrot.slane %v3837_v0, 2  ;;  %v2324_v46 = vadd.f32 %v2277_v10, %v2200_v38  ;;  %v18115_v33 = vld [vmem:[#allocation68_spill] sm:$0xff]  ;;  %v18116_v45 = vld [vmem:[#allocation89_spill] sm:$0xff]  ;;  %v18118_v38 = vld [vmem:[#allocation91_spill] sm:$0xff] }
 0x1d5   : >> { %v4644_v43 = vmul.f32 %v18106_v16, %v18111_v61  ;;  %v18113_v23 = vrot.slane %v18112_v9, 6  ;;  %v4262_v20 = vrot.slane %v4209_v21, 5  ;;  %v4386_v12 = vrot.slane %v4333_v22, 6 }
 0x1d6   : >> { %v4768_v7 = vmul.f32 %v18106_v16, %v18114_v27  ;;  %v2448_v8 = vadd.f32 %v2401_v63, %v2324_v46  ;;  %v11288_v0 = vmul.f32 %v18116_v45, %v18115_v33  ;;  %v4573_v10 = vrot.slane %v4520_v28, 1  ;;  %v18123_v46 = vld [vmem:[#allocation95_spill] sm:$0xff]  ;;  %v18124_v27 = vld [vmem:[#allocation94_spill] sm:$0xff]  ;;  %v18128_v33 = vld [vmem:[#allocation97_spill] sm:$0xff] }
 0x1d7   : >> { %v11282_v14 = vsel %vm1144_vm7, %v18113_v23, %v3579_v4  ;;  %v4892_v6 = vmul.f32 %v18106_v16, %v18117_v62  ;;  %v18119_v61 = vrot.slane %v18118_v38, 1  ;;  %v18120_v4 = vld [vmem:[#allocation92_spill] sm:$0xff]  ;;  %v18122_v23 = vld [vmem:[#allocation93_spill] sm:$0xff]  ;;  %v11308_v28 = vmul.f32 %v18106_v16, %v18123_v46  ;;  %v18133_v46 = vld [vmem:[#allocation114_spill] sm:$0xff] }
 0x1d8   : >> { %v18121_v21 = vrot.slane %v18120_v4, 2  ;;  %v11304_v63 = vmul.f32 %v18106_v16, %v18122_v23  ;;  %v2572_v62 = vadd.f32 %v2525_v44, %v2448_v8  ;;  %v18125_v38 = vrot.slane %v18124_v27, 3  ;;  %v18131_v27 = vld [vmem:[#allocation84_spill] sm:$0xff]  ;;  %v18132_v8 = vld [vmem:[#allocation113_spill] sm:$0xff] }
 0x1d9   : >> { %v11295_v9 = vsel %vm519_vm2, %v18119_v61, %v3766_v17  ;;  %v18126_v61 = vld [vmem:[#allocation96_spill] sm:$0xff]  ;;  %v18129_v23 = vrot.slane %v18128_v33, 5  ;;  %v18130_v16 = vrot.slane %v10968_v56, 6  ;;  %v4945_v33 = vrot.slane %v4892_v6, 4 }
 0x1da   : >> { %v11300_v22 = vsel %vm644_vm3, %v18121_v21, %v3890_v31  ;;  %v11313_v17 = vsel %vm769_vm4, %v18125_v38, %v4014_v2  ;;  %v18127_v4 = vrot.slane %v18126_v61, 4  ;;  %v4697_v21 = vrot.slane %v4644_v43, 2 }
 0x1db   : >> { %v11323_v26 = vsel %vm1019_vm6, %v18129_v23, %v4262_v20  ;;  %v11328_v44 = vsel %vm1144_vm7, %v18130_v16, %v4386_v12  ;;  %v11332_v2 = vmul.f32 %v18132_v8, %v18131_v27  ;;  %v4821_v38 = vrot.slane %v4768_v7, 3  ;;  %v11346_v23 = vld [vmem:[%s8792_s26 + $0xd0] sm:$0xff]  ;;  %v18139_v27 = vld [vmem:[#allocation34_spill] sm:$0xff] }
 0x1dc   : >> { %v11318_v31 = vsel %vm894_vm5, %v18127_v4, %v4138_v57  ;;  %v2696_v61 = vadd.f32 %v2649_v42, %v2572_v62  ;;  %v18134_v57 = vrot.slane %v18133_v46, 1  ;;  %v18135_v4 = vld [vmem:[#allocation100_spill] sm:$0xff]  ;;  %v5069_v56 = vrot.slane %v11304_v63, 5  ;;  %18137 = vst [vmem:[#allocation127_spill] sm:$0xff] %v11346_v23  ;;  %v18138_v16 = vld [vmem:[#allocation17_spill] sm:$0xff]  ;;  %v18141_v62 = vld [vmem:[#allocation115_spill] sm:$0xff] }
 0x1dd   : >> { %v11341_v20 = vmul.f32 %v11026_v3, %v18135_v4  ;;  %v480_v7 = vmul.f32 %v18139_v27, %v18138_v16  ;;  %v11352_v42 = vmul.f32 %v10633_v60, %v18138_v16  ;;  %v18142_v6 = vrot.slane %v18141_v62, 2  ;;  %v18144_v4 = vld [vmem:[#allocation116_spill] sm:$0xff] }
 0x1de   : >> { %v11337_v43 = vsel %vm519_vm2, %v18134_v57, %v4573_v10  ;;  %v2820_v10 = vadd.f32 %v2773_v53, %v2696_v61  ;;  %v18143_v57 = vld [vmem:[#allocation98_spill] sm:$0xff]  ;;  %v441_v12 = vmul.f32 %v18139_v27, %v18038_v35  ;;  %v18145_v3 = vrot.slane %v18144_v4, 3 }
 0x1df   : >> { %18136 = vst [vmem:[#allocation125_spill] sm:$0xff] %v11341_v20  ;;  %18140 = vst [vmem:[#allocation128_spill] sm:$0xff] %v11352_v42  ;;  %v11357_v46 = vsel %vm644_vm3, %v18142_v6, %v4697_v21  ;;  %v11361_v63 = vmul.f32 %v11346_v23, %v18143_v57  ;;  %v535_v16 = vrot.slane %v480_v7, 1  ;;  %v16967_v53 = vrot.slane %v11352_v42, 1  ;;  %v18147_v61 = vld [vmem:[#allocation18_spill] sm:$0xff]  ;;  %v18148_v57 = vld [vmem:[#allocation19_spill] sm:$0xff] }
 0x1e0   : >> { %v11368_v8 = vsel %vm769_vm4, %v18145_v3, %v4821_v38  ;;  %v605_v62 = vmul.f32 %v18139_v27, %v18147_v61  ;;  %v2883_v21 = vadd.f32 %v11230_v47, %v2820_v10  ;;  %v11376_v6 = vmul.f32 %v10633_v60, %v18147_v61 }
 0x1e1   : >> { %18146 = vst [vmem:[#allocation130_spill] sm:$0xff] %v11368_v8  ;;  %v730_v35 = vmul.f32 %v18139_v27, %v18148_v57  ;;  %v11382_v4 = vmul.f32 %v10633_v60, %v18148_v57  ;;  %v537_v3 = vsel %vm519_vm2, %v535_v16, %v16967_v53  ;;  %v855_v7 = vmul.f32 %v18139_v27, %v17935_v1 }
 0x1e2   : >> { %v660_v38 = vrot.slane %v605_v62, 2  ;;  %v11391_v47 = vmul.f32 %v10633_v60, %v17935_v1  ;;  %v3007_v10 = vadd.f32 %v2960_v19, %v2883_v21  ;;  %v582_v61 = vadd.f32 %v537_v3, %v441_v12 }
 0x1e3   : >> { %v16968_v20 = vrot.slane %v11376_v6, 2  ;;  %v785_v8 = vrot.slane %v730_v35, 3  ;;  %v16969_v57 = vrot.slane %v11382_v4, 3  ;;  %v910_v41 = vrot.slane %v855_v7, 4 }
 0x1e4   : >> { %18149 = vst [vmem:[#allocation131_spill] sm:$0xff] %v11391_v47  ;;  %v16973_v42 = vrot.slane %v11391_v47, 4  ;;  %v980_v16 = vmul.f32 %v18139_v27, %v17936_v58  ;;  %v3131_v62 = vadd.f32 %v11258_v48, %v3007_v10  ;;  %v11404_v19 = vmul.f32 %v10633_v60, %v17936_v58 }
 0x1e5   : >> { %v662_v53 = vsel %vm644_vm3, %v660_v38, %v16968_v20  ;;  %v1105_v35 = vmul.f32 %v18139_v27, %v17937_v37  ;;  %v787_v21 = vsel %vm769_vm4, %v785_v8, %v16969_v57  ;;  %v11418_v10 = vmul.f32 %v10633_v60, %v17937_v37  ;;  %v18150_v27 = vld [vmem:[#allocation117_spill] sm:$0xff]  ;;  %v18152_v57 = vld [vmem:[#allocation50_spill] sm:$0xff] }
 0x1e6   : >> { %v707_v12 = vadd.f32 %v662_v53, %v582_v61  ;;  %v912_v48 = vsel %vm894_vm5, %v910_v41, %v16973_v42  ;;  %v1035_v3 = vrot.slane %v980_v16, 5  ;;  %v3255_v7 = vadd.f32 %v11263_v40, %v3131_v62 }
 0x1e7   : >> { %v16971_v38 = vrot.slane %v11404_v19, 5  ;;  %v1160_v20 = vrot.slane %v1105_v35, 6  ;;  %v18151_v53 = vrot.slane %v18150_v27, 4  ;;  %v1293_v47 = vmul.f32 %v18152_v57, %v8877_v25 }
 0x1e8   : >> { %v832_v8 = vadd.f32 %v787_v21, %v707_v12  ;;  %v11429_v41 = vmul.f32 %v10715_v11, %v8877_v25  ;;  %v3379_v40 = vadd.f32 %v11270_v5, %v3255_v7  ;;  %v16972_v16 = vrot.slane %v11418_v10, 6  ;;  %v18155_v5 = vld [vmem:[#allocation102_spill] sm:$0xff] }
 0x1e9   : >> { %v11423_v61 = vsel %vm894_vm5, %v18151_v53, %v4945_v33  ;;  %v1037_v60 = vsel %vm1019_vm6, %v1035_v3, %v16971_v38  ;;  %v1417_v33 = vmul.f32 %v18152_v57, %v8888_v29  ;;  %v1347_v35 = vrot.slane %v1293_v47, 1 }
 0x1ea   : >> { %18153 = vst [vmem:[#allocation70_spill] sm:$0xff] %v11429_v41  ;;  %v957_v62 = vadd.f32 %v912_v48, %v832_v8  ;;  %v16975_v12 = vrot.slane %v11429_v41, 1  ;;  %v11441_v21 = vmul.f32 %v10715_v11, %v8888_v29  ;;  %v3503_v27 = vadd.f32 %v11275_v54, %v3379_v40 }
 0x1eb   : >> { %v18156_v7 = vrot.slane %v18155_v5, 5  ;;  %v1162_v3 = vsel %vm1144_vm7, %v1160_v20, %v16972_v16  ;;  %v1541_v47 = vmul.f32 %v18152_v57, %v8892_v30  ;;  %v1254_v8 = vmul.f32 %v18152_v57, %v8873_v24 }
 0x1ec   : >> { %18154 = vst [vmem:[#allocation71_spill] sm:$0xff] %v11441_v21  ;;  %v1082_v48 = vadd.f32 %v1037_v60, %v957_v62  ;;  %v1471_v38 = vrot.slane %v1417_v33, 2  ;;  %v11458_v54 = vmul.f32 %v10715_v11, %v8892_v30  ;;  %v3627_v40 = vadd.f32 %v11282_v14, %v3503_v27  ;;  %v18158_v62 = vld [vmem:[#allocation103_spill] sm:$0xff] }
 0x1ed   : >> { %v11447_v53 = vsel %vm1019_vm6, %v18156_v7, %v5069_v56  ;;  %v1665_v5 = vmul.f32 %v18152_v57, %v18054_v50  ;;  %v11466_v20 = vmul.f32 %v10715_v11, %v18054_v50  ;;  %v18157_v60 = vrot.slane %v11308_v28, 6 }
 0x1ee   : >> { %v18159_v7 = vrot.slane %v18158_v62, 6  ;;  %v1207_v16 = vadd.f32 %v1162_v3, %v1082_v48  ;;  %v1349_v14 = vsel %vm519_vm2, %v1347_v35, %v16975_v12  ;;  %v1595_v27 = vrot.slane %v1541_v47, 3  ;;  %v18162_v12 = vld [vmem:[#allocation101_spill] sm:$0xff] }
 0x1ef   : >> { %v3690_v42 = vadd.f32 %v11288_v0, %v3627_v40  ;;  %v16981_v56 = vrot.slane %v11458_v54, 3  ;;  %v1789_v50 = vmul.f32 %v18152_v57, %v18055_v52  ;;  %v11484_v28 = vmul.f32 %v10715_v11, %v18055_v52 }
 0x1f0   : >> { %v11473_v33 = vsel %vm1144_vm7, %v18159_v7, %v18157_v60  ;;  %v1270_v62 = vadd.f32 %v1254_v8, %v1207_v16  ;;  %v1719_v60 = vrot.slane %v1665_v5, 4  ;;  %v16980_v3 = vrot.slane %v11466_v20, 4  ;;  %v18163_v8 = vld [vmem:[#allocation104_spill] sm:$0xff] }
 0x1f1   : >> { %18160 = vst [vmem:[#allocation132_spill] sm:$0xff] %v11484_v28  ;;  %v1913_v48 = vmul.f32 %v18152_v57, %v18056_v39  ;;  %v3814_v35 = vadd.f32 %v11295_v9, %v3690_v42  ;;  %v5380_v0 = vrot.slane %v11361_v63, 1  ;;  %v18161_v47 = vrot.slane %v11441_v21, 2 }
 0x1f2   : >> { %v11496_v7 = vmul.f32 %v10715_v11, %v18056_v39  ;;  %v11500_v16 = vmul.f32 %v11346_v23, %v18162_v12  ;;  %v11504_v5 = vmul.f32 %v11346_v23, %v18163_v8  ;;  %v11508_v9 = vmul.f32 %v11346_v23, %v17950_v13  ;;  %v18164_v39 = vld [vmem:[#allocation65_spill] sm:$0xff] }
 0x1f3   : >> { %v1473_v40 = vsel %vm644_vm3, %v1471_v38, %v18161_v47  ;;  %v1394_v42 = vadd.f32 %v1349_v14, %v1270_v62  ;;  %v3938_v57 = vadd.f32 %v11300_v22, %v3814_v35  ;;  %v1597_v11 = vsel %vm769_vm4, %v1595_v27, %v16981_v56 }
 0x1f4   : >> { %v1843_v63 = vrot.slane %v1789_v50, 5  ;;  %v16982_v38 = vrot.slane %v11484_v28, 5  ;;  %v1721_v21 = vsel %vm894_vm5, %v1719_v60, %v16980_v3  ;;  %v1967_v41 = vrot.slane %v1913_v48, 6 }
 0x1f5   : >> { %v1518_v47 = vadd.f32 %v1473_v40, %v1394_v42  ;;  %v2100_v52 = vmul.f32 %v18164_v39, %v18060_v51  ;;  %v4062_v14 = vadd.f32 %v11313_v17, %v3938_v57  ;;  %v16984_v22 = vrot.slane %v11496_v7, 6 }
 0x1f6   : >> { %v11524_v62 = vmul.f32 %v18092_v49, %v18060_v51  ;;  %v2224_v50 = vmul.f32 %v18164_v39, %v18063_v55  ;;  %v11530_v27 = vmul.f32 %v11346_v23, %v17953_v32  ;;  %v11534_v48 = vmul.f32 %v18092_v49, %v18063_v55 }
 0x1f7   : >> { %v1642_v60 = vadd.f32 %v1597_v11, %v1518_v47  ;;  %v2348_v17 = vmul.f32 %v18164_v39, %v18064_v36  ;;  %v4186_v35 = vadd.f32 %v11318_v31, %v4062_v14  ;;  %v18167_v40 = vrot.slane %v11034_v18, 1 }
 0x1f8   : >> { %18165 = vst [vmem:[#allocation26_spill] sm:$0xff] %v11524_v62  ;;  %18166 = vst [vmem:[#allocation133_spill] sm:$0xff] %v11534_v48  ;;  %v1845_v57 = vsel %vm1019_vm6, %v1843_v63, %v16982_v38  ;;  %v11549_v11 = vmul.f32 %v18092_v49, %v18064_v36  ;;  %v5504_v47 = vrot.slane %v11500_v16, 2  ;;  %v2061_v56 = vmul.f32 %v18164_v39, %v18076_v59 }
 0x1f9   : >> { %v11542_v42 = vsel %vm519_vm2, %v18167_v40, %v5380_v0  ;;  %v1766_v3 = vadd.f32 %v1721_v21, %v1642_v60  ;;  %v2154_v31 = vrot.slane %v2100_v52, 1  ;;  %v4310_v18 = vadd.f32 %v11323_v26, %v4186_v35  ;;  %v18170_v60 = vld [vmem:[#allocation51_spill] sm:$0xff] }
 0x1fa   : >> { %18168 = vst [vmem:[#allocation134_spill] sm:$0xff] %v11549_v11  ;;  %v1969_v0 = vsel %vm1144_vm7, %v1967_v41, %v16984_v22  ;;  %v16989_v14 = vrot.slane %v11524_v62, 1  ;;  %v2278_v63 = vrot.slane %v2224_v50, 2  ;;  %v2402_v28 = vrot.slane %v2348_v17, 3  ;;  %v18172_v50 = vld [vmem:[#allocation52_spill] sm:$0xff]  ;;  %v18174_v22 = vld [vmem:[#allocation59_spill] sm:$0xff] }
 0x1fb   : >> { %v1890_v40 = vadd.f32 %v1845_v57, %v1766_v3  ;;  %v2472_v21 = vmul.f32 %v18164_v39, %v18066_v34  ;;  %v4434_v16 = vadd.f32 %v11328_v44, %v4310_v18  ;;  %v11566_v26 = vmul.f32 %v18092_v49, %v18066_v34 }
 0x1fc   : >> { %v2596_v41 = vmul.f32 %v18164_v39, %v18170_v60  ;;  %v11572_v3 = vmul.f32 %v18092_v49, %v18170_v60  ;;  %v2720_v17 = vmul.f32 %v18164_v39, %v18172_v50  ;;  %v11578_v44 = vmul.f32 %v18092_v49, %v18172_v50 }
 0x1fd   : >> { %18169 = vst [vmem:[#allocation135_spill] sm:$0xff] %v11566_v26  ;;  %v2014_v35 = vadd.f32 %v1969_v0, %v1890_v40  ;;  %v4497_v57 = vadd.f32 %v11332_v2, %v4434_v16  ;;  %v5628_v18 = vrot.slane %v11504_v5, 3  ;;  %v11584_v52 = vmul.f32 %v18174_v22, %v11346_v23 }
 0x1fe   : >> { %18171 = vst [vmem:[#allocation85_spill] sm:$0xff] %v11572_v3  ;;  %18173 = vst [vmem:[#allocation136_spill] sm:$0xff] %v11578_v44  ;;  %v2156_v0 = vsel %vm519_vm2, %v2154_v31, %v16989_v14  ;;  %v5752_v40 = vrot.slane %v11508_v9, 4  ;;  %v18175_v39 = vrot.slane %v11534_v48, 2  ;;  %v2526_v59 = vrot.slane %v2472_v21, 4 }
 0x1ff   : >> { %v2077_v38 = vadd.f32 %v2061_v56, %v2014_v35  ;;  %v4621_v2 = vadd.f32 %v11337_v43, %v4497_v57  ;;  %v18176_v5 = vrot.slane %v11549_v11, 3  ;;  %v16990_v22 = vrot.slane %v11566_v26, 4  ;;  %v18179_v35 = vld [vmem:[#allocation57_spill] sm:$0xff]  ;;  %v18180_v57 = vld [vmem:[#allocation118_spill] sm:$0xff] }
 0x200   : >> { %v2280_v49 = vsel %vm644_vm3, %v2278_v63, %v18175_v39  ;;  %v2650_v23 = vrot.slane %v2596_v41, 5  ;;  %v2774_v14 = vrot.slane %v2720_v17, 6  ;;  %v18177_v63 = vld [vmem:[#allocation87_spill] sm:$0xff]  ;;  %v11605_v43 = vmul.f32 %v18116_v45, %v17965_v15  ;;  %v18183_v39 = vld [vmem:[#allocation130_spill] sm:$0xff] }
 0x201   : >> { %v2404_v16 = vsel %vm769_vm4, %v2402_v28, %v18176_v5  ;;  %v2201_v62 = vadd.f32 %v2156_v0, %v2077_v38  ;;  %v4745_v9 = vadd.f32 %v11357_v46, %v4621_v2  ;;  %v2907_v21 = vmul.f32 %v18177_v63, %v17965_v15  ;;  %v18184_v56 = vld [vmem:[#allocation58_spill] sm:$0xff] }
 0x202   : >> { %18178 = vst [vmem:[#allocation137_spill] sm:$0xff] %v11605_v43  ;;  %v3031_v28 = vmul.f32 %v18177_v63, %v18179_v35  ;;  %v18181_v41 = vrot.slane %v18180_v57, 2  ;;  %v5876_v17 = vrot.slane %v11530_v27, 5  ;;  %v11615_v46 = vmul.f32 %v18116_v45, %v18179_v35 }
 0x203   : >> { %v2325_v0 = vadd.f32 %v2280_v49, %v2201_v62  ;;  %v4869_v2 = vadd.f32 %v18183_v39, %v4745_v9  ;;  %v2528_v5 = vsel %vm894_vm5, %v2526_v59, %v16990_v22  ;;  %v3155_v31 = vmul.f32 %v18177_v63, %v18184_v56  ;;  %v18197_v22 = vld [vmem:[#allocation120_spill] sm:$0xff] }
 0x204   : >> { %v5505_v38 = vsel %vm644_vm3, %v18181_v41, %v5504_v47  ;;  %18182 = vst [vmem:[#allocation138_spill] sm:$0xff] %v11615_v46  ;;  %v11625_v57 = vmul.f32 %v18116_v45, %v18184_v56  ;;  %v18186_v47 = vrot.slane %v11572_v3, 5  ;;  %v18187_v9 = vrot.slane %v11578_v44, 6  ;;  %v18188_v56 = vld [vmem:[#allocation61_spill] sm:$0xff] }
 0x205   : >> { %v2449_v62 = vadd.f32 %v2404_v16, %v2325_v0  ;;  %v4993_v59 = vadd.f32 %v11423_v61, %v4869_v2  ;;  %v2961_v39 = vrot.slane %v2907_v21, 1  ;;  %v3085_v26 = vrot.slane %v3031_v28, 2  ;;  %v18190_v61 = vld [vmem:[#allocation63_spill] sm:$0xff]  ;;  %v18191_v2 = vld [vmem:[#allocation110_spill] sm:$0xff] }
 0x206   : >> { %18185 = vst [vmem:[#allocation139_spill] sm:$0xff] %v11625_v57  ;;  %v2652_v49 = vsel %vm1019_vm6, %v2650_v23, %v18186_v47  ;;  %v2776_v41 = vsel %vm1144_vm7, %v2774_v14, %v18187_v9  ;;  %v3279_v16 = vmul.f32 %v18177_v63, %v18188_v56  ;;  %v11641_v0 = vmul.f32 %v18116_v45, %v18188_v56  ;;  %v18193_v9 = vld [vmem:[#allocation56_spill] sm:$0xff] }
 0x207   : >> { %v2573_v11 = vadd.f32 %v2528_v5, %v2449_v62  ;;  %v5117_v23 = vadd.f32 %v11447_v53, %v4993_v59  ;;  %v3209_v47 = vrot.slane %v3155_v31, 3  ;;  %v3403_v21 = vmul.f32 %v18177_v63, %v18190_v61  ;;  %v18195_v31 = vld [vmem:[#allocation112_spill] sm:$0xff] }
 0x208   : >> { %18189 = vst [vmem:[#allocation140_spill] sm:$0xff] %v11641_v0  ;;  %v18192_v28 = vrot.slane %v18191_v2, 3  ;;  %v2868_v27 = vmul.f32 %v18177_v63, %v18193_v9  ;;  %v11654_v48 = vmul.f32 %v18116_v45, %v18190_v61  ;;  %v18196_v59 = vrot.slane %v18195_v31, 4 }
 0x209   : >> { %v2697_v62 = vadd.f32 %v2652_v49, %v2573_v11  ;;  %v5241_v53 = vadd.f32 %v11473_v33, %v5117_v23  ;;  %v18198_v44 = vrot.slane %v18197_v22, 5  ;;  %v3333_v3 = vrot.slane %v3279_v16, 4  ;;  %v18201_v23 = vld [vmem:[#allocation125_spill] sm:$0xff]  ;;  %v18206_v16 = vld [vmem:[#allocation111_spill] sm:$0xff] }
 0x20a   : >> { %v5629_v5 = vsel %vm769_vm4, %v18192_v28, %v5628_v18  ;;  %18194 = vst [vmem:[#allocation27_spill] sm:$0xff] %v11654_v48  ;;  %v5753_v14 = vsel %vm894_vm5, %v18196_v59, %v5752_v40  ;;  %v18199_v18 = vrot.slane %v11605_v43, 1  ;;  %v18200_v28 = vrot.slane %v11615_v46, 2 }
 0x20b   : >> { %v5877_v2 = vsel %vm1019_vm6, %v18198_v44, %v5876_v17  ;;  %v2821_v49 = vadd.f32 %v2776_v41, %v2697_v62  ;;  %v17005_v33 = vrot.slane %v11641_v0, 4  ;;  %v5304_v31 = vadd.f32 %v18201_v23, %v5241_v53  ;;  %v18203_v44 = vld [vmem:[#allocation66_spill] sm:$0xff] }
 0x20c   : >> { %v2963_v11 = vsel %vm519_vm2, %v2961_v39, %v18199_v18  ;;  %v3087_v9 = vsel %vm644_vm3, %v3085_v26, %v18200_v28  ;;  %v18202_v40 = vrot.slane %v11625_v57, 3  ;;  %v3457_v59 = vrot.slane %v3403_v21, 5  ;;  %v18205_v26 = vld [vmem:[#allocation67_spill] sm:$0xff]  ;;  %v18207_v18 = vld [vmem:[#allocation113_spill] sm:$0xff] }
 0x20d   : >> { %v3527_v17 = vmul.f32 %v18177_v63, %v18203_v44  ;;  %v2884_v43 = vadd.f32 %v2868_v27, %v2821_v49  ;;  %v11679_v39 = vmul.f32 %v18116_v45, %v18203_v44  ;;  %v3714_v62 = vmul.f32 %v18206_v16, %v18205_v26  ;;  %v18211_v49 = vld [vmem:[#allocation74_spill] sm:$0xff] }
 0x20e   : >> { %v3211_v22 = vsel %vm769_vm4, %v3209_v47, %v18202_v40  ;;  %v5428_v53 = vadd.f32 %v11542_v42, %v5304_v31  ;;  %v11686_v28 = vmul.f32 %v18207_v18, %v18205_v26  ;;  %v18209_v47 = vld [vmem:[#allocation69_spill] sm:$0xff]  ;;  %v3962_v45 = vmul.f32 %v18206_v16, %v18211_v49  ;;  %v18213_v42 = vld [vmem:[#allocation75_spill] sm:$0xff] }
 0x20f   : >> { %18204 = vst [vmem:[#allocation141_spill] sm:$0xff] %v11679_v39  ;;  %v3838_v21 = vmul.f32 %v18206_v16, %v18209_v47  ;;  %v11692_v63 = vmul.f32 %v18207_v18, %v18209_v47  ;;  %v3008_v27 = vadd.f32 %v2963_v11, %v2884_v43  ;;  %v11698_v23 = vmul.f32 %v18207_v18, %v18211_v49 }
 0x210   : >> { %18208 = vst [vmem:[#allocation142_spill] sm:$0xff] %v11686_v28  ;;  %v4086_v31 = vmul.f32 %v18206_v16, %v18213_v42  ;;  %v5552_v40 = vadd.f32 %v5505_v38, %v5428_v53  ;;  %v3335_v41 = vsel %vm894_vm5, %v3333_v3, %v17005_v33  ;;  %v3581_v57 = vrot.slane %v3527_v17, 6 }
 0x211   : >> { %18210 = vst [vmem:[#allocation143_spill] sm:$0xff] %v11692_v63  ;;  %18212 = vst [vmem:[#allocation144_spill] sm:$0xff] %v11698_v23  ;;  %v11707_v47 = vmul.f32 %v18207_v18, %v18213_v42  ;;  %v3132_v43 = vadd.f32 %v3087_v9, %v3008_v27  ;;  %v18215_v11 = vrot.slane %v11654_v48, 5  ;;  %v17010_v49 = vrot.slane %v11679_v39, 6  ;;  %v18216_v27 = vld [vmem:[#allocation78_spill] sm:$0xff]  ;;  %v18243_v48 = vld [vmem:[#allocation84_spill] sm:$0xff] }
 0x212   : >> { %v3768_v46 = vrot.slane %v3714_v62, 1  ;;  %v5676_v44 = vadd.f32 %v5629_v5, %v5552_v40  ;;  %v17009_v38 = vrot.slane %v11686_v28, 1  ;;  %v3892_v53 = vrot.slane %v3838_v21, 2  ;;  %v18219_v21 = vld [vmem:[#allocation121_spill] sm:$0xff] }
 0x213   : >> { %18214 = vst [vmem:[#allocation145_spill] sm:$0xff] %v11707_v47  ;;  %v3459_v26 = vsel %vm1019_vm6, %v3457_v59, %v18215_v11  ;;  %v17008_v0 = vrot.slane %v11692_v63, 2  ;;  %v3256_v3 = vadd.f32 %v3211_v22, %v3132_v43  ;;  %v4016_v17 = vrot.slane %v3962_v45, 3  ;;  %v18221_v43 = vld [vmem:[#allocation81_spill] sm:$0xff]  ;;  %v18222_v11 = vld [vmem:[#allocation68_spill] sm:$0xff] }
 0x214   : >> { %v4140_v42 = vrot.slane %v4086_v31, 4  ;;  %v5800_v61 = vadd.f32 %v5753_v14, %v5676_v44  ;;  %v4210_v59 = vmul.f32 %v18206_v16, %v18216_v27  ;;  %v11721_v62 = vmul.f32 %v18207_v18, %v18216_v27 }
 0x215   : >> { %v18218_v5 = vrot.slane %v11584_v52, 6  ;;  %v18220_v40 = vrot.slane %v18219_v21, 6  ;;  %v3380_v45 = vadd.f32 %v3335_v41, %v3256_v3  ;;  %v4334_v31 = vmul.f32 %v18206_v16, %v18221_v43 }
 0x216   : >> { %18217 = vst [vmem:[#allocation28_spill] sm:$0xff] %v11721_v62  ;;  %v5924_v14 = vadd.f32 %v5877_v2, %v5800_v61  ;;  %v3583_v44 = vsel %vm1144_vm7, %v3581_v57, %v17010_v49  ;;  %v3675_v9 = vmul.f32 %v18206_v16, %v18222_v11  ;;  %v3770_v52 = vsel %vm519_vm2, %v3768_v46, %v17009_v38  ;;  %v18228_v38 = vld [vmem:[#allocation107_spill] sm:$0xff] }
 0x217   : >> { %v6001_v22 = vsel %vm1144_vm7, %v18220_v40, %v18218_v5  ;;  %v3504_v33 = vadd.f32 %v3459_v26, %v3380_v45  ;;  %v3894_v41 = vsel %vm644_vm3, %v3892_v53, %v17008_v0  ;;  %v18223_v3 = vrot.slane %v11698_v23, 3  ;;  %v18226_v45 = vld [vmem:[#allocation82_spill] sm:$0xff]  ;;  %v18238_v23 = vld [vmem:[#allocation93_spill] sm:$0xff]  ;;  %v18240_v11 = vld [vmem:[#allocation95_spill] sm:$0xff] }
 0x218   : >> { %v11746_v2 = vmul.f32 %v18207_v18, %v18221_v43  ;;  %v6048_v57 = vadd.f32 %v6001_v22, %v5924_v14  ;;  %v18225_v16 = vrot.slane %v11707_v47, 4  ;;  %v4264_v21 = vrot.slane %v4210_v59, 5  ;;  %v18227_v53 = vld [vmem:[#allocation106_spill] sm:$0xff]  ;;  %v18234_v59 = vld [vmem:[#allocation88_spill] sm:$0xff] }
 0x219   : >> { %v4018_v61 = vsel %vm769_vm4, %v4016_v17, %v18223_v3  ;;  %v3628_v26 = vadd.f32 %v3583_v44, %v3504_v33  ;;  %v4388_v40 = vrot.slane %v4334_v31, 6  ;;  %v4521_v0 = vmul.f32 %v18227_v53, %v18226_v45  ;;  %v18230_v3 = vld [vmem:[#allocation126_spill] sm:$0xff] }
 0x21a   : >> { %18224 = vst [vmem:[#allocation146_spill] sm:$0xff] %v11746_v2  ;;  %v4142_v5 = vsel %vm894_vm5, %v4140_v42, %v18225_v16  ;;  %v11756_v17 = vmul.f32 %v18228_v38, %v18226_v45  ;;  %v11759_v18 = vadd.f32 %v18230_v3, %v6048_v57  ;;  %v18232_v22 = vld [vmem:[#allocation86_spill] sm:$0xff]  ;;  %v4769_v33 = vmul.f32 %v18227_v53, %v18234_v59 }
 0x21b   : >> { %v4645_v14 = vmul.f32 %v18227_v53, %v18232_v22  ;;  %v11765_v42 = vmul.f32 %v18228_v38, %v18232_v22  ;;  %v3691_v31 = vadd.f32 %v3675_v9, %v3628_v26  ;;  %v11771_v44 = vmul.f32 %v18228_v38, %v18234_v59  ;;  %v18236_v16 = vld [vmem:[#allocation90_spill] sm:$0xff] }
 0x21c   : >> { %18229 = vst [vmem:[#allocation147_spill] sm:$0xff] %v11756_v17  ;;  %18231 = vst [vmem:[#allocation22_spill] sm:$0xff] %v11759_v18  ;;  %v4893_v49 = vmul.f32 %v18227_v53, %v18236_v16  ;;  %v11777_v57 = vmul.f32 %v18228_v38, %v18236_v16  ;;  %v6094_v46 = vsel %vm273_vm0, %v11759_v18, 0.0  ;;  %v5017_v63 = vmul.f32 %v18227_v53, %v18238_v23 }
 0x21d   : >> { %18233 = vst [vmem:[#allocation148_spill] sm:$0xff] %v11765_v42  ;;  %18235 = vst [vmem:[#allocation149_spill] sm:$0xff] %v11771_v44  ;;  %v11786_v9 = vmul.f32 %v18228_v38, %v18238_v23  ;;  %6095 = vadd.xlane.f32.xlu1 %v6094_v46  ;;  %v3815_v26 = vadd.f32 %v3770_v52, %v3691_v31  ;;  %v4575_v28 = vrot.slane %v4521_v0, 1  ;;  %v4699_v18 = vrot.slane %v4645_v14, 2  ;;  %v11805_v14 = vld [vmem:[%s8792_s26 + $0xd8] sm:$0xff] }
 0x21e   : >> { %18237 = vst [vmem:[#allocation150_spill] sm:$0xff] %v11777_v57  ;;  %v5141_v16 = vmul.f32 %v18227_v53, %v18240_v11  ;;  %v11792_v39 = vmul.f32 %v18228_v38, %v18240_v11  ;;  %v4823_v22 = vrot.slane %v4769_v33, 3  ;;  %v4947_v52 = vrot.slane %v4893_v49, 4  ;;  %18244 = vst [vmem:[#allocation24_spill] sm:$0xff] %v11805_v14  ;;  %v18246_v49 = vld [vmem:[#allocation98_spill] sm:$0xff] }
 0x21f   : >> { %18239 = vst [vmem:[#allocation151_spill] sm:$0xff] %v11786_v9  ;;  %v3939_v23 = vadd.f32 %v3894_v41, %v3815_v26  ;;  %v18242_v31 = vrot.slane %v11721_v62, 5  ;;  %v4482_v38 = vmul.f32 %v18227_v53, %v18243_v48  ;;  %v5071_v11 = vrot.slane %v5017_v63, 5  ;;  %v11809_v26 = vld [vmem:[%s8792_s26 + $0xe0] sm:$0xff] }
 0x220   : >> { %18241 = vst [vmem:[#allocation23_spill] sm:$0xff] %v11792_v39  ;;  %v5195_v33 = vrot.slane %v5141_v16, 6  ;;  %18245 = vst [vmem:[#allocation35_spill] sm:$0xff] %v11809_v26  ;;  %v5328_v0 = vmul.f32 %v11805_v14, %v18246_v49  ;;  %v18247_v46 = vrot.slane %v11746_v2, 6  ;;  %v18248_v53 = vrot.slane %v11756_v17, 1  ;;  %v18252_v17 = vld [vmem:[#allocation100_spill] sm:$0xff] }
 0x221   : >> { %v4266_v45 = vsel %vm1019_vm6, %v4264_v21, %v18242_v31  ;;  %v4063_v59 = vadd.f32 %v4018_v61, %v3939_v23  ;;  %v18249_v31 = vrot.slane %v11765_v42, 2  ;;  %v11824_v61 = vmul.f32 %v11809_v26, %v18246_v49  ;;  %v18256_v49 = vld [vmem:[#allocation17_spill] sm:$0xff]  ;;  %v18260_v42 = vld [vmem:[#allocation18_spill] sm:$0xff] }
 0x222   : >> { %v4390_v21 = vsel %vm1144_vm7, %v4388_v40, %v18247_v46  ;;  %v4577_v63 = vsel %vm519_vm2, %v4575_v28, %v18248_v53  ;;  %v18250_v41 = vrot.slane %v11771_v44, 3  ;;  %v18251_v40 = vrot.slane %v11777_v57, 4  ;;  %v18259_v44 = vld [vmem:[#allocation16_spill] sm:$0xff] }
 0x223   : >> { %v4701_v23 = vsel %vm644_vm3, %v4699_v18, %v18249_v31  ;;  %v4187_v16 = vadd.f32 %v4142_v5, %v4063_v59  ;;  %v11834_v28 = vmul.f32 %v11805_v14, %v18252_v17  ;;  %v18253_v18 = vrot.slane %v11786_v9, 5 }
 0x224   : >> { %v4825_v47 = vsel %vm769_vm4, %v4823_v22, %v18250_v41  ;;  %v4949_v46 = vsel %vm894_vm5, %v4947_v52, %v18251_v40  ;;  %v5452_v5 = vmul.f32 %v11805_v14, %v18162_v12  ;;  %v11845_v59 = vmul.f32 %v11809_v26, %v18162_v12  ;;  %v8360_v12 = vld [vmem:[%s8792_s26 + $0x50] sm:$0xff] }
 0x225   : >> { %v11839_v53 = vsel %vm1019_vm6, %v5071_v11, %v18253_v18  ;;  %v5576_v22 = vmul.f32 %v11805_v14, %v18163_v8  ;;  %v4311_v52 = vadd.f32 %v4266_v45, %v4187_v16  ;;  %v18255_v41 = vrot.slane %v11792_v39, 6  ;;  %v18257_v11 = vld [vmem:[#allocation119_spill] sm:$0xff] }
 0x226   : >> { %18254 = vst [vmem:[#allocation40_spill] sm:$0xff] %v11845_v59  ;;  %v5382_v40 = vrot.slane %v5328_v0, 1  ;;  %v482_v18 = vmul.f32 %v18257_v11, %v18256_v49  ;;  %v11859_v57 = vmul.f32 %v11809_v26, %v18163_v8  ;;  %v442_v17 = vmul.f32 %v8360_v12, %v18259_v44  ;;  %v18262_v44 = vld [vmem:[#allocation128_spill] sm:$0xff] }
 0x227   : >> { %v11852_v31 = vsel %vm1144_vm7, %v5195_v33, %v18255_v41  ;;  %v607_v45 = vmul.f32 %v18257_v11, %v18260_v42  ;;  %v4435_v16 = vadd.f32 %v4390_v21, %v4311_v52  ;;  %v18261_v33 = vld [vmem:[#allocation19_spill] sm:$0xff]  ;;  %v857_v41 = vmul.f32 %v18257_v11, %v17935_v1 }
 0x228   : >> { %18258 = vst [vmem:[#allocation41_spill] sm:$0xff] %v11859_v57  ;;  %v538_v39 = vrot.slane %v482_v18, 1  ;;  %v732_v0 = vmul.f32 %v18257_v11, %v18261_v33  ;;  %v5506_v49 = vrot.slane %v5452_v5, 2  ;;  %v982_v8 = vmul.f32 %v18257_v11, %v17936_v58 }
 0x229   : >> { %v663_v9 = vrot.slane %v607_v45, 2  ;;  %v1107_v48 = vmul.f32 %v18257_v11, %v17937_v37  ;;  %v4498_v12 = vadd.f32 %v4482_v38, %v4435_v16  ;;  %v18263_v2 = vrot.slane %v18262_v44, 1 }
 0x22a   : >> { %v788_v52 = vrot.slane %v732_v0, 3  ;;  %v913_v18 = vrot.slane %v857_v41, 4  ;;  %v17038_v33 = vrot.slane %v11845_v59, 2  ;;  %v5630_v42 = vrot.slane %v5576_v22, 3 }
 0x22b   : >> { %v539_v21 = vsel %vm519_vm2, %v18263_v2, %v538_v39  ;;  %v18264_v5 = vrot.slane %v11376_v6, 2  ;;  %v4622_v1 = vadd.f32 %v4577_v63, %v4498_v12  ;;  %v17037_v58 = vrot.slane %v11859_v57, 3  ;;  %v18268_v63 = vld [vmem:[#allocation131_spill] sm:$0xff] }
 0x22c   : >> { %v583_v62 = vadd.f32 %v539_v21, %v442_v17  ;;  %v18265_v11 = vrot.slane %v11382_v4, 3  ;;  %v1038_v44 = vrot.slane %v982_v8, 5  ;;  %v18266_v39 = vrot.slane %v11824_v61, 1  ;;  %v18270_v8 = vld [vmem:[#allocation122_spill] sm:$0xff] }
 0x22d   : >> { %v664_v45 = vsel %vm644_vm3, %v18264_v5, %v663_v9  ;;  %v5700_v22 = vmul.f32 %v11805_v14, %v17950_v13  ;;  %v11891_v6 = vmul.f32 %v11809_v26, %v17950_v13  ;;  %v4746_v9 = vadd.f32 %v4701_v23, %v4622_v1 }
 0x22e   : >> { %v789_v38 = vsel %vm769_vm4, %v18265_v11, %v788_v52  ;;  %v5384_v2 = vsel %vm519_vm2, %v5382_v40, %v18266_v39  ;;  %v708_v17 = vadd.f32 %v664_v45, %v583_v62  ;;  %v18269_v16 = vrot.slane %v18268_v63, 4  ;;  %v18275_v63 = vld [vmem:[#allocation36_spill] sm:$0xff] }
 0x22f   : >> { %18267 = vst [vmem:[#allocation45_spill] sm:$0xff] %v11891_v6  ;;  %v1163_v0 = vrot.slane %v1107_v48, 6  ;;  %v1295_v41 = vmul.f32 %v18270_v8, %v8877_v25  ;;  %v5508_v40 = vsel %vm644_vm3, %v5506_v49, %v17038_v33  ;;  %v5824_v12 = vmul.f32 %v11805_v14, %v17953_v32 }
 0x230   : >> { %v914_v4 = vsel %vm894_vm5, %v18269_v16, %v913_v18  ;;  %v11905_v21 = vmul.f32 %v11809_v26, %v17953_v32  ;;  %v833_v1 = vadd.f32 %v789_v38, %v708_v17  ;;  %v4870_v62 = vadd.f32 %v4825_v47, %v4746_v9  ;;  %v11921_v47 = vld [vmem:[%s16584_s1 + $0x30] ss:$0 sm:$0xff]  ;;  %v8362_v9 = vld [vmem:[%s8792_s26 + $0x68] sm:$0xff] }
 0x231   : >> { %v5632_v48 = vsel %vm769_vm4, %v5630_v42, %v17037_v58  ;;  %v18272_v23 = vrot.slane %v11404_v19, 5  ;;  %v1419_v49 = vmul.f32 %v18270_v8, %v8888_v29  ;;  %v5754_v18 = vrot.slane %v5700_v22, 4 }
 0x232   : >> { %18271 = vst [vmem:[#allocation47_spill] sm:$0xff] %v11905_v21  ;;  %v17043_v5 = vrot.slane %v11891_v6, 4  ;;  %v958_v45 = vadd.f32 %v914_v4, %v833_v1  ;;  %v1543_v11 = vmul.f32 %v18270_v8, %v8892_v30  ;;  %v4994_v38 = vadd.f32 %v4949_v46, %v4870_v62  ;;  %v18276_v62 = vld [vmem:[#allocation37_spill] sm:$0xff] }
 0x233   : >> { %v1039_v52 = vsel %vm1019_vm6, %v18272_v23, %v1038_v44  ;;  %v5948_v19 = vmul.f32 %v11921_v47, %v11805_v14  ;;  %v18273_v42 = vrot.slane %v11418_v10, 6  ;;  %v1350_v39 = vrot.slane %v1295_v41, 1  ;;  %v18277_v23 = vld [vmem:[#allocation39_spill] sm:$0xff] }
 0x234   : >> { %v11930_v22 = vmul.f32 %v11921_v47, %v11809_v26  ;;  %v1083_v17 = vadd.f32 %v1039_v52, %v958_v45  ;;  %v1255_v46 = vmul.f32 %v8362_v9, %v8873_v24  ;;  %v1667_v16 = vmul.f32 %v18270_v8, %v18275_v63 }
 0x235   : >> { %v1164_v44 = vsel %vm1144_vm7, %v18273_v42, %v1163_v0  ;;  %v5118_v4 = vadd.f32 %v11839_v53, %v4994_v38  ;;  %v1474_v1 = vrot.slane %v1419_v49, 2  ;;  %v1791_v10 = vmul.f32 %v18270_v8, %v18276_v62  ;;  %v18278_v53 = vld [vmem:[#allocation70_spill] sm:$0xff] }
 0x236   : >> { %18274 = vst [vmem:[#allocation49_spill] sm:$0xff] %v11930_v22  ;;  %v1915_v0 = vmul.f32 %v18270_v8, %v18277_v23  ;;  %v5878_v41 = vrot.slane %v5824_v12, 5  ;;  %v1208_v58 = vadd.f32 %v1164_v44, %v1083_v17  ;;  %v1598_v52 = vrot.slane %v1543_v11, 3  ;;  %v18280_v12 = vld [vmem:[#allocation123_spill] sm:$0xff] }
 0x237   : >> { %v5242_v45 = vadd.f32 %v11852_v31, %v5118_v4  ;;  %v5756_v9 = vsel %vm894_vm5, %v5754_v18, %v17043_v5  ;;  %v6002_v33 = vrot.slane %v5948_v19, 6  ;;  %v18279_v49 = vrot.slane %v18278_v53, 1  ;;  %v18281_v44 = vld [vmem:[#allocation71_spill] sm:$0xff] }
 0x238   : >> { %v17042_v14 = vrot.slane %v11930_v22, 6  ;;  %v1271_v57 = vadd.f32 %v1255_v46, %v1208_v58  ;;  %v1722_v8 = vrot.slane %v1667_v16, 4  ;;  %v2102_v42 = vmul.f32 %v18280_v12, %v18060_v51  ;;  %v18301_v22 = vld [vmem:[#allocation85_spill] sm:$0xff] }
 0x239   : >> { %v1351_v38 = vsel %vm519_vm2, %v18279_v49, %v1350_v39  ;;  %v5305_v11 = vadd.f32 %v11834_v28, %v5242_v45  ;;  %v18282_v31 = vrot.slane %v18281_v44, 2  ;;  %v1846_v4 = vrot.slane %v1791_v10, 5 }
 0x23a   : >> { %v1970_v18 = vrot.slane %v1915_v0, 6  ;;  %v18283_v19 = vrot.slane %v11905_v21, 5  ;;  %v1395_v39 = vadd.f32 %v1351_v38, %v1271_v57  ;;  %v18284_v49 = vrot.slane %v11458_v54, 3  ;;  %v18286_v38 = vld [vmem:[#allocation132_spill] sm:$0xff] }
 0x23b   : >> { %v1475_v17 = vsel %vm644_vm3, %v18282_v31, %v1474_v1  ;;  %v2226_v46 = vmul.f32 %v18280_v12, %v18063_v55  ;;  %v5429_v16 = vadd.f32 %v5384_v2, %v5305_v11  ;;  %v2350_v28 = vmul.f32 %v18280_v12, %v18064_v36 }
 0x23c   : >> { %v5880_v53 = vsel %vm1019_vm6, %v5878_v41, %v18283_v19  ;;  %v1599_v58 = vsel %vm769_vm4, %v18284_v49, %v1598_v52  ;;  %v2474_v1 = vmul.f32 %v18280_v12, %v18066_v34  ;;  %v2598_v10 = vmul.f32 %v18280_v12, %v18170_v60 }
 0x23d   : >> { %v6004_v57 = vsel %vm1144_vm7, %v6002_v33, %v17042_v14  ;;  %v1519_v54 = vadd.f32 %v1475_v17, %v1395_v39  ;;  %v2157_v0 = vrot.slane %v2102_v42, 1  ;;  %v2722_v41 = vmul.f32 %v18280_v12, %v18172_v50  ;;  %v18289_v42 = vld [vmem:[#allocation25_spill] sm:$0xff] }
 0x23e   : >> { %v5553_v2 = vadd.f32 %v5508_v40, %v5429_v16  ;;  %v18285_v52 = vrot.slane %v11466_v20, 4  ;;  %v18287_v11 = vrot.slane %v18286_v38, 5  ;;  %v18288_v31 = vrot.slane %v11496_v7, 6  ;;  %v18290_v38 = vld [vmem:[#allocation43_spill] sm:$0xff] }
 0x23f   : >> { %v1643_v33 = vadd.f32 %v1599_v58, %v1519_v54  ;;  %v2281_v17 = vrot.slane %v2226_v46, 2  ;;  %v2909_v39 = vmul.f32 %v18289_v42, %v17965_v15  ;;  %v3033_v40 = vmul.f32 %v18289_v42, %v18179_v35  ;;  %v18293_v54 = vld [vmem:[#allocation58_spill] sm:$0xff] }
 0x240   : >> { %v1723_v45 = vsel %vm894_vm5, %v18285_v52, %v1722_v8  ;;  %v1847_v44 = vsel %vm1019_vm6, %v18287_v11, %v1846_v4  ;;  %v1971_v19 = vsel %vm1144_vm7, %v18288_v31, %v1970_v18  ;;  %v5677_v12 = vadd.f32 %v5632_v48, %v5553_v2  ;;  %v8363_v52 = vld [vmem:[%s8792_s26 + $0x80] sm:$0xff]  ;;  %v18291_v11 = vld [vmem:[#allocation26_spill] sm:$0xff]  ;;  %v18295_v2 = vld [vmem:[#allocation133_spill] sm:$0xff] }
 0x241   : >> { %v2405_v20 = vrot.slane %v2350_v28, 3  ;;  %v2529_v49 = vrot.slane %v2474_v1, 4  ;;  %v2653_v8 = vrot.slane %v2598_v10, 5  ;;  %v1767_v16 = vadd.f32 %v1723_v45, %v1643_v33  ;;  %v18294_v28 = vld [vmem:[#allocation63_spill] sm:$0xff] }
 0x242   : >> { %v2062_v4 = vmul.f32 %v8363_v52, %v18290_v38  ;;  %v18292_v7 = vrot.slane %v18291_v11, 1  ;;  %v2777_v58 = vrot.slane %v2722_v41, 6  ;;  %v5801_v46 = vadd.f32 %v5756_v9, %v5677_v12  ;;  %v18297_v41 = vld [vmem:[#allocation134_spill] sm:$0xff] }
 0x243   : >> { %v3157_v31 = vmul.f32 %v18289_v42, %v18293_v54  ;;  %v3281_v48 = vmul.f32 %v18289_v42, %v18188_v56  ;;  %v3405_v1 = vmul.f32 %v18289_v42, %v18294_v28  ;;  %v1891_v10 = vadd.f32 %v1847_v44, %v1767_v16 }
 0x244   : >> { %v2158_v18 = vsel %vm519_vm2, %v18292_v7, %v2157_v0  ;;  %v18296_v45 = vrot.slane %v18295_v2, 2  ;;  %v2964_v52 = vrot.slane %v2909_v39, 1  ;;  %v3088_v0 = vrot.slane %v3033_v40, 2  ;;  %v18299_v7 = vld [vmem:[#allocation135_spill] sm:$0xff]  ;;  %v18303_v2 = vld [vmem:[#allocation136_spill] sm:$0xff]  ;;  %v8364_v39 = vld [vmem:[%s8792_s26 + $0x98] sm:$0xff] }
 0x245   : >> { %v5925_v11 = vadd.f32 %v5880_v53, %v5801_v46  ;;  %v18298_v9 = vrot.slane %v18297_v41, 3  ;;  %v18300_v14 = vrot.slane %v18299_v7, 4  ;;  %v18302_v21 = vrot.slane %v18301_v22, 5  ;;  %v18305_v40 = vld [vmem:[#allocation56_spill] sm:$0xff]  ;;  %v18306_v46 = vld [vmem:[#allocation66_spill] sm:$0xff]  ;;  %v18312_v7 = vld [vmem:[#allocation67_spill] sm:$0xff] }
 0x246   : >> { %v2282_v33 = vsel %vm644_vm3, %v18296_v45, %v2281_v17  ;;  %v2015_v16 = vadd.f32 %v1971_v19, %v1891_v10  ;;  %v18304_v6 = vrot.slane %v18303_v2, 6  ;;  %v12016_v53 = vmul.f32 %v8364_v39, %v18305_v40 }
 0x247   : >> { %v2406_v12 = vsel %vm769_vm4, %v18298_v9, %v2405_v20  ;;  %v2530_v5 = vsel %vm894_vm5, %v18300_v14, %v2529_v49  ;;  %v2654_v44 = vsel %vm1019_vm6, %v18302_v21, %v2653_v8  ;;  %v3529_v20 = vmul.f32 %v18289_v42, %v18306_v46  ;;  %v12021_v49 = vld [vmem:[%s8792_s26 + $0xb8] sm:$0xff]  ;;  %v18308_v21 = vld [vmem:[#allocation137_spill] sm:$0xff] }
 0x248   : >> { %v2778_v17 = vsel %vm1144_vm7, %v18304_v6, %v2777_v58  ;;  %v6049_v45 = vadd.f32 %v6004_v57, %v5925_v11  ;;  %v3212_v41 = vrot.slane %v3157_v31, 3  ;;  %v3336_v9 = vrot.slane %v3281_v48, 4  ;;  %18307 = vst [vmem:[#allocation54_spill] sm:$0xff] %v12021_v49  ;;  %v18310_v6 = vld [vmem:[#allocation138_spill] sm:$0xff]  ;;  %v18314_v31 = vld [vmem:[#allocation69_spill] sm:$0xff]  ;;  %v18316_v11 = vld [vmem:[#allocation75_spill] sm:$0xff] }
 0x249   : >> { %v3460_v14 = vrot.slane %v3405_v1, 5  ;;  %v2078_v22 = vadd.f32 %v2062_v4, %v2015_v16  ;;  %v18309_v19 = vrot.slane %v18308_v21, 1  ;;  %v18311_v58 = vrot.slane %v18310_v6, 2  ;;  %v18315_v4 = vld [vmem:[#allocation74_spill] sm:$0xff]  ;;  %v18317_v21 = vld [vmem:[#allocation139_spill] sm:$0xff] }
 0x24a   : >> { %v3716_v42 = vmul.f32 %v12021_v49, %v18312_v7  ;;  %v12036_v57 = vadd.f32 %v18230_v3, %v6049_v45  ;;  %v3840_v48 = vmul.f32 %v12021_v49, %v18314_v31  ;;  %v3964_v1 = vmul.f32 %v12021_v49, %v18315_v4  ;;  %v18325_v4 = vld [vmem:[#allocation86_spill] sm:$0xff]  ;;  %v18327_v7 = vld [vmem:[#allocation141_spill] sm:$0xff] }
 0x24b   : >> { %v12026_v8 = vsel %vm519_vm2, %v18309_v19, %v2964_v52  ;;  %v12031_v10 = vsel %vm644_vm3, %v18311_v58, %v3088_v0  ;;  %v4088_v52 = vmul.f32 %v12021_v49, %v18316_v11  ;;  %v2202_v16 = vadd.f32 %v2158_v18, %v2078_v22  ;;  %v18319_v58 = vld [vmem:[#allocation140_spill] sm:$0xff]  ;;  %v18324_v11 = vld [vmem:[#allocation127_spill] sm:$0xff] }
 0x24c   : >> { %18313 = vst [vmem:[#allocation55_spill] sm:$0xff] %v12036_v57  ;;  %v3584_v2 = vrot.slane %v3529_v20, 6  ;;  %v4212_v0 = vmul.f32 %v12021_v49, %v18216_v27  ;;  %v4336_v39 = vmul.f32 %v12021_v49, %v18221_v43  ;;  %v6097_v45 = vsel %vm273_vm0, %v12036_v57, 0.0  ;;  %v18321_v20 = vld [vmem:[#allocation27_spill] sm:$0xff]  ;;  %v18323_v57 = vld [vmem:[#allocation82_spill] sm:$0xff] }
 0x24d   : >> { %v18318_v19 = vrot.slane %v18317_v21, 3  ;;  %v18320_v3 = vrot.slane %v18319_v58, 4  ;;  %v18322_v22 = vrot.slane %v18321_v20, 5  ;;  %6098 = vadd.xlane.f32.xlu0 %v6097_v45  ;;  %v2326_v49 = vadd.f32 %v2282_v33, %v2202_v16  ;;  %v8365_v16 = vld [vmem:[%s8792_s26 + $0xb0] sm:$0xff] }
 0x24e   : >> { %v3771_v43 = vrot.slane %v3716_v42, 1  ;;  %v4523_v21 = vmul.f32 %v18324_v11, %v18323_v57  ;;  %v4019_v58 = vrot.slane %v3964_v1, 3  ;;  %v4143_v31 = vrot.slane %v4088_v52, 4  ;;  %v18331_v1 = vld [vmem:[#allocation93_spill] sm:$0xff] }
 0x24f   : >> { %v12053_v6 = vsel %vm769_vm4, %v18318_v19, %v3212_v41  ;;  %v12058_v18 = vsel %vm894_vm5, %v18320_v3, %v3336_v9  ;;  %v12063_v27 = vsel %vm1019_vm6, %v18322_v22, %v3460_v14  ;;  %v4647_v41 = vmul.f32 %v18324_v11, %v18325_v4  ;;  %v18326_v3 = vld [vmem:[#allocation88_spill] sm:$0xff]  ;;  %v18330_v4 = vld [vmem:[#allocation90_spill] sm:$0xff] }
 0x250   : >> { %v3895_v19 = vrot.slane %v3840_v48, 2  ;;  %v4771_v9 = vmul.f32 %v18324_v11, %v18326_v3  ;;  %v2450_v20 = vadd.f32 %v2406_v12, %v2326_v49  ;;  %v18328_v14 = vrot.slane %v18327_v7, 6  ;;  %v18329_v22 = vld [vmem:[#allocation68_spill] sm:$0xff]  ;;  %v18332_v12 = vld [vmem:[#allocation95_spill] sm:$0xff] }
 0x251   : >> { %v4267_v33 = vrot.slane %v4212_v0, 5  ;;  %v4391_v42 = vrot.slane %v4336_v39, 6  ;;  %v12078_v57 = vmul.f32 %v8365_v16, %v18329_v22  ;;  %v4895_v48 = vmul.f32 %v18324_v11, %v18330_v4  ;;  %v419_v3 = vld [vmem:[%s8792_s26 + $0x60] sm:$0xff] }
 0x252   : >> { %v12074_v45 = vsel %vm1144_vm7, %v18328_v14, %v3584_v2  ;;  %v12084_v52 = vmul.f32 %v18324_v11, %v18331_v1  ;;  %v12088_v49 = vmul.f32 %v18324_v11, %v18332_v12  ;;  %v2574_v7 = vadd.f32 %v2530_v5, %v2450_v20  ;;  %v18333_v2 = vld [vmem:[#allocation142_spill] sm:$0xff]  ;;  %v18335_v22 = vld [vmem:[#allocation143_spill] sm:$0xff]  ;;  %v18337_v1 = vld [vmem:[#allocation144_spill] sm:$0xff] }
 0x253   : >> { %v18334_v0 = vrot.slane %v18333_v2, 1  ;;  %v4578_v14 = vrot.slane %v4523_v21, 1  ;;  %v4702_v16 = vrot.slane %v4647_v41, 2  ;;  %v18336_v4 = vrot.slane %v18335_v22, 2  ;;  %v18339_v11 = vld [vmem:[#allocation145_spill] sm:$0xff]  ;;  %v18341_v21 = vld [vmem:[#allocation28_spill] sm:$0xff] }
 0x254   : >> { %v18338_v40 = vrot.slane %v18337_v1, 3  ;;  %v18340_v5 = vrot.slane %v18339_v11, 4  ;;  %v2698_v2 = vadd.f32 %v2654_v44, %v2574_v7  ;;  %v18342_v41 = vrot.slane %v18341_v21, 5  ;;  %v18343_v22 = vld [vmem:[#allocation146_spill] sm:$0xff]  ;;  %v8366_v1 = vld [vmem:[%s8792_s26 + $0xc8] sm:$0xff]  ;;  %v18346_v7 = vld [vmem:[#allocation17_spill] sm:$0xff] }
 0x255   : >> { %v12093_v39 = vsel %vm519_vm2, %v18334_v0, %v3771_v43  ;;  %v12099_v46 = vsel %vm644_vm3, %v18336_v4, %v3895_v19  ;;  %v4826_v43 = vrot.slane %v4771_v9, 3  ;;  %v18344_v4 = vrot.slane %v18343_v22, 6  ;;  %v12126_v11 = vld [vmem:[%s8792_s26 + $0x68] sm:$0xff]  ;;  %v18347_v21 = vld [vmem:[#allocation147_spill] sm:$0xff] }
 0x256   : >> { %v12104_v28 = vsel %vm769_vm4, %v18338_v40, %v4019_v58  ;;  %v12109_v20 = vsel %vm894_vm5, %v18340_v5, %v4143_v31  ;;  %v12114_v0 = vsel %vm1019_vm6, %v18342_v41, %v4267_v33  ;;  %v18345_v40 = vld [vmem:[#allocation84_spill] sm:$0xff]  ;;  %v4950_v31 = vrot.slane %v4895_v48, 4 }
 0x257   : >> { %v12119_v19 = vsel %vm1144_vm7, %v18344_v4, %v4391_v42  ;;  %v12123_v58 = vmul.f32 %v8366_v1, %v18345_v40  ;;  %v5074_v9 = vrot.slane %v12084_v52, 5  ;;  %v5198_v44 = vrot.slane %v12088_v49, 6  ;;  %v18349_v42 = vld [vmem:[#allocation148_spill] sm:$0xff]  ;;  %v18353_v52 = vld [vmem:[#allocation149_spill] sm:$0xff] }
 0x258   : >> { %v483_v5 = vmul.f32 %v18346_v7, %v419_v3  ;;  %v2822_v33 = vadd.f32 %v2778_v17, %v2698_v2  ;;  %v18348_v41 = vrot.slane %v18347_v21, 1  ;;  %v18350_v4 = vrot.slane %v18349_v42, 2  ;;  %v18351_v40 = vld [vmem:[#allocation100_spill] sm:$0xff] }
 0x259   : >> { %v12143_v48 = vmul.f32 %v11809_v26, %v18351_v40  ;;  %v18354_v12 = vrot.slane %v18353_v52, 3  ;;  %v18355_v17 = vld [vmem:[#allocation16_spill] sm:$0xff]  ;;  %v18358_v40 = vld [vmem:[#allocation19_spill] sm:$0xff] }
 0x25a   : >> { %v12134_v22 = vsel %vm519_vm2, %v18348_v41, %v4578_v14  ;;  %v12139_v1 = vsel %vm644_vm3, %v18350_v4, %v4702_v16  ;;  %v443_v2 = vmul.f32 %v18355_v17, %v419_v3  ;;  %v12153_v14 = vmul.f32 %v18346_v7, %v12126_v11  ;;  %v18357_v16 = vld [vmem:[#allocation18_spill] sm:$0xff]  ;;  %v18359_v17 = vld [vmem:[#allocation20_spill] sm:$0xff] }
 0x25b   : >> { %18352 = vst [vmem:[#allocation60_spill] sm:$0xff] %v12143_v48  ;;  %v12148_v49 = vsel %vm769_vm4, %v18354_v12, %v4826_v43  ;;  %v540_v21 = vrot.slane %v483_v5, 1  ;;  %v2885_v41 = vadd.f32 %v12016_v53, %v2822_v33  ;;  %v608_v42 = vmul.f32 %v18357_v16, %v419_v3 }
 0x25c   : >> { %18356 = vst [vmem:[#allocation62_spill] sm:$0xff] %v12153_v14  ;;  %v12159_v4 = vmul.f32 %v18357_v16, %v12126_v11  ;;  %v733_v52 = vmul.f32 %v18358_v40, %v419_v3  ;;  %v17065_v12 = vrot.slane %v12153_v14, 1  ;;  %v12165_v43 = vmul.f32 %v18358_v40, %v12126_v11 }
 0x25d   : >> { %v858_v7 = vmul.f32 %v18359_v17, %v419_v3  ;;  %v12170_v5 = vmul.f32 %v18359_v17, %v12126_v11  ;;  %v3009_v53 = vadd.f32 %v12026_v8, %v2885_v41  ;;  %v665_v33 = vrot.slane %v608_v42, 2  ;;  %v18360_v41 = vld [vmem:[#allocation21_spill] sm:$0xff] }
 0x25e   : >> { %v17063_v16 = vrot.slane %v12159_v4, 2  ;;  %v790_v26 = vrot.slane %v733_v52, 3  ;;  %v542_v48 = vsel %vm519_vm2, %v540_v21, %v17065_v12  ;;  %v17062_v40 = vrot.slane %v12165_v43, 3  ;;  %v18361_v52 = vld [vmem:[#allocation150_spill] sm:$0xff] }
 0x25f   : >> { %v915_v56 = vrot.slane %v858_v7, 4  ;;  %v17064_v54 = vrot.slane %v12170_v5, 4  ;;  %v3133_v59 = vadd.f32 %v12031_v10, %v3009_v53  ;;  %v584_v17 = vadd.f32 %v542_v48, %v443_v2 }
 0x260   : >> { %v667_v8 = vsel %vm644_vm3, %v665_v33, %v17063_v16  ;;  %v983_v42 = vmul.f32 %v18360_v41, %v419_v3  ;;  %v18362_v14 = vrot.slane %v18361_v52, 4  ;;  %v792_v7 = vsel %vm769_vm4, %v790_v26, %v17062_v40  ;;  %v12210_v16 = vld [vmem:[%s8792_s26 + $0x80] sm:$0xff] }
 0x261   : >> { %v12194_v10 = vmul.f32 %v18360_v41, %v12126_v11  ;;  %v1108_v48 = vmul.f32 %v17937_v37, %v419_v3  ;;  %v3257_v2 = vadd.f32 %v12053_v6, %v3133_v59  ;;  %v709_v53 = vadd.f32 %v667_v8, %v584_v17  ;;  %v18370_v17 = vld [vmem:[#allocation23_spill] sm:$0xff] }
 0x262   : >> { %v12187_v21 = vsel %vm894_vm5, %v18362_v14, %v4950_v31  ;;  %v1040_v33 = vrot.slane %v983_v42, 5  ;;  %v12200_v52 = vmul.f32 %v17937_v37, %v12126_v11  ;;  %v12203_v31 = vld [vmem:[%s8792_s26 + $0x78] sm:$0xff]  ;;  %v917_v26 = vsel %vm894_vm5, %v915_v56, %v17064_v54  ;;  %v18367_v42 = vld [vmem:[#allocation151_spill] sm:$0xff] }
 0x263   : >> { %18363 = vst [vmem:[#allocation64_spill] sm:$0xff] %v12194_v10  ;;  %18365 = vst [vmem:[#allocation73_spill] sm:$0xff] %v12203_v31  ;;  %v17066_v14 = vrot.slane %v12194_v10, 5  ;;  %v1165_v40 = vrot.slane %v1108_v48, 6  ;;  %v1296_v59 = vmul.f32 %v12203_v31, %v8877_v25  ;;  %v3381_v6 = vadd.f32 %v12058_v18, %v3257_v2 }
 0x264   : >> { %18364 = vst [vmem:[#allocation72_spill] sm:$0xff] %v12200_v52  ;;  %v834_v3 = vadd.f32 %v792_v7, %v709_v53  ;;  %v12218_v8 = vmul.f32 %v12210_v16, %v8877_v25  ;;  %v18368_v56 = vrot.slane %v18367_v42, 5  ;;  %v1420_v18 = vmul.f32 %v12203_v31, %v8888_v29 }
 0x265   : >> { %v1042_v48 = vsel %vm1019_vm6, %v1040_v33, %v17066_v14  ;;  %v12232_v7 = vmul.f32 %v12210_v16, %v8888_v29  ;;  %v3505_v2 = vadd.f32 %v12063_v27, %v3381_v6  ;;  %v1352_v12 = vrot.slane %v1296_v59, 1 }
 0x266   : >> { %18366 = vst [vmem:[#allocation76_spill] sm:$0xff] %v12218_v8  ;;  %v12223_v54 = vsel %vm1019_vm6, %v18368_v56, %v5074_v9  ;;  %v959_v53 = vadd.f32 %v917_v26, %v834_v3  ;;  %v17076_v42 = vrot.slane %v12218_v8, 1  ;;  %v18371_v9 = vrot.slane %v18370_v17, 6  ;;  %v12252_v26 = vld [vmem:[%s8792_s26 + $0xe8] sm:$0xff]  ;;  %v18374_v3 = vld [vmem:[#allocation98_spill] sm:$0xff] }
 0x267   : >> { %18369 = vst [vmem:[#allocation77_spill] sm:$0xff] %v12232_v7  ;;  %v18372_v33 = vrot.slane %v12200_v52, 6  ;;  %v1544_v10 = vmul.f32 %v12203_v31, %v8892_v30  ;;  %v12248_v29 = vmul.f32 %v12210_v16, %v8892_v30  ;;  %v3629_v27 = vadd.f32 %v12074_v45, %v3505_v2  ;;  %18373 = vst [vmem:[#allocation33_spill] sm:$0xff] %v12252_v26 }
 0x268   : >> { %v12239_v56 = vsel %vm1144_vm7, %v18371_v9, %v5198_v44  ;;  %v1084_v59 = vadd.f32 %v1042_v48, %v959_v53  ;;  %v1256_v44 = vmul.f32 %v12203_v31, %v8873_v24  ;;  %v1668_v6 = vmul.f32 %v12203_v31, %v18275_v63 }
 0x269   : >> { %v1167_v14 = vsel %vm1144_vm7, %v1165_v40, %v18372_v33  ;;  %v12260_v40 = vmul.f32 %v12252_v26, %v18374_v3  ;;  %v1476_v17 = vrot.slane %v1420_v18, 2  ;;  %v12265_v33 = vmul.f32 %v12210_v16, %v18275_v63 }
 0x26a   : >> { %v3692_v45 = vadd.f32 %v12078_v57, %v3629_v27  ;;  %v1209_v48 = vadd.f32 %v1167_v14, %v1084_v59  ;;  %v1354_v2 = vsel %vm519_vm2, %v1352_v12, %v17076_v42  ;;  %v1600_v53 = vrot.slane %v1544_v10, 3  ;;  %v18377_v12 = vld [vmem:[#allocation101_spill] sm:$0xff]  ;;  %v18378_v27 = vld [vmem:[#allocation104_spill] sm:$0xff] }
 0x26b   : >> { %18375 = vst [vmem:[#allocation79_spill] sm:$0xff] %v12265_v33  ;;  %v1724_v52 = vrot.slane %v1668_v6, 4  ;;  %v1792_v18 = vmul.f32 %v12203_v31, %v18276_v62  ;;  %v12276_v9 = vmul.f32 %v12210_v16, %v18276_v62  ;;  %v1916_v14 = vmul.f32 %v12203_v31, %v18277_v23 }
 0x26c   : >> { %v3816_v63 = vadd.f32 %v12093_v39, %v3692_v45  ;;  %v1272_v30 = vadd.f32 %v1256_v44, %v1209_v48  ;;  %v12284_v10 = vmul.f32 %v12252_v26, %v18377_v12  ;;  %v12288_v59 = vmul.f32 %v12252_v26, %v18378_v27 }
 0x26d   : >> { %18376 = vst [vmem:[#allocation80_spill] sm:$0xff] %v12276_v9  ;;  %v18379_v6 = vrot.slane %v12232_v7, 2  ;;  %v12295_v44 = vmul.f32 %v12210_v16, %v18277_v23  ;;  %v5385_v48 = vrot.slane %v12260_v40, 1  ;;  %v12301_v42 = vmul.f32 %v12252_v26, %v17950_v13 }
 0x26e   : >> { %v3940_v45 = vadd.f32 %v12099_v46, %v3816_v63  ;;  %v1396_v57 = vadd.f32 %v1354_v2, %v1272_v30  ;;  %v12305_v24 = vmul.f32 %v12252_v26, %v17953_v32  ;;  %v18380_v31 = vrot.slane %v12248_v29, 3  ;;  %v12316_v30 = vld [vmem:[%s8792_s26 + $0x90] sm:$0xff]  ;;  %v12319_v2 = vld [vmem:[%s8792_s26 + $0x98] sm:$0xff] }
 0x26f   : >> { %v1478_v39 = vsel %vm644_vm3, %v1476_v17, %v18379_v6  ;;  %v1848_v6 = vrot.slane %v1792_v18, 5  ;;  %v17085_v7 = vrot.slane %v12276_v9, 5  ;;  %v18381_v40 = vrot.slane %v12265_v33, 4  ;;  %18382 = vst [vmem:[#allocation83_spill] sm:$0xff] %v12316_v30 }
 0x270   : >> { %v1602_v17 = vsel %vm769_vm4, %v1600_v53, %v18380_v31  ;;  %v4064_v63 = vadd.f32 %v12104_v28, %v3940_v45  ;;  %v1520_v46 = vadd.f32 %v1478_v39, %v1396_v57  ;;  %v1972_v8 = vrot.slane %v1916_v14, 6 }
 0x271   : >> { %v1726_v23 = vsel %vm894_vm5, %v1724_v52, %v18381_v40  ;;  %v2103_v31 = vmul.f32 %v12316_v30, %v18060_v51  ;;  %v12326_v53 = vmul.f32 %v12319_v2, %v18060_v51  ;;  %v2227_v28 = vmul.f32 %v12316_v30, %v18063_v55 }
 0x272   : >> { %v4188_v18 = vadd.f32 %v12109_v20, %v4064_v63  ;;  %v12333_v52 = vmul.f32 %v11921_v47, %v12252_v26  ;;  %v1644_v57 = vadd.f32 %v1602_v17, %v1520_v46  ;;  %v12337_v14 = vmul.f32 %v12319_v2, %v18063_v55 }
 0x273   : >> { %v5509_v39 = vrot.slane %v12284_v10, 2  ;;  %v1850_v45 = vsel %vm1019_vm6, %v1848_v6, %v17085_v7  ;;  %v2351_v40 = vmul.f32 %v12316_v30, %v18064_v36  ;;  %v12347_v20 = vmul.f32 %v12319_v2, %v18064_v36 }
 0x274   : >> { %18383 = vst [vmem:[#allocation89_spill] sm:$0xff] %v12337_v14  ;;  %v4312_v63 = vadd.f32 %v12114_v0, %v4188_v18  ;;  %v5633_v17 = vrot.slane %v12288_v59, 3  ;;  %v1768_v46 = vadd.f32 %v1726_v23, %v1644_v57  ;;  %v2063_v62 = vmul.f32 %v12316_v30, %v18290_v38 }
 0x275   : >> { %18384 = vst [vmem:[#allocation91_spill] sm:$0xff] %v12347_v20  ;;  %v18385_v10 = vrot.slane %v12295_v44, 6  ;;  %v2159_v6 = vrot.slane %v2103_v31, 1  ;;  %v17090_v7 = vrot.slane %v12326_v53, 1  ;;  %v2283_v9 = vrot.slane %v2227_v28, 2 }
 0x276   : >> { %v4436_v33 = vadd.f32 %v12119_v19, %v4312_v63  ;;  %v1892_v36 = vadd.f32 %v1850_v45, %v1768_v46  ;;  %v17092_v55 = vrot.slane %v12337_v14, 2  ;;  %v2475_v0 = vmul.f32 %v12316_v30, %v18066_v34 }
 0x277   : >> { %v1974_v26 = vsel %vm1144_vm7, %v1972_v8, %v18385_v10  ;;  %v2407_v23 = vrot.slane %v2351_v40, 3  ;;  %v17091_v59 = vrot.slane %v12347_v20, 3  ;;  %v12364_v18 = vmul.f32 %v12319_v2, %v18066_v34 }
 0x278   : >> { %v2599_v8 = vmul.f32 %v12316_v30, %v18170_v60  ;;  %v4499_v31 = vadd.f32 %v12123_v58, %v4436_v33  ;;  %v2016_v28 = vadd.f32 %v1974_v26, %v1892_v36  ;;  %v12371_v19 = vmul.f32 %v12319_v2, %v18170_v60 }
 0x279   : >> { %18386 = vst [vmem:[#allocation92_spill] sm:$0xff] %v12364_v18  ;;  %v2723_v57 = vmul.f32 %v12316_v30, %v18172_v50  ;;  %v18388_v45 = vrot.slane %v11824_v61, 1  ;;  %v5757_v63 = vrot.slane %v12301_v42, 4  ;;  %v2161_v58 = vsel %vm519_vm2, %v2159_v6, %v17090_v7 }
 0x27a   : >> { %18387 = vst [vmem:[#allocation94_spill] sm:$0xff] %v12371_v19  ;;  %v12384_v36 = vmul.f32 %v12319_v2, %v18172_v50  ;;  %v4623_v26 = vadd.f32 %v12134_v22, %v4499_v31  ;;  %v5881_v33 = vrot.slane %v12305_v24, 5  ;;  %v2079_v46 = vadd.f32 %v2063_v62, %v2016_v28  ;;  %v12398_v24 = vld [vmem:[%s8792_s26 + $0xa8] sm:$0xff]  ;;  %v12401_v62 = vld [vmem:[%s8792_s26 + $0xb0] sm:$0xff] }
 0x27b   : >> { %v5386_v40 = vsel %vm519_vm2, %v18388_v45, %v5385_v48  ;;  %v2285_v61 = vsel %vm644_vm3, %v2283_v9, %v17092_v55  ;;  %v2409_v42 = vsel %vm769_vm4, %v2407_v23, %v17091_v59  ;;  %v2531_v48 = vrot.slane %v2475_v0, 4  ;;  %18390 = vst [vmem:[#allocation97_spill] sm:$0xff] %v12398_v24  ;;  %18391 = vst [vmem:[#allocation114_spill] sm:$0xff] %v12401_v62  ;;  %v18396_v9 = vld [vmem:[#allocation58_spill] sm:$0xff] }
 0x27c   : >> { %18389 = vst [vmem:[#allocation96_spill] sm:$0xff] %v12384_v36  ;;  %v17093_v10 = vrot.slane %v12364_v18, 4  ;;  %v2655_v6 = vrot.slane %v2599_v8, 5  ;;  %v4747_v45 = vadd.f32 %v12139_v1, %v4623_v26  ;;  %v2203_v7 = vadd.f32 %v2161_v58, %v2079_v46  ;;  %v18394_v26 = vld [vmem:[#allocation40_spill] sm:$0xff]  ;;  %v18411_v18 = vld [vmem:[#allocation49_spill] sm:$0xff] }
 0x27d   : >> { %v2779_v31 = vrot.slane %v2723_v57, 6  ;;  %v2910_v28 = vmul.f32 %v12398_v24, %v17965_v15  ;;  %v12408_v0 = vmul.f32 %v12401_v62, %v17965_v15  ;;  %v3034_v1 = vmul.f32 %v12398_v24, %v18179_v35 }
 0x27e   : >> { %v4871_v23 = vadd.f32 %v12148_v49, %v4747_v45  ;;  %v6005_v8 = vrot.slane %v12333_v52, 6  ;;  %v2327_v57 = vadd.f32 %v2285_v61, %v2203_v7  ;;  %v12416_v58 = vmul.f32 %v12401_v62, %v18179_v35  ;;  %v18398_v52 = vld [vmem:[#allocation41_spill] sm:$0xff] }
 0x27f   : >> { %18392 = vst [vmem:[#allocation34_spill] sm:$0xff] %v12408_v0  ;;  %v18395_v46 = vrot.slane %v18394_v26, 2  ;;  %v2533_v55 = vsel %vm894_vm5, %v2531_v48, %v17093_v10  ;;  %v3158_v22 = vmul.f32 %v12398_v24, %v18396_v9  ;;  %v12428_v49 = vmul.f32 %v12401_v62, %v18396_v9 }
 0x280   : >> { %18393 = vst [vmem:[#allocation115_spill] sm:$0xff] %v12416_v58  ;;  %v4995_v7 = vadd.f32 %v12187_v21, %v4871_v23  ;;  %v18399_v61 = vrot.slane %v18398_v52, 3  ;;  %v2451_v26 = vadd.f32 %v2409_v42, %v2327_v57  ;;  %v18401_v48 = vrot.slane %v12384_v36, 6  ;;  %v18402_v52 = vld [vmem:[#allocation61_spill] sm:$0xff] }
 0x281   : >> { %v5510_v59 = vsel %vm644_vm3, %v18395_v46, %v5509_v39  ;;  %18397 = vst [vmem:[#allocation116_spill] sm:$0xff] %v12428_v49  ;;  %v18400_v39 = vrot.slane %v12371_v19, 5  ;;  %v2966_v30 = vrot.slane %v2910_v28, 1  ;;  %v3090_v20 = vrot.slane %v3034_v1, 2 }
 0x282   : >> { %v5634_v45 = vsel %vm769_vm4, %v18399_v61, %v5633_v17  ;;  %v2781_v10 = vsel %vm1144_vm7, %v2779_v31, %v18401_v48  ;;  %v5119_v14 = vadd.f32 %v12223_v54, %v4995_v7  ;;  %v2575_v21 = vadd.f32 %v2533_v55, %v2451_v26  ;;  %v18404_v31 = vld [vmem:[#allocation63_spill] sm:$0xff]  ;;  %v18405_v54 = vld [vmem:[#allocation56_spill] sm:$0xff] }
 0x283   : >> { %v2657_v46 = vsel %vm1019_vm6, %v2655_v6, %v18400_v39  ;;  %v3282_v17 = vmul.f32 %v12398_v24, %v18402_v52  ;;  %v3214_v42 = vrot.slane %v3158_v22, 3  ;;  %v12448_v6 = vmul.f32 %v12401_v62, %v18402_v52  ;;  %v18407_v22 = vld [vmem:[#allocation45_spill] sm:$0xff]  ;;  %v18409_v48 = vld [vmem:[#allocation47_spill] sm:$0xff] }
 0x284   : >> { %v3406_v28 = vmul.f32 %v12398_v24, %v18404_v31  ;;  %v5243_v1 = vadd.f32 %v12239_v56, %v5119_v14  ;;  %v2699_v61 = vadd.f32 %v2657_v46, %v2575_v21  ;;  %v2870_v55 = vmul.f32 %v12398_v24, %v18405_v54  ;;  %v18414_v21 = vld [vmem:[#allocation60_spill] sm:$0xff] }
 0x285   : >> { %18403 = vst [vmem:[#allocation117_spill] sm:$0xff] %v12448_v6  ;;  %v12457_v7 = vmul.f32 %v12401_v62, %v18404_v31  ;;  %v18408_v26 = vrot.slane %v18407_v22, 4  ;;  %v18410_v57 = vrot.slane %v18409_v48, 5  ;;  %v18412_v36 = vrot.slane %v18411_v18, 6 }
 0x286   : >> { %v18413_v14 = vrot.slane %v12408_v0, 1  ;;  %v5306_v31 = vadd.f32 %v18414_v21, %v5243_v1  ;;  %v2823_v54 = vadd.f32 %v2781_v10, %v2699_v61  ;;  %v18415_v22 = vrot.slane %v12416_v58, 2  ;;  %v18421_v61 = vld [vmem:[#allocation67_spill] sm:$0xff]  ;;  %v18425_v21 = vld [vmem:[#allocation74_spill] sm:$0xff] }
 0x287   : >> { %18406 = vst [vmem:[#allocation50_spill] sm:$0xff] %v12457_v7  ;;  %v5758_v39 = vsel %vm894_vm5, %v18408_v26, %v5757_v63  ;;  %v5882_v23 = vsel %vm1019_vm6, %v18410_v57, %v5881_v33  ;;  %v6006_v56 = vsel %vm1144_vm7, %v18412_v36, %v6005_v8  ;;  %v3338_v26 = vrot.slane %v3282_v17, 4  ;;  %v18417_v36 = vld [vmem:[#allocation66_spill] sm:$0xff]  ;;  %v12490_v17 = vld [vmem:[%s8792_s26 + $0xc8] sm:$0xff] }
 0x288   : >> { %v2968_v46 = vsel %vm519_vm2, %v2966_v30, %v18413_v14  ;;  %v3092_v63 = vsel %vm644_vm3, %v3090_v20, %v18415_v22  ;;  %v18416_v48 = vrot.slane %v12428_v49, 3  ;;  %v17110_v18 = vrot.slane %v12448_v6, 4  ;;  %v12487_v20 = vld [vmem:[%s8792_s26 + $0xc0] sm:$0xff]  ;;  %18420 = vst [vmem:[#allocation65_spill] sm:$0xff] %v12490_v17  ;;  %v18423_v14 = vld [vmem:[#allocation69_spill] sm:$0xff] }
 0x289   : >> { %v3462_v57 = vrot.slane %v3406_v28, 5  ;;  %v3530_v8 = vmul.f32 %v12398_v24, %v18417_v36  ;;  %v5430_v0 = vadd.f32 %v5386_v40, %v5306_v31  ;;  %v2886_v30 = vadd.f32 %v2870_v55, %v2823_v54  ;;  %18419 = vst [vmem:[#allocation103_spill] sm:$0xff] %v12487_v20  ;;  %v18427_v49 = vld [vmem:[#allocation75_spill] sm:$0xff] }
 0x28a   : >> { %v3216_v33 = vsel %vm769_vm4, %v3214_v42, %v18416_v48  ;;  %v12484_v10 = vmul.f32 %v12401_v62, %v18417_v36  ;;  %v3717_v42 = vmul.f32 %v12487_v20, %v18421_v61  ;;  %v12496_v28 = vmul.f32 %v12490_v17, %v18421_v61 }
 0x28b   : >> { %v3841_v40 = vmul.f32 %v12487_v20, %v18423_v14  ;;  %v12502_v31 = vmul.f32 %v12490_v17, %v18423_v14  ;;  %v5554_v54 = vadd.f32 %v5510_v59, %v5430_v0  ;;  %v3010_v55 = vadd.f32 %v2968_v46, %v2886_v30 }
 0x28c   : >> { %18418 = vst [vmem:[#allocation102_spill] sm:$0xff] %v12484_v10  ;;  %18422 = vst [vmem:[#allocation59_spill] sm:$0xff] %v12496_v28  ;;  %v3965_v22 = vmul.f32 %v12487_v20, %v18425_v21  ;;  %v12508_v48 = vmul.f32 %v12490_v17, %v18425_v21  ;;  %v3340_v1 = vsel %vm894_vm5, %v3338_v26, %v17110_v18  ;;  %v3586_v24 = vrot.slane %v3530_v8, 6 }
 0x28d   : >> { %18424 = vst [vmem:[#allocation87_spill] sm:$0xff] %v12502_v31  ;;  %v4089_v58 = vmul.f32 %v12487_v20, %v18427_v49  ;;  %v12517_v14 = vmul.f32 %v12490_v17, %v18427_v49  ;;  %v5678_v59 = vadd.f32 %v5634_v45, %v5554_v54  ;;  %v3134_v0 = vadd.f32 %v3092_v63, %v3010_v55  ;;  %v18430_v63 = vld [vmem:[#allocation78_spill] sm:$0xff] }
 0x28e   : >> { %18426 = vst [vmem:[#allocation118_spill] sm:$0xff] %v12508_v48  ;;  %v18429_v46 = vrot.slane %v12457_v7, 5  ;;  %v17120_v21 = vrot.slane %v12484_v10, 6  ;;  %v3773_v61 = vrot.slane %v3717_v42, 1  ;;  %v17118_v6 = vrot.slane %v12496_v28, 1 }
 0x28f   : >> { %18428 = vst [vmem:[#allocation130_spill] sm:$0xff] %v12517_v14  ;;  %v3897_v26 = vrot.slane %v3841_v40, 2  ;;  %v17117_v8 = vrot.slane %v12502_v31, 2  ;;  %v5802_v18 = vadd.f32 %v5758_v39, %v5678_v59  ;;  %v3258_v36 = vadd.f32 %v3216_v33, %v3134_v0  ;;  %v18431_v33 = vld [vmem:[#allocation68_spill] sm:$0xff] }
 0x290   : >> { %v3464_v30 = vsel %vm1019_vm6, %v3462_v57, %v18429_v46  ;;  %v4021_v62 = vrot.slane %v3965_v22, 3  ;;  %v17116_v49 = vrot.slane %v12508_v48, 3  ;;  %v4145_v19 = vrot.slane %v4089_v58, 4  ;;  %v18446_v48 = vld [vmem:[#allocation93_spill] sm:$0xff] }
 0x291   : >> { %v17119_v45 = vrot.slane %v12517_v14, 4  ;;  %v4213_v54 = vmul.f32 %v12487_v20, %v18430_v63  ;;  %v12531_v57 = vmul.f32 %v12490_v17, %v18430_v63  ;;  %v5926_v42 = vadd.f32 %v5882_v23, %v5802_v18  ;;  %v18432_v18 = vld [vmem:[#allocation81_spill] sm:$0xff] }
 0x292   : >> { %v3382_v55 = vadd.f32 %v3340_v1, %v3258_v36  ;;  %v3588_v39 = vsel %vm1144_vm7, %v3586_v24, %v17120_v21  ;;  %v3677_v40 = vmul.f32 %v12487_v20, %v18431_v33  ;;  %v3775_v58 = vsel %vm519_vm2, %v3773_v61, %v17118_v6  ;;  %v18440_v6 = vld [vmem:[#allocation86_spill] sm:$0xff] }
 0x293   : >> { %v3899_v22 = vsel %vm644_vm3, %v3897_v26, %v17117_v8  ;;  %v6050_v59 = vadd.f32 %v6006_v56, %v5926_v42  ;;  %v4023_v23 = vsel %vm769_vm4, %v4021_v62, %v17116_v49  ;;  %v4337_v24 = vmul.f32 %v12487_v20, %v18432_v18  ;;  %v18434_v56 = vld [vmem:[#allocation126_spill] sm:$0xff]  ;;  %v18437_v62 = vld [vmem:[#allocation24_spill] sm:$0xff]  ;;  %v18438_v49 = vld [vmem:[#allocation35_spill] sm:$0xff] }
 0x294   : >> { %v3506_v0 = vadd.f32 %v3464_v30, %v3382_v55  ;;  %v4147_v36 = vsel %vm894_vm5, %v4145_v19, %v17119_v45  ;;  %v4269_v1 = vrot.slane %v4213_v54, 5  ;;  %v12555_v46 = vmul.f32 %v12490_v17, %v18432_v18  ;;  %v18436_v42 = vld [vmem:[#allocation82_spill] sm:$0xff]  ;;  %v18442_v45 = vld [vmem:[#allocation88_spill] sm:$0xff] }
 0x295   : >> { %v12558_v30 = vadd.f32 %v18434_v56, %v6050_v59  ;;  %v4524_v55 = vmul.f32 %v18437_v62, %v18436_v42  ;;  %v12564_v8 = vmul.f32 %v18438_v49, %v18436_v42  ;;  %v4648_v19 = vmul.f32 %v18437_v62, %v18440_v6  ;;  %v18444_v61 = vld [vmem:[#allocation90_spill] sm:$0xff] }
 0x296   : >> { %18433 = vst [vmem:[#allocation110_spill] sm:$0xff] %v12555_v46  ;;  %v3630_v26 = vadd.f32 %v3588_v39, %v3506_v0  ;;  %v12570_v54 = vmul.f32 %v18438_v49, %v18440_v6  ;;  %v4772_v21 = vmul.f32 %v18437_v62, %v18442_v45  ;;  %v12576_v39 = vmul.f32 %v18438_v49, %v18442_v45  ;;  %v18448_v45 = vld [vmem:[#allocation95_spill] sm:$0xff] }
 0x297   : >> { %18435 = vst [vmem:[#allocation112_spill] sm:$0xff] %v12558_v30  ;;  %18439 = vst [vmem:[#allocation120_spill] sm:$0xff] %v12564_v8  ;;  %v6100_v59 = vsel %vm273_vm0, %v12558_v30, 0.0  ;;  %v4896_v20 = vmul.f32 %v18437_v62, %v18444_v61  ;;  %v12584_v14 = vmul.f32 %v18438_v49, %v18444_v61  ;;  %v5020_v31 = vmul.f32 %v18437_v62, %v18446_v48 }
 0x298   : >> { %18441 = vst [vmem:[#allocation125_spill] sm:$0xff] %v12570_v54  ;;  %18443 = vst [vmem:[#allocation111_spill] sm:$0xff] %v12576_v39  ;;  %v3693_v0 = vadd.f32 %v3677_v40, %v3630_v26  ;;  %6101 = vadd.xlane.f32.xlu1 %v6100_v59  ;;  %v12590_v28 = vmul.f32 %v18438_v49, %v18446_v48  ;;  %v5144_v17 = vmul.f32 %v18437_v62, %v18448_v45 }
 0x299   : >> { %18445 = vst [vmem:[#allocation113_spill] sm:$0xff] %v12584_v14  ;;  %v12596_v40 = vmul.f32 %v18438_v49, %v18448_v45  ;;  %v4393_v30 = vrot.slane %v4337_v24, 6  ;;  %v17139_v61 = vrot.slane %v12555_v46, 6  ;;  %v4580_v59 = vrot.slane %v4524_v55, 1  ;;  %v421_v55 = vld [vmem:[%s8792_s26 + $0x70] sm:$0xff] }
 0x29a   : >> { %18447 = vst [vmem:[#allocation121_spill] sm:$0xff] %v12590_v28  ;;  %v3817_v26 = vadd.f32 %v3775_v58, %v3693_v0  ;;  %v17142_v33 = vrot.slane %v12564_v8, 1  ;;  %v4704_v10 = vrot.slane %v4648_v19, 2  ;;  %v4828_v48 = vrot.slane %v4772_v21, 3  ;;  %v12606_v0 = vld [vmem:[%s8792_s26 + $0xf0] sm:$0xff] }
 0x29b   : >> { %18449 = vst [vmem:[#allocation106_spill] sm:$0xff] %v12596_v40  ;;  %v17141_v42 = vrot.slane %v12576_v39, 3  ;;  %v4952_v18 = vrot.slane %v4896_v20, 4  ;;  %v17140_v49 = vrot.slane %v12584_v14, 4  ;;  %v5076_v45 = vrot.slane %v5020_v31, 5  ;;  %18450 = vst [vmem:[#allocation107_spill] sm:$0xff] %v12606_v0 }
 0x29c   : >> { %v3941_v6 = vadd.f32 %v3899_v22, %v3817_v26  ;;  %v5200_v24 = vrot.slane %v5144_v17, 6  ;;  %v18451_v7 = vrot.slane %v12531_v57, 5  ;;  %v5331_v22 = vmul.f32 %v12606_v0, %v18374_v3  ;;  %v18452_v31 = vld [vmem:[#allocation84_spill] sm:$0xff]  ;;  %v18459_v14 = vld [vmem:[#allocation18_spill] sm:$0xff] }
 0x29d   : >> { %v4395_v20 = vsel %vm1144_vm7, %v4393_v30, %v17139_v61  ;;  %v4484_v26 = vmul.f32 %v18437_v62, %v18452_v31  ;;  %v4582_v17 = vsel %vm519_vm2, %v4580_v59, %v17142_v33  ;;  %v4954_v30 = vsel %vm894_vm5, %v4952_v18, %v17140_v49  ;;  %v12632_v61 = vld [vmem:[%s8792_s26 + $0xf8] sm:$0xff]  ;;  %v18454_v62 = vld [vmem:[#allocation100_spill] sm:$0xff] }
 0x29e   : >> { %v4065_v19 = vadd.f32 %v4023_v23, %v3941_v6  ;;  %v4271_v21 = vsel %vm1019_vm6, %v4269_v1, %v18451_v7  ;;  %v18453_v6 = vrot.slane %v12570_v54, 2  ;;  %v4830_v1 = vsel %vm769_vm4, %v4828_v48, %v17141_v42  ;;  %v18458_v42 = vld [vmem:[#allocation17_spill] sm:$0xff]  ;;  %v18464_v31 = vld [vmem:[#allocation62_spill] sm:$0xff] }
 0x29f   : >> { %v12636_v58 = vmul.f32 %v12606_v0, %v18454_v62  ;;  %v18455_v59 = vrot.slane %v12590_v28, 5  ;;  %v12648_v48 = vmul.f32 %v12632_v61, %v18374_v3  ;;  %v5455_v18 = vmul.f32 %v12606_v0, %v18377_v12  ;;  %v18463_v3 = vld [vmem:[#allocation20_spill] sm:$0xff] }
 0x2a0   : >> { %v4706_v23 = vsel %vm644_vm3, %v4704_v10, %v18453_v6  ;;  %v4189_v7 = vadd.f32 %v4147_v36, %v4065_v19  ;;  %v18456_v36 = vrot.slane %v12596_v40, 6  ;;  %v5387_v49 = vrot.slane %v5331_v22, 1 }
 0x2a1   : >> { %v5078_v10 = vsel %vm1019_vm6, %v5076_v45, %v18455_v59  ;;  %18457 = vst [vmem:[#allocation119_spill] sm:$0xff] %v12648_v48  ;;  %v485_v33 = vmul.f32 %v18458_v42, %v421_v55  ;;  %v610_v28 = vmul.f32 %v18459_v14, %v421_v55  ;;  %v12656_v45 = vmul.f32 %v12632_v61, %v18377_v12 }
 0x2a2   : >> { %v12644_v19 = vsel %vm1144_vm7, %v5200_v24, %v18456_v36  ;;  %v4313_v6 = vadd.f32 %v4271_v21, %v4189_v7  ;;  %v18461_v24 = vld [vmem:[#allocation16_spill] sm:$0xff]  ;;  %v18462_v36 = vld [vmem:[#allocation19_spill] sm:$0xff]  ;;  %v860_v39 = vmul.f32 %v18463_v3, %v421_v55  ;;  %v985_v21 = vmul.f32 %v18360_v41, %v421_v55 }
 0x2a3   : >> { %18460 = vst [vmem:[#allocation128_spill] sm:$0xff] %v12656_v45  ;;  %v444_v59 = vmul.f32 %v18461_v24, %v12126_v11  ;;  %v735_v40 = vmul.f32 %v18462_v36, %v421_v55  ;;  %v543_v54 = vrot.slane %v485_v33, 1  ;;  %v668_v8 = vrot.slane %v610_v28, 2 }
 0x2a4   : >> { %v4437_v62 = vadd.f32 %v4395_v20, %v4313_v6  ;;  %v5579_v7 = vmul.f32 %v12606_v0, %v18378_v27  ;;  %v918_v12 = vrot.slane %v860_v39, 4  ;;  %v18465_v46 = vrot.slane %v18464_v31, 1 }
 0x2a5   : >> { %v793_v14 = vrot.slane %v735_v40, 3  ;;  %v18466_v3 = vrot.slane %v12159_v4, 2  ;;  %v1110_v28 = vmul.f32 %v17937_v37, %v421_v55  ;;  %v5511_v20 = vrot.slane %v5455_v18, 2  ;;  %v12691_v18 = vld [vmem:[%s8792_s26 + $0x88] sm:$0xff] }
 0x2a6   : >> { %v4500_v42 = vadd.f32 %v4484_v26, %v4437_v62  ;;  %v544_v11 = vsel %vm519_vm2, %v18465_v46, %v543_v54  ;;  %v17152_v6 = vrot.slane %v12656_v45, 2  ;;  %v12676_v22 = vmul.f32 %v12632_v61, %v18378_v27  ;;  %18471 = vst [vmem:[#allocation70_spill] sm:$0xff] %v12691_v18 }
 0x2a7   : >> { %v669_v33 = vsel %vm644_vm3, %v18466_v3, %v668_v8  ;;  %v585_v39 = vadd.f32 %v544_v11, %v444_v59  ;;  %v5703_v31 = vmul.f32 %v12606_v0, %v17950_v13  ;;  %v18468_v46 = vrot.slane %v12165_v43, 3 }
 0x2a8   : >> { %18467 = vst [vmem:[#allocation131_spill] sm:$0xff] %v12676_v22  ;;  %v4624_v40 = vadd.f32 %v4582_v17, %v4500_v42  ;;  %v1043_v54 = vrot.slane %v985_v21, 5  ;;  %v18469_v3 = vrot.slane %v12648_v48, 1  ;;  %v5635_v55 = vrot.slane %v5579_v7, 3  ;;  %v12743_v48 = vld [vmem:[%s8792_s26 + $0xa0] sm:$0xff] }
 0x2a9   : >> { %v794_v4 = vsel %vm769_vm4, %v18468_v46, %v793_v14  ;;  %v12688_v26 = vmul.f32 %v12632_v61, %v17950_v13  ;;  %v710_v62 = vadd.f32 %v669_v33, %v585_v39  ;;  %v18472_v17 = vrot.slane %v12170_v5, 4  ;;  %v18473_v39 = vld [vmem:[#allocation64_spill] sm:$0xff]  ;;  %18487 = vst [vmem:[#allocation132_spill] sm:$0xff] %v12743_v48 }
 0x2aa   : >> { %v5389_v8 = vsel %vm519_vm2, %v5387_v49, %v18469_v3  ;;  %v4748_v42 = vadd.f32 %v4706_v23, %v4624_v40  ;;  %v1168_v59 = vrot.slane %v1110_v28, 6  ;;  %v1298_v14 = vmul.f32 %v12691_v18, %v8877_v25  ;;  %v18475_v28 = vld [vmem:[#allocation31_spill] sm:$0xff] }
 0x2ab   : >> { %18470 = vst [vmem:[#allocation122_spill] sm:$0xff] %v12688_v26  ;;  %v919_v43 = vsel %vm894_vm5, %v18472_v17, %v918_v12  ;;  %v5513_v49 = vsel %vm644_vm3, %v5511_v20, %v17152_v6  ;;  %v17155_v21 = vrot.slane %v12676_v22, 3  ;;  %v5827_v7 = vmul.f32 %v12606_v0, %v17953_v32  ;;  %v18477_v17 = vld [vmem:[#allocation32_spill] sm:$0xff] }
 0x2ac   : >> { %v835_v11 = vadd.f32 %v794_v4, %v710_v62  ;;  %v4872_v33 = vadd.f32 %v4830_v1, %v4748_v42  ;;  %v5759_v23 = vrot.slane %v5703_v31, 4  ;;  %v18474_v5 = vrot.slane %v18473_v39, 5  ;;  %v18478_v31 = vld [vmem:[#allocation72_spill] sm:$0xff] }
 0x2ad   : >> { %v1422_v40 = vmul.f32 %v12691_v18, %v18475_v28  ;;  %v12712_v20 = vmul.f32 %v12632_v61, %v17953_v32  ;;  %v1546_v6 = vmul.f32 %v12691_v18, %v18477_v17  ;;  %v5951_v1 = vmul.f32 %v11921_v47, %v12606_v0  ;;  %v18482_v0 = vld [vmem:[#allocation36_spill] sm:$0xff] }
 0x2ae   : >> { %v1044_v12 = vsel %vm1019_vm6, %v18474_v5, %v1043_v54  ;;  %v960_v3 = vadd.f32 %v919_v43, %v835_v11  ;;  %v4996_v4 = vadd.f32 %v4954_v30, %v4872_v33  ;;  %v18479_v62 = vrot.slane %v18478_v31, 6  ;;  %v18481_v5 = vld [vmem:[#allocation29_spill] sm:$0xff] }
 0x2af   : >> { %18476 = vst [vmem:[#allocation123_spill] sm:$0xff] %v12712_v20  ;;  %v1355_v42 = vrot.slane %v1298_v14, 1  ;;  %v5637_v39 = vsel %vm769_vm4, %v5635_v55, %v17155_v21  ;;  %v12726_v43 = vmul.f32 %v11921_v47, %v12632_v61  ;;  %v1257_v30 = vmul.f32 %v12210_v16, %v18481_v5 }
 0x2b0   : >> { %v1169_v54 = vsel %vm1144_vm7, %v18479_v62, %v1168_v59  ;;  %v1085_v11 = vadd.f32 %v1044_v12, %v960_v3  ;;  %v5120_v33 = vadd.f32 %v5078_v10, %v4996_v4  ;;  %v1479_v46 = vrot.slane %v1422_v40, 2  ;;  %v18483_v59 = vld [vmem:[#allocation37_spill] sm:$0xff]  ;;  %v18485_v10 = vld [vmem:[#allocation76_spill] sm:$0xff] }
 0x2b1   : >> { %18480 = vst [vmem:[#allocation71_spill] sm:$0xff] %v12726_v43  ;;  %v1670_v31 = vmul.f32 %v12691_v18, %v18482_v0  ;;  %v1794_v14 = vmul.f32 %v12691_v18, %v18483_v59  ;;  %v18484_v62 = vrot.slane %v12688_v26, 4  ;;  %v5883_v21 = vrot.slane %v5827_v7, 5  ;;  %v18488_v26 = vld [vmem:[#allocation39_spill] sm:$0xff]  ;;  %v18489_v7 = vld [vmem:[#allocation77_spill] sm:$0xff] }
 0x2b2   : >> { %v1210_v22 = vadd.f32 %v1169_v54, %v1085_v11  ;;  %v1603_v47 = vrot.slane %v1546_v6, 3  ;;  %v5244_v12 = vadd.f32 %v12644_v19, %v5120_v33  ;;  %v6007_v45 = vrot.slane %v5951_v1, 6 }
 0x2b3   : >> { %v5761_v55 = vsel %vm894_vm5, %v5759_v23, %v18484_v62  ;;  %v18486_v40 = vrot.slane %v18485_v10, 1  ;;  %v1918_v23 = vmul.f32 %v12691_v18, %v18488_v26  ;;  %v2105_v6 = vmul.f32 %v12743_v48, %v18060_v51  ;;  %v18498_v18 = vld [vmem:[#allocation80_spill] sm:$0xff] }
 0x2b4   : >> { %v1273_v13 = vadd.f32 %v1257_v30, %v1210_v22  ;;  %v5307_v19 = vadd.f32 %v12636_v58, %v5244_v12  ;;  %v18490_v54 = vrot.slane %v18489_v7, 2  ;;  %v1727_v11 = vrot.slane %v1670_v31, 4  ;;  %v18492_v22 = vld [vmem:[#allocation44_spill] sm:$0xff] }
 0x2b5   : >> { %v1356_v4 = vsel %vm519_vm2, %v18486_v40, %v1355_v42  ;;  %v1851_v33 = vrot.slane %v1794_v14, 5  ;;  %v18491_v62 = vrot.slane %v12248_v29, 3  ;;  %v2229_v30 = vmul.f32 %v12743_v48, %v18492_v22  ;;  %v18493_v40 = vld [vmem:[#allocation46_spill] sm:$0xff] }
 0x2b6   : >> { %v1480_v1 = vsel %vm644_vm3, %v18490_v54, %v1479_v46  ;;  %v1397_v42 = vadd.f32 %v1356_v4, %v1273_v13  ;;  %v2353_v32 = vmul.f32 %v12743_v48, %v18493_v40  ;;  %v5431_v3 = vadd.f32 %v5389_v8, %v5307_v19  ;;  %v18496_v19 = vld [vmem:[#allocation79_spill] sm:$0xff] }
 0x2b7   : >> { %v1604_v10 = vsel %vm769_vm4, %v18491_v62, %v1603_v47  ;;  %v2477_v58 = vmul.f32 %v12743_v48, %v18066_v34  ;;  %v2601_v46 = vmul.f32 %v12743_v48, %v18170_v60  ;;  %v2725_v13 = vmul.f32 %v12743_v48, %v18172_v50 }
 0x2b8   : >> { %v18494_v29 = vrot.slane %v12712_v20, 5  ;;  %v1521_v14 = vadd.f32 %v1480_v1, %v1397_v42  ;;  %v1975_v47 = vrot.slane %v1918_v23, 6  ;;  %v2162_v12 = vrot.slane %v2105_v6, 1 }
 0x2b9   : >> { %v5555_v4 = vadd.f32 %v5513_v49, %v5431_v3  ;;  %v18495_v7 = vrot.slane %v12726_v43, 6  ;;  %v18497_v54 = vrot.slane %v18496_v19, 4  ;;  %v18499_v60 = vrot.slane %v18498_v18, 5  ;;  %v18528_v43 = vld [vmem:[#allocation116_spill] sm:$0xff] }
 0x2ba   : >> { %v5885_v31 = vsel %vm1019_vm6, %v5883_v21, %v18494_v29  ;;  %v1645_v50 = vadd.f32 %v1604_v10, %v1521_v14  ;;  %v2286_v20 = vrot.slane %v2229_v30, 2  ;;  %v2410_v34 = vrot.slane %v2353_v32, 3  ;;  %v18500_v21 = vld [vmem:[#allocation54_spill] sm:$0xff]  ;;  %v18503_v10 = vld [vmem:[#allocation89_spill] sm:$0xff] }
 0x2bb   : >> { %v6009_v8 = vsel %vm1144_vm7, %v6007_v45, %v18495_v7  ;;  %v1728_v62 = vsel %vm894_vm5, %v18497_v54, %v1727_v11  ;;  %v1852_v48 = vsel %vm1019_vm6, %v18499_v60, %v1851_v33  ;;  %v2912_v23 = vmul.f32 %v18500_v21, %v17965_v15  ;;  %v18509_v7 = vld [vmem:[#allocation94_spill] sm:$0xff] }
 0x2bc   : >> { %v5679_v6 = vadd.f32 %v5637_v39, %v5555_v4  ;;  %v2534_v49 = vrot.slane %v2477_v58, 4  ;;  %v2658_v3 = vrot.slane %v2601_v46, 5  ;;  %v2782_v1 = vrot.slane %v2725_v13, 6  ;;  %v18505_v46 = vld [vmem:[#allocation91_spill] sm:$0xff] }
 0x2bd   : >> { %v1769_v42 = vadd.f32 %v1728_v62, %v1645_v50  ;;  %v18501_v45 = vrot.slane %v12295_v44, 6  ;;  %v2064_v18 = vmul.f32 %v12319_v2, %v18290_v38  ;;  %v18502_v60 = vrot.slane %v12326_v53, 1 }
 0x2be   : >> { %v5803_v32 = vadd.f32 %v5761_v55, %v5679_v6  ;;  %v3036_v33 = vmul.f32 %v18500_v21, %v18179_v35  ;;  %v3160_v39 = vmul.f32 %v18500_v21, %v18396_v9  ;;  %v3284_v50 = vmul.f32 %v18500_v21, %v18402_v52 }
 0x2bf   : >> { %v1976_v29 = vsel %vm1144_vm7, %v18501_v45, %v1975_v47  ;;  %v2163_v11 = vsel %vm519_vm2, %v18502_v60, %v2162_v12  ;;  %v1893_v44 = vadd.f32 %v1852_v48, %v1769_v42  ;;  %v18504_v30 = vrot.slane %v18503_v10, 2  ;;  %v18507_v47 = vld [vmem:[#allocation92_spill] sm:$0xff]  ;;  %v18514_v45 = vld [vmem:[#allocation114_spill] sm:$0xff] }
 0x2c0   : >> { %v18506_v53 = vrot.slane %v18505_v46, 3  ;;  %v2969_v55 = vrot.slane %v2912_v23, 1  ;;  %v5927_v14 = vadd.f32 %v5885_v31, %v5803_v32  ;;  %v18508_v12 = vrot.slane %v18507_v47, 4  ;;  %v18511_v48 = vld [vmem:[#allocation96_spill] sm:$0xff]  ;;  %v18516_v23 = vld [vmem:[#allocation66_spill] sm:$0xff] }
 0x2c1   : >> { %v2287_v58 = vsel %vm644_vm3, %v18504_v30, %v2286_v20  ;;  %v18510_v19 = vrot.slane %v18509_v7, 5  ;;  %v18512_v62 = vrot.slane %v18511_v48, 6  ;;  %v2017_v42 = vadd.f32 %v1976_v29, %v1893_v44  ;;  %v18513_v20 = vld [vmem:[#allocation56_spill] sm:$0xff]  ;;  %v18518_v47 = vld [vmem:[#allocation34_spill] sm:$0xff]  ;;  %v18520_v44 = vld [vmem:[#allocation67_spill] sm:$0xff] }
 0x2c2   : >> { %v2411_v13 = vsel %vm769_vm4, %v18506_v53, %v2410_v34  ;;  %v2535_v4 = vsel %vm894_vm5, %v18508_v12, %v2534_v49  ;;  %v12812_v60 = vmul.f32 %v18514_v45, %v18513_v20  ;;  %v18515_v34 = vld [vmem:[#allocation63_spill] sm:$0xff]  ;;  %v3532_v32 = vmul.f32 %v18500_v21, %v18516_v23  ;;  %v18521_v7 = vld [vmem:[#allocation69_spill] sm:$0xff] }
 0x2c3   : >> { %v2659_v54 = vsel %vm1019_vm6, %v18510_v19, %v2658_v3  ;;  %v2783_v6 = vsel %vm1144_vm7, %v18512_v62, %v2782_v1  ;;  %v3408_v31 = vmul.f32 %v18500_v21, %v18515_v34  ;;  %v6051_v49 = vadd.f32 %v6009_v8, %v5927_v14  ;;  %v12819_v3 = vld [vmem:[%s8792_s26 + $0xd0] sm:$0xff]  ;;  %v18523_v8 = vld [vmem:[#allocation74_spill] sm:$0xff] }
 0x2c4   : >> { %v3093_v10 = vrot.slane %v3036_v33, 2  ;;  %v3217_v30 = vrot.slane %v3160_v39, 3  ;;  %v3341_v46 = vrot.slane %v3284_v50, 4  ;;  %18517 = vst [vmem:[#allocation25_spill] sm:$0xff] %v12819_v3  ;;  %v2080_v53 = vadd.f32 %v2064_v18, %v2017_v42  ;;  %v18524_v39 = vld [vmem:[#allocation75_spill] sm:$0xff]  ;;  %v18525_v62 = vld [vmem:[#allocation81_spill] sm:$0xff] }
 0x2c5   : >> { %v18519_v1 = vrot.slane %v18518_v47, 1  ;;  %v3719_v12 = vmul.f32 %v12819_v3, %v18520_v44  ;;  %v3843_v19 = vmul.f32 %v12819_v3, %v18521_v7  ;;  %v12831_v21 = vadd.f32 %v18434_v56, %v6051_v49  ;;  %v18526_v49 = vld [vmem:[#allocation115_spill] sm:$0xff]  ;;  %v18530_v7 = vld [vmem:[#allocation117_spill] sm:$0xff] }
 0x2c6   : >> { %v3967_v33 = vmul.f32 %v12819_v3, %v18523_v8  ;;  %v4091_v18 = vmul.f32 %v12819_v3, %v18524_v39  ;;  %v4215_v50 = vmul.f32 %v12819_v3, %v18430_v63  ;;  %v3465_v14 = vrot.slane %v3408_v31, 5 }
 0x2c7   : >> { %v12824_v29 = vsel %vm519_vm2, %v18519_v1, %v2969_v55  ;;  %18522 = vst [vmem:[#allocation26_spill] sm:$0xff] %v12831_v21  ;;  %v2204_v55 = vadd.f32 %v2163_v11, %v2080_v53  ;;  %v3589_v48 = vrot.slane %v3532_v32, 6  ;;  %v4339_v42 = vmul.f32 %v12819_v3, %v18525_v62  ;;  %v18532_v53 = vld [vmem:[#allocation82_spill] sm:$0xff]  ;;  %v18533_v3 = vld [vmem:[#allocation33_spill] sm:$0xff] }
 0x2c8   : >> { %v6103_v47 = vsel %vm273_vm0, %v12831_v21, 0.0  ;;  %v18527_v1 = vrot.slane %v18526_v49, 2  ;;  %v18529_v8 = vrot.slane %v18528_v43, 3  ;;  %v18531_v63 = vrot.slane %v18530_v7, 4  ;;  %v18534_v62 = vld [vmem:[#allocation86_spill] sm:$0xff] }
 0x2c9   : >> { %6104 = vadd.xlane.f32.xlu0 %v6103_v47  ;;  %v2328_v31 = vadd.f32 %v2287_v58, %v2204_v55  ;;  %v3776_v32 = vrot.slane %v3719_v12, 1  ;;  %v4526_v21 = vmul.f32 %v18533_v3, %v18532_v53  ;;  %v4650_v49 = vmul.f32 %v18533_v3, %v18534_v62  ;;  %v18539_v55 = vld [vmem:[#allocation68_spill] sm:$0xff]  ;;  %v18540_v47 = vld [vmem:[#allocation65_spill] sm:$0xff] }
 0x2ca   : >> { %v3094_v56 = vsel %vm644_vm3, %v18527_v1, %v3093_v10  ;;  %v12849_v39 = vsel %vm769_vm4, %v18529_v8, %v3217_v30  ;;  %v12854_v11 = vsel %vm894_vm5, %v18531_v63, %v3341_v46  ;;  %v3900_v10 = vrot.slane %v3843_v19, 2  ;;  %v18535_v8 = vld [vmem:[#allocation50_spill] sm:$0xff]  ;;  %v18541_v19 = vld [vmem:[#allocation88_spill] sm:$0xff] }
 0x2cb   : >> { %v4024_v1 = vrot.slane %v3967_v33, 3  ;;  %v4148_v43 = vrot.slane %v4091_v18, 4  ;;  %v4272_v44 = vrot.slane %v4215_v50, 5  ;;  %v2452_v30 = vadd.f32 %v2411_v13, %v2328_v31  ;;  %v18537_v63 = vld [vmem:[#allocation102_spill] sm:$0xff] }
 0x2cc   : >> { %v18536_v23 = vrot.slane %v18535_v8, 5  ;;  %v18538_v46 = vrot.slane %v18537_v63, 6  ;;  %v4396_v12 = vrot.slane %v4339_v42, 6  ;;  %v12872_v62 = vmul.f32 %v18540_v47, %v18539_v55  ;;  %v18542_v13 = vld [vmem:[#allocation90_spill] sm:$0xff] }
 0x2cd   : >> { %v12876_v33 = vmul.f32 %v18533_v3, %v18541_v19  ;;  %v12880_v18 = vmul.f32 %v18533_v3, %v18542_v13  ;;  %v4583_v8 = vrot.slane %v4526_v21, 1  ;;  %v4707_v63 = vrot.slane %v4650_v49, 2  ;;  %v18548_v55 = vld [vmem:[#allocation118_spill] sm:$0xff] }
 0x2ce   : >> { %v12863_v7 = vsel %vm1019_vm6, %v18536_v23, %v3465_v14  ;;  %v12868_v58 = vsel %vm1144_vm7, %v18538_v46, %v3589_v48  ;;  %v18543_v23 = vld [vmem:[#allocation93_spill] sm:$0xff]  ;;  %v2576_v14 = vadd.f32 %v2535_v4, %v2452_v30  ;;  %v18544_v48 = vld [vmem:[#allocation59_spill] sm:$0xff]  ;;  %v18549_v13 = vrot.slane %v18548_v55, 3  ;;  %v18553_v30 = vld [vmem:[#allocation110_spill] sm:$0xff] }
 0x2cf   : >> { %v12884_v50 = vmul.f32 %v18533_v3, %v18543_v23  ;;  %v18545_v31 = vrot.slane %v18544_v48, 1  ;;  %v18546_v46 = vld [vmem:[#allocation87_spill] sm:$0xff]  ;;  %v18550_v23 = vld [vmem:[#allocation130_spill] sm:$0xff]  ;;  %v18554_v48 = vrot.slane %v18553_v30, 6  ;;  %v18555_v55 = vld [vmem:[#allocation84_spill] sm:$0xff] }
 0x2d0   : >> { %v18547_v53 = vrot.slane %v18546_v46, 2  ;;  %v12899_v34 = vsel %vm769_vm4, %v18549_v13, %v4024_v1  ;;  %v18551_v20 = vrot.slane %v18550_v23, 4  ;;  %v2700_v49 = vadd.f32 %v2659_v54, %v2576_v14  ;;  %v18556_v13 = vld [vmem:[#allocation95_spill] sm:$0xff]  ;;  %v18557_v54 = vld [vmem:[#allocation17_spill] sm:$0xff] }
 0x2d1   : >> { %v12889_v42 = vsel %vm519_vm2, %v18545_v31, %v3776_v32  ;;  %v18552_v32 = vrot.slane %v12531_v57, 5  ;;  %v12922_v23 = vmul.f32 %v18533_v3, %v18556_v13  ;;  %v4955_v57 = vrot.slane %v12880_v18, 4  ;;  %v18561_v30 = vld [vmem:[#allocation125_spill] sm:$0xff] }
 0x2d2   : >> { %v12894_v19 = vsel %vm644_vm3, %v18547_v53, %v3900_v10  ;;  %v12904_v4 = vsel %vm894_vm5, %v18551_v20, %v4148_v43  ;;  %v12914_v53 = vsel %vm1144_vm7, %v18554_v48, %v4396_v12  ;;  %v8367_v10 = vld [vmem:[%s8792_s26 + $0xe0] sm:$0xff]  ;;  %v4831_v20 = vrot.slane %v12876_v33, 3  ;;  %v18558_v43 = vld [vmem:[#allocation73_spill] sm:$0xff]  ;;  %v18559_v12 = vld [vmem:[#allocation120_spill] sm:$0xff] }
 0x2d3   : >> { %v12909_v21 = vsel %vm1019_vm6, %v18552_v32, %v4272_v44  ;;  %v12918_v1 = vmul.f32 %v8367_v10, %v18555_v55  ;;  %v486_v14 = vmul.f32 %v18558_v43, %v18557_v54  ;;  %v2824_v31 = vadd.f32 %v2783_v6, %v2700_v49  ;;  %v18563_v44 = vld [vmem:[#allocation18_spill] sm:$0xff] }
 0x2d4   : >> { %v18560_v46 = vrot.slane %v18559_v12, 1  ;;  %v18562_v48 = vrot.slane %v18561_v30, 2  ;;  %v445_v33 = vmul.f32 %v18558_v43, %v18461_v24  ;;  %v12943_v18 = vmul.f32 %v12210_v16, %v18557_v54 }
 0x2d5   : >> { %v545_v10 = vrot.slane %v486_v14, 1  ;;  %v611_v6 = vmul.f32 %v18558_v43, %v18563_v44  ;;  %v2887_v49 = vadd.f32 %v12812_v60, %v2824_v31  ;;  %v12956_v12 = vmul.f32 %v12210_v16, %v18462_v36 }
 0x2d6   : >> { %v12932_v32 = vsel %vm519_vm2, %v18560_v46, %v4583_v8  ;;  %v12937_v3 = vsel %vm644_vm3, %v18562_v48, %v4707_v63  ;;  %v12949_v8 = vmul.f32 %v12210_v16, %v18563_v44  ;;  %v736_v63 = vmul.f32 %v18558_v43, %v18462_v36  ;;  %v18564_v46 = vld [vmem:[#allocation20_spill] sm:$0xff] }
 0x2d7   : >> { %v861_v30 = vmul.f32 %v18558_v43, %v18564_v46  ;;  %v17185_v14 = vrot.slane %v12943_v18, 1  ;;  %v670_v48 = vrot.slane %v611_v6, 2  ;;  %v12964_v44 = vmul.f32 %v12210_v16, %v18564_v46 }
 0x2d8   : >> { %v17182_v24 = vrot.slane %v12949_v8, 2  ;;  %v3011_v60 = vadd.f32 %v12824_v29, %v2887_v49  ;;  %v795_v31 = vrot.slane %v736_v63, 3  ;;  %v17183_v54 = vrot.slane %v12956_v12, 3 }
 0x2d9   : >> { %v920_v55 = vrot.slane %v861_v30, 4  ;;  %v547_v36 = vsel %vm519_vm2, %v545_v10, %v17185_v14  ;;  %v17184_v13 = vrot.slane %v12964_v44, 4  ;;  %v986_v46 = vmul.f32 %v18558_v43, %v18360_v41  ;;  %v18571_v14 = vld [vmem:[#allocation113_spill] sm:$0xff] }
 0x2da   : >> { %v672_v6 = vsel %vm644_vm3, %v670_v48, %v17182_v24  ;;  %v3135_v52 = vadd.f32 %v3094_v56, %v3011_v60  ;;  %v5203_v29 = vrot.slane %v12922_v23, 6  ;;  %v586_v49 = vadd.f32 %v547_v36, %v445_v33 }
 0x2db   : >> { %v12980_v63 = vmul.f32 %v12210_v16, %v18360_v41  ;;  %v797_v10 = vsel %vm769_vm4, %v795_v31, %v17183_v54  ;;  %v1045_v30 = vrot.slane %v986_v46, 5  ;;  %v1111_v48 = vmul.f32 %v18558_v43, %v17937_v37  ;;  %v18566_v46 = vld [vmem:[#allocation83_spill] sm:$0xff] }
 0x2dc   : >> { %v12989_v24 = vmul.f32 %v12210_v16, %v17937_v37  ;;  %v3259_v56 = vadd.f32 %v12849_v39, %v3135_v52  ;;  %v711_v23 = vadd.f32 %v672_v6, %v586_v49  ;;  %v922_v36 = vsel %vm894_vm5, %v920_v55, %v17184_v13  ;;  %v18568_v52 = vld [vmem:[#allocation100_spill] sm:$0xff]  ;;  %v18569_v49 = vld [vmem:[#allocation111_spill] sm:$0xff] }
 0x2dd   : >> { %v1170_v60 = vrot.slane %v1111_v48, 6  ;;  %v1299_v54 = vmul.f32 %v18566_v46, %v8877_v25  ;;  %v13001_v43 = vmul.f32 %v12319_v2, %v8877_v25  ;;  %v13006_v39 = vmul.f32 %v12632_v61, %v18568_v52 }
 0x2de   : >> { %18565 = vst [vmem:[#allocation133_spill] sm:$0xff] %v12989_v24  ;;  %v3383_v16 = vadd.f32 %v12854_v11, %v3259_v56  ;;  %v836_v6 = vadd.f32 %v797_v10, %v711_v23  ;;  %v1423_v55 = vmul.f32 %v18566_v46, %v18475_v28  ;;  %v18570_v48 = vrot.slane %v18569_v49, 3 }
 0x2df   : >> { %18567 = vst [vmem:[#allocation134_spill] sm:$0xff] %v13001_v43  ;;  %v18572_v31 = vrot.slane %v18571_v14, 4  ;;  %v18573_v11 = vrot.slane %v12980_v63, 5  ;;  %v13025_v10 = vmul.f32 %v12319_v2, %v18475_v28  ;;  %v1357_v25 = vrot.slane %v1299_v54, 1 }
 0x2e0   : >> { %v13013_v13 = vsel %vm769_vm4, %v18570_v48, %v4831_v20  ;;  %v3507_v23 = vadd.f32 %v12863_v7, %v3383_v16  ;;  %v961_v49 = vadd.f32 %v922_v36, %v836_v6  ;;  %v18575_v14 = vrot.slane %v12989_v24, 6  ;;  %v18580_v20 = vld [vmem:[#allocation106_spill] sm:$0xff] }
 0x2e1   : >> { %v13018_v33 = vsel %vm894_vm5, %v18572_v31, %v4955_v57  ;;  %v1047_v56 = vsel %vm1019_vm6, %v1045_v30, %v18573_v11  ;;  %18574 = vst [vmem:[#allocation135_spill] sm:$0xff] %v13025_v10  ;;  %v1258_v31 = vmul.f32 %v18566_v46, %v18481_v5  ;;  %v1547_v30 = vmul.f32 %v18566_v46, %v18477_v17  ;;  %v18578_v11 = vld [vmem:[#allocation121_spill] sm:$0xff] }
 0x2e2   : >> { %v1172_v57 = vsel %vm1144_vm7, %v1170_v60, %v18575_v14  ;;  %v13038_v48 = vmul.f32 %v12319_v2, %v18477_v17  ;;  %v3631_v7 = vadd.f32 %v12868_v58, %v3507_v23  ;;  %v1086_v36 = vadd.f32 %v1047_v56, %v961_v49  ;;  %v13055_v17 = vld [vmem:[%s8792_s26 + $0x100] sm:$0xff]  ;;  %v18584_v56 = vld [vmem:[#allocation98_spill] sm:$0xff] }
 0x2e3   : >> { %v1481_v54 = vrot.slane %v1423_v55, 2  ;;  %v18577_v6 = vrot.slane %v12884_v50, 5  ;;  %v18579_v60 = vrot.slane %v18578_v11, 5  ;;  %v18581_v5 = vrot.slane %v18580_v20, 6  ;;  %18582 = vst [vmem:[#allocation136_spill] sm:$0xff] %v13055_v17 }
 0x2e4   : >> { %18576 = vst [vmem:[#allocation85_spill] sm:$0xff] %v13038_v48  ;;  %v1671_v58 = vmul.f32 %v18566_v46, %v18482_v0  ;;  %v13061_v55 = vmul.f32 %v12319_v2, %v18482_v0  ;;  %v3694_v50 = vadd.f32 %v12872_v62, %v3631_v7  ;;  %v13066_v23 = vmul.f32 %v13055_v17, %v18584_v56  ;;  %v18586_v7 = vld [vmem:[#allocation101_spill] sm:$0xff] }
 0x2e5   : >> { %v13047_v14 = vsel %vm1019_vm6, %v18579_v60, %v18577_v6  ;;  %v13052_v24 = vsel %vm1144_vm7, %v18581_v5, %v5203_v29  ;;  %v1211_v49 = vadd.f32 %v1172_v57, %v1086_v36  ;;  %v18585_v20 = vrot.slane %v13001_v43, 1 }
 0x2e6   : >> { %18583 = vst [vmem:[#allocation137_spill] sm:$0xff] %v13061_v55  ;;  %v1605_v29 = vrot.slane %v1547_v30, 3  ;;  %v1795_v11 = vmul.f32 %v18566_v46, %v18483_v59  ;;  %v13076_v60 = vmul.f32 %v12319_v2, %v18483_v59  ;;  %v3818_v62 = vadd.f32 %v12889_v42, %v3694_v50 }
 0x2e7   : >> { %v1359_v5 = vsel %vm519_vm2, %v1357_v25, %v18585_v20  ;;  %v13081_v16 = vmul.f32 %v13055_v17, %v18586_v7  ;;  %v1274_v57 = vadd.f32 %v1258_v31, %v1211_v49  ;;  %v18587_v36 = vrot.slane %v13025_v10, 2  ;;  %v18589_v31 = vld [vmem:[#allocation105_spill] sm:$0xff] }
 0x2e8   : >> { %v1729_v30 = vrot.slane %v1671_v58, 4  ;;  %v1919_v6 = vmul.f32 %v18566_v46, %v18488_v26  ;;  %v13091_v43 = vmul.f32 %v12319_v2, %v18488_v26  ;;  %v3942_v42 = vadd.f32 %v12894_v19, %v3818_v62  ;;  %v18590_v58 = vld [vmem:[#allocation108_spill] sm:$0xff]  ;;  %v18592_v26 = vld [vmem:[#allocation97_spill] sm:$0xff] }
 0x2e9   : >> { %v1483_v25 = vsel %vm644_vm3, %v1481_v54, %v18587_v36  ;;  %v13096_v50 = vmul.f32 %v13055_v17, %v18378_v27  ;;  %v13100_v49 = vmul.f32 %v13055_v17, %v18589_v31  ;;  %v1398_v54 = vadd.f32 %v1359_v5, %v1274_v57 }
 0x2ea   : >> { %18588 = vst [vmem:[#allocation138_spill] sm:$0xff] %v13091_v43  ;;  %v13104_v36 = vmul.f32 %v13055_v17, %v18590_v58  ;;  %v18591_v46 = vrot.slane %v13038_v48, 3  ;;  %v1853_v20 = vrot.slane %v1795_v11, 5  ;;  %v17200_v19 = vrot.slane %v13076_v60, 5 }
 0x2eb   : >> { %v4066_v62 = vadd.f32 %v12899_v34, %v3942_v42  ;;  %v1522_v10 = vadd.f32 %v1483_v25, %v1398_v54  ;;  %v2106_v59 = vmul.f32 %v18592_v26, %v18060_v51  ;;  %v13115_v5 = vmul.f32 %v18514_v45, %v18060_v51  ;;  %v13127_v25 = vld [vmem:[%s16584_s1 + $0x30] ss:$0 sm:$0xff] }
 0x2ec   : >> { %v1607_v2 = vsel %vm769_vm4, %v1605_v29, %v18591_v46  ;;  %v18594_v57 = vrot.slane %v13061_v55, 4  ;;  %v1977_v48 = vrot.slane %v1919_v6, 6  ;;  %v2230_v11 = vmul.f32 %v18592_v26, %v18492_v22  ;;  %18595 = vst [vmem:[#allocation140_spill] sm:$0xff] %v13127_v25 }
 0x2ed   : >> { %18593 = vst [vmem:[#allocation139_spill] sm:$0xff] %v13115_v5  ;;  %v4190_v34 = vadd.f32 %v12904_v4, %v4066_v62  ;;  %v13131_v42 = vmul.f32 %v13127_v25, %v13055_v17  ;;  %v1646_v54 = vadd.f32 %v1607_v2, %v1522_v10  ;;  %v13135_v6 = vmul.f32 %v18514_v45, %v18492_v22 }
 0x2ee   : >> { %v1731_v0 = vsel %vm894_vm5, %v1729_v30, %v18594_v57  ;;  %v5390_v30 = vrot.slane %v13066_v23, 1  ;;  %v5514_v46 = vrot.slane %v13081_v16, 2  ;;  %v1855_v4 = vsel %vm1019_vm6, %v1853_v20, %v17200_v19 }
 0x2ef   : >> { %18596 = vst [vmem:[#allocation27_spill] sm:$0xff] %v13135_v6  ;;  %v2065_v62 = vmul.f32 %v18592_v26, %v18290_v38  ;;  %v4314_v57 = vadd.f32 %v12909_v21, %v4190_v34  ;;  %v1770_v29 = vadd.f32 %v1731_v0, %v1646_v54  ;;  %v2164_v17 = vrot.slane %v2106_v59, 1  ;;  %v18599_v59 = vld [vmem:[#allocation48_spill] sm:$0xff]  ;;  %v18601_v0 = vld [vmem:[#allocation51_spill] sm:$0xff] }
 0x2f0   : >> { %v17203_v10 = vrot.slane %v13115_v5, 1  ;;  %v18597_v2 = vrot.slane %v13091_v43, 6  ;;  %v2288_v23 = vrot.slane %v2230_v11, 2  ;;  %v2354_v16 = vmul.f32 %v18592_v26, %v18493_v40 }
 0x2f1   : >> { %v13153_v20 = vmul.f32 %v18514_v45, %v18493_v40  ;;  %v4438_v19 = vadd.f32 %v12914_v53, %v4314_v57  ;;  %v1894_v38 = vadd.f32 %v1855_v4, %v1770_v29  ;;  %v2478_v21 = vmul.f32 %v18592_v26, %v18599_v59 }
 0x2f2   : >> { %v1979_v55 = vsel %vm1144_vm7, %v1977_v48, %v18597_v2  ;;  %v5638_v34 = vrot.slane %v13096_v50, 3  ;;  %v5762_v48 = vrot.slane %v13100_v49, 4  ;;  %v5886_v11 = vrot.slane %v13104_v36, 5  ;;  %v18606_v50 = vld [vmem:[#allocation103_spill] sm:$0xff] }
 0x2f3   : >> { %18598 = vst [vmem:[#allocation127_spill] sm:$0xff] %v13153_v20  ;;  %v13164_v54 = vmul.f32 %v18514_v45, %v18599_v59  ;;  %v4501_v2 = vadd.f32 %v12918_v1, %v4438_v19  ;;  %v2018_v29 = vadd.f32 %v1979_v55, %v1894_v38  ;;  %v2166_v4 = vsel %vm519_vm2, %v2164_v17, %v17203_v10 }
 0x2f4   : >> { %v2412_v57 = vrot.slane %v2354_v16, 3  ;;  %v2602_v49 = vmul.f32 %v18592_v26, %v18601_v0  ;;  %v13176_v36 = vmul.f32 %v18514_v45, %v18601_v0  ;;  %v18603_v19 = vrot.slane %v13135_v6, 2  ;;  %v18604_v16 = vld [vmem:[#allocation52_spill] sm:$0xff] }
 0x2f5   : >> { %18600 = vst [vmem:[#allocation141_spill] sm:$0xff] %v13164_v54  ;;  %v4625_v43 = vadd.f32 %v12932_v32, %v4501_v2  ;;  %v2081_v1 = vadd.f32 %v2065_v62, %v2018_v29  ;;  %v2536_v55 = vrot.slane %v2478_v21, 4  ;;  %v2726_v10 = vmul.f32 %v18592_v26, %v18604_v16  ;;  %v18607_v62 = vld [vmem:[#allocation119_spill] sm:$0xff] }
 0x2f6   : >> { %18602 = vst [vmem:[#allocation142_spill] sm:$0xff] %v13176_v36  ;;  %v2290_v38 = vsel %vm644_vm3, %v2288_v23, %v18603_v19  ;;  %v13187_v53 = vmul.f32 %v18514_v45, %v18604_v16  ;;  %v2913_v5 = vmul.f32 %v18606_v50, %v17965_v15  ;;  %v18608_v2 = vrot.slane %v18607_v62, 1 }
 0x2f7   : >> { %v4749_v32 = vadd.f32 %v12937_v3, %v4625_v43  ;;  %v2205_v23 = vadd.f32 %v2166_v4, %v2081_v1  ;;  %v13197_v21 = vmul.f32 %v18540_v47, %v17965_v15  ;;  %v18610_v26 = vrot.slane %v13153_v20, 3  ;;  %v18611_v43 = vld [vmem:[#allocation128_spill] sm:$0xff] }
 0x2f8   : >> { %18605 = vst [vmem:[#allocation143_spill] sm:$0xff] %v13187_v53  ;;  %v5391_v29 = vsel %vm519_vm2, %v18608_v2, %v5390_v30  ;;  %v2660_v45 = vrot.slane %v2602_v49, 5  ;;  %v3037_v6 = vmul.f32 %v18606_v50, %v18179_v35  ;;  %v18612_v62 = vrot.slane %v18611_v43, 2 }
 0x2f9   : >> { %18609 = vst [vmem:[#allocation144_spill] sm:$0xff] %v13197_v21  ;;  %v2414_v19 = vsel %vm769_vm4, %v2412_v57, %v18610_v26  ;;  %v4873_v3 = vadd.f32 %v13013_v13, %v4749_v32  ;;  %v2329_v4 = vadd.f32 %v2290_v38, %v2205_v23  ;;  %v13211_v1 = vmul.f32 %v18540_v47, %v18179_v35  ;;  %v18615_v38 = vld [vmem:[#allocation131_spill] sm:$0xff] }
 0x2fa   : >> { %v5515_v30 = vsel %vm644_vm3, %v18612_v62, %v5514_v46  ;;  %v18614_v2 = vrot.slane %v13164_v54, 4  ;;  %v2784_v49 = vrot.slane %v2726_v10, 6  ;;  %v2971_v17 = vrot.slane %v2913_v5, 1  ;;  %v18645_v54 = vld [vmem:[#allocation75_spill] sm:$0xff] }
 0x2fb   : >> { %18613 = vst [vmem:[#allocation145_spill] sm:$0xff] %v13211_v1  ;;  %v4997_v20 = vadd.f32 %v13018_v33, %v4873_v3  ;;  %v2453_v13 = vadd.f32 %v2414_v19, %v2329_v4  ;;  %v3161_v46 = vmul.f32 %v18606_v50, %v18396_v9  ;;  %v18616_v23 = vrot.slane %v18615_v38, 3  ;;  %v18619_v4 = vld [vmem:[#allocation61_spill] sm:$0xff]  ;;  %v18620_v38 = vld [vmem:[#allocation122_spill] sm:$0xff] }
 0x2fc   : >> { %v2538_v57 = vsel %vm894_vm5, %v2536_v55, %v18614_v2  ;;  %v18617_v62 = vrot.slane %v13176_v36, 5  ;;  %v3095_v10 = vrot.slane %v3037_v6, 2  ;;  %v13229_v5 = vmul.f32 %v18540_v47, %v18396_v9 }
 0x2fd   : >> { %v5639_v43 = vsel %vm769_vm4, %v18616_v23, %v5638_v34  ;;  %v5121_v33 = vadd.f32 %v13047_v14, %v4997_v20  ;;  %v2577_v19 = vadd.f32 %v2538_v57, %v2453_v13  ;;  %v17208_v3 = vrot.slane %v13211_v1, 2  ;;  %v18622_v23 = vld [vmem:[#allocation123_spill] sm:$0xff]  ;;  %v18625_v20 = vld [vmem:[#allocation56_spill] sm:$0xff] }
 0x2fe   : >> { %v2662_v55 = vsel %vm1019_vm6, %v2660_v45, %v18617_v62  ;;  %18618 = vst [vmem:[#allocation28_spill] sm:$0xff] %v13229_v5  ;;  %v3285_v2 = vmul.f32 %v18606_v50, %v18619_v4  ;;  %v18621_v32 = vrot.slane %v18620_v38, 4  ;;  %v18623_v26 = vrot.slane %v18622_v23, 5 }
 0x2ff   : >> { %v18624_v45 = vrot.slane %v13187_v53, 6  ;;  %v2872_v57 = vmul.f32 %v18606_v50, %v18625_v20  ;;  %v5245_v13 = vadd.f32 %v13052_v24, %v5121_v33  ;;  %v2701_v62 = vadd.f32 %v2662_v55, %v2577_v19  ;;  %v13266_v33 = vld [vmem:[%s8792_s26 + $0xd8] sm:$0xff]  ;;  %v13269_v19 = vld [vmem:[%s8792_s26 + $0xe0] sm:$0xff] }
 0x300   : >> { %v5763_v34 = vsel %vm894_vm5, %v18621_v32, %v5762_v48  ;;  %v5887_v6 = vsel %vm1019_vm6, %v18623_v26, %v5886_v11  ;;  %v18626_v38 = vrot.slane %v13197_v21, 1  ;;  %v3219_v32 = vrot.slane %v3161_v46, 3  ;;  %v18628_v26 = vld [vmem:[#allocation63_spill] sm:$0xff]  ;;  %18630 = vst [vmem:[#allocation148_spill] sm:$0xff] %v13266_v33  ;;  %18631 = vst [vmem:[#allocation149_spill] sm:$0xff] %v13269_v19 }
 0x301   : >> { %v2786_v14 = vsel %vm1144_vm7, %v2784_v49, %v18624_v45  ;;  %v13253_v11 = vmul.f32 %v18540_v47, %v18619_v4  ;;  %v3409_v49 = vmul.f32 %v18606_v50, %v18628_v26  ;;  %v13259_v45 = vmul.f32 %v18540_v47, %v18628_v26  ;;  %v18634_v20 = vld [vmem:[#allocation67_spill] sm:$0xff] }
 0x302   : >> { %v2973_v48 = vsel %vm519_vm2, %v2971_v17, %v18626_v38  ;;  %v5308_v24 = vadd.f32 %v13006_v39, %v5245_v13  ;;  %v2825_v55 = vadd.f32 %v2786_v14, %v2701_v62  ;;  %v3097_v17 = vsel %vm644_vm3, %v3095_v10, %v17208_v3  ;;  %v18632_v38 = vld [vmem:[#allocation66_spill] sm:$0xff]  ;;  %v18636_v13 = vld [vmem:[#allocation69_spill] sm:$0xff] }
 0x303   : >> { %18627 = vst [vmem:[#allocation146_spill] sm:$0xff] %v13253_v11  ;;  %18629 = vst [vmem:[#allocation147_spill] sm:$0xff] %v13259_v45  ;;  %v3343_v46 = vrot.slane %v3285_v2, 4  ;;  %v3533_v23 = vmul.f32 %v18606_v50, %v18632_v38  ;;  %v13275_v21 = vmul.f32 %v18540_v47, %v18632_v38  ;;  %v3720_v39 = vmul.f32 %v13266_v33, %v18634_v20 }
 0x304   : >> { %v13281_v14 = vmul.f32 %v13269_v19, %v18634_v20  ;;  %v5432_v10 = vadd.f32 %v5391_v29, %v5308_v24  ;;  %v2888_v2 = vadd.f32 %v2872_v57, %v2825_v55  ;;  %v3844_v62 = vmul.f32 %v13266_v33, %v18636_v13  ;;  %v18639_v29 = vld [vmem:[#allocation74_spill] sm:$0xff] }
 0x305   : >> { %18633 = vst [vmem:[#allocation150_spill] sm:$0xff] %v13275_v21  ;;  %v13287_v3 = vmul.f32 %v13269_v19, %v18636_v13  ;;  %v18638_v50 = vrot.slane %v13229_v5, 3  ;;  %v3467_v38 = vrot.slane %v3409_v49, 5  ;;  %v3968_v57 = vmul.f32 %v13266_v33, %v18639_v29 }
 0x306   : >> { %18635 = vst [vmem:[#allocation151_spill] sm:$0xff] %v13281_v14  ;;  %v5556_v20 = vadd.f32 %v5515_v30, %v5432_v10  ;;  %v3012_v36 = vadd.f32 %v2973_v48, %v2888_v2  ;;  %v13298_v24 = vmul.f32 %v13269_v19, %v18639_v29  ;;  %v3591_v55 = vrot.slane %v3533_v23, 6  ;;  %v18642_v48 = vld [vmem:[#allocation71_spill] sm:$0xff] }
 0x307   : >> { %18637 = vst [vmem:[#allocation23_spill] sm:$0xff] %v13287_v3  ;;  %v3221_v47 = vsel %vm769_vm4, %v3219_v32, %v18638_v50  ;;  %v17218_v13 = vrot.slane %v13275_v21, 6  ;;  %v3778_v5 = vrot.slane %v3720_v39, 1  ;;  %v3902_v49 = vrot.slane %v3844_v62, 2 }
 0x308   : >> { %18640 = vst [vmem:[#allocation40_spill] sm:$0xff] %v13298_v24  ;;  %v5680_v50 = vadd.f32 %v5639_v43, %v5556_v20  ;;  %v3136_v1 = vadd.f32 %v3097_v17, %v3012_v36  ;;  %v18641_v30 = vrot.slane %v13131_v42, 6  ;;  %v18643_v10 = vrot.slane %v18642_v48, 6 }
 0x309   : >> { %v18644_v29 = vrot.slane %v13253_v11, 4  ;;  %v4092_v39 = vmul.f32 %v13266_v33, %v18645_v54  ;;  %v13315_v43 = vmul.f32 %v13269_v19, %v18645_v54  ;;  %v4026_v17 = vrot.slane %v3968_v57, 3 }
 0x30a   : >> { %v6011_v2 = vsel %vm1144_vm7, %v18643_v10, %v18641_v30  ;;  %v5804_v36 = vadd.f32 %v5763_v34, %v5680_v50  ;;  %v3260_v20 = vadd.f32 %v3221_v47, %v3136_v1  ;;  %v18646_v62 = vrot.slane %v13259_v45, 5  ;;  %v18648_v10 = vld [vmem:[#allocation78_spill] sm:$0xff] }
 0x30b   : >> { %v3345_v23 = vsel %vm894_vm5, %v3343_v46, %v18644_v29  ;;  %v3593_v46 = vsel %vm1144_vm7, %v3591_v55, %v17218_v13  ;;  %v18647_v29 = vld [vmem:[#allocation68_spill] sm:$0xff]  ;;  %v4216_v53 = vmul.f32 %v13266_v33, %v18648_v10  ;;  %v18649_v1 = vrot.slane %v13281_v14, 1  ;;  %v18652_v13 = vld [vmem:[#allocation81_spill] sm:$0xff]  ;;  %v18664_v14 = vld [vmem:[#allocation90_spill] sm:$0xff] }
 0x30c   : >> { %v3469_v30 = vsel %vm1019_vm6, %v3467_v38, %v18646_v62  ;;  %v3679_v48 = vmul.f32 %v13266_v33, %v18647_v29  ;;  %v5928_v32 = vadd.f32 %v5887_v6, %v5804_v36  ;;  %v3384_v34 = vadd.f32 %v3345_v23, %v3260_v20 }
 0x30d   : >> { %v3780_v47 = vsel %vm519_vm2, %v3778_v5, %v18649_v1  ;;  %v18650_v57 = vrot.slane %v13287_v3, 2  ;;  %v4150_v50 = vrot.slane %v4092_v39, 4  ;;  %v13337_v55 = vmul.f32 %v13269_v19, %v18648_v10  ;;  %v18655_v39 = vld [vmem:[#allocation82_spill] sm:$0xff]  ;;  %v18656_v1 = vld [vmem:[#allocation107_spill] sm:$0xff] }
 0x30e   : >> { %v4340_v42 = vmul.f32 %v13266_v33, %v18652_v13  ;;  %v6052_v6 = vadd.f32 %v6011_v2, %v5928_v32  ;;  %v3508_v23 = vadd.f32 %v3469_v30, %v3384_v34  ;;  %v18653_v36 = vrot.slane %v13298_v24, 3  ;;  %v18658_v3 = vld [vmem:[#allocation86_spill] sm:$0xff] }
 0x30f   : >> { %v3904_v38 = vsel %vm644_vm3, %v3902_v49, %v18650_v57  ;;  %18651 = vst [vmem:[#allocation41_spill] sm:$0xff] %v13337_v55  ;;  %v13346_v20 = vmul.f32 %v13269_v19, %v18652_v13  ;;  %v4274_v49 = vrot.slane %v4216_v53, 5  ;;  %v4527_v57 = vmul.f32 %v18656_v1, %v18655_v39  ;;  %v18659_v2 = vld [vmem:[#allocation126_spill] sm:$0xff] }
 0x310   : >> { %v4028_v5 = vsel %vm769_vm4, %v4026_v17, %v18653_v36  ;;  %v13352_v62 = vmul.f32 %v12632_v61, %v18655_v39  ;;  %v4651_v32 = vmul.f32 %v18656_v1, %v18658_v3  ;;  %v13357_v30 = vadd.f32 %v18659_v2, %v6052_v6  ;;  %v18662_v36 = vld [vmem:[#allocation88_spill] sm:$0xff] }
 0x311   : >> { %18654 = vst [vmem:[#allocation45_spill] sm:$0xff] %v13346_v20  ;;  %v3632_v34 = vadd.f32 %v3593_v46, %v3508_v23  ;;  %v13361_v17 = vmul.f32 %v12632_v61, %v18658_v3  ;;  %v4775_v53 = vmul.f32 %v18656_v1, %v18662_v36  ;;  %v13368_v24 = vmul.f32 %v12632_v61, %v18662_v36  ;;  %v18666_v3 = vld [vmem:[#allocation93_spill] sm:$0xff] }
 0x312   : >> { %18657 = vst [vmem:[#allocation47_spill] sm:$0xff] %v13352_v62  ;;  %18660 = vst [vmem:[#allocation49_spill] sm:$0xff] %v13357_v30  ;;  %v4899_v19 = vmul.f32 %v18656_v1, %v18664_v14  ;;  %v13374_v6 = vmul.f32 %v12632_v61, %v18664_v14  ;;  %v6106_v46 = vsel %vm273_vm0, %v13357_v30, 0.0  ;;  %v5023_v29 = vmul.f32 %v18656_v1, %v18666_v3 }
 0x313   : >> { %18661 = vst [vmem:[#allocation60_spill] sm:$0xff] %v13361_v17  ;;  %18663 = vst [vmem:[#allocation24_spill] sm:$0xff] %v13368_v24  ;;  %v3695_v23 = vadd.f32 %v3679_v48, %v3632_v34  ;;  %v13382_v33 = vmul.f32 %v12632_v61, %v18666_v3  ;;  %6107 = vadd.xlane.f32.xlu1 %v6106_v46  ;;  %v4398_v36 = vrot.slane %v4340_v42, 6  ;;  %v4585_v45 = vrot.slane %v4527_v57, 1  ;;  %v18668_v3 = vld [vmem:[#allocation95_spill] sm:$0xff]  ;;  %v13408_v57 = vld [vmem:[%s8792_s26 + $0x108] sm:$0xff] }
 0x314   : >> { %18665 = vst [vmem:[#allocation35_spill] sm:$0xff] %v13374_v6  ;;  %v17238_v39 = vrot.slane %v13352_v62, 1  ;;  %v4709_v11 = vrot.slane %v4651_v32, 2  ;;  %v17237_v30 = vrot.slane %v13361_v17, 2  ;;  %v4833_v48 = vrot.slane %v4775_v53, 3  ;;  %18673 = vst [vmem:[#allocation64_spill] sm:$0xff] %v13408_v57 }
 0x315   : >> { %18667 = vst [vmem:[#allocation62_spill] sm:$0xff] %v13382_v33  ;;  %v3819_v14 = vadd.f32 %v3780_v47, %v3695_v23  ;;  %v4957_v13 = vrot.slane %v4899_v19, 4  ;;  %v5147_v46 = vmul.f32 %v18656_v1, %v18668_v3  ;;  %v5081_v21 = vrot.slane %v5023_v29, 5  ;;  %v18683_v17 = vld [vmem:[#allocation19_spill] sm:$0xff] }
 0x316   : >> { %v13394_v47 = vmul.f32 %v12632_v61, %v18668_v3  ;;  %v18669_v32 = vrot.slane %v13315_v43, 4  ;;  %v18670_v19 = vrot.slane %v13337_v55, 5  ;;  %v18671_v10 = vrot.slane %v13346_v20, 6 }
 0x317   : >> { %v3943_v42 = vadd.f32 %v3904_v38, %v3819_v14  ;;  %v18672_v38 = vld [vmem:[#allocation84_spill] sm:$0xff]  ;;  %v4587_v61 = vsel %vm519_vm2, %v4585_v45, %v17238_v39  ;;  %v13429_v45 = vmul.f32 %v13408_v57, %v18568_v52  ;;  %v8369_v39 = vld [vmem:[%s8792_s26 + $0x80] sm:$0xff] }
 0x318   : >> { %v4152_v53 = vsel %vm894_vm5, %v4150_v50, %v18669_v32  ;;  %v4276_v23 = vsel %vm1019_vm6, %v4274_v49, %v18670_v19  ;;  %v4400_v14 = vsel %vm1144_vm7, %v4398_v36, %v18671_v10  ;;  %v4486_v29 = vmul.f32 %v18656_v1, %v18672_v38 }
 0x319   : >> { %v4067_v34 = vadd.f32 %v4028_v5, %v3943_v42  ;;  %v4711_v50 = vsel %vm644_vm3, %v4709_v11, %v17237_v30  ;;  %v5334_v49 = vmul.f32 %v13408_v57, %v18584_v56  ;;  %v18674_v32 = vrot.slane %v13368_v24, 3  ;;  %v13425_v42 = vld [vmem:[%s8792_s26 + $0x110] sm:$0xff] }
 0x31a   : >> { %v18675_v1 = vrot.slane %v13374_v6, 4  ;;  %v5205_v36 = vrot.slane %v5147_v46, 6  ;;  %v18676_v19 = vrot.slane %v13382_v33, 5  ;;  %v13445_v46 = vmul.f32 %v13425_v42, %v18586_v7  ;;  %v18681_v33 = vld [vmem:[#allocation16_spill] sm:$0xff] }
 0x31b   : >> { %v4835_v10 = vsel %vm769_vm4, %v4833_v48, %v18674_v32  ;;  %v4191_v11 = vadd.f32 %v4152_v53, %v4067_v34  ;;  %v13439_v48 = vmul.f32 %v13425_v42, %v18584_v56  ;;  %v5582_v34 = vmul.f32 %v13408_v57, %v18378_v27  ;;  %v18679_v53 = vld [vmem:[#allocation17_spill] sm:$0xff]  ;;  %v18680_v32 = vld [vmem:[#allocation70_spill] sm:$0xff] }
 0x31c   : >> { %v4959_v5 = vsel %vm894_vm5, %v4957_v13, %v18675_v1  ;;  %v13434_v30 = vsel %vm1019_vm6, %v5081_v21, %v18676_v19  ;;  %v5458_v13 = vmul.f32 %v13408_v57, %v18586_v7  ;;  %18678 = vst [vmem:[#allocation76_spill] sm:$0xff] %v13445_v46  ;;  %v488_v21 = vmul.f32 %v18680_v32, %v18679_v53  ;;  %v18682_v56 = vld [vmem:[#allocation18_spill] sm:$0xff]  ;;  %v18684_v7 = vld [vmem:[#allocation20_spill] sm:$0xff] }
 0x31d   : >> { %18677 = vst [vmem:[#allocation72_spill] sm:$0xff] %v13439_v48  ;;  %v4315_v1 = vadd.f32 %v4276_v23, %v4191_v11  ;;  %v5392_v19 = vrot.slane %v5334_v49, 1  ;;  %v446_v52 = vmul.f32 %v8369_v39, %v18681_v33  ;;  %v613_v6 = vmul.f32 %v18680_v32, %v18682_v56 }
 0x31e   : >> { %v548_v24 = vrot.slane %v488_v21, 1  ;;  %v738_v62 = vmul.f32 %v18680_v32, %v18683_v17  ;;  %v863_v38 = vmul.f32 %v18680_v32, %v18684_v7  ;;  %v988_v20 = vmul.f32 %v18680_v32, %v18360_v41 }
 0x31f   : >> { %v4439_v55 = vadd.f32 %v4400_v14, %v4315_v1  ;;  %v13464_v49 = vmul.f32 %v13425_v42, %v18378_v27  ;;  %v673_v39 = vrot.slane %v613_v6, 2  ;;  %v18686_v11 = vrot.slane %v12943_v18, 1 }
 0x320   : >> { %v798_v56 = vrot.slane %v738_v62, 3  ;;  %v923_v17 = vrot.slane %v863_v38, 4  ;;  %v1113_v7 = vmul.f32 %v18680_v32, %v17937_v37  ;;  %v18687_v41 = vrot.slane %v13394_v47, 6 }
 0x321   : >> { %18685 = vst [vmem:[#allocation77_spill] sm:$0xff] %v13464_v49  ;;  %v549_v21 = vsel %vm519_vm2, %v18686_v11, %v548_v24  ;;  %v4502_v33 = vadd.f32 %v4486_v29, %v4439_v55  ;;  %v18688_v23 = vrot.slane %v12949_v8, 2  ;;  %v5516_v6 = vrot.slane %v5458_v13, 2 }
 0x322   : >> { %v5207_v14 = vsel %vm1144_vm7, %v5205_v36, %v18687_v41  ;;  %v587_v1 = vadd.f32 %v549_v21, %v446_v52  ;;  %v17252_v18 = vrot.slane %v13445_v46, 2  ;;  %v18689_v24 = vrot.slane %v12956_v12, 3 }
 0x323   : >> { %v674_v27 = vsel %vm644_vm3, %v18688_v23, %v673_v39  ;;  %v1048_v38 = vrot.slane %v988_v20, 5  ;;  %v4626_v11 = vadd.f32 %v4587_v61, %v4502_v33  ;;  %v18690_v55 = vrot.slane %v13439_v48, 1  ;;  %v18692_v23 = vld [vmem:[#allocation30_spill] sm:$0xff]  ;;  %v18693_v39 = vld [vmem:[#allocation132_spill] sm:$0xff] }
 0x324   : >> { %v799_v62 = vsel %vm769_vm4, %v18689_v24, %v798_v56  ;;  %v5640_v32 = vrot.slane %v5582_v34, 3  ;;  %v712_v41 = vadd.f32 %v674_v27, %v587_v1  ;;  %v17251_v52 = vrot.slane %v13464_v49, 3  ;;  %v18697_v1 = vld [vmem:[#allocation32_spill] sm:$0xff] }
 0x325   : >> { %v5394_v29 = vsel %vm519_vm2, %v5392_v19, %v18690_v55  ;;  %v18691_v8 = vrot.slane %v12964_v44, 4  ;;  %v1173_v13 = vrot.slane %v1113_v7, 6  ;;  %v1301_v12 = vmul.f32 %v18693_v39, %v18692_v23 }
 0x326   : >> { %v4750_v21 = vadd.f32 %v4711_v50, %v4626_v11  ;;  %v5706_v56 = vmul.f32 %v13408_v57, %v18589_v31  ;;  %v13494_v33 = vmul.f32 %v13425_v42, %v18589_v31  ;;  %v837_v20 = vadd.f32 %v799_v62, %v712_v41  ;;  %v18698_v62 = vld [vmem:[#allocation133_spill] sm:$0xff] }
 0x327   : >> { %v924_v36 = vsel %vm894_vm5, %v18691_v8, %v923_v17  ;;  %v5518_v27 = vsel %vm644_vm3, %v5516_v6, %v17252_v18  ;;  %v5830_v44 = vmul.f32 %v13408_v57, %v18590_v58  ;;  %v18695_v7 = vrot.slane %v12980_v63, 5 }
 0x328   : >> { %18694 = vst [vmem:[#allocation79_spill] sm:$0xff] %v13494_v33  ;;  %v1425_v61 = vmul.f32 %v18693_v39, %v18475_v28  ;;  %v4874_v50 = vadd.f32 %v4835_v10, %v4750_v21  ;;  %v13508_v34 = vmul.f32 %v13425_v42, %v18590_v58  ;;  %v962_v19 = vadd.f32 %v924_v36, %v837_v20  ;;  %v8370_v36 = vld [vmem:[%s8792_s26 + $0x98] sm:$0xff]  ;;  %v18701_v21 = vld [vmem:[#allocation29_spill] sm:$0xff] }
 0x329   : >> { %v1049_v17 = vsel %vm1019_vm6, %v18695_v7, %v1048_v38  ;;  %v1549_v24 = vmul.f32 %v18693_v39, %v18697_v1  ;;  %v5642_v6 = vsel %vm769_vm4, %v5640_v32, %v17251_v52  ;;  %v5954_v63 = vmul.f32 %v13127_v25, %v13408_v57  ;;  %v18702_v52 = vld [vmem:[#allocation36_spill] sm:$0xff]  ;;  %v18703_v57 = vld [vmem:[#allocation37_spill] sm:$0xff] }
 0x32a   : >> { %18696 = vst [vmem:[#allocation80_spill] sm:$0xff] %v13508_v34  ;;  %v18699_v38 = vrot.slane %v18698_v62, 6  ;;  %v1360_v10 = vrot.slane %v1301_v12, 1  ;;  %v4998_v55 = vadd.f32 %v4959_v5, %v4874_v50  ;;  %v13522_v41 = vmul.f32 %v13127_v25, %v13425_v42  ;;  %v18704_v50 = vld [vmem:[#allocation39_spill] sm:$0xff] }
 0x32b   : >> { %v1087_v8 = vadd.f32 %v1049_v17, %v962_v19  ;;  %v1259_v20 = vmul.f32 %v8370_v36, %v18701_v21  ;;  %v5764_v7 = vrot.slane %v5706_v56, 4  ;;  %v1484_v32 = vrot.slane %v1425_v61, 2  ;;  %v18705_v36 = vld [vmem:[#allocation134_spill] sm:$0xff] }
 0x32c   : >> { %v1174_v11 = vsel %vm1144_vm7, %v18699_v38, %v1173_v13  ;;  %18700 = vst [vmem:[#allocation54_spill] sm:$0xff] %v13522_v41  ;;  %v1673_v18 = vmul.f32 %v18693_v39, %v18702_v52  ;;  %v1797_v62 = vmul.f32 %v18693_v39, %v18703_v57  ;;  %v5122_v13 = vadd.f32 %v13434_v30, %v4998_v55  ;;  %v13540_v30 = vld [vmem:[%s8792_s26 + $0xb8] sm:$0xff] }
 0x32d   : >> { %v1212_v5 = vadd.f32 %v1174_v11, %v1087_v8  ;;  %v1608_v12 = vrot.slane %v1549_v24, 3  ;;  %v1921_v38 = vmul.f32 %v18693_v39, %v18704_v50  ;;  %v17260_v17 = vrot.slane %v13494_v33, 4  ;;  %18707 = vst [vmem:[#allocation89_spill] sm:$0xff] %v13540_v30  ;;  %v18708_v24 = vld [vmem:[#allocation135_spill] sm:$0xff] }
 0x32e   : >> { %v5888_v19 = vrot.slane %v5830_v44, 5  ;;  %v18706_v61 = vrot.slane %v18705_v36, 1  ;;  %v5246_v46 = vadd.f32 %v5207_v14, %v5122_v13  ;;  %v6012_v48 = vrot.slane %v5954_v63, 6 }
 0x32f   : >> { %v17264_v25 = vrot.slane %v13522_v41, 6  ;;  %v1275_v58 = vadd.f32 %v1259_v20, %v1212_v5  ;;  %v18709_v11 = vrot.slane %v18708_v24, 2  ;;  %v1732_v55 = vrot.slane %v1673_v18, 4 }
 0x330   : >> { %v1361_v49 = vsel %vm519_vm2, %v18706_v61, %v1360_v10  ;;  %v1856_v8 = vrot.slane %v1797_v62, 5  ;;  %v2108_v44 = vmul.f32 %v13540_v30, %v18060_v51  ;;  %v5309_v36 = vadd.f32 %v13429_v45, %v5246_v46  ;;  %v18710_v10 = vld [vmem:[#allocation85_spill] sm:$0xff] }
 0x331   : >> { %v1485_v39 = vsel %vm644_vm3, %v18709_v11, %v1484_v32  ;;  %v1399_v56 = vadd.f32 %v1361_v49, %v1275_v58  ;;  %v18711_v14 = vrot.slane %v18710_v10, 3  ;;  %v1980_v13 = vrot.slane %v1921_v38, 6  ;;  %v18713_v61 = vld [vmem:[#allocation137_spill] sm:$0xff]  ;;  %v18716_v10 = vld [vmem:[#allocation138_spill] sm:$0xff] }
 0x332   : >> { %v2232_v20 = vmul.f32 %v13540_v30, %v18492_v22  ;;  %v2356_v5 = vmul.f32 %v13540_v30, %v18493_v40  ;;  %v2480_v18 = vmul.f32 %v13540_v30, %v18599_v59  ;;  %v2604_v32 = vmul.f32 %v13540_v30, %v18601_v0 }
 0x333   : >> { %v1609_v63 = vsel %vm769_vm4, %v18711_v14, %v1608_v12  ;;  %v5433_v62 = vadd.f32 %v5394_v29, %v5309_v36  ;;  %v5766_v58 = vsel %vm894_vm5, %v5764_v7, %v17260_v17  ;;  %v1523_v45 = vadd.f32 %v1485_v39, %v1399_v56 }
 0x334   : >> { %v2728_v46 = vmul.f32 %v13540_v30, %v18604_v16  ;;  %v18712_v49 = vrot.slane %v13508_v34, 5  ;;  %v6014_v38 = vsel %vm1144_vm7, %v6012_v48, %v17264_v25  ;;  %v18714_v24 = vrot.slane %v18713_v61, 4  ;;  %v8371_v61 = vld [vmem:[%s8792_s26 + $0xb0] sm:$0xff]  ;;  %v18718_v34 = vld [vmem:[#allocation43_spill] sm:$0xff] }
 0x335   : >> { %v2167_v11 = vrot.slane %v2108_v44, 1  ;;  %v5557_v36 = vadd.f32 %v5518_v27, %v5433_v62  ;;  %v1647_v7 = vadd.f32 %v1609_v63, %v1523_v45  ;;  %v18715_v56 = vrot.slane %v13076_v60, 5  ;;  %v18719_v27 = vld [vmem:[#allocation139_spill] sm:$0xff] }
 0x336   : >> { %v5890_v12 = vsel %vm1019_vm6, %v5888_v19, %v18712_v49  ;;  %v1733_v29 = vsel %vm894_vm5, %v18714_v24, %v1732_v55  ;;  %v18717_v14 = vrot.slane %v18716_v10, 6  ;;  %v2291_v19 = vrot.slane %v2232_v20, 2  ;;  %v18722_v45 = vld [vmem:[#allocation27_spill] sm:$0xff] }
 0x337   : >> { %v1857_v39 = vsel %vm1019_vm6, %v18715_v56, %v1856_v8  ;;  %v2415_v49 = vrot.slane %v2356_v5, 3  ;;  %v2539_v30 = vrot.slane %v2480_v18, 4  ;;  %v2663_v41 = vrot.slane %v2604_v32, 5  ;;  %v18721_v8 = vld [vmem:[#allocation25_spill] sm:$0xff] }
 0x338   : >> { %v1981_v17 = vsel %vm1144_vm7, %v18717_v14, %v1980_v13  ;;  %v5681_v48 = vadd.f32 %v5642_v6, %v5557_v36  ;;  %v1771_v25 = vadd.f32 %v1733_v29, %v1647_v7  ;;  %v2066_v55 = vmul.f32 %v8371_v61, %v18718_v34  ;;  %v18724_v29 = vld [vmem:[#allocation127_spill] sm:$0xff]  ;;  %v18726_v7 = vld [vmem:[#allocation141_spill] sm:$0xff] }
 0x339   : >> { %v2787_v44 = vrot.slane %v2728_v46, 6  ;;  %v18720_v63 = vrot.slane %v18719_v27, 1  ;;  %v2915_v62 = vmul.f32 %v18721_v8, %v17965_v15  ;;  %v3039_v13 = vmul.f32 %v18721_v8, %v18179_v35  ;;  %v18730_v61 = vld [vmem:[#allocation143_spill] sm:$0xff] }
 0x33a   : >> { %v3163_v20 = vmul.f32 %v18721_v8, %v18396_v9  ;;  %v5805_v6 = vadd.f32 %v5766_v58, %v5681_v48  ;;  %v1895_v5 = vadd.f32 %v1857_v39, %v1771_v25  ;;  %v3287_v18 = vmul.f32 %v18721_v8, %v18619_v4  ;;  %v18728_v25 = vld [vmem:[#allocation142_spill] sm:$0xff] }
 0x33b   : >> { %v2168_v60 = vsel %vm519_vm2, %v18720_v63, %v2167_v11  ;;  %v3411_v32 = vmul.f32 %v18721_v8, %v18628_v26  ;;  %v18723_v46 = vrot.slane %v18722_v45, 2  ;;  %v18725_v11 = vrot.slane %v18724_v29, 3  ;;  %v18732_v45 = vld [vmem:[#allocation56_spill] sm:$0xff] }
 0x33c   : >> { %v18727_v56 = vrot.slane %v18726_v7, 4  ;;  %v18729_v39 = vrot.slane %v18728_v25, 5  ;;  %v5929_v14 = vadd.f32 %v5890_v12, %v5805_v6  ;;  %v2019_v48 = vadd.f32 %v1981_v17, %v1895_v5  ;;  %v18733_v7 = vld [vmem:[#allocation66_spill] sm:$0xff]  ;;  %v13616_v12 = vld [vmem:[%s8792_s26 + $0xe8] sm:$0xff]  ;;  %v18735_v17 = vld [vmem:[#allocation67_spill] sm:$0xff] }
 0x33d   : >> { %v2292_v24 = vsel %vm644_vm3, %v18723_v46, %v2291_v19  ;;  %v2416_v36 = vsel %vm769_vm4, %v18725_v11, %v2415_v49  ;;  %v18731_v27 = vrot.slane %v18730_v61, 6  ;;  %v8372_v19 = vld [vmem:[%s8792_s26 + $0xc8] sm:$0xff]  ;;  %v2974_v49 = vrot.slane %v2915_v62, 1  ;;  %18734 = vst [vmem:[#allocation91_spill] sm:$0xff] %v13616_v12 }
 0x33e   : >> { %v2540_v58 = vsel %vm894_vm5, %v18727_v56, %v2539_v30  ;;  %v2664_v10 = vsel %vm1019_vm6, %v18729_v39, %v2663_v41  ;;  %v13611_v46 = vmul.f32 %v8372_v19, %v18732_v45  ;;  %v3098_v29 = vrot.slane %v3039_v13, 2  ;;  %v18737_v39 = vld [vmem:[#allocation74_spill] sm:$0xff] }
 0x33f   : >> { %v2788_v63 = vsel %vm1144_vm7, %v18731_v27, %v2787_v44  ;;  %v3222_v11 = vrot.slane %v3163_v20, 3  ;;  %v3535_v30 = vmul.f32 %v18721_v8, %v18733_v7  ;;  %v6053_v56 = vadd.f32 %v6014_v38, %v5929_v14  ;;  %v18736_v44 = vld [vmem:[#allocation69_spill] sm:$0xff]  ;;  %v18741_v14 = vld [vmem:[#allocation144_spill] sm:$0xff] }
 0x340   : >> { %v2082_v25 = vadd.f32 %v2066_v55, %v2019_v48  ;;  %v3346_v26 = vrot.slane %v3287_v18, 4  ;;  %v3470_v41 = vrot.slane %v3411_v32, 5  ;;  %v3722_v6 = vmul.f32 %v13616_v12, %v18735_v17  ;;  %v18739_v55 = vld [vmem:[#allocation78_spill] sm:$0xff]  ;;  %v18740_v18 = vld [vmem:[#allocation81_spill] sm:$0xff]  ;;  %v18775_v7 = vld [vmem:[#allocation16_spill] sm:$0xff] }
 0x341   : >> { %v3846_v5 = vmul.f32 %v13616_v12, %v18736_v44  ;;  %v3970_v62 = vmul.f32 %v13616_v12, %v18737_v39  ;;  %v4094_v13 = vmul.f32 %v13616_v12, %v18645_v54  ;;  %v13627_v8 = vadd.f32 %v18659_v2, %v6053_v56  ;;  %v18743_v27 = vld [vmem:[#allocation145_spill] sm:$0xff]  ;;  %v18745_v54 = vld [vmem:[#allocation28_spill] sm:$0xff] }
 0x342   : >> { %v2206_v38 = vadd.f32 %v2168_v60, %v2082_v25  ;;  %v4218_v20 = vmul.f32 %v13616_v12, %v18739_v55  ;;  %v4342_v32 = vmul.f32 %v13616_v12, %v18740_v18  ;;  %v18742_v48 = vrot.slane %v18741_v14, 1  ;;  %v18747_v12 = vld [vmem:[#allocation146_spill] sm:$0xff] }
 0x343   : >> { %18738 = vst [vmem:[#allocation92_spill] sm:$0xff] %v13627_v8  ;;  %v18744_v19 = vrot.slane %v18743_v27, 2  ;;  %v18746_v44 = vrot.slane %v18745_v54, 3  ;;  %v3594_v60 = vrot.slane %v3535_v30, 6  ;;  %v6109_v25 = vsel %vm273_vm0, %v13627_v8, 0.0  ;;  %v18753_v55 = vld [vmem:[#allocation150_spill] sm:$0xff] }
 0x344   : >> { %v2975_v61 = vsel %vm519_vm2, %v18742_v48, %v2974_v49  ;;  %v2330_v2 = vadd.f32 %v2292_v24, %v2206_v38  ;;  %v18748_v18 = vrot.slane %v18747_v12, 4  ;;  %v18749_v49 = vld [vmem:[#allocation82_spill] sm:$0xff]  ;;  %v18750_v48 = vld [vmem:[#allocation136_spill] sm:$0xff]  ;;  %6110 = vadd.xlane.f32.xlu0 %v6109_v25  ;;  %v3905_v30 = vrot.slane %v3846_v5, 2  ;;  %v18756_v25 = vld [vmem:[#allocation149_spill] sm:$0xff] }
 0x345   : >> { %v13639_v39 = vsel %vm644_vm3, %v18744_v19, %v3098_v29  ;;  %v13644_v56 = vsel %vm769_vm4, %v18746_v44, %v3222_v11  ;;  %v4529_v27 = vmul.f32 %v18750_v48, %v18749_v49  ;;  %v18751_v29 = vld [vmem:[#allocation147_spill] sm:$0xff]  ;;  %v3781_v11 = vrot.slane %v3722_v6, 1  ;;  %v18755_v49 = vld [vmem:[#allocation68_spill] sm:$0xff] }
 0x346   : >> { %v13651_v14 = vsel %vm894_vm5, %v18748_v18, %v3346_v26  ;;  %v18752_v19 = vrot.slane %v18751_v29, 5  ;;  %v4029_v44 = vrot.slane %v3970_v62, 3  ;;  %v2454_v8 = vadd.f32 %v2416_v36, %v2330_v2  ;;  %v18757_v29 = vld [vmem:[#allocation86_spill] sm:$0xff]  ;;  %v18758_v6 = vld [vmem:[#allocation88_spill] sm:$0xff] }
 0x347   : >> { %v4153_v24 = vrot.slane %v4094_v13, 4  ;;  %v4277_v38 = vrot.slane %v4218_v20, 5  ;;  %v4401_v12 = vrot.slane %v4342_v32, 6  ;;  %v18754_v26 = vrot.slane %v18753_v55, 6  ;;  %v18759_v62 = vld [vmem:[#allocation90_spill] sm:$0xff]  ;;  %v18760_v55 = vld [vmem:[#allocation93_spill] sm:$0xff] }
 0x348   : >> { %v13658_v54 = vsel %vm1019_vm6, %v18752_v19, %v3470_v41  ;;  %v13667_v17 = vmul.f32 %v18756_v25, %v18755_v49  ;;  %v4653_v41 = vmul.f32 %v18750_v48, %v18757_v29  ;;  %v13673_v2 = vmul.f32 %v18750_v48, %v18758_v6  ;;  %v425_v32 = vld [vmem:[%s8792_s26 + $0x90] sm:$0xff]  ;;  %v18763_v29 = vld [vmem:[#allocation23_spill] sm:$0xff] }
 0x349   : >> { %v13663_v18 = vsel %vm1144_vm7, %v18754_v26, %v3594_v60  ;;  %v2578_v36 = vadd.f32 %v2540_v58, %v2454_v8  ;;  %v4588_v5 = vrot.slane %v4529_v27, 1  ;;  %v13677_v13 = vmul.f32 %v18750_v48, %v18759_v62  ;;  %v18761_v60 = vld [vmem:[#allocation151_spill] sm:$0xff]  ;;  %v18765_v58 = vld [vmem:[#allocation40_spill] sm:$0xff] }
 0x34a   : >> { %v13681_v20 = vmul.f32 %v18750_v48, %v18760_v55  ;;  %v18762_v19 = vrot.slane %v18761_v60, 1  ;;  %v18764_v49 = vrot.slane %v18763_v29, 2  ;;  %v18766_v8 = vrot.slane %v18765_v58, 3 }
 0x34b   : >> { %v13701_v55 = vmul.f32 %v18750_v48, %v18668_v3  ;;  %v2702_v62 = vadd.f32 %v2664_v10, %v2578_v36  ;;  %v18767_v60 = vrot.slane %v13315_v43, 4  ;;  %v8373_v48 = vld [vmem:[%s8792_s26 + $0xf8] sm:$0xff]  ;;  %v18772_v3 = vld [vmem:[#allocation84_spill] sm:$0xff]  ;;  %v4712_v43 = vrot.slane %v4653_v41, 2 }
 0x34c   : >> { %v13687_v26 = vsel %vm519_vm2, %v18762_v19, %v3781_v11  ;;  %v13692_v6 = vsel %vm644_vm3, %v18764_v49, %v3905_v30  ;;  %v13697_v27 = vsel %vm769_vm4, %v18766_v8, %v4029_v44  ;;  %v18768_v19 = vld [vmem:[#allocation41_spill] sm:$0xff]  ;;  %v13719_v8 = vld [vmem:[%s8792_s26 + $0x98] sm:$0xff]  ;;  %v13723_v10 = vmul.f32 %v8373_v48, %v18772_v3 }
 0x34d   : >> { %v13706_v11 = vsel %vm894_vm5, %v18767_v60, %v4153_v24  ;;  %v18769_v29 = vrot.slane %v18768_v19, 5  ;;  %v18770_v30 = vld [vmem:[#allocation45_spill] sm:$0xff]  ;;  %v4836_v24 = vrot.slane %v13673_v2, 3  ;;  %v489_v36 = vmul.f32 %v18679_v53, %v425_v32  ;;  %v18773_v19 = vld [vmem:[#allocation47_spill] sm:$0xff] }
 0x34e   : >> { %v18771_v58 = vrot.slane %v18770_v30, 6  ;;  %v2826_v60 = vadd.f32 %v2788_v63, %v2702_v62  ;;  %v447_v48 = vmul.f32 %v18775_v7, %v425_v32  ;;  %v13738_v41 = vmul.f32 %v18679_v53, %v13719_v8  ;;  %v18777_v62 = vld [vmem:[#allocation18_spill] sm:$0xff]  ;;  %v18779_v7 = vld [vmem:[#allocation20_spill] sm:$0xff] }
 0x34f   : >> { %v13711_v49 = vsel %vm1019_vm6, %v18769_v29, %v4277_v38  ;;  %v18774_v38 = vrot.slane %v18773_v19, 1  ;;  %v550_v2 = vrot.slane %v489_v36, 1  ;;  %v614_v19 = vmul.f32 %v18777_v62, %v425_v32 }
 0x350   : >> { %v13716_v44 = vsel %vm1144_vm7, %v18771_v58, %v4401_v12  ;;  %v4960_v12 = vrot.slane %v13677_v13, 4  ;;  %18776 = vst [vmem:[#allocation94_spill] sm:$0xff] %v13738_v41  ;;  %v2889_v63 = vadd.f32 %v13611_v46, %v2826_v60  ;;  %v18778_v13 = vld [vmem:[#allocation19_spill] sm:$0xff]  ;;  %v17283_v30 = vrot.slane %v13738_v41, 1 }
 0x351   : >> { %v13730_v29 = vsel %vm519_vm2, %v18774_v38, %v4588_v5  ;;  %v13744_v5 = vmul.f32 %v18777_v62, %v13719_v8  ;;  %v739_v38 = vmul.f32 %v18778_v13, %v425_v32  ;;  %v13750_v58 = vmul.f32 %v18778_v13, %v13719_v8 }
 0x352   : >> { %v864_v53 = vmul.f32 %v18779_v7, %v425_v32  ;;  %v13755_v36 = vmul.f32 %v18779_v7, %v13719_v8  ;;  %v3013_v46 = vadd.f32 %v2975_v61, %v2889_v63  ;;  %v675_v60 = vrot.slane %v614_v19, 2  ;;  %v18780_v63 = vld [vmem:[#allocation21_spill] sm:$0xff] }
 0x353   : >> { %v17282_v3 = vrot.slane %v13744_v5, 2  ;;  %v800_v62 = vrot.slane %v739_v38, 3  ;;  %v552_v45 = vsel %vm519_vm2, %v550_v2, %v17283_v30  ;;  %v17281_v33 = vrot.slane %v13750_v58, 3  ;;  %v18781_v38 = vld [vmem:[#allocation60_spill] sm:$0xff] }
 0x354   : >> { %v925_v13 = vrot.slane %v864_v53, 4  ;;  %v17284_v4 = vrot.slane %v13755_v36, 4  ;;  %v3137_v9 = vadd.f32 %v13639_v39, %v3013_v46  ;;  %v588_v7 = vadd.f32 %v552_v45, %v447_v48 }
 0x355   : >> { %v677_v61 = vsel %vm644_vm3, %v675_v60, %v17282_v3  ;;  %v989_v19 = vmul.f32 %v18780_v63, %v425_v32  ;;  %v18782_v41 = vrot.slane %v18781_v38, 2  ;;  %v802_v53 = vsel %vm769_vm4, %v800_v62, %v17281_v33  ;;  %v13794_v3 = vld [vmem:[%s8792_s26 + $0xb0] sm:$0xff] }
 0x356   : >> { %v13778_v39 = vmul.f32 %v18780_v63, %v13719_v8  ;;  %v1114_v45 = vmul.f32 %v17937_v37, %v425_v32  ;;  %v3261_v48 = vadd.f32 %v13644_v56, %v3137_v9  ;;  %v713_v46 = vadd.f32 %v677_v61, %v588_v7 }
 0x357   : >> { %v13771_v2 = vsel %vm644_vm3, %v18782_v41, %v4712_v43  ;;  %v1050_v60 = vrot.slane %v989_v19, 5  ;;  %v13784_v38 = vmul.f32 %v17937_v37, %v13719_v8  ;;  %v13787_v43 = vld [vmem:[%s8792_s26 + $0xa8] sm:$0xff]  ;;  %v927_v41 = vsel %vm894_vm5, %v925_v13, %v17284_v4 }
 0x358   : >> { %18784 = vst [vmem:[#allocation114_spill] sm:$0xff] %v13787_v43  ;;  %v17285_v62 = vrot.slane %v13778_v39, 5  ;;  %v1175_v33 = vrot.slane %v1114_v45, 6  ;;  %v1302_v9 = vmul.f32 %v13787_v43, %v18692_v23  ;;  %v3385_v7 = vadd.f32 %v13651_v14, %v3261_v48  ;;  %v18786_v19 = vld [vmem:[#allocation24_spill] sm:$0xff] }
 0x359   : >> { %18783 = vst [vmem:[#allocation96_spill] sm:$0xff] %v13784_v38  ;;  %v838_v56 = vadd.f32 %v802_v53, %v713_v46  ;;  %v17287_v32 = vrot.slane %v13784_v38, 6  ;;  %v13802_v61 = vmul.f32 %v13794_v3, %v18692_v23  ;;  %v18787_v30 = vrot.slane %v18786_v19, 3 }
 0x35a   : >> { %v1052_v45 = vsel %vm1019_vm6, %v1050_v60, %v17285_v62  ;;  %v1426_v4 = vmul.f32 %v13787_v43, %v18475_v28  ;;  %v13816_v14 = vmul.f32 %v13794_v3, %v18475_v28  ;;  %v3509_v53 = vadd.f32 %v13658_v54, %v3385_v7 }
 0x35b   : >> { %18785 = vst [vmem:[#allocation34_spill] sm:$0xff] %v13802_v61  ;;  %v13807_v13 = vsel %vm769_vm4, %v18787_v30, %v4836_v24  ;;  %v963_v48 = vadd.f32 %v927_v41, %v838_v56  ;;  %v1260_v46 = vmul.f32 %v13787_v43, %v18701_v21  ;;  %v1362_v19 = vrot.slane %v1302_v9, 1  ;;  %v18790_v56 = vld [vmem:[#allocation35_spill] sm:$0xff] }
 0x35c   : >> { %18788 = vst [vmem:[#allocation115_spill] sm:$0xff] %v13816_v14  ;;  %v1177_v24 = vsel %vm1144_vm7, %v1175_v33, %v17287_v32  ;;  %v1550_v60 = vmul.f32 %v13787_v43, %v18697_v1  ;;  %v13829_v62 = vmul.f32 %v13794_v3, %v18697_v1  ;;  %v3633_v54 = vadd.f32 %v13663_v18, %v3509_v53  ;;  %v18792_v32 = vld [vmem:[#allocation100_spill] sm:$0xff] }
 0x35d   : >> { %v1088_v41 = vadd.f32 %v1052_v45, %v963_v48  ;;  %v1486_v7 = vrot.slane %v1426_v4, 2  ;;  %v18791_v21 = vrot.slane %v18790_v56, 4  ;;  %v13840_v30 = vmul.f32 %v13425_v42, %v18792_v32  ;;  %v18795_v45 = vld [vmem:[#allocation62_spill] sm:$0xff] }
 0x35e   : >> { %18789 = vst [vmem:[#allocation116_spill] sm:$0xff] %v13829_v62  ;;  %v1674_v38 = vmul.f32 %v13787_v43, %v18702_v52  ;;  %v13846_v1 = vmul.f32 %v13794_v3, %v18702_v52  ;;  %v3696_v4 = vadd.f32 %v13667_v17, %v3633_v54  ;;  %v18794_v18 = vrot.slane %v13681_v20, 5  ;;  %v13859_v56 = vld [vmem:[%s8792_s26 + $0x118] sm:$0xff] }
 0x35f   : >> { %v13836_v33 = vsel %vm894_vm5, %v18791_v21, %v4960_v12  ;;  %v18796_v53 = vrot.slane %v18795_v45, 5  ;;  %v1213_v12 = vadd.f32 %v1177_v24, %v1088_v41  ;;  %v1798_v48 = vmul.f32 %v13787_v43, %v18703_v57  ;;  %18797 = vst [vmem:[#allocation33_spill] sm:$0xff] %v13859_v56  ;;  %v18800_v54 = vld [vmem:[#allocation98_spill] sm:$0xff] }
 0x360   : >> { %18793 = vst [vmem:[#allocation117_spill] sm:$0xff] %v13846_v1  ;;  %v18798_v9 = vrot.slane %v13802_v61, 1  ;;  %v1610_v28 = vrot.slane %v1550_v60, 3  ;;  %v13867_v20 = vmul.f32 %v13794_v3, %v18703_v57  ;;  %v3820_v24 = vadd.f32 %v13687_v26, %v3696_v4 }
 0x361   : >> { %v13854_v21 = vsel %vm1019_vm6, %v18796_v53, %v18794_v18  ;;  %v13872_v41 = vmul.f32 %v13859_v56, %v18800_v54  ;;  %v1276_v18 = vadd.f32 %v1260_v46, %v1213_v12  ;;  %v18801_v45 = vrot.slane %v13816_v14, 2  ;;  %v13887_v12 = vld [vmem:[%s8792_s26 + $0xc0] sm:$0xff]  ;;  %v13890_v14 = vld [vmem:[%s8792_s26 + $0xc8] sm:$0xff] }
 0x362   : >> { %v1364_v52 = vsel %vm519_vm2, %v1362_v19, %v18798_v9  ;;  %18799 = vst [vmem:[#allocation50_spill] sm:$0xff] %v13867_v20  ;;  %v1734_v9 = vrot.slane %v1674_v38, 4  ;;  %v1922_v53 = vmul.f32 %v13787_v43, %v18704_v50  ;;  %v13882_v17 = vmul.f32 %v13794_v3, %v18704_v50  ;;  %18803 = vst [vmem:[#allocation65_spill] sm:$0xff] %v13887_v12 }
 0x363   : >> { %v1488_v19 = vsel %vm644_vm3, %v1486_v7, %v18801_v45  ;;  %v3944_v26 = vadd.f32 %v13692_v6, %v3820_v24  ;;  %v1400_v4 = vadd.f32 %v1364_v52, %v1276_v18  ;;  %v1858_v61 = vrot.slane %v1798_v48, 5  ;;  %v18807_v24 = vld [vmem:[#allocation101_spill] sm:$0xff] }
 0x364   : >> { %18802 = vst [vmem:[#allocation102_spill] sm:$0xff] %v13882_v17  ;;  %v18804_v38 = vrot.slane %v13701_v55, 6  ;;  %v18805_v7 = vrot.slane %v13394_v47, 6  ;;  %v18806_v60 = vrot.slane %v13829_v62, 3  ;;  %v2109_v52 = vmul.f32 %v13887_v12, %v18060_v51  ;;  %v18808_v47 = vld [vmem:[#allocation104_spill] sm:$0xff] }
 0x365   : >> { %v13906_v6 = vmul.f32 %v13890_v14, %v18060_v51  ;;  %v4068_v48 = vadd.f32 %v13697_v27, %v3944_v26  ;;  %v13911_v55 = vmul.f32 %v13859_v56, %v18807_v24  ;;  %v13915_v18 = vmul.f32 %v13859_v56, %v18808_v47 }
 0x366   : >> { %v13897_v45 = vsel %vm1144_vm7, %v18805_v7, %v18804_v38  ;;  %v1612_v43 = vsel %vm769_vm4, %v1610_v28, %v18806_v60  ;;  %v1524_v38 = vadd.f32 %v1488_v19, %v1400_v4  ;;  %v13919_v28 = vmul.f32 %v13859_v56, %v18589_v31 }
 0x367   : >> { %v18809_v60 = vrot.slane %v13846_v1, 4  ;;  %v1982_v46 = vrot.slane %v1922_v53, 6  ;;  %v17301_v27 = vrot.slane %v13882_v17, 6  ;;  %v4192_v26 = vadd.f32 %v13706_v11, %v4068_v48 }
 0x368   : >> { %v5395_v51 = vrot.slane %v13872_v41, 1  ;;  %v1648_v62 = vadd.f32 %v1612_v43, %v1524_v38  ;;  %v18810_v50 = vrot.slane %v13867_v20, 5  ;;  %v2169_v4 = vrot.slane %v2109_v52, 1  ;;  %v18812_v38 = vld [vmem:[#allocation140_spill] sm:$0xff] }
 0x369   : >> { %v1736_v7 = vsel %vm894_vm5, %v1734_v9, %v18809_v60  ;;  %v2233_v1 = vmul.f32 %v13887_v12, %v18492_v22  ;;  %v13935_v9 = vmul.f32 %v13890_v14, %v18492_v22  ;;  %v4316_v53 = vadd.f32 %v13711_v49, %v4192_v26 }
 0x36a   : >> { %v1860_v19 = vsel %vm1019_vm6, %v1858_v61, %v18810_v50  ;;  %v1772_v11 = vadd.f32 %v1736_v7, %v1648_v62  ;;  %v2357_v43 = vmul.f32 %v13887_v12, %v18493_v40  ;;  %v13942_v41 = vmul.f32 %v13890_v14, %v18493_v40  ;;  %v18811_v50 = vld [vmem:[#allocation108_spill] sm:$0xff] }
 0x36b   : >> { %v13946_v61 = vmul.f32 %v13859_v56, %v18811_v50  ;;  %v1984_v52 = vsel %vm1144_vm7, %v1982_v46, %v17301_v27  ;;  %v2481_v48 = vmul.f32 %v13887_v12, %v18599_v59  ;;  %v13955_v49 = vmul.f32 %v13890_v14, %v18599_v59 }
 0x36c   : >> { %v4440_v62 = vadd.f32 %v13716_v44, %v4316_v53  ;;  %v13960_v60 = vmul.f32 %v18812_v38, %v13859_v56  ;;  %v1896_v7 = vadd.f32 %v1860_v19, %v1772_v11  ;;  %v2067_v26 = vmul.f32 %v13887_v12, %v18718_v34 }
 0x36d   : >> { %v5519_v57 = vrot.slane %v13911_v55, 2  ;;  %v18813_v46 = vrot.slane %v13906_v6, 1  ;;  %v2293_v17 = vrot.slane %v2233_v1, 2  ;;  %v17307_v20 = vrot.slane %v13935_v9, 2 }
 0x36e   : >> { %v4503_v59 = vadd.f32 %v13723_v10, %v4440_v62  ;;  %v2020_v44 = vadd.f32 %v1984_v52, %v1896_v7  ;;  %v2417_v53 = vrot.slane %v2357_v43, 3  ;;  %v17308_v38 = vrot.slane %v13942_v41, 3  ;;  %v18815_v52 = vld [vmem:[#allocation72_spill] sm:$0xff] }
 0x36f   : >> { %v2171_v27 = vsel %vm519_vm2, %v2169_v4, %v18813_v46  ;;  %v2541_v56 = vrot.slane %v2481_v48, 4  ;;  %v2605_v11 = vmul.f32 %v13887_v12, %v18601_v0  ;;  %v13976_v55 = vmul.f32 %v13890_v14, %v18601_v0 }
 0x370   : >> { %v4627_v1 = vadd.f32 %v13730_v29, %v4503_v59  ;;  %v2083_v4 = vadd.f32 %v2067_v26, %v2020_v44  ;;  %v2729_v10 = vmul.f32 %v13887_v12, %v18604_v16  ;;  %v13983_v43 = vmul.f32 %v13890_v14, %v18604_v16 }
 0x371   : >> { %18814 = vst [vmem:[#allocation59_spill] sm:$0xff] %v13976_v55  ;;  %v18816_v48 = vrot.slane %v18815_v52, 1  ;;  %v5643_v7 = vrot.slane %v13915_v18, 3  ;;  %v5767_v46 = vrot.slane %v13919_v28, 4  ;;  %v2295_v59 = vsel %vm644_vm3, %v2293_v17, %v17307_v20 }
 0x372   : >> { %v4751_v29 = vadd.f32 %v13771_v2, %v4627_v1  ;;  %v5891_v26 = vrot.slane %v13946_v61, 5  ;;  %v2207_v19 = vadd.f32 %v2171_v27, %v2083_v4  ;;  %v2419_v52 = vsel %vm769_vm4, %v2417_v53, %v17308_v38  ;;  %v18818_v1 = vld [vmem:[#allocation148_spill] sm:$0xff]  ;;  %v18825_v61 = vld [vmem:[#allocation58_spill] sm:$0xff] }
 0x373   : >> { %v5396_v62 = vsel %vm519_vm2, %v18816_v48, %v5395_v51  ;;  %v18817_v51 = vrot.slane %v13955_v49, 4  ;;  %v2665_v28 = vrot.slane %v2605_v11, 5  ;;  %v17312_v48 = vrot.slane %v13976_v55, 5 }
 0x374   : >> { %v4875_v17 = vadd.f32 %v13807_v13, %v4751_v29  ;;  %v2331_v20 = vadd.f32 %v2295_v59, %v2207_v19  ;;  %v2789_v2 = vrot.slane %v2729_v10, 6  ;;  %v2916_v27 = vmul.f32 %v18818_v1, %v17965_v15  ;;  %v18821_v19 = vld [vmem:[#allocation76_spill] sm:$0xff]  ;;  %v18823_v59 = vld [vmem:[#allocation77_spill] sm:$0xff] }
 0x375   : >> { %v2543_v18 = vsel %vm894_vm5, %v2541_v56, %v18817_v51  ;;  %v14009_v4 = vmul.f32 %v18756_v25, %v17965_v15  ;;  %v3040_v53 = vmul.f32 %v18818_v1, %v18179_v35  ;;  %v14015_v56 = vmul.f32 %v18756_v25, %v18179_v35 }
 0x376   : >> { %v4999_v13 = vadd.f32 %v13836_v33, %v4875_v17  ;;  %v18822_v11 = vrot.slane %v18821_v19, 2  ;;  %v18824_v29 = vrot.slane %v18823_v59, 3  ;;  %v2455_v38 = vadd.f32 %v2419_v52, %v2331_v20  ;;  %v18827_v33 = vld [vmem:[#allocation61_spill] sm:$0xff] }
 0x377   : >> { %18819 = vst [vmem:[#allocation87_spill] sm:$0xff] %v14009_v4  ;;  %18820 = vst [vmem:[#allocation118_spill] sm:$0xff] %v14015_v56  ;;  %v2667_v44 = vsel %vm1019_vm6, %v2665_v28, %v17312_v48  ;;  %v3164_v12 = vmul.f32 %v18818_v1, %v18825_v61  ;;  %v14031_v35 = vmul.f32 %v18756_v25, %v18825_v61  ;;  %v2976_v28 = vrot.slane %v2916_v27, 1  ;;  %v18830_v61 = vld [vmem:[#allocation79_spill] sm:$0xff] }
 0x378   : >> { %v5520_v10 = vsel %vm644_vm3, %v18822_v11, %v5519_v57  ;;  %v5644_v51 = vsel %vm769_vm4, %v18824_v29, %v5643_v7  ;;  %v3288_v17 = vmul.f32 %v18818_v1, %v18827_v33  ;;  %v5123_v57 = vadd.f32 %v13854_v21, %v4999_v13  ;;  %v18833_v13 = vld [vmem:[#allocation80_spill] sm:$0xff] }
 0x379   : >> { %18826 = vst [vmem:[#allocation130_spill] sm:$0xff] %v14031_v35  ;;  %v2579_v19 = vadd.f32 %v2543_v18, %v2455_v38  ;;  %v18828_v7 = vrot.slane %v13983_v43, 6  ;;  %v14041_v52 = vmul.f32 %v18756_v25, %v18827_v33  ;;  %v3100_v59 = vrot.slane %v3040_v53, 2  ;;  %v18832_v18 = vld [vmem:[#allocation56_spill] sm:$0xff]  ;;  %v18835_v33 = vld [vmem:[#allocation63_spill] sm:$0xff] }
 0x37a   : >> { %v5247_v48 = vadd.f32 %v13897_v45, %v5123_v57  ;;  %v18831_v55 = vrot.slane %v18830_v61, 4  ;;  %v3224_v11 = vrot.slane %v3164_v12, 3  ;;  %v17317_v53 = vrot.slane %v14031_v35, 3 }
 0x37b   : >> { %v2791_v20 = vsel %vm1144_vm7, %v2789_v2, %v18828_v7  ;;  %18829 = vst [vmem:[#allocation110_spill] sm:$0xff] %v14041_v52  ;;  %v2703_v38 = vadd.f32 %v2667_v44, %v2579_v19  ;;  %v2874_v2 = vmul.f32 %v18818_v1, %v18832_v18  ;;  %v18834_v7 = vrot.slane %v18833_v13, 5 }
 0x37c   : >> { %v5768_v21 = vsel %vm894_vm5, %v18831_v55, %v5767_v46  ;;  %v3348_v29 = vrot.slane %v3288_v17, 4  ;;  %v5310_v45 = vadd.f32 %v13840_v30, %v5247_v48  ;;  %v17322_v61 = vrot.slane %v14041_v52, 4  ;;  %v18839_v17 = vld [vmem:[#allocation66_spill] sm:$0xff]  ;;  %v14072_v48 = vld [vmem:[%s8792_s26 + $0xf0] sm:$0xff] }
 0x37d   : >> { %v5892_v27 = vsel %vm1019_vm6, %v18834_v7, %v5891_v26  ;;  %v2827_v57 = vadd.f32 %v2791_v20, %v2703_v38  ;;  %v3412_v55 = vmul.f32 %v18818_v1, %v18835_v33  ;;  %v18836_v46 = vrot.slane %v14009_v4, 1  ;;  %18840 = vst [vmem:[#allocation120_spill] sm:$0xff] %v14072_v48  ;;  %v18843_v7 = vld [vmem:[#allocation67_spill] sm:$0xff]  ;;  %v18851_v52 = vld [vmem:[#allocation54_spill] sm:$0xff] }
 0x37e   : >> { %v18837_v19 = vrot.slane %v14015_v56, 2  ;;  %v14067_v12 = vmul.f32 %v18756_v25, %v18835_v33  ;;  %v3536_v30 = vmul.f32 %v18818_v1, %v18839_v17  ;;  %v5434_v20 = vadd.f32 %v5396_v62, %v5310_v45  ;;  %v18847_v56 = vld [vmem:[#allocation74_spill] sm:$0xff] }
 0x37f   : >> { %v2978_v44 = vsel %vm519_vm2, %v2976_v28, %v18836_v46  ;;  %v2890_v38 = vadd.f32 %v2874_v2, %v2827_v57  ;;  %v14076_v13 = vmul.f32 %v18756_v25, %v18839_v17  ;;  %v14079_v28 = vld [vmem:[%s8792_s26 + $0xf8] sm:$0xff]  ;;  %v3226_v46 = vsel %vm769_vm4, %v3224_v11, %v17317_v53 }
 0x380   : >> { %v3102_v26 = vsel %vm644_vm3, %v3100_v59, %v18837_v19  ;;  %18838 = vst [vmem:[#allocation73_spill] sm:$0xff] %v14067_v12  ;;  %18842 = vst [vmem:[#allocation83_spill] sm:$0xff] %v14079_v28  ;;  %v3723_v59 = vmul.f32 %v14072_v48, %v18843_v7  ;;  %v14088_v1 = vmul.f32 %v14079_v28, %v18843_v7  ;;  %v18845_v19 = vld [vmem:[#allocation69_spill] sm:$0xff]  ;;  %v3472_v35 = vrot.slane %v3412_v55, 5  ;;  %v18849_v55 = vld [vmem:[#allocation75_spill] sm:$0xff] }
 0x381   : >> { %18841 = vst [vmem:[#allocation125_spill] sm:$0xff] %v14076_v13  ;;  %v3847_v62 = vmul.f32 %v14072_v48, %v18845_v19  ;;  %v14094_v25 = vmul.f32 %v14079_v28, %v18845_v19  ;;  %v5558_v2 = vadd.f32 %v5520_v10, %v5434_v20  ;;  %v3014_v45 = vadd.f32 %v2978_v44, %v2890_v38 }
 0x382   : >> { %18844 = vst [vmem:[#allocation111_spill] sm:$0xff] %v14088_v1  ;;  %v3350_v57 = vsel %vm894_vm5, %v3348_v29, %v17322_v61  ;;  %v3596_v53 = vrot.slane %v3536_v30, 6  ;;  %v3971_v4 = vmul.f32 %v14072_v48, %v18847_v56  ;;  %v14104_v18 = vmul.f32 %v14079_v28, %v18847_v56 }
 0x383   : >> { %18846 = vst [vmem:[#allocation113_spill] sm:$0xff] %v14094_v25  ;;  %v5682_v7 = vadd.f32 %v5644_v51, %v5558_v2  ;;  %v3138_v19 = vadd.f32 %v3102_v26, %v3014_v45  ;;  %v17328_v10 = vrot.slane %v14076_v13, 6  ;;  %v3783_v44 = vrot.slane %v3723_v59, 1 }
 0x384   : >> { %18848 = vst [vmem:[#allocation121_spill] sm:$0xff] %v14104_v18  ;;  %v17326_v20 = vrot.slane %v14088_v1, 1  ;;  %v3907_v38 = vrot.slane %v3847_v62, 2  ;;  %v4095_v30 = vmul.f32 %v14072_v48, %v18849_v55  ;;  %v18850_v11 = vrot.slane %v13960_v60, 6 }
 0x385   : >> { %v5806_v61 = vadd.f32 %v5768_v21, %v5682_v7  ;;  %v18852_v17 = vrot.slane %v18851_v52, 6  ;;  %v3262_v51 = vadd.f32 %v3226_v46, %v3138_v19  ;;  %v18853_v26 = vrot.slane %v14067_v12, 5  ;;  %v18854_v7 = vld [vmem:[#allocation68_spill] sm:$0xff]  ;;  %v18870_v12 = vld [vmem:[#allocation93_spill] sm:$0xff] }
 0x386   : >> { %v4031_v2 = vrot.slane %v3971_v4, 3  ;;  %v17327_v62 = vrot.slane %v14104_v18, 3  ;;  %v14122_v45 = vmul.f32 %v14079_v28, %v18849_v55  ;;  %v3681_v60 = vmul.f32 %v14072_v48, %v18854_v7  ;;  %v18868_v18 = vld [vmem:[#allocation90_spill] sm:$0xff] }
 0x387   : >> { %v6016_v56 = vsel %vm1144_vm7, %v18852_v17, %v18850_v11  ;;  %v3474_v59 = vsel %vm1019_vm6, %v3472_v35, %v18853_v26  ;;  %v5930_v29 = vadd.f32 %v5892_v27, %v5806_v61  ;;  %v3386_v21 = vadd.f32 %v3350_v57, %v3262_v51  ;;  %v18856_v27 = vld [vmem:[#allocation78_spill] sm:$0xff]  ;;  %v18857_v51 = vld [vmem:[#allocation81_spill] sm:$0xff] }
 0x388   : >> { %v3598_v52 = vsel %vm1144_vm7, %v3596_v53, %v17328_v10  ;;  %v3785_v35 = vsel %vm519_vm2, %v3783_v44, %v17326_v20  ;;  %v18855_v4 = vrot.slane %v14094_v25, 2  ;;  %v4155_v46 = vrot.slane %v4095_v30, 4  ;;  %v18866_v44 = vld [vmem:[#allocation88_spill] sm:$0xff] }
 0x389   : >> { %v6054_v19 = vadd.f32 %v6016_v56, %v5930_v29  ;;  %v3510_v11 = vadd.f32 %v3474_v59, %v3386_v21  ;;  %v4219_v61 = vmul.f32 %v14072_v48, %v18856_v27  ;;  %v14139_v57 = vmul.f32 %v14079_v28, %v18856_v27  ;;  %v18861_v59 = vld [vmem:[#allocation82_spill] sm:$0xff]  ;;  %v18862_v21 = vld [vmem:[#allocation64_spill] sm:$0xff] }
 0x38a   : >> { %v3909_v17 = vsel %vm644_vm3, %v3907_v38, %v18855_v4  ;;  %v4033_v53 = vsel %vm769_vm4, %v4031_v2, %v17327_v62  ;;  %v4343_v26 = vmul.f32 %v14072_v48, %v18857_v51  ;;  %v14149_v56 = vmul.f32 %v14079_v28, %v18857_v51  ;;  %v18859_v38 = vld [vmem:[#allocation126_spill] sm:$0xff] }
 0x38b   : >> { %v14152_v29 = vadd.f32 %v18859_v38, %v6054_v19  ;;  %v3634_v30 = vadd.f32 %v3598_v52, %v3510_v11  ;;  %v4530_v4 = vmul.f32 %v18862_v21, %v18861_v59  ;;  %v14158_v20 = vmul.f32 %v13425_v42, %v18861_v59  ;;  %v18864_v2 = vld [vmem:[#allocation86_spill] sm:$0xff] }
 0x38c   : >> { %18858 = vst [vmem:[#allocation106_spill] sm:$0xff] %v14149_v56  ;;  %v4654_v62 = vmul.f32 %v18862_v21, %v18864_v2  ;;  %v14164_v10 = vmul.f32 %v13425_v42, %v18864_v2  ;;  %v4778_v48 = vmul.f32 %v18862_v21, %v18866_v44  ;;  %v14170_v52 = vmul.f32 %v13425_v42, %v18866_v44 }
 0x38d   : >> { %18860 = vst [vmem:[#allocation97_spill] sm:$0xff] %v14152_v29  ;;  %18863 = vst [vmem:[#allocation52_spill] sm:$0xff] %v14158_v20  ;;  %v6112_v19 = vsel %vm273_vm0, %v14152_v29, 0.0  ;;  %v3697_v11 = vadd.f32 %v3681_v60, %v3634_v30  ;;  %v4902_v25 = vmul.f32 %v18862_v21, %v18868_v18  ;;  %v14178_v1 = vmul.f32 %v13425_v42, %v18868_v18 }
 0x38e   : >> { %18865 = vst [vmem:[#allocation103_spill] sm:$0xff] %v14164_v10  ;;  %18867 = vst [vmem:[#allocation119_spill] sm:$0xff] %v14170_v52  ;;  %6113 = vadd.xlane.f32.xlu1 %v6112_v19  ;;  %v4279_v2 = vrot.slane %v4219_v61, 5  ;;  %v4403_v7 = vrot.slane %v4343_v26, 6  ;;  %v4590_v13 = vrot.slane %v4530_v4, 1  ;;  %v5026_v29 = vmul.f32 %v18862_v21, %v18870_v12 }
 0x38f   : >> { %18869 = vst [vmem:[#allocation128_spill] sm:$0xff] %v14178_v1  ;;  %v3821_v44 = vadd.f32 %v3785_v35, %v3697_v11  ;;  %v14186_v60 = vmul.f32 %v13425_v42, %v18870_v12  ;;  %v17347_v30 = vrot.slane %v14158_v20, 1  ;;  %v4714_v18 = vrot.slane %v4654_v62, 2  ;;  %v18873_v12 = vld [vmem:[#allocation95_spill] sm:$0xff]  ;;  %v18885_v20 = vld [vmem:[#allocation16_spill] sm:$0xff] }
 0x390   : >> { %v4838_v61 = vrot.slane %v4778_v48, 3  ;;  %v4962_v59 = vrot.slane %v4902_v25, 4  ;;  %v18872_v4 = vrot.slane %v14122_v45, 4  ;;  %v5150_v51 = vmul.f32 %v18862_v21, %v18873_v12 }
 0x391   : >> { %18871 = vst [vmem:[#allocation131_spill] sm:$0xff] %v14186_v60  ;;  %v3945_v28 = vadd.f32 %v3909_v17, %v3821_v44  ;;  %v14199_v62 = vmul.f32 %v13425_v42, %v18873_v12  ;;  %v5086_v48 = vrot.slane %v5026_v29, 5  ;;  %v18874_v25 = vrot.slane %v14139_v57, 5 }
 0x392   : >> { %v4157_v11 = vsel %vm894_vm5, %v4155_v46, %v18872_v4  ;;  %v18875_v35 = vrot.slane %v14149_v56, 6  ;;  %v18876_v4 = vld [vmem:[#allocation84_spill] sm:$0xff]  ;;  %v4592_v42 = vsel %vm519_vm2, %v4590_v13, %v17347_v30  ;;  %v18877_v29 = vrot.slane %v14164_v10, 2 }
 0x393   : >> { %v4069_v19 = vadd.f32 %v4033_v53, %v3945_v28  ;;  %v4281_v44 = vsel %vm1019_vm6, %v4279_v2, %v18874_v25  ;;  %v4488_v26 = vmul.f32 %v18862_v21, %v18876_v4  ;;  %v427_v28 = vld [vmem:[%s8792_s26 + $0xa0] sm:$0xff]  ;;  %v18878_v2 = vrot.slane %v14170_v52, 3 }
 0x394   : >> { %v4405_v46 = vsel %vm1144_vm7, %v4403_v7, %v18875_v35  ;;  %v4716_v17 = vsel %vm644_vm3, %v4714_v18, %v18877_v29  ;;  %v18879_v12 = vrot.slane %v14178_v1, 4  ;;  %v14224_v35 = vld [vmem:[%s8792_s26 + $0x120] sm:$0xff]  ;;  %v5210_v21 = vrot.slane %v5150_v51, 6  ;;  %v14237_v29 = vld [vmem:[%s8792_s26 + $0x128] sm:$0xff] }
 0x395   : >> { %v4193_v53 = vadd.f32 %v4157_v11, %v4069_v19  ;;  %v4840_v25 = vsel %vm769_vm4, %v4838_v61, %v18878_v2  ;;  %18880 = vst [vmem:[#allocation122_spill] sm:$0xff] %v14224_v35  ;;  %v14229_v13 = vmul.f32 %v14224_v35, %v18792_v32  ;;  %v5337_v18 = vmul.f32 %v14224_v35, %v18800_v54  ;;  %v18883_v2 = vld [vmem:[#allocation18_spill] sm:$0xff]  ;;  %v18886_v52 = vld [vmem:[#allocation19_spill] sm:$0xff] }
 0x396   : >> { %v4964_v7 = vsel %vm894_vm5, %v4962_v59, %v18879_v12  ;;  %v18881_v11 = vrot.slane %v14186_v60, 5  ;;  %v18882_v12 = vld [vmem:[#allocation17_spill] sm:$0xff]  ;;  %v616_v51 = vmul.f32 %v18883_v2, %v427_v28  ;;  %v14243_v30 = vmul.f32 %v14237_v29, %v18800_v54 }
 0x397   : >> { %v4317_v19 = vadd.f32 %v4281_v44, %v4193_v53  ;;  %v491_v59 = vmul.f32 %v18882_v12, %v427_v28  ;;  %v448_v1 = vmul.f32 %v18885_v20, %v13719_v8  ;;  %v741_v32 = vmul.f32 %v18886_v52, %v427_v28  ;;  %v18887_v44 = vld [vmem:[#allocation20_spill] sm:$0xff]  ;;  %v18889_v8 = vld [vmem:[#allocation94_spill] sm:$0xff] }
 0x398   : >> { %v5088_v61 = vsel %vm1019_vm6, %v5086_v48, %v18881_v11  ;;  %18884 = vst [vmem:[#allocation123_spill] sm:$0xff] %v14243_v30  ;;  %v866_v53 = vmul.f32 %v18887_v44, %v427_v28  ;;  %v678_v48 = vrot.slane %v616_v51, 2  ;;  %v991_v11 = vmul.f32 %v18780_v63, %v427_v28 }
 0x399   : >> { %v4441_v60 = vadd.f32 %v4405_v46, %v4317_v19  ;;  %v553_v10 = vrot.slane %v491_v59, 1  ;;  %v5461_v12 = vmul.f32 %v14224_v35, %v18807_v24  ;;  %v14254_v2 = vmul.f32 %v14237_v29, %v18807_v24 }
 0x39a   : >> { %v803_v54 = vrot.slane %v741_v32, 3  ;;  %v928_v4 = vrot.slane %v866_v53, 4  ;;  %v18890_v20 = vrot.slane %v18889_v8, 1  ;;  %v18891_v46 = vrot.slane %v13744_v5, 2 }
 0x39b   : >> { %18888 = vst [vmem:[#allocation71_spill] sm:$0xff] %v14254_v2  ;;  %v4504_v56 = vadd.f32 %v4488_v26, %v4441_v60  ;;  %v1116_v59 = vmul.f32 %v17937_v37, %v427_v28  ;;  %v18892_v51 = vrot.slane %v14199_v62, 6  ;;  %v5397_v44 = vrot.slane %v5337_v18, 1 }
 0x39c   : >> { %v554_v52 = vsel %vm519_vm2, %v18890_v20, %v553_v10  ;;  %v679_v19 = vsel %vm644_vm3, %v18891_v46, %v678_v48  ;;  %v5585_v32 = vmul.f32 %v14224_v35, %v18808_v47  ;;  %v17356_v26 = vrot.slane %v14243_v30, 1 }
 0x39d   : >> { %v5212_v63 = vsel %vm1144_vm7, %v5210_v21, %v18892_v51  ;;  %v589_v53 = vadd.f32 %v554_v52, %v448_v1  ;;  %v4628_v60 = vadd.f32 %v4592_v42, %v4504_v56  ;;  %v18893_v10 = vrot.slane %v13750_v58, 3  ;;  %v18896_v52 = vld [vmem:[#allocation89_spill] sm:$0xff] }
 0x39e   : >> { %v1053_v20 = vrot.slane %v991_v11, 5  ;;  %v5521_v48 = vrot.slane %v5461_v12, 2  ;;  %v17359_v28 = vrot.slane %v14254_v2, 2  ;;  %v14275_v8 = vmul.f32 %v14237_v29, %v18808_v47 }
 0x39f   : >> { %v804_v5 = vsel %vm769_vm4, %v18893_v10, %v803_v54  ;;  %v714_v21 = vadd.f32 %v679_v19, %v589_v53  ;;  %v4752_v18 = vadd.f32 %v4716_v17, %v4628_v60  ;;  %v18895_v46 = vrot.slane %v13755_v36, 4  ;;  %v18899_v19 = vld [vmem:[#allocation31_spill] sm:$0xff]  ;;  %v18900_v10 = vld [vmem:[#allocation32_spill] sm:$0xff] }
 0x3a0   : >> { %18894 = vst [vmem:[#allocation107_spill] sm:$0xff] %v14275_v8  ;;  %v1178_v56 = vrot.slane %v1116_v59, 6  ;;  %v1304_v58 = vmul.f32 %v18896_v52, %v18692_v23  ;;  %v5645_v42 = vrot.slane %v5585_v32, 3  ;;  %v5709_v54 = vmul.f32 %v14224_v35, %v18589_v31  ;;  %v18903_v32 = vld [vmem:[#allocation29_spill] sm:$0xff] }
 0x3a1   : >> { %v929_v1 = vsel %vm894_vm5, %v18895_v46, %v928_v4  ;;  %v14286_v12 = vmul.f32 %v14237_v29, %v18589_v31  ;;  %v839_v11 = vadd.f32 %v804_v5, %v714_v21  ;;  %v4876_v51 = vadd.f32 %v4840_v25, %v4752_v18  ;;  %v18904_v31 = vld [vmem:[#allocation36_spill] sm:$0xff] }
 0x3a2   : >> { %v5399_v36 = vsel %vm519_vm2, %v5397_v44, %v17356_v26  ;;  %v18898_v17 = vrot.slane %v13778_v39, 5  ;;  %v1428_v59 = vmul.f32 %v18896_v52, %v18899_v19  ;;  %v5833_v53 = vmul.f32 %v14224_v35, %v18811_v50  ;;  %v18901_v39 = vld [vmem:[#allocation96_spill] sm:$0xff] }
 0x3a3   : >> { %18897 = vst [vmem:[#allocation70_spill] sm:$0xff] %v14286_v12  ;;  %v964_v60 = vadd.f32 %v929_v1, %v839_v11  ;;  %v1552_v25 = vmul.f32 %v18896_v52, %v18900_v10  ;;  %v5000_v5 = vadd.f32 %v4964_v7, %v4876_v51  ;;  %v5523_v44 = vsel %vm644_vm3, %v5521_v48, %v17359_v28  ;;  %v18905_v51 = vld [vmem:[#allocation37_spill] sm:$0xff] }
 0x3a4   : >> { %v1054_v4 = vsel %vm1019_vm6, %v18898_v17, %v1053_v20  ;;  %v18902_v21 = vrot.slane %v18901_v39, 6  ;;  %v1365_v18 = vrot.slane %v1304_v58, 1  ;;  %v5769_v46 = vrot.slane %v5709_v54, 4 }
 0x3a5   : >> { %v17364_v17 = vrot.slane %v14286_v12, 4  ;;  %v1089_v26 = vadd.f32 %v1054_v4, %v964_v60  ;;  %v1261_v1 = vmul.f32 %v13794_v3, %v18903_v32  ;;  %v5124_v11 = vadd.f32 %v5088_v61, %v5000_v5 }
 0x3a6   : >> { %v1179_v20 = vsel %vm1144_vm7, %v18902_v21, %v1178_v56  ;;  %v1489_v30 = vrot.slane %v1428_v59, 2  ;;  %v1676_v7 = vmul.f32 %v18896_v52, %v18904_v31  ;;  %v1800_v48 = vmul.f32 %v18896_v52, %v18905_v51  ;;  %v14324_v59 = vld [vmem:[%s16584_s1 + $0x30] ss:$0 sm:$0xff]  ;;  %v18909_v21 = vld [vmem:[#allocation34_spill] sm:$0xff] }
 0x3a7   : >> { %v18906_v39 = vrot.slane %v14275_v8, 3  ;;  %v14319_v58 = vmul.f32 %v14237_v29, %v18811_v50  ;;  %v1214_v54 = vadd.f32 %v1179_v20, %v1089_v26  ;;  %v1613_v4 = vrot.slane %v1552_v25, 3  ;;  %18908 = vst [vmem:[#allocation132_spill] sm:$0xff] %v14324_v59 }
 0x3a8   : >> { %v5248_v60 = vadd.f32 %v5212_v63, %v5124_v11  ;;  %v5893_v61 = vrot.slane %v5833_v53, 5  ;;  %v5957_v5 = vmul.f32 %v14324_v59, %v14224_v35  ;;  %v18910_v28 = vrot.slane %v18909_v21, 1  ;;  %v18912_v53 = vld [vmem:[#allocation39_spill] sm:$0xff] }
 0x3a9   : >> { %v5647_v56 = vsel %vm769_vm4, %v5645_v42, %v18906_v39  ;;  %18907 = vst [vmem:[#allocation30_spill] sm:$0xff] %v14319_v58  ;;  %v5771_v39 = vsel %vm894_vm5, %v5769_v46, %v17364_v17  ;;  %v14336_v63 = vmul.f32 %v14324_v59, %v14237_v29  ;;  %v1277_v26 = vadd.f32 %v1261_v1, %v1214_v54  ;;  %v18913_v11 = vld [vmem:[#allocation115_spill] sm:$0xff]  ;;  %v18916_v46 = vld [vmem:[#allocation116_spill] sm:$0xff]  ;;  %v18918_v59 = vld [vmem:[#allocation42_spill] sm:$0xff] }
 0x3aa   : >> { %v1366_v42 = vsel %vm519_vm2, %v18910_v28, %v1365_v18  ;;  %v1924_v25 = vmul.f32 %v18896_v52, %v18912_v53  ;;  %v5311_v20 = vadd.f32 %v14229_v13, %v5248_v60  ;;  %v18914_v35 = vrot.slane %v18913_v11, 2  ;;  %v14345_v18 = vld [vmem:[%s8792_s26 + $0xd0] sm:$0xff] }
 0x3ab   : >> { %18911 = vst [vmem:[#allocation133_spill] sm:$0xff] %v14336_v63  ;;  %v1737_v8 = vrot.slane %v1676_v7, 4  ;;  %v1861_v28 = vrot.slane %v1800_v48, 5  ;;  %18915 = vst [vmem:[#allocation134_spill] sm:$0xff] %v14345_v18  ;;  %v1401_v12 = vadd.f32 %v1366_v42, %v1277_v26  ;;  %v18917_v17 = vrot.slane %v18916_v46, 3 }
 0x3ac   : >> { %v1490_v21 = vsel %vm644_vm3, %v18914_v35, %v1489_v30  ;;  %v2111_v1 = vmul.f32 %v14345_v18, %v18918_v59  ;;  %v2235_v52 = vmul.f32 %v14345_v18, %v18492_v22  ;;  %v5435_v13 = vadd.f32 %v5399_v36, %v5311_v20  ;;  %v18919_v30 = vld [vmem:[#allocation48_spill] sm:$0xff]  ;;  %v18920_v36 = vld [vmem:[#allocation117_spill] sm:$0xff] }
 0x3ad   : >> { %v1614_v2 = vsel %vm769_vm4, %v18917_v17, %v1613_v4  ;;  %v2359_v54 = vmul.f32 %v14345_v18, %v18493_v40  ;;  %v2483_v35 = vmul.f32 %v14345_v18, %v18919_v30  ;;  %v2607_v7 = vmul.f32 %v14345_v18, %v18601_v0  ;;  %v18922_v30 = vld [vmem:[#allocation50_spill] sm:$0xff] }
 0x3ae   : >> { %v6017_v60 = vrot.slane %v5957_v5, 6  ;;  %v1525_v17 = vadd.f32 %v1490_v21, %v1401_v12  ;;  %v2731_v4 = vmul.f32 %v14345_v18, %v18604_v16  ;;  %v5559_v42 = vadd.f32 %v5523_v44, %v5435_v13 }
 0x3af   : >> { %v18921_v20 = vrot.slane %v18920_v36, 4  ;;  %v1985_v46 = vrot.slane %v1924_v25, 6  ;;  %v18923_v40 = vrot.slane %v18922_v30, 5  ;;  %v2172_v47 = vrot.slane %v2111_v1, 1  ;;  %v18926_v25 = vld [vmem:[#allocation102_spill] sm:$0xff] }
 0x3b0   : >> { %v1649_v50 = vadd.f32 %v1614_v2, %v1525_v17  ;;  %v2296_v48 = vrot.slane %v2235_v52, 2  ;;  %v5683_v5 = vadd.f32 %v5647_v56, %v5559_v42  ;;  %v2420_v12 = vrot.slane %v2359_v54, 3  ;;  %v18930_v52 = vld [vmem:[#allocation91_spill] sm:$0xff] }
 0x3b1   : >> { %v1738_v11 = vsel %vm894_vm5, %v18921_v20, %v1737_v8  ;;  %v1862_v0 = vsel %vm1019_vm6, %v18923_v40, %v1861_v28  ;;  %v2544_v21 = vrot.slane %v2483_v35, 4  ;;  %v2668_v24 = vrot.slane %v2607_v7, 5  ;;  %v18937_v20 = vld [vmem:[#allocation58_spill] sm:$0xff] }
 0x3b2   : >> { %v18924_v44 = vrot.slane %v14319_v58, 5  ;;  %v1773_v26 = vadd.f32 %v1738_v11, %v1649_v50  ;;  %v2792_v36 = vrot.slane %v2731_v4, 6  ;;  %v5807_v18 = vadd.f32 %v5771_v39, %v5683_v5 }
 0x3b3   : >> { %v18925_v8 = vrot.slane %v14336_v63, 6  ;;  %v18927_v30 = vrot.slane %v18926_v25, 6  ;;  %v2068_v56 = vmul.f32 %v13890_v14, %v18718_v34  ;;  %v18928_v1 = vrot.slane %v13906_v6, 1  ;;  %v18933_v6 = vld [vmem:[#allocation59_spill] sm:$0xff]  ;;  %v18949_v63 = vld [vmem:[#allocation118_spill] sm:$0xff] }
 0x3b4   : >> { %v5895_v13 = vsel %vm1019_vm6, %v5893_v61, %v18924_v44  ;;  %v1897_v28 = vadd.f32 %v1862_v0, %v1773_v26  ;;  %v18929_v50 = vrot.slane %v13935_v9, 2  ;;  %v2918_v54 = vmul.f32 %v18930_v52, %v17965_v15  ;;  %v18936_v26 = vld [vmem:[#allocation57_spill] sm:$0xff] }
 0x3b5   : >> { %v6019_v2 = vsel %vm1144_vm7, %v6017_v60, %v18925_v8  ;;  %v1986_v40 = vsel %vm1144_vm7, %v18927_v30, %v1985_v46  ;;  %v2173_v61 = vsel %vm519_vm2, %v18928_v1, %v2172_v47  ;;  %v5931_v35 = vadd.f32 %v5895_v13, %v5807_v18  ;;  %v18938_v46 = vld [vmem:[#allocation61_spill] sm:$0xff]  ;;  %v18941_v13 = vld [vmem:[#allocation67_spill] sm:$0xff]  ;;  %v18944_v30 = vld [vmem:[#allocation74_spill] sm:$0xff] }
 0x3b6   : >> { %v2297_v39 = vsel %vm644_vm3, %v18929_v50, %v2296_v48  ;;  %v18931_v7 = vrot.slane %v13942_v41, 3  ;;  %v18932_v17 = vrot.slane %v13955_v49, 4  ;;  %v18934_v4 = vrot.slane %v18933_v6, 5  ;;  %v18942_v8 = vld [vmem:[#allocation69_spill] sm:$0xff] }
 0x3b7   : >> { %v2021_v42 = vadd.f32 %v1986_v40, %v1897_v28  ;;  %v18935_v9 = vrot.slane %v13983_v43, 6  ;;  %v3042_v18 = vmul.f32 %v18930_v52, %v18936_v26  ;;  %v3166_v41 = vmul.f32 %v18930_v52, %v18937_v20 }
 0x3b8   : >> { %v2421_v60 = vsel %vm769_vm4, %v18931_v7, %v2420_v12  ;;  %v2545_v0 = vsel %vm894_vm5, %v18932_v17, %v2544_v21  ;;  %v2669_v47 = vsel %vm1019_vm6, %v18934_v4, %v2668_v24  ;;  %v6055_v11 = vadd.f32 %v6019_v2, %v5931_v35  ;;  %v18939_v12 = vld [vmem:[#allocation66_spill] sm:$0xff]  ;;  %v14412_v21 = vld [vmem:[%s8792_s26 + $0x100] sm:$0xff] }
 0x3b9   : >> { %v2793_v48 = vsel %vm1144_vm7, %v18935_v9, %v2792_v36  ;;  %v3290_v49 = vmul.f32 %v18930_v52, %v18938_v46  ;;  %v3414_v5 = vmul.f32 %v18930_v52, %v18835_v33  ;;  %v3538_v24 = vmul.f32 %v18930_v52, %v18939_v12  ;;  %18940 = vst [vmem:[#allocation135_spill] sm:$0xff] %v14412_v21  ;;  %v8375_v9 = vld [vmem:[%s8792_s26 + $0xe0] sm:$0xff]  ;;  %v18985_v33 = vld [vmem:[#allocation21_spill] sm:$0xff] }
 0x3ba   : >> { %v2084_v43 = vadd.f32 %v2068_v56, %v2021_v42  ;;  %v2979_v44 = vrot.slane %v2918_v54, 1  ;;  %v3725_v36 = vmul.f32 %v14412_v21, %v18941_v13  ;;  %v3849_v2 = vmul.f32 %v14412_v21, %v18942_v8  ;;  %v18945_v54 = vld [vmem:[#allocation81_spill] sm:$0xff] }
 0x3bb   : >> { %v14419_v25 = vadd.f32 %v18859_v38, %v6055_v11  ;;  %v3973_v40 = vmul.f32 %v14412_v21, %v18944_v30  ;;  %v4097_v28 = vmul.f32 %v14412_v21, %v18849_v55  ;;  %v4221_v56 = vmul.f32 %v14412_v21, %v18856_v27  ;;  %v18946_v11 = vld [vmem:[#allocation56_spill] sm:$0xff]  ;;  %v18947_v55 = vld [vmem:[#allocation87_spill] sm:$0xff] }
 0x3bc   : >> { %v2208_v1 = vadd.f32 %v2173_v61, %v2084_v43  ;;  %v3103_v50 = vrot.slane %v3042_v18, 2  ;;  %v3227_v52 = vrot.slane %v3166_v41, 3  ;;  %v4345_v35 = vmul.f32 %v14412_v21, %v18945_v54 }
 0x3bd   : >> { %18943 = vst [vmem:[#allocation85_spill] sm:$0xff] %v14419_v25  ;;  %v6115_v7 = vsel %vm273_vm0, %v14419_v25, 0.0  ;;  %v3351_v17 = vrot.slane %v3290_v49, 4  ;;  %v3475_v6 = vrot.slane %v3414_v5, 5  ;;  %v3599_v4 = vrot.slane %v3538_v24, 6  ;;  %v18951_v5 = vld [vmem:[#allocation130_spill] sm:$0xff] }
 0x3be   : >> { %6116 = vadd.xlane.f32.xlu0 %v6115_v7  ;;  %v2332_v42 = vadd.f32 %v2297_v39, %v2208_v1  ;;  %v2875_v38 = vmul.f32 %v8375_v9, %v18946_v11  ;;  %v18948_v30 = vrot.slane %v18947_v55, 1  ;;  %v3786_v18 = vrot.slane %v3725_v36, 1  ;;  %v18953_v7 = vld [vmem:[#allocation110_spill] sm:$0xff]  ;;  %v18955_v36 = vld [vmem:[#allocation73_spill] sm:$0xff] }
 0x3bf   : >> { %v3910_v41 = vrot.slane %v3849_v2, 2  ;;  %v4034_v43 = vrot.slane %v3973_v40, 3  ;;  %v4158_v27 = vrot.slane %v4097_v28, 4  ;;  %v4282_v21 = vrot.slane %v4221_v56, 5  ;;  %v18960_v28 = vld [vmem:[#allocation33_spill] sm:$0xff] }
 0x3c0   : >> { %v2980_v61 = vsel %vm519_vm2, %v18948_v30, %v2979_v44  ;;  %v2456_v54 = vadd.f32 %v2421_v60, %v2332_v42  ;;  %v18950_v25 = vrot.slane %v18949_v63, 2  ;;  %v18952_v24 = vrot.slane %v18951_v5, 3  ;;  %v18957_v60 = vld [vmem:[#allocation125_spill] sm:$0xff] }
 0x3c1   : >> { %v4406_v1 = vrot.slane %v4345_v35, 6  ;;  %v18954_v55 = vrot.slane %v18953_v7, 4  ;;  %v18956_v2 = vrot.slane %v18955_v36, 5  ;;  %v18958_v40 = vrot.slane %v18957_v60, 6  ;;  %v18962_v35 = vld [vmem:[#allocation83_spill] sm:$0xff]  ;;  %v18968_v36 = vld [vmem:[#allocation121_spill] sm:$0xff] }
 0x3c2   : >> { %v3104_v49 = vsel %vm644_vm3, %v18950_v25, %v3103_v50  ;;  %v3228_v39 = vsel %vm769_vm4, %v18952_v24, %v3227_v52  ;;  %v18959_v25 = vld [vmem:[#allocation82_spill] sm:$0xff]  ;;  %v2580_v50 = vadd.f32 %v2545_v0, %v2456_v54  ;;  %v18961_v52 = vld [vmem:[#allocation68_spill] sm:$0xff]  ;;  %v18969_v0 = vrot.slane %v18968_v36, 3 }
 0x3c3   : >> { %v3352_v44 = vsel %vm894_vm5, %v18954_v55, %v3351_v17  ;;  %v14448_v30 = vsel %vm1019_vm6, %v18956_v2, %v3475_v6  ;;  %v14453_v63 = vsel %vm1144_vm7, %v18958_v40, %v3599_v4  ;;  %v14457_v56 = vmul.f32 %v18960_v28, %v18959_v25  ;;  %v18963_v17 = vld [vmem:[#allocation111_spill] sm:$0xff]  ;;  %v18965_v6 = vld [vmem:[#allocation86_spill] sm:$0xff]  ;;  %v18966_v4 = vld [vmem:[#allocation113_spill] sm:$0xff] }
 0x3c4   : >> { %v14461_v42 = vmul.f32 %v18962_v35, %v18961_v52  ;;  %v18964_v9 = vrot.slane %v18963_v17, 1  ;;  %v14470_v24 = vmul.f32 %v18960_v28, %v18965_v6  ;;  %v18967_v7 = vrot.slane %v18966_v4, 2  ;;  %v18974_v36 = vld [vmem:[#allocation84_spill] sm:$0xff] }
 0x3c5   : >> { %v14480_v54 = vsel %vm769_vm4, %v18969_v0, %v4034_v43  ;;  %v18970_v2 = vrot.slane %v14122_v45, 4  ;;  %v2704_v17 = vadd.f32 %v2669_v47, %v2580_v50  ;;  %v18975_v0 = vld [vmem:[#allocation88_spill] sm:$0xff]  ;;  %v18977_v47 = vld [vmem:[#allocation93_spill] sm:$0xff] }
 0x3c6   : >> { %v14466_v5 = vsel %vm519_vm2, %v18964_v9, %v3786_v18  ;;  %v14475_v55 = vsel %vm644_vm3, %v18967_v7, %v3910_v41  ;;  %v18971_v18 = vrot.slane %v14139_v57, 5  ;;  %v18972_v9 = vld [vmem:[#allocation106_spill] sm:$0xff]  ;;  %v8376_v7 = vld [vmem:[%s8792_s26 + $0x110] sm:$0xff]  ;;  %v14503_v45 = vmul.f32 %v18960_v28, %v18975_v0  ;;  %v18981_v0 = vld [vmem:[#allocation16_spill] sm:$0xff] }
 0x3c7   : >> { %v14485_v60 = vsel %vm894_vm5, %v18970_v2, %v4158_v27  ;;  %v18973_v4 = vrot.slane %v18972_v9, 6  ;;  %v14499_v43 = vmul.f32 %v8376_v7, %v18974_v36  ;;  %v4593_v27 = vrot.slane %v14457_v56, 1  ;;  %v18976_v57 = vld [vmem:[#allocation90_spill] sm:$0xff]  ;;  %v18980_v7 = vld [vmem:[#allocation95_spill] sm:$0xff] }
 0x3c8   : >> { %v14490_v40 = vsel %vm1019_vm6, %v18971_v18, %v4282_v21  ;;  %v14508_v21 = vmul.f32 %v18960_v28, %v18976_v57  ;;  %v14512_v50 = vmul.f32 %v18960_v28, %v18977_v47  ;;  %v18979_v2 = vld [vmem:[#allocation114_spill] sm:$0xff]  ;;  %v2828_v9 = vadd.f32 %v2793_v48, %v2704_v17  ;;  %v18983_v17 = vld [vmem:[#allocation19_spill] sm:$0xff] }
 0x3c9   : >> { %v14495_v41 = vsel %vm1144_vm7, %v18973_v4, %v4406_v1  ;;  %v18978_v1 = vld [vmem:[#allocation17_spill] sm:$0xff]  ;;  %v4717_v4 = vrot.slane %v14470_v24, 2  ;;  %v14519_v36 = vmul.f32 %v18960_v28, %v18980_v7  ;;  %v449_v56 = vmul.f32 %v18979_v2, %v18981_v0  ;;  %v18982_v47 = vld [vmem:[#allocation18_spill] sm:$0xff]  ;;  %v18984_v0 = vld [vmem:[#allocation20_spill] sm:$0xff] }
 0x3ca   : >> { %v492_v18 = vmul.f32 %v18979_v2, %v18978_v1  ;;  %v14525_v57 = vmul.f32 %v13794_v3, %v18978_v1  ;;  %v617_v25 = vmul.f32 %v18979_v2, %v18982_v47  ;;  %v14531_v48 = vmul.f32 %v13794_v3, %v18982_v47 }
 0x3cb   : >> { %v2891_v24 = vadd.f32 %v2875_v38, %v2828_v9  ;;  %v742_v28 = vmul.f32 %v18979_v2, %v18983_v17  ;;  %v14537_v7 = vmul.f32 %v13794_v3, %v18983_v17  ;;  %v867_v1 = vmul.f32 %v18979_v2, %v18984_v0 }
 0x3cc   : >> { %v555_v6 = vrot.slane %v492_v18, 1  ;;  %v17389_v18 = vrot.slane %v14525_v57, 1  ;;  %v680_v52 = vrot.slane %v617_v25, 2  ;;  %v17388_v58 = vrot.slane %v14531_v48, 2 }
 0x3cd   : >> { %v14545_v47 = vmul.f32 %v13794_v3, %v18984_v0  ;;  %v3015_v38 = vadd.f32 %v2980_v61, %v2891_v24  ;;  %v805_v9 = vrot.slane %v742_v28, 3  ;;  %v17391_v8 = vrot.slane %v14537_v7, 3 }
 0x3ce   : >> { %v930_v13 = vrot.slane %v867_v1, 4  ;;  %v557_v17 = vsel %vm519_vm2, %v555_v6, %v17389_v18  ;;  %v682_v12 = vsel %vm644_vm3, %v680_v52, %v17388_v58  ;;  %v992_v11 = vmul.f32 %v18979_v2, %v18985_v33 }
 0x3cf   : >> { %v17390_v25 = vrot.slane %v14545_v47, 4  ;;  %v3139_v0 = vadd.f32 %v3104_v49, %v3015_v38  ;;  %v4841_v61 = vrot.slane %v14503_v45, 3  ;;  %v590_v24 = vadd.f32 %v557_v17, %v449_v56 }
 0x3d0   : >> { %v14560_v1 = vmul.f32 %v13794_v3, %v18985_v33  ;;  %v807_v6 = vsel %vm769_vm4, %v805_v9, %v17391_v8  ;;  %v1055_v28 = vrot.slane %v992_v11, 5  ;;  %v1117_v52 = vmul.f32 %v18979_v2, %v17937_v37  ;;  %v18986_v11 = vld [vmem:[#allocation65_spill] sm:$0xff] }
 0x3d1   : >> { %v14569_v58 = vmul.f32 %v13794_v3, %v17937_v37  ;;  %v3263_v49 = vadd.f32 %v3228_v39, %v3139_v0  ;;  %v715_v38 = vadd.f32 %v682_v12, %v590_v24  ;;  %v932_v45 = vsel %vm894_vm5, %v930_v13, %v17390_v25  ;;  %v18987_v24 = vld [vmem:[#allocation52_spill] sm:$0xff] }
 0x3d2   : >> { %v17393_v56 = vrot.slane %v14560_v1, 5  ;;  %v1180_v17 = vrot.slane %v1117_v52, 6  ;;  %v1305_v9 = vmul.f32 %v18986_v11, %v18692_v23  ;;  %v14580_v2 = vmul.f32 %v13890_v14, %v18692_v23 }
 0x3d3   : >> { %v17392_v18 = vrot.slane %v14569_v58, 6  ;;  %v3387_v3 = vadd.f32 %v3352_v44, %v3263_v49  ;;  %v4965_v39 = vrot.slane %v14508_v21, 4  ;;  %v5089_v12 = vrot.slane %v14512_v50, 5 }
 0x3d4   : >> { %v840_v0 = vadd.f32 %v807_v6, %v715_v38  ;;  %v18988_v13 = vrot.slane %v18987_v24, 1  ;;  %v1057_v52 = vsel %vm1019_vm6, %v1055_v28, %v17393_v56  ;;  %v1429_v8 = vmul.f32 %v18986_v11, %v18899_v19 }
 0x3d5   : >> { %v14596_v44 = vmul.f32 %v13890_v14, %v18899_v19  ;;  %v3511_v21 = vadd.f32 %v14448_v30, %v3387_v3  ;;  %v1367_v6 = vrot.slane %v1305_v9, 1  ;;  %v1262_v28 = vmul.f32 %v18986_v11, %v18903_v32 }
 0x3d6   : >> { %v14587_v25 = vsel %vm519_vm2, %v18988_v13, %v4593_v27  ;;  %v965_v50 = vadd.f32 %v932_v45, %v840_v0  ;;  %v1182_v27 = vsel %vm1144_vm7, %v1180_v17, %v17392_v18  ;;  %v1553_v38 = vmul.f32 %v18986_v11, %v18900_v10  ;;  %v18992_v17 = vld [vmem:[#allocation103_spill] sm:$0xff] }
 0x3d7   : >> { %18989 = vst [vmem:[#allocation137_spill] sm:$0xff] %v14596_v44  ;;  %v14609_v24 = vmul.f32 %v13890_v14, %v18900_v10  ;;  %v3635_v30 = vadd.f32 %v14453_v63, %v3511_v21  ;;  %v1677_v9 = vmul.f32 %v18986_v11, %v18904_v31  ;;  %v14616_v3 = vmul.f32 %v13890_v14, %v18904_v31 }
 0x3d8   : >> { %v1090_v45 = vadd.f32 %v1057_v52, %v965_v50  ;;  %v18993_v0 = vrot.slane %v18992_v17, 2  ;;  %v5213_v18 = vrot.slane %v14519_v36, 6  ;;  %v1491_v56 = vrot.slane %v1429_v8, 2  ;;  %v18994_v52 = vld [vmem:[#allocation100_spill] sm:$0xff] }
 0x3d9   : >> { %18990 = vst [vmem:[#allocation138_spill] sm:$0xff] %v14609_v24  ;;  %18991 = vst [vmem:[#allocation139_spill] sm:$0xff] %v14616_v3  ;;  %v17397_v49 = vrot.slane %v14596_v44, 2  ;;  %v3698_v63 = vadd.f32 %v14461_v42, %v3635_v30  ;;  %v14628_v21 = vmul.f32 %v14237_v29, %v18994_v52  ;;  %v18995_v31 = vrot.slane %v14580_v2, 1 }
 0x3da   : >> { %v14621_v13 = vsel %vm644_vm3, %v18993_v0, %v4717_v4  ;;  %v1215_v50 = vadd.f32 %v1182_v27, %v1090_v45  ;;  %v1615_v17 = vrot.slane %v1553_v38, 3  ;;  %v1801_v8 = vmul.f32 %v18986_v11, %v18905_v51 }
 0x3db   : >> { %v1369_v32 = vsel %vm519_vm2, %v1367_v6, %v18995_v31  ;;  %v14638_v42 = vmul.f32 %v13890_v14, %v18905_v51  ;;  %v3822_v36 = vadd.f32 %v14466_v5, %v3698_v63  ;;  %v1739_v30 = vrot.slane %v1677_v9, 4  ;;  %v18997_v31 = vld [vmem:[#allocation119_spill] sm:$0xff] }
 0x3dc   : >> { %v1278_v27 = vadd.f32 %v1262_v28, %v1215_v50  ;;  %v17398_v45 = vrot.slane %v14616_v3, 4  ;;  %v18998_v6 = vrot.slane %v18997_v31, 3  ;;  %v1493_v0 = vsel %vm644_vm3, %v1491_v56, %v17397_v49  ;;  %v19000_v28 = vld [vmem:[#allocation128_spill] sm:$0xff]  ;;  %v14669_v49 = vld [vmem:[%s8792_s26 + $0xe0] sm:$0xff] }
 0x3dd   : >> { %18996 = vst [vmem:[#allocation25_spill] sm:$0xff] %v14638_v42  ;;  %v1925_v4 = vmul.f32 %v18986_v11, %v18912_v53  ;;  %v14654_v51 = vmul.f32 %v13890_v14, %v18912_v53  ;;  %v3946_v5 = vadd.f32 %v14475_v55, %v3822_v36  ;;  %v19001_v9 = vrot.slane %v19000_v28, 4  ;;  %v14677_v55 = vld [vmem:[%s8792_s26 + $0x130] sm:$0xff] }
 0x3de   : >> { %v14645_v38 = vsel %vm769_vm4, %v18998_v6, %v4841_v61  ;;  %v19002_v61 = vld [vmem:[#allocation131_spill] sm:$0xff]  ;;  %v1402_v56 = vadd.f32 %v1369_v32, %v1278_v27  ;;  %v7859_v6 = vld [vmem:[%s8792_s26 + $0xd8] sm:$0xff]  ;;  %v19004_v11 = vrot.slane %v14199_v62, 6  ;;  %19005 = vst [vmem:[#allocation127_spill] sm:$0xff] %v14677_v55  ;;  %v19006_v36 = vrot.slane %v14609_v24, 3 }
 0x3df   : >> { %18999 = vst [vmem:[#allocation27_spill] sm:$0xff] %v14654_v51  ;;  %v14660_v63 = vsel %vm894_vm5, %v19001_v9, %v4965_v39  ;;  %v19003_v50 = vrot.slane %v19002_v61, 5  ;;  %v1863_v28 = vrot.slane %v1801_v8, 5  ;;  %v17406_v9 = vrot.slane %v14638_v42, 5  ;;  %v19007_v32 = vld [vmem:[#allocation98_spill] sm:$0xff] }
 0x3e0   : >> { %v14674_v14 = vsel %vm1144_vm7, %v19004_v11, %v5213_v18  ;;  %v1617_v39 = vsel %vm769_vm4, %v1615_v17, %v19006_v36  ;;  %v14686_v27 = vmul.f32 %v14677_v55, %v19007_v32  ;;  %v1526_v61 = vadd.f32 %v1493_v0, %v1402_v56  ;;  %v19008_v56 = vld [vmem:[#allocation101_spill] sm:$0xff] }
 0x3e1   : >> { %v14665_v31 = vsel %vm1019_vm6, %v19003_v50, %v5089_v12  ;;  %v4070_v12 = vadd.f32 %v14480_v54, %v3946_v5  ;;  %v1741_v62 = vsel %vm894_vm5, %v1739_v30, %v17398_v45  ;;  %v1987_v18 = vrot.slane %v1925_v4, 6  ;;  %v19009_v30 = vld [vmem:[#allocation104_spill] sm:$0xff]  ;;  %v19010_v45 = vld [vmem:[#allocation105_spill] sm:$0xff] }
 0x3e2   : >> { %v2112_v11 = vmul.f32 %v7859_v6, %v18918_v59  ;;  %v14695_v17 = vmul.f32 %v14669_v49, %v18918_v59  ;;  %v1650_v8 = vadd.f32 %v1617_v39, %v1526_v61  ;;  %v2236_v5 = vmul.f32 %v7859_v6, %v18492_v22  ;;  %v19011_v61 = vld [vmem:[#allocation46_spill] sm:$0xff] }
 0x3e3   : >> { %v4194_v54 = vadd.f32 %v14485_v60, %v4070_v12  ;;  %v14701_v0 = vmul.f32 %v14669_v49, %v18492_v22  ;;  %v14705_v4 = vmul.f32 %v14677_v55, %v19008_v56  ;;  %v14709_v36 = vmul.f32 %v14677_v55, %v19009_v30 }
 0x3e4   : >> { %v14713_v50 = vmul.f32 %v14677_v55, %v19010_v45  ;;  %v1865_v60 = vsel %vm1019_vm6, %v1863_v28, %v17406_v9  ;;  %v1774_v12 = vadd.f32 %v1741_v62, %v1650_v8  ;;  %v2360_v22 = vmul.f32 %v7859_v6, %v19011_v61 }
 0x3e5   : >> { %v4318_v39 = vadd.f32 %v14490_v40, %v4194_v54  ;;  %v14722_v59 = vmul.f32 %v14669_v49, %v19011_v61  ;;  %v19012_v3 = vrot.slane %v14654_v51, 6  ;;  %v2069_v53 = vmul.f32 %v7859_v6, %v18718_v34  ;;  %v19013_v54 = vld [vmem:[#allocation108_spill] sm:$0xff] }
 0x3e6   : >> { %v2174_v44 = vrot.slane %v2112_v11, 1  ;;  %v17413_v42 = vrot.slane %v14695_v17, 1  ;;  %v1898_v9 = vadd.f32 %v1865_v60, %v1774_v12  ;;  %v2298_v40 = vrot.slane %v2236_v5, 2  ;;  %v19014_v61 = vld [vmem:[#allocation132_spill] sm:$0xff] }
 0x3e7   : >> { %v1989_v24 = vsel %vm1144_vm7, %v1987_v18, %v19012_v3  ;;  %v4442_v28 = vadd.f32 %v14495_v41, %v4318_v39  ;;  %v14733_v8 = vmul.f32 %v14677_v55, %v19013_v54  ;;  %v14737_v51 = vmul.f32 %v19014_v61, %v14677_v55  ;;  %v19015_v3 = vld [vmem:[#allocation48_spill] sm:$0xff]  ;;  %v19016_v55 = vld [vmem:[#allocation51_spill] sm:$0xff] }
 0x3e8   : >> { %v2484_v18 = vmul.f32 %v7859_v6, %v19015_v3  ;;  %v14742_v11 = vmul.f32 %v14669_v49, %v19015_v3  ;;  %v2022_v60 = vadd.f32 %v1989_v24, %v1898_v9  ;;  %v2422_v5 = vrot.slane %v2360_v22, 3 }
 0x3e9   : >> { %v4505_v41 = vadd.f32 %v14499_v43, %v4442_v28  ;;  %v5400_v12 = vrot.slane %v14686_v27, 1  ;;  %v2176_v62 = vsel %vm519_vm2, %v2174_v44, %v17413_v42  ;;  %v2608_v34 = vmul.f32 %v7859_v6, %v19016_v55 }
 0x3ea   : >> { %v14753_v61 = vmul.f32 %v14669_v49, %v19016_v55  ;;  %v5524_v43 = vrot.slane %v14705_v4, 2  ;;  %v2085_v24 = vadd.f32 %v2069_v53, %v2022_v60  ;;  %v19017_v22 = vrot.slane %v14701_v0, 2 }
 0x3eb   : >> { %v4629_v3 = vadd.f32 %v14587_v25, %v4505_v41  ;;  %v2546_v27 = vrot.slane %v2484_v18, 4  ;;  %v2732_v44 = vmul.f32 %v7859_v6, %v18604_v16  ;;  %v14764_v42 = vmul.f32 %v14669_v49, %v18604_v16  ;;  %v19019_v18 = vld [vmem:[#allocation120_spill] sm:$0xff] }
 0x3ec   : >> { %v2300_v9 = vsel %vm644_vm3, %v2298_v40, %v19017_v22  ;;  %v5648_v25 = vrot.slane %v14709_v36, 3  ;;  %v2209_v41 = vadd.f32 %v2176_v62, %v2085_v24  ;;  %v19018_v53 = vrot.slane %v14722_v59, 3 }
 0x3ed   : >> { %v4753_v39 = vadd.f32 %v14621_v13, %v4629_v3  ;;  %v2670_v60 = vrot.slane %v2608_v34, 5  ;;  %v2919_v22 = vmul.f32 %v19019_v18, %v17965_v15  ;;  %v14776_v6 = vmul.f32 %v18962_v35, %v17965_v15 }
 0x3ee   : >> { %v2424_v4 = vsel %vm769_vm4, %v2422_v5, %v19018_v53  ;;  %v2333_v13 = vadd.f32 %v2300_v9, %v2209_v41  ;;  %v3043_v36 = vmul.f32 %v19019_v18, %v18936_v26  ;;  %v14783_v62 = vmul.f32 %v18962_v35, %v18936_v26 }
 0x3ef   : >> { %19020 = vst [vmem:[#allocation141_spill] sm:$0xff] %v14776_v6  ;;  %v4877_v28 = vadd.f32 %v14645_v38, %v4753_v39  ;;  %v5772_v34 = vrot.slane %v14713_v50, 4  ;;  %v19022_v3 = vrot.slane %v14742_v11, 4  ;;  %v2794_v24 = vrot.slane %v2732_v44, 6 }
 0x3f0   : >> { %19021 = vst [vmem:[#allocation142_spill] sm:$0xff] %v14783_v62  ;;  %v5896_v38 = vrot.slane %v14733_v8, 5  ;;  %v6020_v39 = vrot.slane %v14737_v51, 6  ;;  %v2457_v9 = vadd.f32 %v2424_v4, %v2333_v13  ;;  %v19023_v41 = vrot.slane %v14753_v61, 5  ;;  %v19024_v8 = vld [vmem:[#allocation123_spill] sm:$0xff] }
 0x3f1   : >> { %v2548_v5 = vsel %vm894_vm5, %v2546_v27, %v19022_v3  ;;  %v5001_v40 = vadd.f32 %v14660_v63, %v4877_v28  ;;  %v2981_v15 = vrot.slane %v2919_v22, 1  ;;  %v3167_v27 = vmul.f32 %v19019_v18, %v18937_v20  ;;  %v19033_v63 = vld [vmem:[#allocation70_spill] sm:$0xff] }
 0x3f2   : >> { %v2672_v26 = vsel %vm1019_vm6, %v2670_v60, %v19023_v41  ;;  %v2581_v3 = vadd.f32 %v2548_v5, %v2457_v9  ;;  %v3105_v53 = vrot.slane %v3043_v36, 2  ;;  %v19025_v28 = vrot.slane %v19024_v8, 1  ;;  %v19028_v36 = vld [vmem:[#allocation56_spill] sm:$0xff]  ;;  %v19029_v9 = vld [vmem:[#allocation71_spill] sm:$0xff] }
 0x3f3   : >> { %v5125_v44 = vadd.f32 %v14665_v31, %v5001_v40  ;;  %v19026_v4 = vrot.slane %v14764_v42, 6  ;;  %v14809_v22 = vmul.f32 %v18962_v35, %v18937_v20  ;;  %v3291_v31 = vmul.f32 %v19019_v18, %v18938_v46  ;;  %v19031_v8 = vld [vmem:[#allocation107_spill] sm:$0xff] }
 0x3f4   : >> { %v5401_v51 = vsel %vm519_vm2, %v19025_v28, %v5400_v12  ;;  %v2705_v13 = vadd.f32 %v2672_v26, %v2581_v3  ;;  %v2876_v5 = vmul.f32 %v19019_v18, %v19028_v36  ;;  %v14818_v12 = vmul.f32 %v18962_v35, %v18938_v46 }
 0x3f5   : >> { %v2796_v60 = vsel %vm1144_vm7, %v2794_v24, %v19026_v4  ;;  %19027 = vst [vmem:[#allocation143_spill] sm:$0xff] %v14809_v22  ;;  %v5249_v40 = vadd.f32 %v14674_v14, %v5125_v44  ;;  %v19030_v24 = vrot.slane %v19029_v9, 2  ;;  %v19032_v28 = vrot.slane %v19031_v8, 3  ;;  %v14838_v8 = vld [vmem:[%s8792_s26 + $0x110] sm:$0xff] }
 0x3f6   : >> { %v19034_v50 = vrot.slane %v19033_v63, 4  ;;  %v3229_v26 = vrot.slane %v3167_v27, 3  ;;  %v2829_v3 = vadd.f32 %v2796_v60, %v2705_v13  ;;  %v19035_v36 = vrot.slane %v14776_v6, 1  ;;  %19037 = vst [vmem:[#allocation144_spill] sm:$0xff] %v14838_v8  ;;  %v19039_v60 = vld [vmem:[#allocation66_spill] sm:$0xff]  ;;  %v19041_v13 = vld [vmem:[#allocation67_spill] sm:$0xff] }
 0x3f7   : >> { %v5525_v41 = vsel %vm644_vm3, %v19030_v24, %v5524_v43  ;;  %v5649_v4 = vsel %vm769_vm4, %v19032_v28, %v5648_v25  ;;  %v5312_v44 = vadd.f32 %v14628_v21, %v5249_v40  ;;  %v19036_v9 = vrot.slane %v14783_v62, 2  ;;  %v7911_v24 = vld [vmem:[%s8792_s26 + $0x108] sm:$0xff]  ;;  %v19038_v28 = vld [vmem:[#allocation63_spill] sm:$0xff] }
 0x3f8   : >> { %v5773_v14 = vsel %vm894_vm5, %v19034_v50, %v5772_v34  ;;  %v2983_v46 = vsel %vm519_vm2, %v2981_v15, %v19035_v36  ;;  %v3353_v63 = vrot.slane %v3291_v31, 4  ;;  %v3415_v34 = vmul.f32 %v19019_v18, %v19038_v28 }
 0x3f9   : >> { %v3107_v43 = vsel %vm644_vm3, %v3105_v53, %v19036_v9  ;;  %v14845_v21 = vmul.f32 %v18962_v35, %v19038_v28  ;;  %v5436_v50 = vadd.f32 %v5401_v51, %v5312_v44  ;;  %v2892_v27 = vadd.f32 %v2876_v5, %v2829_v3  ;;  %v19043_v9 = vld [vmem:[#allocation69_spill] sm:$0xff]  ;;  %v19044_v51 = vld [vmem:[#allocation30_spill] sm:$0xff] }
 0x3fa   : >> { %v3539_v53 = vmul.f32 %v19019_v18, %v19039_v60  ;;  %v14852_v40 = vmul.f32 %v18962_v35, %v19039_v60  ;;  %v3726_v31 = vmul.f32 %v7911_v24, %v19041_v13  ;;  %v14857_v36 = vmul.f32 %v14838_v8, %v19041_v13  ;;  %v19047_v35 = vld [vmem:[#allocation133_spill] sm:$0xff] }
 0x3fb   : >> { %v3850_v25 = vmul.f32 %v7911_v24, %v19043_v9  ;;  %v5560_v62 = vadd.f32 %v5525_v41, %v5436_v50  ;;  %v19045_v5 = vrot.slane %v19044_v51, 5  ;;  %v3016_v3 = vadd.f32 %v2983_v46, %v2892_v27 }
 0x3fc   : >> { %19040 = vst [vmem:[#allocation145_spill] sm:$0xff] %v14852_v40  ;;  %19042 = vst [vmem:[#allocation28_spill] sm:$0xff] %v14857_v36  ;;  %v14865_v18 = vmul.f32 %v14838_v8, %v19043_v9  ;;  %v19048_v15 = vrot.slane %v19047_v35, 6  ;;  %v19049_v28 = vrot.slane %v14809_v22, 3  ;;  %v3477_v6 = vrot.slane %v3415_v34, 5 }
 0x3fd   : >> { %v5897_v44 = vsel %vm1019_vm6, %v19045_v5, %v5896_v38  ;;  %v17424_v41 = vrot.slane %v14845_v21, 5  ;;  %v5684_v50 = vadd.f32 %v5649_v4, %v5560_v62  ;;  %v3140_v51 = vadd.f32 %v3107_v43, %v3016_v3  ;;  %v19053_v43 = vld [vmem:[#allocation75_spill] sm:$0xff] }
 0x3fe   : >> { %19046 = vst [vmem:[#allocation146_spill] sm:$0xff] %v14865_v18  ;;  %v6021_v60 = vsel %vm1144_vm7, %v19048_v15, %v6020_v39  ;;  %v3231_v13 = vsel %vm769_vm4, %v3229_v26, %v19049_v28  ;;  %v19050_v38 = vrot.slane %v14818_v12, 4  ;;  %v3601_v27 = vrot.slane %v3539_v53, 6  ;;  %v19051_v28 = vld [vmem:[#allocation74_spill] sm:$0xff] }
 0x3ff   : >> { %v17425_v5 = vrot.slane %v14852_v40, 6  ;;  %v3788_v9 = vrot.slane %v3726_v31, 1  ;;  %v17429_v35 = vrot.slane %v14857_v36, 1  ;;  %v3912_v39 = vrot.slane %v3850_v25, 2  ;;  %v19054_v31 = vld [vmem:[#allocation68_spill] sm:$0xff] }
 0x400   : >> { %v3355_v46 = vsel %vm894_vm5, %v3353_v63, %v19050_v38  ;;  %v5808_v15 = vadd.f32 %v5773_v14, %v5684_v50  ;;  %v3264_v22 = vadd.f32 %v3231_v13, %v3140_v51  ;;  %v17428_v26 = vrot.slane %v14865_v18, 2  ;;  %v19068_v18 = vld [vmem:[#allocation90_spill] sm:$0xff] }
 0x401   : >> { %v3974_v34 = vmul.f32 %v7911_v24, %v19051_v28  ;;  %v3479_v62 = vsel %vm1019_vm6, %v3477_v6, %v17424_v41  ;;  %v14886_v4 = vmul.f32 %v14838_v8, %v19051_v28  ;;  %v4098_v63 = vmul.f32 %v7911_v24, %v19053_v43 }
 0x402   : >> { %v14891_v53 = vmul.f32 %v14838_v8, %v19053_v43  ;;  %v5932_v14 = vadd.f32 %v5897_v44, %v5808_v15  ;;  %v3388_v25 = vadd.f32 %v3355_v46, %v3264_v22  ;;  %v3603_v13 = vsel %vm1144_vm7, %v3601_v27, %v17425_v5  ;;  %v19055_v15 = vld [vmem:[#allocation78_spill] sm:$0xff] }
 0x403   : >> { %19052 = vst [vmem:[#allocation136_spill] sm:$0xff] %v14886_v4  ;;  %v3683_v3 = vmul.f32 %v7911_v24, %v19054_v31  ;;  %v3790_v6 = vsel %vm519_vm2, %v3788_v9, %v17429_v35  ;;  %v3914_v38 = vsel %vm644_vm3, %v3912_v39, %v17428_v26  ;;  %v4036_v41 = vrot.slane %v3974_v34, 3  ;;  %v19056_v5 = vld [vmem:[#allocation126_spill] sm:$0xff]  ;;  %v19059_v9 = vld [vmem:[#allocation81_spill] sm:$0xff]  ;;  %v19066_v35 = vld [vmem:[#allocation88_spill] sm:$0xff] }
 0x404   : >> { %v6056_v50 = vadd.f32 %v6021_v60, %v5932_v14  ;;  %v3512_v51 = vadd.f32 %v3479_v62, %v3388_v25  ;;  %v17436_v44 = vrot.slane %v14886_v4, 3  ;;  %v4160_v22 = vrot.slane %v4098_v63, 4  ;;  %v19061_v34 = vld [vmem:[#allocation82_spill] sm:$0xff] }
 0x405   : >> { %v4222_v27 = vmul.f32 %v7911_v24, %v19055_v15  ;;  %v14911_v60 = vmul.f32 %v14838_v8, %v19055_v15  ;;  %v4346_v62 = vmul.f32 %v7911_v24, %v19059_v9  ;;  %v14916_v39 = vmul.f32 %v14838_v8, %v19059_v9  ;;  %v19062_v63 = vld [vmem:[#allocation122_spill] sm:$0xff] }
 0x406   : >> { %v14907_v43 = vadd.f32 %v19056_v5, %v6056_v50  ;;  %v3636_v36 = vadd.f32 %v3603_v13, %v3512_v51  ;;  %v4533_v14 = vmul.f32 %v19062_v63, %v19061_v34  ;;  %v14922_v25 = vmul.f32 %v14237_v29, %v19061_v34  ;;  %v19064_v50 = vld [vmem:[#allocation86_spill] sm:$0xff] }
 0x407   : >> { %19058 = vst [vmem:[#allocation150_spill] sm:$0xff] %v14911_v60  ;;  %19060 = vst [vmem:[#allocation149_spill] sm:$0xff] %v14916_v39  ;;  %v4657_v13 = vmul.f32 %v19062_v63, %v19064_v50  ;;  %v14930_v24 = vmul.f32 %v14237_v29, %v19064_v50  ;;  %v4781_v46 = vmul.f32 %v19062_v63, %v19066_v35  ;;  %v19070_v50 = vrot.slane %v14891_v53, 4 }
 0x408   : >> { %19057 = vst [vmem:[#allocation147_spill] sm:$0xff] %v14907_v43  ;;  %19063 = vst [vmem:[#allocation151_spill] sm:$0xff] %v14922_v25  ;;  %v6118_v51 = vsel %vm273_vm0, %v14907_v43, 0.0  ;;  %v3699_v26 = vadd.f32 %v3683_v3, %v3636_v36  ;;  %v4038_v34 = vsel %vm769_vm4, %v4036_v41, %v17436_v44  ;;  %v14939_v9 = vmul.f32 %v14237_v29, %v19066_v35 }
 0x409   : >> { %19065 = vst [vmem:[#allocation23_spill] sm:$0xff] %v14930_v24  ;;  %6119 = vadd.xlane.f32.xlu1 %v6118_v51  ;;  %v4905_v43 = vmul.f32 %v19062_v63, %v19068_v18  ;;  %v14945_v36 = vmul.f32 %v14237_v29, %v19068_v18  ;;  %v4162_v51 = vsel %vm894_vm5, %v4160_v22, %v19070_v50  ;;  %v4284_v15 = vrot.slane %v4222_v27, 5  ;;  %v19071_v27 = vld [vmem:[#allocation93_spill] sm:$0xff] }
 0x40a   : >> { %19067 = vst [vmem:[#allocation40_spill] sm:$0xff] %v14939_v9  ;;  %v3823_v3 = vadd.f32 %v3790_v6, %v3699_v26  ;;  %v4408_v44 = vrot.slane %v4346_v62, 6  ;;  %v17444_v35 = vrot.slane %v14916_v39, 6  ;;  %v4595_v4 = vrot.slane %v4533_v14, 1  ;;  %v430_v14 = vld [vmem:[%s8792_s26 + $0xb8] sm:$0xff]  ;;  %v19074_v26 = vld [vmem:[#allocation95_spill] sm:$0xff] }
 0x40b   : >> { %19069 = vst [vmem:[#allocation41_spill] sm:$0xff] %v14945_v36  ;;  %v17446_v8 = vrot.slane %v14922_v25, 1  ;;  %v4719_v28 = vrot.slane %v4657_v13, 2  ;;  %v17448_v18 = vrot.slane %v14930_v24, 2  ;;  %v4843_v40 = vrot.slane %v4781_v46, 3  ;;  %v19073_v46 = vld [vmem:[#allocation84_spill] sm:$0xff] }
 0x40c   : >> { %v3947_v31 = vadd.f32 %v3914_v38, %v3823_v3  ;;  %v4967_v6 = vrot.slane %v4905_v43, 4  ;;  %v5029_v50 = vmul.f32 %v19062_v63, %v19071_v27  ;;  %v14960_v62 = vmul.f32 %v14237_v29, %v19071_v27  ;;  %v8377_v24 = vld [vmem:[%s8792_s26 + $0xb0] sm:$0xff]  ;;  %v14991_v39 = vld [vmem:[%s8792_s26 + $0x138] sm:$0xff] }
 0x40d   : >> { %v19072_v38 = vrot.slane %v14911_v60, 5  ;;  %v4410_v43 = vsel %vm1144_vm7, %v4408_v44, %v17444_v35  ;;  %v4490_v3 = vmul.f32 %v19062_v63, %v19073_v46  ;;  %v19076_v44 = vrot.slane %v14945_v36, 4  ;;  %v19079_v46 = vld [vmem:[#allocation18_spill] sm:$0xff]  ;;  %v19081_v36 = vld [vmem:[#allocation20_spill] sm:$0xff] }
 0x40e   : >> { %v4071_v41 = vadd.f32 %v4038_v34, %v3947_v31  ;;  %v4597_v31 = vsel %vm519_vm2, %v4595_v4, %v17446_v8  ;;  %v4721_v34 = vsel %vm644_vm3, %v4719_v28, %v17448_v18  ;;  %v5092_v8 = vrot.slane %v14960_v62, 5  ;;  %v19078_v28 = vld [vmem:[#allocation16_spill] sm:$0xff] }
 0x40f   : >> { %v4286_v13 = vsel %vm1019_vm6, %v4284_v15, %v19072_v38  ;;  %v5153_v15 = vmul.f32 %v19062_v63, %v19074_v26  ;;  %v19075_v38 = vrot.slane %v14939_v9, 3  ;;  %v4969_v35 = vsel %vm894_vm5, %v4967_v6, %v19076_v44  ;;  %v15001_v44 = vld [vmem:[%s8792_s26 + $0x140] sm:$0xff] }
 0x410   : >> { %v4195_v22 = vadd.f32 %v4162_v51, %v4071_v41  ;;  %v5091_v51 = vrot.slane %v5029_v50, 5  ;;  %v19077_v41 = vld [vmem:[#allocation17_spill] sm:$0xff]  ;;  %v450_v18 = vmul.f32 %v8377_v24, %v19078_v28  ;;  %v619_v63 = vmul.f32 %v19079_v46, %v430_v14 }
 0x411   : >> { %v4845_v27 = vsel %vm769_vm4, %v4843_v40, %v19075_v38  ;;  %v494_v25 = vmul.f32 %v19077_v41, %v430_v14  ;;  %v19080_v40 = vld [vmem:[#allocation19_spill] sm:$0xff]  ;;  %v869_v60 = vmul.f32 %v19081_v36, %v430_v14  ;;  %v994_v6 = vmul.f32 %v18985_v33, %v430_v14 }
 0x412   : >> { %v4319_v4 = vadd.f32 %v4286_v13, %v4195_v22  ;;  %v744_v38 = vmul.f32 %v19080_v40, %v430_v14  ;;  %v14998_v22 = vmul.f32 %v14237_v29, %v19074_v26  ;;  %v5215_v13 = vrot.slane %v5153_v15, 6 }
 0x413   : >> { %v558_v9 = vrot.slane %v494_v25, 1  ;;  %v683_v24 = vrot.slane %v619_v63, 2  ;;  %v19082_v46 = vrot.slane %v14525_v57, 1  ;;  %v933_v28 = vrot.slane %v869_v60, 4 }
 0x414   : >> { %v4443_v50 = vadd.f32 %v4410_v43, %v4319_v4  ;;  %v808_v25 = vrot.slane %v744_v38, 3  ;;  %v1119_v40 = vmul.f32 %v17937_v37, %v430_v14  ;;  %v5297_v33 = vmul.f32 %v14991_v39, %v18994_v52 }
 0x415   : >> { %v559_v41 = vsel %vm519_vm2, %v19082_v46, %v558_v9  ;;  %v19083_v29 = vrot.slane %v14531_v48, 2  ;;  %v5340_v4 = vmul.f32 %v14991_v39, %v19007_v32  ;;  %v15016_v57 = vmul.f32 %v15001_v44, %v19007_v32 }
 0x416   : >> { %v4506_v36 = vadd.f32 %v4490_v3, %v4443_v50  ;;  %v591_v43 = vadd.f32 %v559_v41, %v450_v18  ;;  %v19084_v60 = vrot.slane %v14537_v7, 3  ;;  %v1058_v9 = vrot.slane %v994_v6, 5  ;;  %v19086_v7 = vld [vmem:[#allocation134_spill] sm:$0xff] }
 0x417   : >> { %v684_v15 = vsel %vm644_vm3, %v19083_v29, %v683_v24  ;;  %v5093_v18 = vsel %vm1019_vm6, %v5091_v51, %v5092_v8  ;;  %v5216_v48 = vrot.slane %v14998_v22, 6  ;;  %v5464_v63 = vmul.f32 %v14991_v39, %v19008_v56 }
 0x418   : >> { %v809_v37 = vsel %vm769_vm4, %v19084_v60, %v808_v25  ;;  %v4630_v14 = vadd.f32 %v4597_v31, %v4506_v36  ;;  %v716_v3 = vadd.f32 %v684_v15, %v591_v43  ;;  %v19085_v38 = vrot.slane %v14545_v47, 4 }
 0x419   : >> { %v1183_v24 = vrot.slane %v1119_v40, 6  ;;  %v1307_v46 = vmul.f32 %v19086_v7, %v18692_v23  ;;  %v15034_v31 = vmul.f32 %v15001_v44, %v19008_v56  ;;  %v5588_v51 = vmul.f32 %v14991_v39, %v19009_v30 }
 0x41a   : >> { %v934_v50 = vsel %vm894_vm5, %v19085_v38, %v933_v28  ;;  %v4754_v6 = vadd.f32 %v4721_v34, %v4630_v14  ;;  %v841_v41 = vadd.f32 %v809_v37, %v716_v3  ;;  %v5402_v25 = vrot.slane %v5340_v4, 1  ;;  %v8378_v14 = vld [vmem:[%s8792_s26 + $0xc8] sm:$0xff] }
 0x41b   : >> { %v17454_v36 = vrot.slane %v15016_v57, 1  ;;  %v19087_v47 = vrot.slane %v14560_v1, 5  ;;  %v1431_v23 = vmul.f32 %v19086_v7, %v18899_v19  ;;  %v5217_v40 = vsel %vm1144_vm7, %v5215_v13, %v5216_v48  ;;  %v19089_v13 = vld [vmem:[#allocation29_spill] sm:$0xff] }
 0x41c   : >> { %v4878_v34 = vadd.f32 %v4845_v27, %v4754_v6  ;;  %v15049_v43 = vmul.f32 %v15001_v44, %v19009_v30  ;;  %v966_v29 = vadd.f32 %v934_v50, %v841_v41  ;;  %v5526_v15 = vrot.slane %v5464_v63, 2 }
 0x41d   : >> { %v1059_v28 = vsel %vm1019_vm6, %v19087_v47, %v1058_v9  ;;  %v19088_v4 = vrot.slane %v14569_v58, 6  ;;  %v1370_v60 = vrot.slane %v1307_v46, 1  ;;  %v1555_v37 = vmul.f32 %v19086_v7, %v18900_v10  ;;  %v19090_v58 = vld [vmem:[#allocation36_spill] sm:$0xff] }
 0x41e   : >> { %v5002_v19 = vadd.f32 %v4969_v35, %v4878_v34  ;;  %v17453_v27 = vrot.slane %v15034_v31, 2  ;;  %v1091_v9 = vadd.f32 %v1059_v28, %v966_v29  ;;  %v1263_v3 = vmul.f32 %v8378_v14, %v19089_v13  ;;  %v19092_v28 = vld [vmem:[#allocation37_spill] sm:$0xff] }
 0x41f   : >> { %v1184_v1 = vsel %vm1144_vm7, %v19088_v4, %v1183_v24  ;;  %v5404_v38 = vsel %vm519_vm2, %v5402_v25, %v17454_v36  ;;  %v5650_v63 = vrot.slane %v5588_v51, 3  ;;  %v1494_v50 = vrot.slane %v1431_v23, 2 }
 0x420   : >> { %v1679_v24 = vmul.f32 %v19086_v7, %v19090_v58  ;;  %v5126_v46 = vadd.f32 %v5093_v18, %v5002_v19  ;;  %v5712_v10 = vmul.f32 %v14991_v39, %v19010_v45  ;;  %v15068_v35 = vmul.f32 %v15001_v44, %v19010_v45 }
 0x421   : >> { %v1216_v6 = vadd.f32 %v1184_v1, %v1091_v9  ;;  %v5651_v41 = vrot.slane %v15049_v43, 3  ;;  %v19091_v47 = vrot.slane %v14580_v2, 1  ;;  %v1618_v25 = vrot.slane %v1555_v37, 3  ;;  %v19093_v2 = vld [vmem:[#allocation137_spill] sm:$0xff]  ;;  %v19095_v9 = vld [vmem:[#allocation39_spill] sm:$0xff] }
 0x422   : >> { %v1803_v23 = vmul.f32 %v19086_v7, %v19092_v28  ;;  %v5250_v18 = vadd.f32 %v5217_v40, %v5126_v46  ;;  %v5528_v34 = vsel %vm644_vm3, %v5526_v15, %v17453_v27  ;;  %v5836_v29 = vmul.f32 %v14991_v39, %v19013_v54  ;;  %v7861_v46 = vld [vmem:[%s8792_s26 + $0xe8] sm:$0xff]  ;;  %v19097_v28 = vld [vmem:[#allocation138_spill] sm:$0xff] }
 0x423   : >> { %v1371_v51 = vsel %vm519_vm2, %v19091_v47, %v1370_v60  ;;  %v1279_v4 = vadd.f32 %v1263_v3, %v1216_v6  ;;  %v15083_v1 = vmul.f32 %v15001_v44, %v19013_v54  ;;  %v19094_v19 = vrot.slane %v19093_v2, 2  ;;  %v19096_v3 = vld [vmem:[#allocation132_spill] sm:$0xff]  ;;  %v19101_v27 = vld [vmem:[#allocation42_spill] sm:$0xff] }
 0x424   : >> { %v1742_v37 = vrot.slane %v1679_v24, 4  ;;  %v1927_v40 = vmul.f32 %v19086_v7, %v19095_v9  ;;  %v5313_v14 = vadd.f32 %v5297_v33, %v5250_v18  ;;  %v5774_v13 = vrot.slane %v5712_v10, 4 }
 0x425   : >> { %v1495_v60 = vsel %vm644_vm3, %v19094_v19, %v1494_v50  ;;  %v5775_v15 = vrot.slane %v15068_v35, 4  ;;  %v1403_v58 = vadd.f32 %v1371_v51, %v1279_v4  ;;  %v5960_v6 = vmul.f32 %v19096_v3, %v14991_v39  ;;  %v6081_v19 = vpop.xlane.xlu0 %6080  ;;  %v19099_v39 = vld [vmem:[#allocation139_spill] sm:$0xff] }
 0x426   : >> { %v15096_v47 = vmul.f32 %v19096_v3, %v15001_v44  ;;  %v19098_v2 = vrot.slane %v19097_v28, 3  ;;  %v1866_v24 = vrot.slane %v1803_v23, 5  ;;  %v5437_v7 = vadd.f32 %v5404_v38, %v5313_v14 }
 0x427   : >> { %v5652_v33 = vsel %vm769_vm4, %v5650_v63, %v5651_v41  ;;  %v5898_v10 = vrot.slane %v5836_v29, 5  ;;  %v1527_v51 = vadd.f32 %v1495_v60, %v1403_v58  ;;  %v5899_v18 = vrot.slane %v15083_v1, 5  ;;  %v19102_v29 = vld [vmem:[#allocation25_spill] sm:$0xff]  ;;  %v19104_v58 = vld [vmem:[#allocation44_spill] sm:$0xff] }
 0x428   : >> { %v1619_v50 = vsel %vm769_vm4, %v19098_v2, %v1618_v25  ;;  %v19100_v4 = vrot.slane %v19099_v39, 4  ;;  %v1990_v3 = vrot.slane %v1927_v40, 6  ;;  %v2114_v28 = vmul.f32 %v7861_v46, %v19101_v27 }
 0x429   : >> { %v5561_v36 = vadd.f32 %v5528_v34, %v5437_v7  ;;  %v5776_v38 = vsel %vm894_vm5, %v5774_v13, %v5775_v15  ;;  %v1651_v25 = vadd.f32 %v1619_v50, %v1527_v51  ;;  %v6022_v23 = vrot.slane %v5960_v6, 6  ;;  %v19105_v34 = vld [vmem:[#allocation27_spill] sm:$0xff]  ;;  %v19107_v6 = vld [vmem:[#allocation46_spill] sm:$0xff]  ;;  %v15124_v51 = vpop.xlane.xlu0 %6083 }
 0x42a   : >> { %v1743_v9 = vsel %vm894_vm5, %v19100_v4, %v1742_v37  ;;  %v6023_v63 = vrot.slane %v15096_v47, 6  ;;  %v19103_v60 = vrot.slane %v19102_v29, 5  ;;  %v2238_v2 = vmul.f32 %v7861_v46, %v19104_v58 }
 0x42b   : >> { %v5685_v39 = vadd.f32 %v5652_v33, %v5561_v36  ;;  %v1775_v37 = vadd.f32 %v1743_v9, %v1651_v25  ;;  %v5900_v27 = vsel %vm1019_vm6, %v5898_v10, %v5899_v18  ;;  %v19106_v40 = vrot.slane %v19105_v34, 6  ;;  %v19109_v10 = vld [vmem:[#allocation48_spill] sm:$0xff] }
 0x42c   : >> { %v1867_v14 = vsel %vm1019_vm6, %v19103_v60, %v1866_v24  ;;  %v2177_v50 = vrot.slane %v2114_v28, 1  ;;  %v2362_v7 = vmul.f32 %v7861_v46, %v19107_v6  ;;  %v19108_v24 = vld [vmem:[#allocation43_spill] sm:$0xff]  ;;  %v6024_v36 = vsel %vm1144_vm7, %v6022_v23, %v6023_v63 }
 0x42d   : >> { %v1991_v13 = vsel %vm1144_vm7, %v19106_v40, %v1990_v3  ;;  %v5809_v4 = vadd.f32 %v5776_v38, %v5685_v39  ;;  %v1899_v29 = vadd.f32 %v1867_v14, %v1775_v37  ;;  %v2070_v60 = vmul.f32 %v14669_v49, %v19108_v24 }
 0x42e   : >> { %v2301_v33 = vrot.slane %v2238_v2, 2  ;;  %v2486_v9 = vmul.f32 %v7861_v46, %v19109_v10  ;;  %v19110_v3 = vrot.slane %v14695_v17, 1  ;;  %v2425_v34 = vrot.slane %v2362_v7, 3  ;;  %v6093_v2 = vpop.xlane.xlu0 %6092 }
 0x42f   : >> { %v5933_v25 = vadd.f32 %v5900_v27, %v5809_v4  ;;  %v2023_v58 = vadd.f32 %v1991_v13, %v1899_v29  ;;  %v2610_v38 = vmul.f32 %v7861_v46, %v19016_v55  ;;  %v19111_v49 = vrot.slane %v14701_v0, 2  ;;  %v19114_v4 = vld [vmem:[#allocation53_spill] sm:$0xff]  ;;  %v19115_v29 = vld [vmem:[#allocation135_spill] sm:$0xff] }
 0x430   : >> { %v2178_v28 = vsel %vm519_vm2, %v19110_v3, %v2177_v50  ;;  %v2549_v40 = vrot.slane %v2486_v9, 4  ;;  %v2734_v23 = vmul.f32 %v7861_v46, %v18604_v16  ;;  %v19112_v17 = vrot.slane %v14722_v59, 3 }
 0x431   : >> { %v6057_v14 = vadd.f32 %v6024_v36, %v5933_v25  ;;  %v2086_v39 = vadd.f32 %v2070_v60, %v2023_v58  ;;  %v2302_v37 = vsel %vm644_vm3, %v19111_v49, %v2301_v33  ;;  %v2673_v6 = vrot.slane %v2610_v38, 5  ;;  %v19117_v33 = vld [vmem:[#allocation57_spill] sm:$0xff]  ;;  %v6087_v49 = vpop.xlane.xlu1 %6086 }
 0x432   : >> { %v2426_v50 = vsel %vm769_vm4, %v19112_v17, %v2425_v34  ;;  %v19113_v7 = vrot.slane %v14742_v11, 4  ;;  %v2797_v46 = vrot.slane %v2734_v23, 6  ;;  %v2921_v24 = vmul.f32 %v19115_v29, %v19114_v4  ;;  %v6099_v9 = vpop.xlane.xlu0 %6098  ;;  %v19125_v4 = vld [vmem:[#allocation66_spill] sm:$0xff] }
 0x433   : >> { %v15141_v27 = vadd.f32 %v19056_v5, %v6057_v14  ;;  %v2210_v13 = vadd.f32 %v2178_v28, %v2086_v39  ;;  %v19116_v59 = vrot.slane %v14753_v61, 5  ;;  %v3045_v10 = vmul.f32 %v19115_v29, %v19117_v33  ;;  %v8379_v14 = vld [vmem:[%s8792_s26 + $0xf8] sm:$0xff]  ;;  %v19119_v39 = vld [vmem:[#allocation56_spill] sm:$0xff] }
 0x434   : >> { %v2550_v16 = vsel %vm894_vm5, %v19113_v7, %v2549_v40  ;;  %v19118_v58 = vrot.slane %v14764_v42, 6  ;;  %v2984_v3 = vrot.slane %v2921_v24, 1  ;;  %v3169_v28 = vmul.f32 %v19115_v29, %v18937_v20  ;;  %v19120_v40 = vld [vmem:[#allocation61_spill] sm:$0xff] }
 0x435   : >> { %v6121_v55 = vsel %vm273_vm0, %v15141_v27, 0.0  ;;  %v2334_v0 = vadd.f32 %v2302_v37, %v2210_v13  ;;  %v2674_v36 = vsel %vm1019_vm6, %v19116_v59, %v2673_v6  ;;  %v6128_v34 = vmul.f32 0.015625, %v6081_v19  ;;  %v19121_v13 = vld [vmem:[#allocation129_spill] sm:$0xff]  ;;  %v19124_v19 = vld [vmem:[#allocation63_spill] sm:$0xff] }
 0x436   : >> { %6122 = vadd.xlane.f32.xlu0 %v6121_v55  ;;  %v2798_v11 = vsel %vm1144_vm7, %v19118_v58, %v2797_v46  ;;  %v2877_v61 = vmul.f32 %v8379_v14, %v19119_v39  ;;  %v3108_v37 = vrot.slane %v3045_v10, 2  ;;  %v3293_v23 = vmul.f32 %v19115_v29, %v19120_v40  ;;  %v19128_v58 = vld [vmem:[#allocation109_spill] sm:$0xff]  ;;  %v19129_v14 = vld [vmem:[#allocation124_spill] sm:$0xff] }
 0x437   : >> { %v2458_v60 = vadd.f32 %v2426_v50, %v2334_v0  ;;  %v15168_v17 = vsub.f32 %v19121_v13, %v6128_v34  ;;  %v19122_v50 = vld [vmem:[#allocation141_spill] sm:$0xff]  ;;  %v3232_v20 = vrot.slane %v3169_v28, 3  ;;  %v3417_v0 = vmul.f32 %v19115_v29, %v19124_v19  ;;  %v7913_v34 = vld [vmem:[%s8792_s26 + $0x118] sm:$0xff]  ;;  %v19132_v13 = vld [vmem:[#allocation55_spill] sm:$0xff] }
 0x438   : >> { %v19123_v6 = vrot.slane %v19122_v50, 1  ;;  %v6130_v7 = vmul.f32 0.015625, %v6087_v49  ;;  %v3541_v24 = vmul.f32 %v19115_v29, %v19125_v4  ;;  %v6132_v59 = vmul.f32 0.015625, %v6093_v2  ;;  %v19130_v29 = vld [vmem:[#allocation143_spill] sm:$0xff] }
 0x439   : >> { %v2582_v25 = vadd.f32 %v2550_v16, %v2458_v60  ;;  %v6105_v16 = vpop.xlane.xlu0 %6104  ;;  %v6160_v60 = vmul.f32 %v15168_v17, %v15168_v17  ;;  %v3480_v49 = vrot.slane %v3417_v0, 5  ;;  %v19133_v50 = vrot.slane %v14818_v12, 4  ;;  %v19137_v12 = vld [vmem:[#allocation26_spill] sm:$0xff] }
 0x43a   : >> { %v2985_v55 = vsel %vm519_vm2, %v19123_v6, %v2984_v3  ;;  %v6134_v3 = vmul.f32 0.015625, %v6099_v9  ;;  %v15188_v39 = vsub.f32 %v19129_v14, %v6132_v59  ;;  %v6136_v0 = vmul.f32 0.015625, %v6105_v16  ;;  %v19138_v16 = vld [vmem:[#allocation145_spill] sm:$0xff] }
 0x43b   : >> { %v2706_v38 = vadd.f32 %v2674_v36, %v2582_v25  ;;  %v19126_v36 = vld [vmem:[#allocation142_spill] sm:$0xff]  ;;  %v3356_v25 = vrot.slane %v3293_v23, 4  ;;  %v3604_v23 = vrot.slane %v3541_v24, 6  ;;  %v19135_v4 = vrot.slane %v14845_v21, 5 }
 0x43c   : >> { %v19127_v33 = vrot.slane %v19126_v36, 2  ;;  %v15196_v9 = vsub.f32 %v19132_v13, %v6134_v3  ;;  %v19139_v3 = vrot.slane %v19138_v16, 6 }
 0x43d   : >> { %v2830_v42 = vadd.f32 %v2798_v11, %v2706_v38  ;;  %v15183_v11 = vsub.f32 %v19128_v58, %v6130_v7  ;;  %v6176_v38 = vsel %vm273_vm0, %v6160_v60, 0.0  ;;  %v3357_v6 = vsel %vm894_vm5, %v19133_v50, %v3356_v25  ;;  %v6111_v7 = vpop.xlane.xlu0 %6110  ;;  %v19136_v60 = vld [vmem:[#allocation69_spill] sm:$0xff] }
 0x43e   : >> { %v3109_v10 = vsel %vm644_vm3, %v19127_v33, %v3108_v37  ;;  %6177 = vadd.xlane.f32.xlu0 %v6176_v38  ;;  %v3481_v24 = vsel %vm1019_vm6, %v19135_v4, %v3480_v49  ;;  %v3852_v59 = vmul.f32 %v7913_v34, %v19136_v60  ;;  %v6166_v25 = vmul.f32 %v15196_v9, %v15196_v9  ;;  %v19140_v38 = vld [vmem:[#allocation74_spill] sm:$0xff] }
 0x43f   : >> { %v2893_v46 = vadd.f32 %v2877_v61, %v2830_v42  ;;  %v19131_v61 = vrot.slane %v19130_v29, 3  ;;  %v6162_v37 = vmul.f32 %v15183_v11, %v15183_v11  ;;  %v6164_v42 = vmul.f32 %v15188_v39, %v15188_v39  ;;  %v19148_v60 = vld [vmem:[#allocation146_spill] sm:$0xff] }
 0x440   : >> { %v6138_v58 = vmul.f32 0.015625, %v6111_v7  ;;  %v3976_v14 = vmul.f32 %v7913_v34, %v19140_v38  ;;  %v6194_v50 = vsel %vm273_vm0, %v6166_v25, 0.0 }
 0x441   : >> { %v3017_v28 = vadd.f32 %v2985_v55, %v2893_v46  ;;  %v3233_v2 = vsel %vm769_vm4, %v19131_v61, %v3232_v20  ;;  %v19134_v55 = vld [vmem:[#allocation67_spill] sm:$0xff]  ;;  %v6182_v20 = vsel %vm273_vm0, %v6162_v37, 0.0  ;;  %v6188_v36 = vsel %vm273_vm0, %v6164_v42, 0.0  ;;  %v19141_v61 = vld [vmem:[#allocation68_spill] sm:$0xff] }
 0x442   : >> { %v3728_v19 = vmul.f32 %v7913_v34, %v19134_v55  ;;  %6183 = vadd.xlane.f32.xlu0 %v6182_v20  ;;  %v3915_v37 = vrot.slane %v3852_v59, 2  ;;  %v4039_v7 = vrot.slane %v3976_v14, 3  ;;  %v19149_v59 = vrot.slane %v19148_v60, 2 }
 0x443   : >> { %v3141_v40 = vadd.f32 %v3109_v10, %v3017_v28  ;;  %v15211_v10 = vsub.f32 %v19137_v12, %v6136_v0  ;;  %v3605_v28 = vsel %vm1144_vm7, %v19139_v3, %v3604_v23  ;;  %v19150_v12 = vld [vmem:[#allocation81_spill] sm:$0xff] }
 0x444   : >> { %v3791_v21 = vrot.slane %v3728_v19, 1  ;;  %v19145_v19 = vld [vmem:[#allocation28_spill] sm:$0xff]  ;;  %v4348_v25 = vmul.f32 %v7913_v34, %v19150_v12 }
 0x445   : >> { %v3265_v46 = vadd.f32 %v3233_v2, %v3141_v40  ;;  %v19142_v2 = vld [vmem:[#allocation144_spill] sm:$0xff]  ;;  %v19143_v40 = vld [vmem:[#allocation75_spill] sm:$0xff]  ;;  %v6168_v23 = vmul.f32 %v15211_v10, %v15211_v10  ;;  %v19146_v20 = vrot.slane %v19145_v19, 1  ;;  %v19158_v19 = vld [vmem:[#allocation86_spill] sm:$0xff] }
 0x446   : >> { %v3684_v49 = vmul.f32 %v19142_v2, %v19141_v61  ;;  %v4100_v13 = vmul.f32 %v7913_v34, %v19143_v40  ;;  %6189 = vadd.xlane.f32.xlu0 %v6188_v36  ;;  %v3916_v36 = vsel %vm644_vm3, %v19149_v59, %v3915_v37  ;;  %v19153_v61 = vrot.slane %v14891_v53, 4  ;;  %v19155_v37 = vld [vmem:[#allocation127_spill] sm:$0xff] }
 0x447   : >> { %v3389_v33 = vadd.f32 %v3357_v6, %v3265_v46  ;;  %v19144_v6 = vld [vmem:[#allocation92_spill] sm:$0xff]  ;;  %v3792_v0 = vsel %vm519_vm2, %v19146_v20, %v3791_v21  ;;  %v19147_v46 = vld [vmem:[#allocation78_spill] sm:$0xff]  ;;  %v6200_v16 = vsel %vm273_vm0, %v6168_v23, 0.0  ;;  %v4659_v20 = vmul.f32 %v19155_v37, %v19158_v19 }
 0x448   : >> { %v15224_v55 = vsub.f32 %v19144_v6, %v6138_v58  ;;  %v4224_v4 = vmul.f32 %v7913_v34, %v19147_v46  ;;  %v19154_v34 = vld [vmem:[#allocation82_spill] sm:$0xff] }
 0x449   : >> { %v3513_v29 = vadd.f32 %v3481_v24, %v3389_v33  ;;  %v4163_v33 = vrot.slane %v4100_v13, 4  ;;  %v4535_v40 = vmul.f32 %v19155_v37, %v19154_v34 }
 0x44a   : >> { %6195 = vadd.xlane.f32.xlu0 %v6194_v50  ;;  %v6170_v3 = vmul.f32 %v15224_v55, %v15224_v55  ;;  %v4287_v14 = vrot.slane %v4224_v4, 5  ;;  %v19156_v50 = vld [vmem:[#allocation150_spill] sm:$0xff] }
 0x44b   : >> { %v3637_v42 = vadd.f32 %v3605_v28, %v3513_v29  ;;  %v19151_v28 = vld [vmem:[#allocation136_spill] sm:$0xff]  ;;  %v4164_v2 = vsel %vm894_vm5, %v19153_v61, %v4163_v33  ;;  %v19157_v6 = vrot.slane %v19156_v50, 5  ;;  %v4598_v4 = vrot.slane %v4535_v40, 1 }
 0x44c   : >> { %v19152_v21 = vrot.slane %v19151_v28, 3  ;;  %v19162_v33 = vld [vmem:[#allocation84_spill] sm:$0xff]  ;;  %v19164_v28 = vld [vmem:[#allocation151_spill] sm:$0xff] }
 0x44d   : >> { %v3700_v24 = vadd.f32 %v3684_v49, %v3637_v42  ;;  %v4411_v49 = vrot.slane %v4348_v25, 6  ;;  %v6206_v42 = vsel %vm273_vm0, %v6170_v3, 0.0  ;;  %v4288_v23 = vsel %vm1019_vm6, %v19157_v6, %v4287_v14  ;;  %v7965_v6 = vld [vmem:[%s8792_s26 + $0x148] sm:$0xff] }
 0x44e   : >> { %v4040_v38 = vsel %vm769_vm4, %v19152_v21, %v4039_v7  ;;  %6201 = vadd.xlane.f32.xlu0 %v6200_v16  ;;  %v19159_v7 = vld [vmem:[#allocation149_spill] sm:$0xff]  ;;  %v4722_v25 = vrot.slane %v4659_v20, 2  ;;  %v19165_v21 = vrot.slane %v19164_v28, 1  ;;  %v5838_v22 = vmul.f32 %v7965_v6, %v19013_v54 }
 0x44f   : >> { %v3824_v58 = vadd.f32 %v3792_v0, %v3700_v24  ;;  %v19160_v53 = vrot.slane %v19159_v7, 6  ;;  %v19161_v24 = vld [vmem:[#allocation88_spill] sm:$0xff] }
 0x450   : >> { %v4783_v60 = vmul.f32 %v19155_v37, %v19161_v24 }
 0x451   : >> { %v3948_v29 = vadd.f32 %v3916_v36, %v3824_v58  ;;  %v4412_v46 = vsel %vm1144_vm7, %v19160_v53, %v4411_v49  ;;  %v8380_v36 = vld [vmem:[%s8792_s26 + $0x128] sm:$0xff]  ;;  %v19163_v58 = vld [vmem:[#allocation90_spill] sm:$0xff]  ;;  %v19167_v49 = vld [vmem:[#allocation23_spill] sm:$0xff] }
 0x452   : >> { %6207 = vadd.xlane.f32.xlu0 %v6206_v42  ;;  %v4491_v12 = vmul.f32 %v8380_v36, %v19162_v33  ;;  %v4907_v16 = vmul.f32 %v19155_v37, %v19163_v58  ;;  %v4846_v14 = vrot.slane %v4783_v60, 3  ;;  %v19168_v34 = vrot.slane %v19167_v49, 2  ;;  %v19171_v53 = vld [vmem:[#allocation41_spill] sm:$0xff] }
 0x453   : >> { %v4072_v13 = vadd.f32 %v4040_v38, %v3948_v29  ;;  %v4599_v38 = vsel %vm519_vm2, %v19165_v21, %v4598_v4  ;;  %v19166_v29 = vld [vmem:[#allocation93_spill] sm:$0xff]  ;;  %v5155_v42 = vmul.f32 %v19155_v37, %v19074_v26  ;;  %v5342_v60 = vmul.f32 %v7965_v6, %v19007_v32  ;;  %v6090_v21 = vpop.xlane.xlu1 %6089 }
 0x454   : >> { %v5031_v61 = vmul.f32 %v19155_v37, %v19166_v29  ;;  %v4723_v40 = vsel %vm644_vm3, %v19168_v34, %v4722_v25  ;;  %v5466_v37 = vmul.f32 %v7965_v6, %v19008_v56  ;;  %v5590_v25 = vmul.f32 %v7965_v6, %v19009_v30 }
 0x455   : >> { %v4196_v0 = vadd.f32 %v4164_v2, %v4072_v13  ;;  %v4970_v13 = vrot.slane %v4907_v16, 4  ;;  %v5218_v24 = vrot.slane %v5155_v42, 6  ;;  %v5298_v16 = vmul.f32 %v15001_v44, %v18994_v52  ;;  %v8381_v52 = vld [vmem:[%s16584_s1 + $0x30] ss:$0 sm:$0xff]  ;;  %v19175_v42 = vld [vmem:[#allocation38_spill] sm:$0xff] }
 0x456   : >> { %v5529_v32 = vrot.slane %v5466_v37, 2  ;;  %v5653_v28 = vrot.slane %v5590_v25, 3  ;;  %v5901_v29 = vrot.slane %v5838_v22, 5  ;;  %v6129_v34 = vmul.f32 0.015625, %v15124_v51  ;;  %v19176_v51 = vld [vmem:[#allocation99_spill] sm:$0xff]  ;;  %v19180_v25 = vld [vmem:[#allocation49_spill] sm:$0xff] }
 0x457   : >> { %v4320_v59 = vadd.f32 %v4288_v23, %v4196_v0  ;;  %v19169_v23 = vld [vmem:[#allocation40_spill] sm:$0xff]  ;;  %v5094_v0 = vrot.slane %v5031_v61, 5  ;;  %v5219_v33 = vsel %vm1144_vm7, %v5216_v48, %v5218_v24  ;;  %v6131_v35 = vmul.f32 0.015625, %v6090_v21 }
 0x458   : >> { %v19170_v19 = vrot.slane %v19169_v23, 3  ;;  %v19178_v24 = vld [vmem:[#allocation112_spill] sm:$0xff] }
 0x459   : >> { %v4444_v3 = vadd.f32 %v4412_v46, %v4320_v59  ;;  %v19172_v46 = vrot.slane %v19171_v53, 4  ;;  %v5095_v26 = vsel %vm1019_vm6, %v5092_v8, %v5094_v0  ;;  %v19173_v8 = vrot.slane %v15016_v57, 1  ;;  %v19177_v0 = vld [vmem:[#allocation22_spill] sm:$0xff] }
 0x45a   : >> { %v4847_v20 = vsel %vm769_vm4, %v19170_v19, %v4846_v14  ;;  %v5654_v57 = vsel %vm769_vm4, %v5651_v41, %v5653_v28  ;;  %v15321_v19 = vsub.f32 %v19176_v51, %v6131_v35 }
 0x45b   : >> { %v4507_v2 = vadd.f32 %v4491_v12, %v4444_v3  ;;  %v4971_v4 = vsel %vm894_vm5, %v19172_v46, %v4970_v13  ;;  %v5405_v12 = vrot.slane %v5342_v60, 1  ;;  %v5714_v3 = vmul.f32 %v7965_v6, %v19010_v45 }
 0x45c   : >> { %v5962_v45 = vmul.f32 %v8381_v52, %v7965_v6  ;;  %v6163_v46 = vmul.f32 %v15321_v19, %v15321_v19 }
 0x45d   : >> { %v4631_v50 = vadd.f32 %v4599_v38, %v4507_v2  ;;  %v5406_v56 = vsel %vm519_vm2, %v19173_v8, %v5405_v12  ;;  %v19174_v38 = vrot.slane %v15034_v31, 2  ;;  %v5777_v14 = vrot.slane %v5714_v3, 4  ;;  %v6096_v2 = vpop.xlane.xlu1 %6095 }
 0x45e   : >> { %v6025_v31 = vrot.slane %v5962_v45, 6  ;;  %v6133_v1 = vmul.f32 0.015625, %v6096_v2  ;;  %v8170_v2 = vld [vmem:[%s16587_s4 + $0x24] ss:$8 sps:$4 sm:$0xff]  }
 0x45f   : >> { %v4755_v7 = vadd.f32 %v4723_v40, %v4631_v50  ;;  %v5530_v30 = vsel %vm644_vm3, %v19174_v38, %v5529_v32  ;;  %v5778_v54 = vsel %vm894_vm5, %v5775_v15, %v5777_v14  ;;  %v5902_v40 = vsel %vm1019_vm6, %v5899_v18, %v5901_v29  ;;  %v8164_v14 = vld [vmem:[%s16587_s4 + $0x4] ss:$8 sps:$4 sm:$0xff]  }
 0x460   : >> { %v6026_v43 = vsel %vm1144_vm7, %v6023_v63, %v6025_v31  ;;  %v15315_v50 = vsub.f32 %v19175_v42, %v6129_v34  ;;  %v6117_v63 = vpop.xlane.xlu0 %6116  ;;  %6419 = vmatprep.subr.bf16.mxu0 %v8164_v14  ;;  %v19182_v29 = vld [vmem:[#allocation147_spill] sm:$0xff]  ;;  %v8169_v31 = vld [vmem:[%s16587_s4 + $0x10] ss:$8 sps:$4 sm:$0xff]  }
 0x461   : >> { %v4879_v59 = vadd.f32 %v4847_v20, %v4755_v7  ;;  %v6102_v15 = vpop.xlane.xlu1 %6101  ;;  %v15328_v7 = vsub.f32 %v19177_v0, %v6133_v1  ;;  %v8172_v34 = vld [vmem:[%s16587_s4 + $0x20] ss:$8 sps:$4 sm:$0xff]  }
 0x462   : >> { %v6161_v18 = vmul.f32 %v15315_v50, %v15315_v50 }
 0x463   : >> { %v5003_v36 = vadd.f32 %v4971_v4, %v4879_v59  ;;  %v6140_v4 = vmul.f32 0.015625, %v6117_v63  ;;  %v6185_v59 = vsel %vm273_vm0, %v6163_v46, 0.0  ;;  %v6165_v37 = vmul.f32 %v15328_v7, %v15328_v7 }
 0x464   : >> { %v6179_v53 = vsel %vm273_vm0, %v6161_v18, 0.0 }
 0x465   : >> { %v5127_v58 = vadd.f32 %v5095_v26, %v5003_v36  ;;  %v6108_v20 = vpop.xlane.xlu1 %6107 }
 0x466   : >> { %v6137_v26 = vmul.f32 0.015625, %v6108_v20 }
 0x467   : >> { %v5251_v62 = vadd.f32 %v5219_v33, %v5127_v58  ;;  %v19179_v33 = vld [vmem:[#allocation85_spill] sm:$0xff] }
 0x468   : >> { %v15340_v12 = vsub.f32 %v19179_v33, %v6140_v4  ;;  %v15343_v58 = vsub.f32 %v19180_v25, %v6137_v26 }
 0x469   : >> { %v5314_v48 = vadd.f32 %v5298_v16, %v5251_v62  ;;  %v6114_v36 = vpop.xlane.xlu1 %6113  ;;  %v6191_v16 = vsel %vm273_vm0, %v6165_v37, 0.0 }
 0x46a   : >> { %v6139_v32 = vmul.f32 0.015625, %v6114_v36  ;;  %v6172_v62 = vmul.f32 %v15340_v12, %v15340_v12  ;;  %v6169_v21 = vmul.f32 %v15343_v58, %v15343_v58 }
 0x46b   : >> { %v5438_v44 = vadd.f32 %v5406_v56, %v5314_v48  ;;  %v19181_v56 = vld [vmem:[#allocation97_spill] sm:$0xff] }
 0x46c   : >> { %v6212_v8 = vsel %vm273_vm0, %v6172_v62, 0.0  ;;  %v15352_v28 = vsub.f32 %v19181_v56, %v6139_v32  ;;  %v6203_v48 = vsel %vm273_vm0, %v6169_v21, 0.0  ;;  %v19183_v21 = vld [vmem:[#allocation12_spill] sm:$0xff] }
 0x46d   : >> { %v5562_v61 = vadd.f32 %v5530_v30, %v5438_v44  ;;  %6213 = vadd.xlane.f32.xlu0 %v6212_v8  ;;  %v8166_v44 = vld [vmem:[%s16587_s4] ss:$8 sps:$4 sm:$0xff]  }
 0x46e   : >> { %v6171_v38 = vmul.f32 %v15352_v28, %v15352_v28  ;;  %6420 = vmatpush1.bf16.msra.mxu0 %v8166_v44 }
 0x46f   : >> { %v5686_v49 = vadd.f32 %v5654_v57, %v5562_v61  ;;  %v8167_v57 = vld [vmem:[%s16587_s4 + $0x14] ss:$8 sps:$4 sm:$0xff]  }
 0x470   : >> { %v6209_v30 = vsel %vm273_vm0, %v6171_v38, 0.0  ;;  %6421 = vmatprep.subr.bf16.mxu0 %v8167_v57  ;;  %v19185_v57 = vld [vmem:[#allocation13_spill] sm:$0xff] }
 0x471   : >> { %v5810_v13 = vadd.f32 %v5778_v54, %v5686_v49 }
 0x472   : >> { %6422 = vmatpush1.bf16.msra.mxu0 %v8169_v31 }
 0x473   : >> { %v5934_v41 = vadd.f32 %v5902_v40, %v5810_v13  ;;  %6423 = vmatprep.subr.bf16.mxu0 %v8170_v2  ;;  %v8173_v40 = vld [vmem:[%s16587_s4 + $0x34] ss:$8 sps:$4 sm:$0xff]   ;;  %v8175_v13 = vld [vmem:[%s16587_s4 + $0x30] ss:$8 sps:$4 sm:$0xff]  }
 0x475   : >> { %v6058_v6 = vadd.f32 %v6026_v43, %v5934_v41  ;;  %v8492_v43 = vmov 0  }
 0x476   : >> { %6424 = vmatpush1.bf16.msra.mxu0 %v8172_v34  ;;  %6451 = vmatprep.mubr.bf16.mxu0 %v8492_v43 }
 0x477   : >> { %v15318_v23 = vadd.f32 %v19056_v5, %v6058_v6  ;;  %v6135_v5 = vmul.f32 0.015625, %v6102_v15  ;;  %6425 = vmatprep.subr.bf16.mxu0 %v8173_v40 }
 0x479   : >> { %v6124_v47 = vsel %vm273_vm0, %v15318_v23, 0.0  ;;  %v15334_v60 = vsub.f32 %v19178_v24, %v6135_v5 }
 0x47a   : >> { %6125 = vadd.xlane.f32.xlu1 %v6124_v47  ;;  %6426 = vmatpush1.bf16.msra.mxu0 %v8175_v13 }
 0x47b   : >> { %v6167_v3 = vmul.f32 %v15334_v60, %v15334_v60 }
 0x47d   : >> { %v6197_v22 = vsel %vm273_vm0, %v6167_v3, 0.0 }
 0x47e   : >> { %6180 = vadd.xlane.f32.xlu1 %v6179_v53 }
 0x482   : >> { %6186 = vadd.xlane.f32.xlu1 %v6185_v59 }
 0x486   : >> { %6192 = vadd.xlane.f32.xlu1 %v6191_v16 }
 0x48a   : >> { %6198 = vadd.xlane.f32.xlu1 %v6197_v22 }
 0x48e   : >> { %6204 = vadd.xlane.f32.xlu1 %v6203_v48  ;;  %v19184_v48 = vld [vmem:[#allocation9_spill] sm:$0xff] }
 0x48f   : >> { %v15407_v38 = vrot.slane %v19184_v48, %v19183_v21 }
 0x492   : >> { %6210 = vadd.xlane.f32.xlu1 %v6209_v30 }
 0x496   : >> { %v6120_v52 = vpop.xlane.xlu1 %6119 }
 0x497   : >> { %v6141_v45 = vmul.f32 0.015625, %v6120_v52 }
 0x499   : >> { %v15371_v61 = vsub.f32 %v19182_v29, %v6141_v45  ;;  %v15413_v29 = vrot.slane %v19184_v48, %v19185_v57  ;;  %v8189_v48 = vld [vmem:[%s16588_s5 + $0x30] sm:$0xff]  }
 0x49b   : >> { %v6173_v54 = vmul.f32 %v15371_v61, %v15371_v61 }
 0x49d   : >> { %v6215_v49 = vsel %vm273_vm0, %v6173_v54, 0.0 }
 0x49e   : >> { %6216 = vadd.xlane.f32.xlu1 %v6215_v49 }
 0x4c3   : >> { %v6123_v41 = vpop.xlane.xlu0 %6122 }
 0x4c4   : >> { %v6142_v42 = vmul.f32 0.015625, %v6123_v41 }
 0x4c6   : >> { %v15393_v35 = vsub.f32 %v15141_v27, %v6142_v42 }
 0x4c8   : >> { %v6174_v15 = vmul.f32 %v15393_v35, %v15393_v35 }
 0x4ca   : >> { %v6218_v6 = vsel %vm273_vm0, %v6174_v15, 0.0 }
 0x4cb   : >> { %6219 = vadd.xlane.f32.xlu0 %v6218_v6  ;;  %v6178_v51 = vpop.xlane.xlu0 %6177 }
 0x4cc   : >> { %v6224_v1 = vmul.f32 0.015625, %v6178_v51 }
 0x4ce   : >> { %v6240_v18 = vadd.f32 1e-06, %v6224_v1 }
 0x4cf   : >> { %v6184_v63 = vpop.xlane.xlu0 %6183 }
 0x4d0   : >> { %8192 = vrsqrt.f32 %v6240_v18  ;;  %v6226_v53 = vmul.f32 0.015625, %v6184_v63 }
 0x4d2   : >> { %v6242_v59 = vadd.f32 1e-06, %v6226_v53 }
 0x4d3   : >> { %v6190_v37 = vpop.xlane.xlu0 %6189 }
 0x4d7   : >> { %v6196_v8 = vpop.xlane.xlu0 %6195 }
 0x4d8   : >> { %v6230_v52 = vmul.f32 0.015625, %v6196_v8 }
 0x4da   : >> { %v8193_v16 = vpop.eup %8192  ;;  %v6246_v34 = vadd.f32 1e-06, %v6230_v52 }
 0x4db   : >> { %v6272_v22 = vmul.f32 %v8193_v16, %v15168_v17  ;;  %v6202_v40 = vpop.xlane.xlu0 %6201 }
 0x4dc   : >> { %v6232_v18 = vmul.f32 0.015625, %v6202_v40 }
 0x4dd   : >> { %v6292_v44 = vmul.f32 %v15407_v38, %v6272_v22 }
 0x4df   : >> { %v6312_v13 = vadd.f32 %v15413_v29, %v6292_v44 }
 0x507   : >> { %v6126_v47 = vpop.xlane.xlu1 %6125 }
 0x508   : >> { %v6143_v20 = vmul.f32 0.015625, %v6126_v47 }
 0x50a   : >> { %v15399_v0 = vsub.f32 %v15318_v23, %v6143_v20  ;;  %v6228_v23 = vmul.f32 0.015625, %v6190_v37 }
 0x50b   : >> { %v6181_v5 = vpop.xlane.xlu1 %6180 }
 0x50c   : >> { %v6175_v27 = vmul.f32 %v15399_v0, %v15399_v0  ;;  %v6225_v46 = vmul.f32 0.015625, %v6181_v5  ;;  %v6244_v3 = vadd.f32 1e-06, %v6228_v23  ;;  %v6248_v5 = vadd.f32 1e-06, %v6232_v18 }
 0x50e   : >> { %v6221_v4 = vsel %vm273_vm0, %v6175_v27, 0.0  ;;  %v6241_v24 = vadd.f32 1e-06, %v6225_v46  ;;  %v6208_v27 = vpop.xlane.xlu0 %6207 }
 0x50f   : >> { %6222 = vadd.xlane.f32.xlu1 %v6221_v4  ;;  %v6187_v26 = vpop.xlane.xlu1 %6186 }
 0x510   : >> { %8194 = vrsqrt.f32 %v6241_v24  ;;  %v6227_v36 = vmul.f32 0.015625, %v6187_v26 }
 0x511   : >> { %8196 = vrsqrt.f32 %v6242_v59 }
 0x512   : >> { %v6243_v33 = vadd.f32 1e-06, %v6227_v36  ;;  %v6234_v36 = vmul.f32 0.015625, %v6208_v27 }
 0x513   : >> { %v6193_v25 = vpop.xlane.xlu1 %6192 }
 0x514   : >> { %8198 = vrsqrt.f32 %v6243_v33  ;;  %v6229_v32 = vmul.f32 0.015625, %v6193_v25 }
 0x516   : >> { %v6245_v62 = vadd.f32 1e-06, %v6229_v32  ;;  %v6250_v32 = vadd.f32 1e-06, %v6234_v36 }
 0x517   : >> { %v6199_v56 = vpop.xlane.xlu1 %6198 }
 0x518   : >> { %8200 = vrsqrt.f32 %v6245_v62  ;;  %v6231_v30 = vmul.f32 0.015625, %v6199_v56 }
 0x519   : >> { %8202 = vrsqrt.f32 %v6244_v3  ;;  %v6214_v3 = vpop.xlane.xlu0 %6213 }
 0x51a   : >> { %v8195_v14 = vpop.eup %8194  ;;  %v6247_v31 = vadd.f32 1e-06, %v6231_v30  ;;  %v6236_v52 = vmul.f32 0.015625, %v6214_v3 }
 0x51b   : >> { %v6273_v45 = vmul.f32 %v8195_v14, %v15315_v50  ;;  %v8197_v54 = vpop.eup %8196  ;;  %v6205_v17 = vpop.xlane.xlu1 %6204 }
 0x51c   : >> { %v6274_v50 = vmul.f32 %v8197_v54, %v15183_v11  ;;  %8204 = vrsqrt.f32 %v6247_v31  ;;  %v6233_v15 = vmul.f32 0.015625, %v6205_v17  ;;  %v6252_v54 = vadd.f32 1e-06, %v6236_v52 }
 0x51d   : >> { %v6293_v2 = vmul.f32 %v15407_v38, %v6273_v45  ;;  %8206 = vrsqrt.f32 %v6246_v34 }
 0x51e   : >> { %v8199_v49 = vpop.eup %8198  ;;  %v6294_v47 = vmul.f32 %v15407_v38, %v6274_v50  ;;  %v6249_v20 = vadd.f32 1e-06, %v6233_v15 }
 0x51f   : >> { %v6313_v41 = vadd.f32 %v15413_v29, %v6293_v2  ;;  %v6275_v42 = vmul.f32 %v8199_v49, %v15321_v19  ;;  %v6211_v53 = vpop.xlane.xlu1 %6210 }
 0x520   : >> { %v6314_v46 = vadd.f32 %v15413_v29, %v6294_v47  ;;  %8208 = vrsqrt.f32 %v6249_v20  ;;  %v6235_v24 = vmul.f32 0.015625, %v6211_v53 }
 0x521   : >> { %v6328_v6 = vpack.c.bf16 %v6313_v41, %v6312_v13  ;;  %v6295_v51 = vmul.f32 %v15407_v38, %v6275_v42  ;;  %8210 = vrsqrt.f32 %v6248_v5 }
 0x522   : >> { %v8201_v1 = vpop.eup %8200 }
 0x523   : >> { %7975 = vmatmul.mubr.msk.bf16.vlgmr.msra.gmra.mrb[0].mxu0 %vm273_vm0, %v6328_v6  ;;  %v8203_v63 = vpop.eup %8202  ;;  %v6315_v11 = vadd.f32 %v15413_v29, %v6295_v51  ;;  %v6277_v19 = vmul.f32 %v8201_v1, %v15328_v7  ;;  %v6251_v7 = vadd.f32 1e-06, %v6235_v24 }
 0x524   : >> { %6461 = vmatprep.mubr.bf16.mxu0 %v8492_v43  ;;  %v6276_v4 = vmul.f32 %v8203_v63, %v15188_v39 }
 0x525   : >> { %v6329_v59 = vpack.c.bf16 %v6315_v11, %v6314_v46  ;;  %v6297_v26 = vmul.f32 %v15407_v38, %v6277_v19  ;;  %8212 = vrsqrt.f32 %v6251_v7 }
 0x526   : >> { %v8205_v37 = vpop.eup %8204  ;;  %v6296_v33 = vmul.f32 %v15407_v38, %v6276_v4  ;;  %8214 = vrsqrt.f32 %v6250_v32 }
 0x527   : >> { %v8207_v23 = vpop.eup %8206  ;;  %v6317_v16 = vadd.f32 %v15413_v29, %v6297_v26  ;;  %v6279_v39 = vmul.f32 %v8205_v37, %v15334_v60 }
 0x528   : >> { %v6316_v62 = vadd.f32 %v15413_v29, %v6296_v33  ;;  %v6278_v8 = vmul.f32 %v8207_v23, %v15196_v9 }
 0x529   : >> { %v6299_v30 = vmul.f32 %v15407_v38, %v6279_v39  ;;  %v19187_v39 = vld [vmem:[#allocation10_spill] sm:$0xff] }
 0x52a   : >> { %v6330_v22 = vpack.c.bf16 %v6317_v16, %v6316_v62  ;;  %v8209_v14 = vpop.eup %8208  ;;  %v6298_v45 = vmul.f32 %v15407_v38, %v6278_v8  ;;  %v8176_v16 = vld [vmem:[%s16588_s5 + $0x40] sm:$0xff]   ;;  %v15493_v3 = vrot.slane %v19187_v39, %v19183_v21 }
 0x52b   : >> { %7976 = vmatmul.mubr.msk.bf16.gmra.mrb[4].mxu0 %vm273_vm0, %v6329_v59  ;;  %v6217_v25 = vpop.xlane.xlu1 %6216  ;;  %v8211_v44 = vpop.eup %8210  ;;  %v6319_v57 = vadd.f32 %v15413_v29, %v6299_v30  ;;  %v6281_v9 = vmul.f32 %v8209_v14, %v15343_v58  ;;  %8024 = vmatprep.subr.bf16.mxu0 %v8176_v16 }
 0x52c   : >> { %6471 = vmatprep.mubr.bf16.mxu0 %v8492_v43  ;;  %v6237_v56 = vmul.f32 0.015625, %v6217_v25  ;;  %v6318_v31 = vadd.f32 %v15413_v29, %v6298_v45  ;;  %v6280_v17 = vmul.f32 %v8211_v44, %v15211_v10  ;;  %8088 = vmatprep.subr.bf16.mxu1 %v8176_v16 }
 0x52d   : >> { %v6301_v49 = vmul.f32 %v15407_v38, %v6281_v9 }
 0x52e   : >> { %v6253_v60 = vadd.f32 1e-06, %v6237_v56  ;;  %v6331_v2 = vpack.c.bf16 %v6319_v57, %v6318_v31  ;;  %v6300_v40 = vmul.f32 %v15407_v38, %v6280_v17 }
 0x52f   : >> { %v8213_v34 = vpop.eup %8212  ;;  %v6321_v58 = vadd.f32 %v15413_v29, %v6301_v49 }
 0x530   : >> { %8216 = vrsqrt.f32 %v6253_v60  ;;  %v8215_v13 = vpop.eup %8214  ;;  %v6283_v41 = vmul.f32 %v8213_v34, %v15352_v28  ;;  %v6320_v50 = vadd.f32 %v15413_v29, %v6300_v40 }
 0x531   : >> { %8218 = vrsqrt.f32 %v6252_v54  ;;  %v6282_v10 = vmul.f32 %v8215_v13, %v15224_v55 }
 0x532   : >> { %v6332_v42 = vpack.c.bf16 %v6321_v58, %v6320_v50  ;;  %v6303_v15 = vmul.f32 %v15407_v38, %v6283_v41  ;;  %v8180_v58 = vld [vmem:[%s16588_s5 + $0x50] sm:$0xff]  }
 0x533   : >> { %7977 = vmatmul.mubr.msk.bf16.gmra.mrb[8].mxu0 %vm273_vm0, %v6330_v22  ;;  %v6302_v51 = vmul.f32 %v15407_v38, %v6282_v10 }
 0x534   : >> { %6481 = vmatprep.mubr.bf16.mxu0 %v8492_v43  ;;  %v6323_v18 = vadd.f32 %v15413_v29, %v6303_v15 }
 0x535   : >> { %v6322_v28 = vadd.f32 %v15413_v29, %v6302_v51 }
 0x537   : >> { %v6333_v55 = vpack.c.bf16 %v6323_v18, %v6322_v28 }
 0x53a   : >> { %v8217_v6 = vpop.eup %8216 }
 0x53b   : >> { %7978 = vmatmul.mubr.msk.bf16.gmra.mrb[12].mxu0 %vm273_vm0, %v6331_v2  ;;  %v8219_v1 = vpop.eup %8218  ;;  %v6285_v47 = vmul.f32 %v8217_v6, %v15371_v61 }
 0x53c   : >> { %6491 = vmatprep.mubr.bf16.mxu0 %v8492_v43  ;;  %v6284_v63 = vmul.f32 %v8219_v1, %v15340_v12 }
 0x53d   : >> { %v6305_v20 = vmul.f32 %v15407_v38, %v6285_v47 }
 0x53e   : >> { %v6304_v53 = vmul.f32 %v15407_v38, %v6284_v63 }
 0x53f   : >> { %v6325_v11 = vadd.f32 %v15413_v29, %v6305_v20 }
 0x540   : >> { %v6324_v19 = vadd.f32 %v15413_v29, %v6304_v53 }
 0x542   : >> { %v6334_v5 = vpack.c.bf16 %v6325_v11, %v6324_v19 }
 0x543   : >> { %7979 = vmatmul.mubr.msk.bf16.gmra.mrb[16].mxu0 %vm273_vm0, %v6332_v42 }
 0x544   : >> { %6501 = vmatprep.mubr.bf16.mxu0 %v8492_v43 }
 0x54b   : >> { %7980 = vmatmul.mubr.msk.bf16.gmra.mrb[20].mxu0 %vm273_vm0, %v6333_v55 }
 0x54c   : >> { %6511 = vmatprep.mubr.bf16.mxu0 %v8492_v43 }
 0x553   : >> { %7981 = vmatmul.mubr.msk.bf16.gmra.mrb[24].mxu0 %vm273_vm0, %v6334_v5 }
 0x554   : >> { %6521 = vmatprep.mubr.bf16.mxu0 %v8492_v43 }
 0x558   : >> { %v6220_v61 = vpop.xlane.xlu0 %6219 }
 0x559   : >> { %v6238_v12 = vmul.f32 0.015625, %v6220_v61 }
 0x55b   : >> { %v6254_v27 = vadd.f32 1e-06, %v6238_v12 }
 0x55d   : >> { %8220 = vrsqrt.f32 %v6254_v27 }
 0x567   : >> { %v8221_v59 = vpop.eup %8220 }
 0x568   : >> { %v6286_v26 = vmul.f32 %v8221_v59, %v15393_v35  ;;  %v8177_v35 = vld [vmem:[%s16588_s5] sm:$0xff]  }
 0x569   : >> { %8025 = vmatpush3.bf16.msra.mxu0 %v8177_v35  ;;  %8096 = vmatpush3.bf16.msra.mxu1 %v8177_v35 }
 0x56a   : >> { %v6306_v33 = vmul.f32 %v15407_v38, %v6286_v26 }
 0x56c   : >> { %v6326_v43 = vadd.f32 %v15413_v29, %v6306_v33 }
 0x59c   : >> { %v6223_v46 = vpop.xlane.xlu1 %6222 }
 0x59d   : >> { %v6239_v4 = vmul.f32 0.015625, %v6223_v46 }
 0x59f   : >> { %v6255_v24 = vadd.f32 1e-06, %v6239_v4 }
 0x5a1   : >> { %8222 = vrsqrt.f32 %v6255_v24 }
 0x5ab   : >> { %v8223_v37 = vpop.eup %8222 }
 0x5ac   : >> { %v6287_v36 = vmul.f32 %v8223_v37, %v15399_v0  ;;  %v8178_v0 = vld [vmem:[%s16588_s5 + $0x48] sm:$0xff]  }
 0x5ad   : >> { %8026 = vmatprep.subr.bf16.mxu0 %v8178_v0  ;;  %8089 = vmatprep.subr.bf16.mxu1 %v8178_v0 }
 0x5ae   : >> { %v6307_v23 = vmul.f32 %v15407_v38, %v6287_v36  ;;  %v8179_v38 = vld [vmem:[%s16588_s5 + $0x8] sm:$0xff]  }
 0x5af   : >> { %8027 = vmatpush3.bf16.msra.mxu0 %v8179_v38  ;;  %8097 = vmatpush3.bf16.msra.mxu1 %v8179_v38 }
 0x5b0   : >> { %v6327_v7 = vadd.f32 %v15413_v29, %v6307_v23  ;;  %v19186_v29 = vld [vmem:[#allocation11_spill] sm:$0xff]  ;;  %8028 = vmatprep.subr.bf16.mxu0 %v8180_v58  ;;  %8090 = vmatprep.subr.bf16.mxu1 %v8180_v58 }
 0x5b1   : >> { %v15489_v32 = vrot.slane %v19187_v39, %v19186_v29 }
 0x5b2   : >> { %v6335_v25 = vpack.c.bf16 %v6327_v7, %v6326_v43  ;;  %v8181_v43 = vld [vmem:[%s16588_s5 + $0x10] sm:$0xff]  }
 0x5b3   : >> { %8029 = vmatpush3.bf16.msra.mxu0 %v8181_v43  ;;  %8098 = vmatpush3.bf16.msra.mxu1 %v8181_v43 }
 0x5b4   : >> { %7982 = vmatmul.mubr.msk.bf16.gmra.mrb[28].mxu0 %vm273_vm0, %v6335_v25 }
 0x5f6   : >> { %v6453_v62 = vpop.f32.mrb[0].mxu0 }
 0x5f7   : >> { %v6454_v8 = vadd.f32 %v6453_v62, %v15489_v32  ;;  %v6455_v56 = vpop.f32.mrb[1].mxu0 }
 0x5f8   : >> { %v15497_v22 = vadd.f32 %v6455_v56, %v15493_v3  ;;  %v6457_v30 = vpop.f32.mrb[2].mxu0 }
 0x5f9   : >> { %v15499_v14 = vmul.f32 0.70710677, %v6454_v8  ;;  %v15502_v52 = vadd.f32 %v6457_v30, %v15489_v32  ;;  %v6459_v45 = vpop.f32.mrb[3].mxu0  ;;  %v15559_v25 = vmul.f32 0.5, %v6454_v8 }
 0x5fa   : >> { %v15505_v21 = vmul.f32 0.70710677, %v15497_v22  ;;  %v15508_v44 = vadd.f32 %v6459_v45, %v15493_v3  ;;  %v15570_v8 = vmul.f32 0.5, %v15497_v22  ;;  %v8182_v22 = vld [vmem:[%s16588_s5 + $0x58] sm:$0xff]  }
 0x5fb   : >> { %v6596_v60 = vand.u32 2147483647, %v15499_v14  ;;  %v15512_v57 = vmul.f32 0.70710677, %v15502_v52  ;;  %8030 = vmatprep.subr.bf16.mxu0 %v8182_v22  ;;  %8091 = vmatprep.subr.bf16.mxu1 %v8182_v22  ;;  %vm7204_vm8 = vcmp.ge.f32.partialorder %v15499_v14, 0.0 }
 0x5fc   : >> { %v6597_v9 = vand.u32 2147483647, %v15505_v21  ;;  %v15516_v54 = vmul.f32 0.70710677, %v15508_v44  ;;  %vm7205_vm10 = vcmp.ge.f32.partialorder %v15505_v21, 0.0 }
 0x5fd   : >> { %v6628_v31 = vmul.f32 0.3275911, %v6596_v60  ;;  %v6598_v17 = vand.u32 2147483647, %v15512_v57  ;;  %v7012_v18 = vsub.f32 0.0, %v6596_v60  ;;  %vm7206_vm9 = vcmp.ge.f32.partialorder %v15512_v57, 0.0 }
 0x5fe   : >> { %v6629_v2 = vmul.f32 0.3275911, %v6597_v9  ;;  %v6599_v49 = vand.u32 2147483647, %v15516_v54  ;;  %v6463_v13 = vpop.f32.mrb[4].mxu0  ;;  %v7013_v28 = vsub.f32 0.0, %v6597_v9 }
 0x5ff   : >> { %v6660_v34 = vadd.f32 1.0, %v6628_v31  ;;  %v6630_v40 = vmul.f32 0.3275911, %v6598_v17  ;;  %v6465_v10 = vpop.f32.mrb[5].mxu0  ;;  %v15524_v1 = vadd.f32 %v6463_v13, %v15489_v32  ;;  %v7014_v55 = vsub.f32 0.0, %v6598_v17 }
 0x600   : >> { %v6661_v41 = vadd.f32 1.0, %v6629_v2  ;;  %v6631_v50 = vmul.f32 0.3275911, %v6599_v49  ;;  %v6467_v15 = vpop.f32.mrb[6].mxu0  ;;  %v7015_v20 = vsub.f32 0.0, %v6599_v49  ;;  %v7044_v61 = vmul.f32 %v7012_v18, %v6596_v60 }
 0x601   : >> { %8224 = vrcp.f32 %v6660_v34  ;;  %v6662_v42 = vadd.f32 1.0, %v6630_v40  ;;  %v6469_v6 = vpop.f32.mrb[7].mxu0  ;;  %v15527_v47 = vadd.f32 %v6467_v15, %v15489_v32  ;;  %v15530_v63 = vmul.f32 0.70710677, %v15524_v1  ;;  %v8183_v40 = vld [vmem:[%s16588_s5 + $0x18] sm:$0xff]  }
 0x602   : >> { %8226 = vrcp.f32 %v6661_v41  ;;  %v6663_v51 = vadd.f32 1.0, %v6631_v50  ;;  %v7045_v46 = vmul.f32 %v7013_v28, %v6597_v9  ;;  %v7046_v24 = vmul.f32 %v7014_v55, %v6598_v17  ;;  %8031 = vmatpush3.bf16.msra.mxu0 %v8183_v40  ;;  %8099 = vmatpush3.bf16.msra.mxu1 %v8183_v40 }
 0x603   : >> { %8228 = vrcp.f32 %v6662_v42  ;;  %v15533_v53 = vmul.f32 0.70710677, %v15527_v47  ;;  %v15536_v19 = vand.u32 2147483647, %v15530_v63  ;;  %v7047_v59 = vmul.f32 %v7015_v20, %v6599_v49 }
 0x604   : >> { %8230 = vrcp.f32 %v6663_v51  ;;  %v15550_v33 = vadd.f32 %v6465_v10, %v15493_v3  ;;  %v7076_v35 = vmul.f32 1.442695, %v7044_v61  ;;  %v15563_v38 = vmul.f32 1.442695, %v7045_v46  ;;  %v8185_v46 = vld [vmem:[%s16588_s5 + $0x20] sm:$0xff]  }
 0x605   : >> { %v15541_v12 = vand.u32 2147483647, %v15533_v53  ;;  %v6632_v4 = vmul.f32 0.3275911, %v15536_v19  ;;  %v7080_v56 = vmul.f32 1.442695, %v7046_v24 }
 0x606   : >> { %v6473_v11 = vpop.f32.mrb[8].mxu0  ;;  %19188 = vst [vmem:[#allocation45_spill] sm:$0xff] %v15550_v33  ;;  %v15565_v30 = vmul.f32 1.442695, %v7047_v59  ;;  %v15573_v9 = vmul.f32 0.70710677, %v15550_v33 }
 0x607   : >> { %v15538_v5 = vpop.f32.mrb[9].mxu0  ;;  %v6634_v26 = vmul.f32 0.3275911, %v15541_v12  ;;  %v6664_v36 = vadd.f32 1.0, %v6632_v4  ;;  %v15579_v2 = vmul.f32 0.5, %v15502_v52  ;;  %v15594_v52 = vadd.f32 %v6469_v6, %v15493_v3 }
 0x608   : >> { %v15543_v27 = vpop.f32.mrb[10].mxu0  ;;  %19189 = vst [vmem:[#allocation47_spill] sm:$0xff] %v15573_v9  ;;  %v15597_v41 = vadd.f32 %v6473_v11, %v15489_v32  ;;  %v15603_v18 = vmul.f32 0.5, %v15508_v44  ;;  %v15606_v28 = vand.u32 2147483647, %v15573_v9  ;;  %v8184_v44 = vld [vmem:[%s16588_s5 + $0x60] sm:$0xff]  }
 0x609   : >> { %v15552_v23 = vpop.f32.mrb[11].mxu0  ;;  %8232 = vrcp.f32 %v6664_v36  ;;  %v6666_v29 = vadd.f32 1.0, %v6634_v26  ;;  %19190 = vst [vmem:[#allocation60_spill] sm:$0xff] %v15594_v52  ;;  %v7016_v24 = vsub.f32 0.0, %v15536_v19  ;;  %v15624_v59 = vmul.f32 0.70710677, %v15594_v52  ;;  %8032 = vmatprep.subr.bf16.mxu0 %v8184_v44  ;;  %8092 = vmatprep.subr.bf16.mxu1 %v8184_v44 }
 0x60a   : >> { %v15613_v61 = vmul.f32 0.70710677, %v15597_v41  ;;  %v15628_v26 = vadd.f32 %v15538_v5, %v15493_v3  ;;  %8033 = vmatpush3.bf16.msra.mxu0 %v8185_v46  ;;  %8100 = vmatpush3.bf16.msra.mxu1 %v8185_v46  ;;  %v7018_v46 = vsub.f32 0.0, %v15541_v12  ;;  %vm7207_vm11 = vcmp.ge.f32.partialorder %v15516_v54, 0.0 }
 0x60b   : >> { %v15547_v37 = vpop.eup %8224  ;;  %8234 = vrcp.f32 %v6666_v29  ;;  %19191 = vst [vmem:[#allocation24_spill] sm:$0xff] %v15624_v59  ;;  %vm7208_vm12 = vcmp.ge.f32.partialorder %v15530_v63, 0.0  ;;  %vm7210_vm13 = vcmp.ge.f32.partialorder %v15533_v53, 0.0 }
 0x60c   : >> { %v15557_v7 = vpop.eup %8226  ;;  %v6724_v16 = vmul.f32 1.0614054, %v15547_v37  ;;  %8236 = vpow2.f32 %v7076_v35  ;;  %v15632_v35 = vand.u32 2147483647, %v15613_v61  ;;  %vm7212_vm14 = vcmp.ge.f32.partialorder %v15613_v61, 0.0 }
 0x60d   : >> { %v6725_v0 = vmul.f32 1.0614054, %v15557_v7  ;;  %v15567_v45 = vpop.eup %8228  ;;  %8238 = vpow2.f32 %v7080_v56  ;;  %v8186_v56 = vld [vmem:[%s16588_s5 + $0x68] sm:$0xff]  }
 0x60e   : >> { %v6756_v62 = vadd.f32 -1.4531521, %v6724_v16  ;;  %v15575_v31 = vpop.f32.mrb[12].mxu0  ;;  %v6726_v49 = vmul.f32 1.0614054, %v15567_v45  ;;  %v15590_v13 = vpop.eup %8230  ;;  %8034 = vmatprep.subr.bf16.mxu0 %v8186_v56  ;;  %8093 = vmatprep.subr.bf16.mxu1 %v8186_v56 }
 0x60f   : >> { %v6757_v60 = vadd.f32 -1.4531521, %v6725_v0  ;;  %v15582_v34 = vpop.f32.mrb[13].mxu0  ;;  %v6727_v15 = vmul.f32 1.0614054, %v15590_v13 }
 0x610   : >> { %v6788_v17 = vmul.f32 %v15547_v37, %v6756_v62  ;;  %v15599_v50 = vpop.f32.mrb[14].mxu0  ;;  %v6758_v42 = vadd.f32 -1.4531521, %v6726_v49  ;;  %v15637_v62 = vmul.f32 0.3275911, %v15606_v28 }
 0x611   : >> { %v6789_v58 = vmul.f32 %v15557_v7, %v6757_v60  ;;  %v15608_v6 = vpop.f32.mrb[15].mxu0  ;;  %v6759_v11 = vadd.f32 -1.4531521, %v6727_v15  ;;  %v15640_v60 = vmul.f32 0.70710677, %v15628_v26  ;;  %v15821_v54 = vadd.f32 %v15599_v50, %v15489_v32 }
 0x612   : >> { %v6820_v10 = vadd.f32 1.4214138, %v6788_v17  ;;  %v6790_v20 = vmul.f32 %v15567_v45, %v6758_v42 }
 0x613   : >> { %v6821_v51 = vadd.f32 1.4214138, %v6789_v58  ;;  %v6791_v16 = vmul.f32 %v15590_v13, %v6759_v11  ;;  %v15634_v0 = vpop.eup %8232  ;;  %v15651_v58 = vmul.f32 0.5, %v15524_v1  ;;  %v15655_v42 = vand.u32 2147483647, %v15640_v60 }
 0x614   : >> { %v6852_v55 = vmul.f32 %v15547_v37, %v6820_v10  ;;  %v6822_v43 = vadd.f32 1.4214138, %v6790_v20  ;;  %v6728_v22 = vmul.f32 1.0614054, %v15634_v0  ;;  %v6636_v10 = vmul.f32 0.3275911, %v15632_v35 }
 0x615   : >> { %v6853_v4 = vmul.f32 %v15557_v7, %v6821_v51  ;;  %v6823_v49 = vadd.f32 1.4214138, %v6791_v16  ;;  %v15660_v44 = vpop.eup %8234  ;;  %v7048_v1 = vmul.f32 %v7016_v24, %v15536_v19  ;;  %v8187_v19 = vld [vmem:[%s16588_s5 + $0x28] sm:$0xff]   ;;  %v8188_v24 = vld [vmem:[%s16588_s5 + $0x70] sm:$0xff]   ;;  %vm7213_vm15 = vcmp.ge.f32.partialorder %v15640_v60, 0.0 }
 0x616   : >> { %v6884_v36 = vadd.f32 -0.28449672, %v6852_v55  ;;  %v6854_v17 = vmul.f32 %v15567_v45, %v6822_v43  ;;  %v15645_v40 = vpop.f32.mrb[16].mxu0  ;;  %v6760_v11 = vadd.f32 -1.4531521, %v6728_v22  ;;  %v8237_v56 = vpop.eup %8236  ;;  %8035 = vmatpush3.bf16.msra.mxu0 %v8187_v19  ;;  %8101 = vmatpush3.bf16.msra.mxu1 %v8187_v19 }
 0x617   : >> { %v6885_v29 = vadd.f32 -0.28449672, %v6853_v4  ;;  %v15657_v15 = vpop.f32.mrb[17].mxu0  ;;  %v6855_v20 = vmul.f32 %v15590_v13, %v6823_v49  ;;  %v6668_v4 = vadd.f32 1.0, %v6636_v10  ;;  %8036 = vmatprep.subr.bf16.mxu0 %v8188_v24  ;;  %8094 = vmatprep.subr.bf16.mxu1 %v8188_v24 }
 0x618   : >> { %v6916_v5 = vmul.f32 %v15547_v37, %v6884_v36  ;;  %v6886_v55 = vadd.f32 -0.28449672, %v6854_v17  ;;  %v6637_v36 = vmul.f32 0.3275911, %v15655_v42  ;;  %v15666_v43 = vpop.f32.mrb[18].mxu0  ;;  %v6792_v49 = vmul.f32 %v15634_v0, %v6760_v11 }
 0x619   : >> { %v6887_v17 = vadd.f32 -0.28449672, %v6855_v20  ;;  %v15671_v22 = vpop.f32.mrb[19].mxu0  ;;  %v6917_v10 = vmul.f32 %v15557_v7, %v6885_v29  ;;  %8240 = vrcp.f32 %v6668_v4  ;;  %v7017_v29 = vsub.f32 0.0, %v15606_v28 }
 0x61a   : >> { %v6948_v51 = vadd.f32 0.2548296, %v6916_v5  ;;  %v6918_v5 = vmul.f32 %v15567_v45, %v6886_v55  ;;  %8242 = vpow2.f32 %v15563_v38  ;;  %v6824_v11 = vadd.f32 1.4214138, %v6792_v49  ;;  %v8190_v38 = vld [vmem:[%s16588_s5 + $0x78] sm:$0xff]   ;;  %8037 = vmatpush3.bf16.msra.mxu0 %v8189_v48  ;;  %8102 = vmatpush3.bf16.msra.mxu1 %v8189_v48 }
 0x61b   : >> { %8244 = vpow2.f32 %v15565_v30  ;;  %v6919_v19 = vmul.f32 %v15590_v13, %v6887_v17  ;;  %v6665_v17 = vadd.f32 1.0, %v15637_v62  ;;  %8038 = vmatprep.subr.bf16.mxu0 %v8190_v38  ;;  %8095 = vmatprep.subr.bf16.mxu1 %v8190_v38 }
 0x61c   : >> { %v6980_v16 = vmul.f32 %v15547_v37, %v6948_v51  ;;  %v6730_v37 = vmul.f32 1.0614054, %v15660_v44  ;;  %v15682_v51 = vand.u32 2147483647, %v15624_v59  ;;  %v6950_v20 = vadd.f32 0.2548296, %v6918_v5  ;;  %v8239_v59 = vpop.eup %8238 }
 0x61d   : >> { %v6856_v52 = vmul.f32 %v15634_v0, %v6824_v11 }
 0x61e   : >> { %v7140_v55 = vmul.f32 %v8237_v56, %v6980_v16  ;;  %v15685_v39 = vpop.f32.mrb[20].mxu0  ;;  %v6762_v4 = vadd.f32 -1.4531521, %v6730_v37  ;;  %v6669_v16 = vadd.f32 1.0, %v6637_v36  ;;  %v6982_v49 = vmul.f32 %v15567_v45, %v6950_v20  ;;  %v8191_v45 = vld [vmem:[%s16588_s5 + $0x38] sm:$0xff]  }
 0x61f   : >> { %19192 = vst [vmem:[#allocation35_spill] sm:$0xff] %v15685_v39  ;;  %v15693_v56 = vpop.f32.mrb[21].mxu0  ;;  %v6949_v37 = vadd.f32 0.2548296, %v6917_v10  ;;  %v7084_v36 = vmul.f32 1.442695, %v7048_v1  ;;  %v7049_v1 = vmul.f32 %v7017_v29, %v15606_v28  ;;  %v15722_v28 = vadd.f32 %v15543_v27, %v15489_v32  ;;  %8039 = vmatpush3.bf16.msra.mxu0 %v8191_v45  ;;  %8103 = vmatpush3.bf16.msra.mxu1 %v8191_v45 }
 0x620   : >> { %19193 = vst [vmem:[#allocation62_spill] sm:$0xff] %v15693_v56  ;;  %v7172_v5 = vsub.f32 1.0, %v7140_v55  ;;  %v15701_v30 = vpop.f32.mrb[22].mxu0  ;;  %v6794_v9 = vmul.f32 %v15660_v44, %v6762_v4  ;;  %8246 = vrcp.f32 %v6669_v16  ;;  %v7142_v39 = vmul.f32 %v8239_v59, %v6982_v49 }
 0x621   : >> { %v15704_v33 = vpop.f32.mrb[23].mxu0  ;;  %v6888_v24 = vadd.f32 -0.28449672, %v6856_v52  ;;  %v7050_v55 = vmul.f32 %v7018_v46, %v15541_v12  ;;  %v15713_v10 = vmul.f32 0.5, %v15527_v47  ;;  %v6951_v59 = vadd.f32 0.2548296, %v6919_v19 }
 0x622   : >> { %v7236_v56 = vsub.f32 0.0, %v7172_v5  ;;  %v6826_v20 = vadd.f32 1.4214138, %v6794_v9  ;;  %v7174_v12 = vsub.f32 1.0, %v7142_v39  ;;  %v6981_v11 = vmul.f32 %v15557_v7, %v6949_v37 }
 0x623   : >> { %v6920_v46 = vmul.f32 %v15634_v0, %v6888_v24  ;;  %8248 = vpow2.f32 %v7084_v36  ;;  %v7088_v9 = vmul.f32 1.442695, %v7050_v55  ;;  %v6635_v62 = vmul.f32 0.3275911, %v15682_v51  ;;  %v15727_v39 = vpop.eup %8240 }
 0x624   : >> { %v7268_v52 = vsel %vm7204_vm8, %v7172_v5, %v7236_v56  ;;  %v6858_v48 = vmul.f32 %v15660_v44, %v6826_v20  ;;  %v7238_v47 = vsub.f32 0.0, %v7174_v12  ;;  %8250 = vrcp.f32 %v6665_v17  ;;  %v8243_v56 = vpop.eup %8242 }
 0x625   : >> { %v7300_v14 = vadd.f32 1.0, %v7268_v52  ;;  %v7086_v7 = vmul.f32 1.442695, %v7049_v1  ;;  %v6983_v38 = vmul.f32 %v15590_v13, %v6951_v59  ;;  %v6952_v5 = vadd.f32 0.2548296, %v6920_v46  ;;  %v8245_v37 = vpop.eup %8244 }
 0x626   : >> { %v15725_v29 = vpop.f32.mrb[24].mxu0  ;;  %v6890_v4 = vadd.f32 -0.28449672, %v6858_v48  ;;  %v7270_v27 = vsel %vm7206_vm9, %v7174_v12, %v7238_v47  ;;  %v7020_v49 = vsub.f32 0.0, %v15632_v35  ;;  %v7141_v36 = vmul.f32 %v8243_v56, %v6981_v11 }
 0x627   : >> { %v15729_v16 = vpop.f32.mrb[25].mxu0  ;;  %v7302_v24 = vadd.f32 1.0, %v7270_v27  ;;  %v6732_v55 = vmul.f32 1.0614054, %v15727_v39  ;;  %v15739_v45 = vmul.f32 0.70710677, %v15722_v28  ;;  %8252 = vpow2.f32 %v7088_v9 }
 0x628   : >> { %v15735_v19 = vpop.f32.mrb[26].mxu0  ;;  %v6922_v57 = vmul.f32 %v15660_v44, %v6890_v4  ;;  %v6667_v1 = vadd.f32 1.0, %v6635_v62  ;;  %v7019_v13 = vsub.f32 0.0, %v15682_v51  ;;  %v15748_v52 = vmul.f32 %v7300_v14, %v15559_v25 }
 0x629   : >> { %v15741_v17 = vpop.f32.mrb[27].mxu0  ;;  %v15751_v12 = vmul.f32 %v7302_v24, %v15579_v2  ;;  %v6764_v59 = vadd.f32 -1.4531521, %v6732_v55  ;;  %v15755_v46 = vadd.f32 %v15552_v23, %v15493_v3  ;;  %v7143_v11 = vmul.f32 %v8245_v37, %v6983_v38 }
 0x62a   : >> { %v15745_v20 = vpop.eup %8246  ;;  %19194 = vst [vmem:[#allocation140_spill] sm:$0xff] %v15748_v52  ;;  %v6984_v48 = vmul.f32 %v15634_v0, %v6952_v5  ;;  %v15760_v9 = vand.u32 2147483647, %v15739_v45  ;;  %v7173_v62 = vsub.f32 1.0, %v7141_v36  ;;  %v7052_v14 = vmul.f32 %v7020_v49, %v15632_v35 }
 0x62b   : >> { %19195 = vst [vmem:[#allocation72_spill] sm:$0xff] %v15751_v12  ;;  %v6733_v47 = vmul.f32 1.0614054, %v15745_v20  ;;  %v6796_v2 = vmul.f32 %v15727_v39, %v6764_v59  ;;  %8254 = vpow2.f32 %v7086_v7  ;;  %v6954_v23 = vadd.f32 0.2548296, %v6922_v57 }
 0x62c   : >> { %v6638_v0 = vmul.f32 0.3275911, %v15760_v9  ;;  %v7051_v27 = vmul.f32 %v7019_v13, %v15682_v51  ;;  %v7021_v5 = vsub.f32 0.0, %v15655_v42  ;;  %v15772_v37 = vmul.f32 0.70710677, %v15755_v46 }
 0x62d   : >> { %v6765_v4 = vadd.f32 -1.4531521, %v6733_v47  ;;  %v8249_v56 = vpop.eup %8248  ;;  %v6828_v38 = vadd.f32 1.4214138, %v6796_v2  ;;  %v7175_v36 = vsub.f32 1.0, %v7143_v11  ;;  %v15783_v51 = vadd.f32 %v15575_v31, %v15489_v32 }
 0x62e   : >> { %v7144_v24 = vmul.f32 %v8249_v56, %v6984_v48  ;;  %v6670_v7 = vadd.f32 1.0, %v6638_v0  ;;  %v15775_v49 = vpop.eup %8250  ;;  %v7092_v57 = vmul.f32 1.442695, %v7052_v14  ;;  %v15779_v59 = vand.u32 2147483647, %v15772_v37 }
 0x62f   : >> { %v6797_v35 = vmul.f32 %v15745_v20, %v6765_v4  ;;  %19196 = vst [vmem:[#allocation148_spill] sm:$0xff] %v15775_v49  ;;  %v6860_v55 = vmul.f32 %v15727_v39, %v6828_v38  ;;  %v7237_v13 = vsub.f32 0.0, %v7173_v62  ;;  %v6986_v47 = vmul.f32 %v15660_v44, %v6954_v23 }
 0x630   : >> { %8256 = vrcp.f32 %v6670_v7  ;;  %v6639_v2 = vmul.f32 0.3275911, %v15779_v59  ;;  %v7239_v14 = vsub.f32 0.0, %v7175_v36  ;;  %v7176_v0 = vsub.f32 1.0, %v7144_v24 }
 0x631   : >> { %v6829_v11 = vadd.f32 1.4214138, %v6797_v35  ;;  %8258 = vrcp.f32 %v6667_v1  ;;  %v6892_v48 = vadd.f32 -0.28449672, %v6860_v55  ;;  %v8253_v4 = vpop.eup %8252  ;;  %v7053_v38 = vmul.f32 %v7021_v5, %v15655_v42 }
 0x632   : >> { %v7090_v31 = vmul.f32 1.442695, %v7051_v27  ;;  %8260 = vpow2.f32 %v7092_v57  ;;  %v6671_v25 = vadd.f32 1.0, %v6639_v2  ;;  %v15791_v44 = vmul.f32 0.70710677, %v15783_v51 }
 0x633   : >> { %v6861_v56 = vmul.f32 %v15745_v20, %v6829_v11  ;;  %v7269_v23 = vsel %vm7205_vm10, %v7173_v62, %v7237_v13  ;;  %v7146_v1 = vmul.f32 %v8253_v4, %v6986_v47  ;;  %v6924_v35 = vmul.f32 %v15727_v39, %v6892_v48 }
 0x634   : >> { %v15798_v7 = vadd.f32 %v15582_v34, %v15493_v3  ;;  %v15801_v24 = vmul.f32 0.5, %v15597_v41  ;;  %8262 = vrcp.f32 %v6671_v25  ;;  %v15804_v27 = vand.u32 2147483647, %v15791_v44 }
 0x635   : >> { %v6893_v42 = vadd.f32 -0.28449672, %v6861_v56  ;;  %v15806_v5 = vpop.eup %8254  ;;  %v7271_v21 = vsel %vm7207_vm11, %v7175_v36, %v7239_v14  ;;  %v7240_v62 = vsub.f32 0.0, %v7176_v0  ;;  %v7094_v55 = vmul.f32 1.442695, %v7053_v38 }
 0x636   : >> { %19197 = vst [vmem:[#allocation76_spill] sm:$0xff] %v15806_v5  ;;  %v7022_v57 = vsub.f32 0.0, %v15760_v9  ;;  %v7301_v13 = vadd.f32 1.0, %v7269_v23  ;;  %8264 = vpow2.f32 %v7090_v31  ;;  %v6640_v34 = vmul.f32 0.3275911, %v15804_v27 }
 0x637   : >> { %v15814_v41 = vmul.f32 0.70710677, %v15798_v7  ;;  %v7178_v25 = vsub.f32 1.0, %v7146_v1  ;;  %v6956_v47 = vadd.f32 0.2548296, %v6924_v35  ;;  %v15817_v11 = vmul.f32 0.5, %v15628_v26 }
 0x638   : >> { %v7303_v36 = vadd.f32 1.0, %v7271_v21  ;;  %v6925_v48 = vmul.f32 %v15745_v20, %v6893_v42  ;;  %v6672_v2 = vadd.f32 1.0, %v6640_v34  ;;  %v7272_v56 = vsel %vm7208_vm12, %v7176_v0, %v7240_v62 }
 0x639   : >> { %v15825_v4 = vand.u32 2147483647, %v15814_v41  ;;  %8266 = vpow2.f32 %v7094_v55  ;;  %v7054_v26 = vmul.f32 %v7022_v57, %v15760_v9  ;;  %v15833_v38 = vmul.f32 0.70710677, %v15821_v54 }
 0x63a   : >> { %v15827_v14 = vpop.eup %8256  ;;  %v15838_v31 = vmul.f32 %v7301_v13, %v15570_v8  ;;  %v15841_v23 = vmul.f32 0.5, %v15722_v28  ;;  %8268 = vrcp.f32 %v6672_v2  ;;  %v7242_v35 = vsub.f32 0.0, %v7178_v25 }
 0x63b   : >> { %v15835_v50 = vpop.eup %8258  ;;  %v6734_v1 = vmul.f32 1.0614054, %v15827_v14  ;;  %v6988_v63 = vmul.f32 %v15727_v39, %v6956_v47  ;;  %v6641_v0 = vmul.f32 0.3275911, %v15825_v4  ;;  %v15847_v9 = vand.u32 2147483647, %v15833_v38 }
 0x63c   : >> { %19198 = vst [vmem:[#allocation77_spill] sm:$0xff] %v15835_v50  ;;  %v8261_v42 = vpop.eup %8260  ;;  %v15850_v21 = vmul.f32 %v7303_v36, %v15603_v18  ;;  %v7304_v8 = vadd.f32 1.0, %v7272_v56  ;;  %v6957_v62 = vadd.f32 0.2548296, %v6925_v48  ;;  %v7096_v28 = vmul.f32 1.442695, %v7054_v26 }
 0x63d   : >> { %v6766_v55 = vadd.f32 -1.4531521, %v6734_v1  ;;  %v6673_v57 = vadd.f32 1.0, %v6641_v0  ;;  %v6642_v13 = vmul.f32 0.3275911, %v15847_v9  ;;  %v15855_v34 = vadd.f32 %v15608_v6, %v15493_v3 }
 0x63e   : >> { %19199 = vst [vmem:[#allocation79_spill] sm:$0xff] %v15850_v21  ;;  %v15857_v39 = vpop.eup %8262  ;;  %v15861_v2 = vmul.f32 0.5, %v15755_v46  ;;  %v7023_v18 = vsub.f32 0.0, %v15779_v59  ;;  %v7024_v36 = vsub.f32 0.0, %v15804_v27  ;;  %v7274_v48 = vsel %vm7210_vm13, %v7178_v25, %v7242_v35 }
 0x63f   : >> { %v6798_v47 = vmul.f32 %v15827_v14, %v6766_v55  ;;  %v7148_v56 = vmul.f32 %v8261_v42, %v6988_v63  ;;  %v6735_v26 = vmul.f32 1.0614054, %v15857_v39  ;;  %8270 = vrcp.f32 %v6673_v57 }
 0x640   : >> { %v15868_v6 = vpop.eup %8264  ;;  %v15871_v1 = vmul.f32 %v7304_v8, %v15651_v58  ;;  %v6989_v0 = vmul.f32 %v15745_v20, %v6957_v62  ;;  %v6674_v55 = vadd.f32 1.0, %v6642_v13  ;;  %8272 = vpow2.f32 %v7096_v28 }
 0x641   : >> { %19200 = vst [vmem:[#allocation80_spill] sm:$0xff] %v15868_v6  ;;  %v6830_v46 = vadd.f32 1.4214138, %v6798_v47  ;;  %v6767_v5 = vadd.f32 -1.4531521, %v6735_v26  ;;  %v15875_v50 = vmul.f32 0.5, %v15783_v51  ;;  %v7055_v63 = vmul.f32 %v7023_v18, %v15779_v59 }
 0x642   : >> { %19201 = vst [vmem:[#allocation54_spill] sm:$0xff] %v15871_v1  ;;  %v15878_v53 = vmul.f32 0.70710677, %v15855_v34  ;;  %v7306_v25 = vadd.f32 1.0, %v7274_v48  ;;  %v7056_v58 = vmul.f32 %v7024_v36, %v15804_v27  ;;  %v7180_v8 = vsub.f32 1.0, %v7148_v56 }
 0x643   : >> { %v6862_v35 = vmul.f32 %v15827_v14, %v6830_v46  ;;  %v8267_v42 = vpop.eup %8266  ;;  %v6799_v20 = vmul.f32 %v15857_v39, %v6767_v5  ;;  %8274 = vrcp.f32 %v6674_v55  ;;  %v7025_v13 = vsub.f32 0.0, %v15825_v4 }
 0x644   : >> { %v15886_v51 = vand.u32 2147483647, %v15878_v53  ;;  %v15888_v62 = vpop.eup %8268  ;;  %v7149_v28 = vmul.f32 %v8267_v42, %v6989_v0  ;;  %v15893_v59 = vadd.f32 %v15645_v40, %v15489_v32  ;;  %v15899_v5 = vadd.f32 %v15657_v15, %v15493_v3 }
 0x645   : >> { %v6894_v57 = vadd.f32 -0.28449672, %v6862_v35  ;;  %v6831_v27 = vadd.f32 1.4214138, %v6799_v20  ;;  %v6736_v47 = vmul.f32 1.0614054, %v15888_v62  ;;  %v15902_v36 = vmul.f32 %v7306_v25, %v15713_v10 }
 0x646   : >> { %v6643_v18 = vmul.f32 0.3275911, %v15886_v51  ;;  %v7098_v48 = vmul.f32 1.442695, %v7055_v63  ;;  %v15905_v56 = vmul.f32 0.5, %v15798_v7  ;;  %v7244_v35 = vsub.f32 0.0, %v7180_v8 }
 0x647   : >> { %19202 = vst [vmem:[#allocation64_spill] sm:$0xff] %v15902_v36  ;;  %v15908_v26 = vmul.f32 0.70710677, %v15893_v59  ;;  %v6863_v40 = vmul.f32 %v15857_v39, %v6831_v27  ;;  %v6768_v0 = vadd.f32 -1.4531521, %v6736_v47  ;;  %v7181_v42 = vsub.f32 1.0, %v7149_v28 }
 0x648   : >> { %v7100_v46 = vmul.f32 1.442695, %v7056_v58  ;;  %v6675_v55 = vadd.f32 1.0, %v6643_v18  ;;  %v7057_v15 = vmul.f32 %v7025_v13, %v15825_v4  ;;  %v6926_v7 = vmul.f32 %v15827_v14, %v6894_v57 }
 0x649   : >> { %v15914_v10 = vand.u32 2147483647, %v15908_v26  ;;  %v15916_v25 = vpop.eup %8270  ;;  %v6800_v63 = vmul.f32 %v15888_v62, %v6768_v0  ;;  %v15921_v20 = vmul.f32 0.70710677, %v15899_v5  ;;  %v6895_v58 = vadd.f32 -0.28449672, %v6863_v40 }
 0x64a   : >> { %8276 = vrcp.f32 %v6675_v55  ;;  %v6737_v28 = vmul.f32 1.0614054, %v15916_v25  ;;  %v8273_v4 = vpop.eup %8272  ;;  %v15926_v47 = vmul.f32 0.5, %v15821_v54  ;;  %v7026_v18 = vsub.f32 0.0, %v15847_v9 }
 0x64b   : >> { %8278 = vpow2.f32 %v7098_v48  ;;  %v6644_v27 = vmul.f32 0.3275911, %v15914_v10  ;;  %v6832_v13 = vadd.f32 1.4214138, %v6800_v63  ;;  %v15930_v57 = vand.u32 2147483647, %v15921_v20 }
 0x64c   : >> { %v7276_v0 = vsel %vm7212_vm14, %v7180_v8, %v7244_v35  ;;  %v7245_v55 = vsub.f32 0.0, %v7181_v42  ;;  %v6769_v40 = vadd.f32 -1.4531521, %v6737_v28  ;;  %v6958_v36 = vadd.f32 0.2548296, %v6926_v7 }
 0x64d   : >> { %v6676_v48 = vadd.f32 1.0, %v6644_v27  ;;  %v15934_v6 = vpop.eup %8274  ;;  %v6864_v1 = vmul.f32 %v15888_v62, %v6832_v13  ;;  %v7102_v63 = vmul.f32 1.442695, %v7057_v15  ;;  %v6645_v54 = vmul.f32 0.3275911, %v15930_v57 }
 0x64e   : >> { %v6927_v49 = vmul.f32 %v15857_v39, %v6895_v58  ;;  %v6801_v52 = vmul.f32 %v15916_v25, %v6769_v40  ;;  %v6738_v12 = vmul.f32 1.0614054, %v15934_v6  ;;  %v7058_v8 = vmul.f32 %v7026_v18, %v15847_v9 }
 0x64f   : >> { %8280 = vrcp.f32 %v6676_v48  ;;  %v6896_v61 = vadd.f32 -0.28449672, %v6864_v1  ;;  %v7027_v35 = vsub.f32 0.0, %v15886_v51  ;;  %v6677_v28 = vadd.f32 1.0, %v6645_v54 }
 0x650   : >> { %v7308_v27 = vadd.f32 1.0, %v7276_v0  ;;  %8282 = vpow2.f32 %v7100_v46  ;;  %v6833_v7 = vadd.f32 1.4214138, %v6801_v52  ;;  %v6770_v13 = vadd.f32 -1.4531521, %v6738_v12 }
 0x651   : >> { %v7277_v15 = vsel %vm7213_vm15, %v7181_v42, %v7245_v55  ;;  %v6990_v58 = vmul.f32 %v15827_v14, %v6958_v36  ;;  %v6928_v40 = vmul.f32 %v15888_v62, %v6896_v61  ;;  %8284 = vpow2.f32 %v7102_v63 }
 0x652   : >> { %v6959_v21 = vadd.f32 0.2548296, %v6927_v49  ;;  %v6865_v1 = vmul.f32 %v15916_v25, %v6833_v7  ;;  %v6802_v9 = vmul.f32 %v15934_v6, %v6770_v13  ;;  %8286 = vrcp.f32 %v6677_v28 }
 0x653   : >> { %v6960_v0 = vadd.f32 0.2548296, %v6928_v40  ;;  %v7104_v46 = vmul.f32 1.442695, %v7058_v8  ;;  %v7059_v52 = vmul.f32 %v7027_v35, %v15886_v51  ;;  %v7028_v60 = vsub.f32 0.0, %v15914_v10 }
 0x654   : >> { %v15949_v18 = vpop.eup %8276  ;;  %v6897_v42 = vadd.f32 -0.28449672, %v6865_v1  ;;  %v6834_v14 = vadd.f32 1.4214138, %v6802_v9  ;;  %v15956_v49 = vadd.f32 %v15666_v43, %v15489_v32  ;;  %v15959_v55 = vmul.f32 %v7308_v27, %v15801_v24 }
 0x655   : >> { %v8279_v12 = vpop.eup %8278  ;;  %v6739_v36 = vmul.f32 1.0614054, %v15949_v18  ;;  %v7309_v48 = vadd.f32 1.0, %v7277_v15  ;;  %v7150_v63 = vmul.f32 %v8273_v4, %v6990_v58  ;;  %v15962_v54 = vmul.f32 0.5, %v15855_v34 }
 0x656   : >> { %v6991_v51 = vmul.f32 %v15857_v39, %v6959_v21  ;;  %v6929_v61 = vmul.f32 %v15916_v25, %v6897_v42  ;;  %v6866_v8 = vmul.f32 %v15934_v6, %v6834_v14  ;;  %8288 = vpow2.f32 %v7104_v46 }
 0x657   : >> { %v6771_v35 = vadd.f32 -1.4531521, %v6739_v36  ;;  %v7106_v28 = vmul.f32 1.442695, %v7059_v52  ;;  %v7060_v43 = vmul.f32 %v7028_v60, %v15914_v10  ;;  %v15969_v7 = vmul.f32 0.70710677, %v15956_v49 }
 0x658   : >> { %vm7214_vm1 = vcmp.ge.f32.partialorder %v15739_v45, 0.0  ;;  %v6992_v34 = vmul.f32 %v15888_v62, %v6960_v0  ;;  %v6961_v4 = vadd.f32 0.2548296, %v6929_v61  ;;  %v6898_v21 = vadd.f32 -0.28449672, %v6866_v8 }
 0x659   : >> { %v15971_v24 = vpop.eup %8280  ;;  %v6803_v39 = vmul.f32 %v15949_v18, %v6771_v35  ;;  %v15977_v27 = vmul.f32 %v7309_v48, %v15817_v11  ;;  %v7182_v13 = vsub.f32 1.0, %v7150_v63  ;;  %v6614_v10 = vand.u32 2147483647, %v15969_v7 }
 0x65a   : >> { %v6740_v15 = vmul.f32 1.0614054, %v15971_v24  ;;  %v8283_v58 = vpop.eup %8282  ;;  %v7151_v40 = vmul.f32 %v8279_v12, %v6991_v51  ;;  %v6993_v1 = vmul.f32 %v15916_v25, %v6961_v4  ;;  %v6930_v9 = vmul.f32 %v15934_v6, %v6898_v21 }
 0x65b   : >> { %v6835_v46 = vadd.f32 1.4214138, %v6803_v39  ;;  %v8285_v62 = vpop.eup %8284  ;;  %8290 = vpow2.f32 %v7106_v28  ;;  %v7108_v52 = vmul.f32 1.442695, %v7060_v43  ;;  %v6646_v60 = vmul.f32 0.3275911, %v6614_v10 }
 0x65c   : >> { %v6772_v0 = vadd.f32 -1.4531521, %v6740_v15  ;;  %v15983_v42 = vpop.eup %8286  ;;  %v7152_v11 = vmul.f32 %v8283_v58, %v6992_v34  ;;  %v6962_v14 = vadd.f32 0.2548296, %v6930_v9  ;;  %v7029_v48 = vsub.f32 0.0, %v15930_v57 }
 0x65d   : >> { %v6867_v36 = vmul.f32 %v15949_v18, %v6835_v46  ;;  %v7246_v63 = vsub.f32 0.0, %v7182_v13  ;;  %vm7215_vm2 = vcmp.ge.f32.partialorder %v15772_v37, 0.0  ;;  %v6741_v12 = vmul.f32 1.0614054, %v15983_v42 }
 0x65e   : >> { %v6804_v25 = vmul.f32 %v15971_v24, %v6772_v0  ;;  %v6678_v51 = vadd.f32 1.0, %v6646_v60  ;;  %v7183_v61 = vsub.f32 1.0, %v7151_v40  ;;  %v7153_v8 = vmul.f32 %v8285_v62, %v6993_v1 }
 0x65f   : >> { %v6899_v35 = vadd.f32 -0.28449672, %v6867_v36  ;;  %v15992_v28 = vadd.f32 %v15671_v22, %v15493_v3  ;;  %v6994_v43 = vmul.f32 %v15934_v6, %v6962_v14  ;;  %v6773_v4 = vadd.f32 -1.4531521, %v6741_v12  ;;  %v19203_v12 = vld [vmem:[#allocation35_spill] sm:$0xff] }
 0x660   : >> { %v6836_v34 = vadd.f32 1.4214138, %v6804_v25  ;;  %8292 = vrcp.f32 %v6678_v51  ;;  %v7184_v21 = vsub.f32 1.0, %v7152_v11  ;;  %vm7216_vm3 = vcmp.ge.f32.partialorder %v15791_v44, 0.0  ;;  %v8289_v40 = vpop.eup %8288 }
 0x661   : >> { %v6931_v39 = vmul.f32 %v15949_v18, %v6899_v35  ;;  %v15998_v15 = vmul.f32 0.5, %v15893_v59  ;;  %v7061_v58 = vmul.f32 %v7029_v48, %v15930_v57  ;;  %v7278_v22 = vsel %vm7214_vm1, %v7182_v13, %v7246_v63 }
 0x662   : >> { %v6868_v1 = vmul.f32 %v15971_v24, %v6836_v34  ;;  %8294 = vpow2.f32 %v7108_v52  ;;  %v6805_v6 = vmul.f32 %v15983_v42, %v6773_v4  ;;  %v7247_v9 = vsub.f32 0.0, %v7183_v61 }
 0x663   : >> { %vm7217_vm4 = vcmp.ge.f32.partialorder %v15814_v41, 0.0  ;;  %v6963_v46 = vadd.f32 0.2548296, %v6931_v39  ;;  %v7030_v62 = vsub.f32 0.0, %v6614_v10  ;;  %v16007_v0 = vmul.f32 0.70710677, %v15992_v28 }
 0x664   : >> { %v7185_v59 = vsub.f32 1.0, %v7153_v8  ;;  %v7154_v60 = vmul.f32 %v8289_v40, %v6994_v43  ;;  %v6900_v57 = vadd.f32 -0.28449672, %v6868_v1  ;;  %v6837_v11 = vadd.f32 1.4214138, %v6805_v6 }
 0x665   : >> { %v7310_v14 = vadd.f32 1.0, %v7278_v22  ;;  %v7248_v45 = vsub.f32 0.0, %v7184_v21  ;;  %v7110_v13 = vmul.f32 1.442695, %v7061_v58  ;;  %v6615_v36 = vand.u32 2147483647, %v16007_v0  ;;  %v8291_v52 = vpop.eup %8290 }
 0x666   : >> { %v6995_v48 = vmul.f32 %v15949_v18, %v6963_v46  ;;  %v6932_v63 = vmul.f32 %v15971_v24, %v6900_v57  ;;  %v6869_v25 = vmul.f32 %v15983_v42, %v6837_v11  ;;  %v6504_v51 = vadd.f32 %v19203_v12, %v15489_v32 }
 0x667   : >> { %v7279_v8 = vsel %vm7215_vm2, %v7183_v61, %v7247_v9  ;;  %vm7218_vm5 = vcmp.ge.f32.partialorder %v15833_v38, 0.0  ;;  %v16019_v35 = vmul.f32 0.5, %v15899_v5  ;;  %v7062_v43 = vmul.f32 %v7030_v62, %v6614_v10 }
 0x668   : >> { %v6647_v34 = vmul.f32 0.3275911, %v6615_v36  ;;  %v7249_v4 = vsub.f32 0.0, %v7185_v59  ;;  %v7186_v39 = vsub.f32 1.0, %v7154_v60  ;;  %v6964_v18 = vadd.f32 0.2548296, %v6932_v63 }
 0x669   : >> { %v6901_v58 = vadd.f32 -0.28449672, %v6869_v25  ;;  %v16022_v40 = vmul.f32 %v7310_v14, %v15841_v23  ;;  %8296 = vpow2.f32 %v7110_v13  ;;  %v16024_v1 = vmul.f32 0.70710677, %v6504_v51  ;;  %v19204_v23 = vld [vmem:[#allocation62_spill] sm:$0xff] }
 0x66a   : >> { %v6679_v22 = vadd.f32 1.0, %v6647_v34  ;;  %v16026_v37 = vpop.eup %8292  ;;  %v7311_v61 = vadd.f32 1.0, %v7279_v8  ;;  %v7280_v5 = vsel %vm7216_vm3, %v7184_v21, %v7248_v45  ;;  %v7155_v6 = vmul.f32 %v8291_v52, %v6995_v48 }
 0x66b   : >> { %v6933_v10 = vmul.f32 %v15983_v42, %v6901_v58  ;;  %v6996_v9 = vmul.f32 %v15971_v24, %v6964_v18  ;;  %v6742_v46 = vmul.f32 1.0614054, %v16026_v37  ;;  %v16035_v62 = vadd.f32 %v19204_v23, %v15493_v3 }
 0x66c   : >> { %8298 = vrcp.f32 %v6679_v22  ;;  %v8295_v60 = vpop.eup %8294  ;;  %v7281_v57 = vsel %vm7217_vm4, %v7185_v59, %v7249_v4  ;;  %v7250_v11 = vsub.f32 0.0, %v7186_v39  ;;  %v7112_v14 = vmul.f32 1.442695, %v7062_v43 }
 0x66d   : >> { %v6616_v44 = vand.u32 2147483647, %v16024_v1  ;;  %vm7219_vm6 = vcmp.ge.f32.partialorder %v15878_v53, 0.0  ;;  %v6965_v21 = vadd.f32 0.2548296, %v6933_v10  ;;  %v16042_v24 = vmul.f32 0.5, %v15956_v49 }
 0x66e   : >> { %v6774_v45 = vadd.f32 -1.4531521, %v6742_v46  ;;  %v7031_v13 = vsub.f32 0.0, %v6615_v36  ;;  %v16045_v52 = vmul.f32 %v7311_v61, %v15861_v2  ;;  %v7312_v48 = vadd.f32 1.0, %v7280_v5 }
 0x66f   : >> { %v7187_v63 = vsub.f32 1.0, %v7155_v6  ;;  %v6648_v25 = vmul.f32 0.3275911, %v6616_v44  ;;  %v7313_v41 = vadd.f32 1.0, %v7281_v57  ;;  %v7156_v59 = vmul.f32 %v8295_v60, %v6996_v9 }
 0x670   : >> { %v6806_v12 = vmul.f32 %v16026_v37, %v6774_v45  ;;  %v16049_v8 = vmul.f32 0.70710677, %v16035_v62  ;;  %v7282_v43 = vsel %vm7218_vm5, %v7186_v39, %v7250_v11  ;;  %8300 = vpow2.f32 %v7112_v14 }
 0x671   : >> { %v6680_v49 = vadd.f32 1.0, %v6648_v25  ;;  %v6508_v34 = vadd.f32 %v15701_v30, %v15489_v32  ;;  %v6997_v2 = vmul.f32 %v15983_v42, %v6965_v21  ;;  %v7063_v18 = vmul.f32 %v7031_v13, %v6615_v36 }
 0x672   : >> { %v6838_v4 = vadd.f32 1.4214138, %v6806_v12  ;;  %v6617_v58 = vand.u32 2147483647, %v16049_v8  ;;  %v16058_v22 = vmul.f32 %v7312_v48, %v15875_v50  ;;  %v7251_v61 = vsub.f32 0.0, %v7187_v63 }
 0x673   : >> { %vm7220_vm7 = vcmp.ge.f32.partialorder %v15908_v26, 0.0  ;;  %v16062_v38 = vmul.f32 0.5, %v15992_v28  ;;  %8302 = vrcp.f32 %v6680_v49  ;;  %v8297_v39 = vpop.eup %8296  ;;  %v7314_v5 = vadd.f32 1.0, %v7282_v43 }
 0x674   : >> { %v7188_v6 = vsub.f32 1.0, %v7156_v59  ;;  %v6870_v30 = vmul.f32 %v16026_v37, %v6838_v4  ;;  %v6649_v42 = vmul.f32 0.3275911, %v6617_v58  ;;  %v16066_v36 = vmul.f32 %v7313_v41, %v15905_v56 }
 0x675   : >> { %v16068_v10 = vmul.f32 0.5, %v6504_v51  ;;  %v7032_v50 = vsub.f32 0.0, %v6616_v44  ;;  %v16070_v9 = vmul.f32 0.70710677, %v6508_v34  ;;  %v7157_v23 = vmul.f32 %v8297_v39, %v6997_v2 }
 0x676   : >> { %v16072_v46 = vpop.eup %8298  ;;  %v6902_v28 = vadd.f32 -0.28449672, %v6870_v30  ;;  %v7114_v60 = vmul.f32 1.442695, %v7063_v18  ;;  %v6681_v57 = vadd.f32 1.0, %v6649_v42  ;;  %v7283_v11 = vsel %vm7219_vm6, %v7187_v63, %v7251_v61 }
 0x677   : >> { %v6743_v14 = vmul.f32 1.0614054, %v16072_v46  ;;  %v6618_v21 = vand.u32 2147483647, %v16070_v9  ;;  %v16080_v56 = vadd.f32 %v15704_v33, %v15493_v3  ;;  %v16083_v51 = vmul.f32 %v7314_v5, %v15926_v47 }
 0x678   : >> { %v7252_v45 = vsub.f32 0.0, %v7188_v6  ;;  %v6934_v13 = vmul.f32 %v16026_v37, %v6902_v28  ;;  %8304 = vrcp.f32 %v6681_v57  ;;  %vm7221_vm8 = vcmp.ge.f32.partialorder %v15921_v20, 0.0 }
 0x679   : >> { %v6775_v48 = vadd.f32 -1.4531521, %v6743_v14  ;;  %v7064_v53 = vmul.f32 %v7032_v50, %v6616_v44  ;;  %v6650_v63 = vmul.f32 0.3275911, %v6618_v21  ;;  %v16089_v25 = vadd.f32 %v15725_v29, %v15489_v32 }
 0x67a   : >> { %v7315_v41 = vadd.f32 1.0, %v7283_v11  ;;  %v7189_v59 = vsub.f32 1.0, %v7157_v23  ;;  %v6966_v33 = vadd.f32 0.2548296, %v6934_v13  ;;  %8306 = vpow2.f32 %v7114_v60  ;;  %v8301_v12 = vpop.eup %8300 }
 0x67b   : >> { %v6807_v47 = vmul.f32 %v16072_v46, %v6775_v48  ;;  %v16093_v43 = vmul.f32 0.5, %v16035_v62  ;;  %v6682_v49 = vadd.f32 1.0, %v6650_v63  ;;  %v16096_v2 = vmul.f32 0.70710677, %v16080_v56 }
 0x67c   : >> { %v7284_v44 = vsel %vm7220_vm7, %v7188_v6, %v7252_v45  ;;  %v6998_v29 = vmul.f32 %v16026_v37, %v6966_v33  ;;  %v7033_v4 = vsub.f32 0.0, %v6617_v58  ;;  %v16102_v18 = vmul.f32 0.70710677, %v16089_v25 }
 0x67d   : >> { %v16104_v61 = vpop.eup %8302  ;;  %v6839_v39 = vadd.f32 1.4214138, %v6807_v47  ;;  %v7116_v5 = vmul.f32 1.442695, %v7064_v53  ;;  %8308 = vrcp.f32 %v6682_v49  ;;  %v6619_v62 = vand.u32 2147483647, %v16096_v2 }
 0x67e   : >> { %v16108_v30 = vmul.f32 %v7315_v41, %v15962_v54  ;;  %v7253_v42 = vsub.f32 0.0, %v7189_v59  ;;  %v6744_v26 = vmul.f32 1.0614054, %v16104_v61  ;;  %v6620_v6 = vand.u32 2147483647, %v16102_v18 }
 0x67f   : >> { %v7158_v37 = vmul.f32 %v8301_v12, %v6998_v29  ;;  %v6871_v50 = vmul.f32 %v16072_v46, %v6839_v39  ;;  %v16113_v23 = vmul.f32 0.5, %v6508_v34  ;;  %v6651_v28 = vmul.f32 0.3275911, %v6619_v62 }
 0x680   : >> { %v7316_v60 = vadd.f32 1.0, %v7284_v44  ;;  %v6776_v57 = vadd.f32 -1.4531521, %v6744_v26  ;;  %v7065_v11 = vmul.f32 %v7033_v4, %v6617_v58  ;;  %v6652_v14 = vmul.f32 0.3275911, %v6620_v6 }
 0x681   : >> { %v6903_v45 = vadd.f32 -0.28449672, %v6871_v50  ;;  %8310 = vpow2.f32 %v7116_v5  ;;  %v7034_v13 = vsub.f32 0.0, %v6618_v21  ;;  %v6683_v54 = vadd.f32 1.0, %v6651_v28 }
 0x682   : >> { %v16115_v48 = vpop.eup %8304  ;;  %v7285_v53 = vsel %vm7221_vm8, %v7189_v59, %v7253_v42  ;;  %vm7222_vm9 = vcmp.ge.f32.partialorder %v15969_v7, 0.0  ;;  %v6808_v63 = vmul.f32 %v16104_v61, %v6776_v57  ;;  %v6684_v34 = vadd.f32 1.0, %v6652_v14 }
 0x683   : >> { %v16123_v41 = vadd.f32 %v15729_v16, %v15493_v3  ;;  %v7190_v58 = vsub.f32 1.0, %v7158_v37  ;;  %v6935_v33 = vmul.f32 %v16072_v46, %v6903_v45  ;;  %v6745_v12 = vmul.f32 1.0614054, %v16115_v48 }
 0x684   : >> { %8312 = vrcp.f32 %v6683_v54  ;;  %v8307_v47 = vpop.eup %8306  ;;  %v16128_v49 = vmul.f32 %v7316_v60, %v15998_v15  ;;  %v6840_v20 = vadd.f32 1.4214138, %v6808_v63  ;;  %v7118_v59 = vmul.f32 1.442695, %v7065_v11 }
 0x685   : >> { %8314 = vrcp.f32 %v6684_v34  ;;  %v6967_v44 = vadd.f32 0.2548296, %v6935_v33  ;;  %v6777_v29 = vadd.f32 -1.4531521, %v6745_v12  ;;  %v7066_v4 = vmul.f32 %v7034_v13, %v6618_v21 }
 0x686   : >> { %19205 = vst [vmem:[#allocation94_spill] sm:$0xff] %v16128_v49  ;;  %v7035_v39 = vsub.f32 0.0, %v6619_v62  ;;  %v7317_v5 = vadd.f32 1.0, %v7285_v53  ;;  %v6872_v16 = vmul.f32 %v16104_v61, %v6840_v20  ;;  %v16132_v42 = vmul.f32 0.5, %v16080_v56 }
 0x687   : >> { %v16135_v26 = vmul.f32 0.70710677, %v16123_v41  ;;  %v16137_v37 = vpop.f32.mrb[28].mxu0  ;;  %v16139_v15 = vpop.eup %8308  ;;  %v7254_v50 = vsub.f32 0.0, %v7190_v58  ;;  %v6809_v28 = vmul.f32 %v16115_v48, %v6777_v29  ;;  %v7036_v60 = vsub.f32 0.0, %v6620_v6 }
 0x688   : >> { %v16144_v21 = vadd.f32 %v15735_v19, %v15489_v32  ;;  %v16146_v57 = vpop.f32.mrb[29].mxu0  ;;  %v6999_v56 = vmul.f32 %v16072_v46, %v6967_v44  ;;  %v6904_v11 = vadd.f32 -0.28449672, %v6872_v16  ;;  %v6746_v14 = vmul.f32 1.0614054, %v16139_v15 }
 0x689   : >> { %v16151_v45 = vand.u32 2147483647, %v16135_v26  ;;  %v6841_v13 = vadd.f32 1.4214138, %v6809_v28  ;;  %8316 = vpow2.f32 %v7118_v59  ;;  %v7120_v54 = vmul.f32 1.442695, %v7066_v4 }
 0x68a   : >> { %v7067_v53 = vmul.f32 %v7035_v39, %v6619_v62  ;;  %v16153_v63 = vpop.f32.mrb[30].mxu0  ;;  %v6936_v34 = vmul.f32 %v16104_v61, %v6904_v11  ;;  %v6778_v19 = vadd.f32 -1.4531521, %v6746_v14  ;;  %v16157_v33 = vmul.f32 0.5, %v16089_v25 }
 0x68b   : >> { %v6653_v46 = vmul.f32 0.3275911, %v16151_v45  ;;  %v16160_v12 = vpop.f32.mrb[31].mxu0  ;;  %v8311_v20 = vpop.eup %8310  ;;  %v7286_v44 = vsel %vm7222_vm9, %v7190_v58, %v7254_v50  ;;  %v6873_v59 = vmul.f32 %v16115_v48, %v6841_v13  ;;  %v7068_v29 = vmul.f32 %v7036_v60, %v6620_v6 }
 0x68c   : >> { %v16166_v62 = vmul.f32 0.70710677, %v16144_v21  ;;  %v7159_v4 = vmul.f32 %v8307_v47, %v6999_v56  ;;  %v6968_v39 = vadd.f32 0.2548296, %v6936_v34  ;;  %v6810_v16 = vmul.f32 %v16139_v15, %v6778_v19 }
 0x68d   : >> { %v6685_v25 = vadd.f32 1.0, %v6653_v46  ;;  %v6905_v11 = vadd.f32 -0.28449672, %v6873_v59  ;;  %8318 = vpow2.f32 %v7120_v54  ;;  %v7122_v14 = vmul.f32 1.442695, %v7067_v53 }
 0x68e   : >> { %v16169_v28 = vpop.eup %8312  ;;  %v16172_v49 = vand.u32 2147483647, %v16166_v62  ;;  %v7000_v6 = vmul.f32 %v16104_v61, %v6968_v39  ;;  %v6842_v58 = vadd.f32 1.4214138, %v6810_v16  ;;  %v7318_v47 = vadd.f32 1.0, %v7286_v44 }
 0x68f   : >> { %v16174_v7 = vpop.eup %8314  ;;  %v6747_v50 = vmul.f32 1.0614054, %v16169_v28  ;;  %8320 = vrcp.f32 %v6685_v25  ;;  %v6937_v60 = vmul.f32 %v16115_v48, %v6905_v11  ;;  %v7124_v13 = vmul.f32 1.442695, %v7068_v29 }
 0x690   : >> { %v6748_v56 = vmul.f32 1.0614054, %v16174_v7  ;;  %v7191_v34 = vsub.f32 1.0, %v7159_v4  ;;  %vm7223_vm10 = vcmp.ge.f32.partialorder %v16007_v0, 0.0  ;;  %v7160_v54 = vmul.f32 %v8311_v20, %v7000_v6 }
 0x691   : >> { %v6874_v53 = vmul.f32 %v16139_v15, %v6842_v58  ;;  %v6779_v19 = vadd.f32 -1.4531521, %v6747_v50  ;;  %v16183_v46 = vmul.f32 %v7317_v5, %v16019_v35  ;;  %v6969_v61 = vadd.f32 0.2548296, %v6937_v60 }
 0x692   : >> { %v6780_v59 = vadd.f32 -1.4531521, %v6748_v56  ;;  %v6654_v39 = vmul.f32 0.3275911, %v16172_v49  ;;  %8322 = vpow2.f32 %v7122_v14  ;;  %v16189_v29 = vadd.f32 %v15741_v17, %v15493_v3 }
 0x693   : >> { %v6906_v44 = vadd.f32 -0.28449672, %v6874_v53  ;;  %v6811_v16 = vmul.f32 %v16169_v28, %v6779_v19  ;;  %v8317_v4 = vpop.eup %8316  ;;  %vm7224_vm11 = vcmp.ge.f32.partialorder %v16024_v1, 0.0  ;;  %v7001_v20 = vmul.f32 %v16115_v48, %v6969_v61 }
 0x694   : >> { %v6812_v35 = vmul.f32 %v16174_v7, %v6780_v59  ;;  %v7037_v5 = vsub.f32 0.0, %v16151_v45  ;;  %v6686_v25 = vadd.f32 1.0, %v6654_v39  ;;  %v7192_v11 = vsub.f32 1.0, %v7160_v54 }
 0x695   : >> { %v6938_v6 = vmul.f32 %v16139_v15, %v6906_v44  ;;  %v6843_v58 = vadd.f32 1.4214138, %v6811_v16  ;;  %8324 = vpow2.f32 %v7124_v13  ;;  %v7255_v14 = vsub.f32 0.0, %v7191_v34 }
 0x696   : >> { %v6844_v50 = vadd.f32 1.4214138, %v6812_v35  ;;  %v16197_v17 = vmul.f32 0.5, %v16123_v41  ;;  %8326 = vrcp.f32 %v6686_v25  ;;  %v7161_v60 = vmul.f32 %v8317_v4, %v7001_v20 }
 0x697   : >> { %v6970_v56 = vadd.f32 0.2548296, %v6938_v6  ;;  %v6875_v48 = vmul.f32 %v16169_v28, %v6843_v58  ;;  %v16201_v53 = vmul.f32 0.70710677, %v16189_v29  ;;  %v8319_v19 = vpop.eup %8318  ;;  %v16204_v54 = vmul.f32 %v7318_v47, %v16042_v24 }
 0x698   : >> { %v6876_v61 = vmul.f32 %v16174_v7, %v6844_v50  ;;  %v7069_v13 = vmul.f32 %v7037_v5, %v16151_v45  ;;  %v7038_v59 = vsub.f32 0.0, %v16172_v49  ;;  %v7256_v39 = vsub.f32 0.0, %v7192_v11 }
 0x699   : >> { %v16209_v41 = vpop.eup %8320  ;;  %v7002_v44 = vmul.f32 %v16139_v15, %v6970_v56  ;;  %v6907_v16 = vadd.f32 -0.28449672, %v6875_v48  ;;  %v6623_v4 = vand.u32 2147483647, %v16201_v53  ;;  %v7287_v20 = vsel %vm7223_vm10, %v7191_v34, %v7255_v14 }
 0x69a   : >> { %vm7225_vm12 = vcmp.ge.f32.partialorder %v16049_v8, 0.0  ;;  %v6908_v24 = vadd.f32 -0.28449672, %v6876_v61  ;;  %v6749_v47 = vmul.f32 1.0614054, %v16209_v41  ;;  %v16218_v45 = vmul.f32 0.5, %v16144_v21 }
 0x69b   : >> { %v7193_v35 = vsub.f32 1.0, %v7161_v60  ;;  %v7162_v5 = vmul.f32 %v8319_v19, %v7002_v44  ;;  %vm7226_vm13 = vcmp.ge.f32.partialorder %v16070_v9, 0.0  ;;  %v6939_v15 = vmul.f32 %v16169_v28, %v6907_v16 }
 0x69c   : >> { %v6655_v25 = vmul.f32 0.3275911, %v6623_v4  ;;  %v6940_v6 = vmul.f32 %v16174_v7, %v6908_v24  ;;  %v6781_v58 = vadd.f32 -1.4531521, %v6749_v47  ;;  %v7126_v0 = vmul.f32 1.442695, %v7069_v13  ;;  %v8323_v14 = vpop.eup %8322 }
 0x69d   : >> { %v7070_v34 = vmul.f32 %v7038_v59, %v16172_v49  ;;  %v7288_v50 = vsel %vm7224_vm11, %v7192_v11, %v7256_v39  ;;  %v7194_v56 = vsub.f32 1.0, %v7162_v5  ;;  %v6971_v21 = vadd.f32 0.2548296, %v6939_v15 }
 0x69e   : >> { %v6687_v48 = vadd.f32 1.0, %v6655_v25  ;;  %v6972_v60 = vadd.f32 0.2548296, %v6940_v6  ;;  %v6813_v19 = vmul.f32 %v16209_v41, %v6781_v58  ;;  %v7039_v61 = vsub.f32 0.0, %v6623_v4 }
 0x69f   : >> { %v16229_v44 = vadd.f32 %v16137_v37, %v15489_v32  ;;  %v8325_v16 = vpop.eup %8324  ;;  %v7319_v24 = vadd.f32 1.0, %v7287_v20  ;;  %v7257_v13 = vsub.f32 0.0, %v7193_v35  ;;  %v7003_v49 = vmul.f32 %v16169_v28, %v6971_v21 }
 0x6a0   : >> { %8328 = vrcp.f32 %v6687_v48  ;;  %v16232_v59 = vpop.eup %8326  ;;  %v7258_v1 = vsub.f32 0.0, %v7194_v56  ;;  %v7004_v11 = vmul.f32 %v16174_v7, %v6972_v60  ;;  %v6845_v39 = vadd.f32 1.4214138, %v6813_v19  ;;  %v19206_v60 = vld [vmem:[#allocation79_spill] sm:$0xff] }
 0x6a1   : >> { %8330 = vpow2.f32 %v7126_v0  ;;  %v7320_v47 = vadd.f32 1.0, %v7288_v50  ;;  %v7163_v5 = vmul.f32 %v8323_v14, %v7003_v49  ;;  %v6750_v15 = vmul.f32 1.0614054, %v16232_v59 }
 0x6a2   : >> { %v16237_v37 = vmul.f32 0.70710677, %v16229_v44  ;;  %vm7227_vm14 = vcmp.ge.f32.partialorder %v16096_v2, 0.0  ;;  %v7164_v20 = vmul.f32 %v8325_v16, %v7004_v11  ;;  %v6877_v28 = vmul.f32 %v16209_v41, %v6845_v39 }
 0x6a3   : >> { %v7128_v25 = vmul.f32 1.442695, %v7070_v34  ;;  %v7071_v6 = vmul.f32 %v7039_v61, %v6623_v4  ;;  %v7289_v58 = vsel %vm7225_vm12, %v7193_v35, %v7257_v13  ;;  %v7195_v7 = vsub.f32 1.0, %v7163_v5 }
 0x6a4   : >> { %vm7228_vm15 = vcmp.ge.f32.partialorder %v16102_v18, 0.0  ;;  %v6782_v0 = vadd.f32 -1.4531521, %v6750_v15  ;;  %v6624_v14 = vand.u32 2147483647, %v16237_v37  ;;  %v7290_v50 = vsel %vm7226_vm13, %v7194_v56, %v7258_v1  ;;  %v19208_v1 = vld [vmem:[#allocation140_spill] sm:$0xff] }
 0x6a5   : >> { %v7196_v21 = vsub.f32 1.0, %v7164_v20  ;;  %v6909_v48 = vadd.f32 -0.28449672, %v6877_v28  ;;  %v7365_v19 = vpack.c.bf16 %v19206_v60, %v15838_v31  ;;  %v16250_v34 = vmul.f32 %v7319_v24, %v16062_v38  ;;  %v19207_v24 = vld [vmem:[#allocation72_spill] sm:$0xff] }
 0x6a6   : >> { %v6814_v8 = vmul.f32 %v16232_v59, %v6782_v0  ;;  %v16254_v4 = vmul.f32 0.5, %v16189_v29  ;;  %v6656_v35 = vmul.f32 0.3275911, %v6624_v14  ;;  %v7321_v61 = vadd.f32 1.0, %v7289_v58 }
 0x6a7   : >> { %v6941_v16 = vmul.f32 %v16209_v41, %v6909_v48  ;;  %v7130_v13 = vmul.f32 1.442695, %v7071_v6  ;;  %7544 = vmatprep.mubr.bf16.mxu0 %v7365_v19  ;;  %v16259_v9 = vadd.f32 %v16146_v57, %v15493_v3  ;;  %v7322_v56 = vadd.f32 1.0, %v7290_v50 }
 0x6a8   : >> { %v7259_v31 = vsub.f32 0.0, %v7195_v7  ;;  %v6846_v49 = vadd.f32 1.4214138, %v6814_v8  ;;  %v6688_v38 = vadd.f32 1.0, %v6656_v35  ;;  %v19209_v11 = vpack.c.bf16 %v19207_v24, %v19208_v1 }
 0x6a9   : >> { %v16265_v29 = vmul.f32 %v7320_v47, %v16068_v10  ;;  %v7260_v39 = vsub.f32 0.0, %v7196_v21  ;;  %v6973_v5 = vadd.f32 0.2548296, %v6941_v16  ;;  %8332 = vpow2.f32 %v7128_v25 }
 0x6aa   : >> { %7545 = vmatmul.mubr.bf16.vlgmr.msra.gmra.mrb[32].mxu0 %v19209_v11  ;;  %v16267_v15 = vpop.eup %8328  ;;  %vm7229_vm1 = vcmp.ge.f32.partialorder %v16135_v26, 0.0  ;;  %v6878_v57 = vmul.f32 %v16232_v59, %v6846_v49  ;;  %8334 = vrcp.f32 %v6688_v38  ;;  %v7040_v20 = vsub.f32 0.0, %v6624_v14 }
 0x6ab   : >> { %v16273_v28 = vadd.f32 %v16153_v63, %v15489_v32  ;;  %v8331_v6 = vpop.eup %8330  ;;  %v16276_v58 = vmul.f32 %v7321_v61, %v16093_v43  ;;  %v7005_v10 = vmul.f32 %v16209_v41, %v6973_v5  ;;  %v6751_v47 = vmul.f32 1.0614054, %v16267_v15 }
 0x6ac   : >> { %v16281_v25 = vmul.f32 0.70710677, %v16259_v9  ;;  %v16284_v0 = vmul.f32 %v7322_v56, %v16113_v23  ;;  %v7291_v50 = vsel %vm7227_vm14, %v7195_v7, %v7259_v31  ;;  %v6910_v48 = vadd.f32 -0.28449672, %v6878_v57 }
 0x6ad   : >> { %8336 = vpow2.f32 %v7130_v13  ;;  %v7292_v32 = vsel %vm7228_vm15, %v7196_v21, %v7260_v39  ;;  %v7165_v43 = vmul.f32 %v8331_v6, %v7005_v10  ;;  %v6783_v63 = vadd.f32 -1.4531521, %v6751_v47 }
 0x6ae   : >> { %v6625_v41 = vand.u32 2147483647, %v16281_v25  ;;  %v6942_v60 = vmul.f32 %v16232_v59, %v6910_v48  ;;  %v7072_v19 = vmul.f32 %v7040_v20, %v6624_v14  ;;  %v16293_v8 = vmul.f32 0.70710677, %v16273_v28 }
 0x6af   : >> { %v16297_v23 = vadd.f32 %v16160_v12, %v15493_v3  ;;  %v7197_v2 = vsub.f32 1.0, %v7165_v43  ;;  %v6815_v7 = vmul.f32 %v16267_v15, %v6783_v63  ;;  %v7323_v21 = vadd.f32 1.0, %v7291_v50 }
 0x6b0   : >> { %v6657_v35 = vmul.f32 0.3275911, %v6625_v41  ;;  %v7041_v18 = vsub.f32 0.0, %v6625_v41  ;;  %v7324_v61 = vadd.f32 1.0, %v7292_v32  ;;  %v6974_v16 = vadd.f32 0.2548296, %v6942_v60 }
 0x6b1   : >> { %v6626_v13 = vand.u32 2147483647, %v16293_v8  ;;  %v7261_v56 = vsub.f32 0.0, %v7197_v2  ;;  %vm7230_vm2 = vcmp.ge.f32.partialorder %v16166_v62, 0.0  ;;  %v6847_v14 = vadd.f32 1.4214138, %v6815_v7 }
 0x6b2   : >> { %v6689_v31 = vadd.f32 1.0, %v6657_v35  ;;  %v7073_v49 = vmul.f32 %v7041_v18, %v6625_v41  ;;  %v7006_v38 = vmul.f32 %v16232_v59, %v6974_v16  ;;  %v7132_v3 = vmul.f32 1.442695, %v7072_v19  ;;  %v19210_v41 = vld [vmem:[#allocation148_spill] sm:$0xff]  ;;  %v19211_v18 = vld [vmem:[#allocation77_spill] sm:$0xff] }
 0x6b3   : >> { %v6658_v12 = vmul.f32 0.3275911, %v6626_v13  ;;  %v16304_v24 = vmul.f32 0.70710677, %v16297_v23  ;;  %v8333_v1 = vpop.eup %8332  ;;  %v7293_v11 = vsel %vm7229_vm1, %v7197_v2, %v7261_v56  ;;  %v6879_v39 = vmul.f32 %v16267_v15, %v6847_v14 }
 0x6b4   : >> { %8338 = vrcp.f32 %v6689_v31  ;;  %v7042_v5 = vsub.f32 0.0, %v6626_v13  ;;  %v16309_v57 = vpop.eup %8334  ;;  %v7325_v20 = vadd.f32 1.0, %v7293_v11  ;;  %v7166_v6 = vmul.f32 %v8333_v1, %v7006_v38  ;;  %v19212_v38 = vld [vmem:[#allocation54_spill] sm:$0xff] }
 0x6b5   : >> { %v7134_v10 = vmul.f32 1.442695, %v7073_v49  ;;  %v6690_v47 = vadd.f32 1.0, %v6658_v12  ;;  %v16312_v59 = vmul.f32 %v7323_v21, %v16132_v42  ;;  %v6911_v50 = vadd.f32 -0.28449672, %v6879_v39 }
 0x6b6   : >> { %v6752_v48 = vmul.f32 1.0614054, %v16309_v57  ;;  %v16316_v32 = vand.u32 2147483647, %v16304_v24  ;;  %v16319_v43 = vmul.f32 %v7324_v61, %v16157_v33  ;;  %v7198_v63 = vsub.f32 1.0, %v7166_v6 }
 0x6b7   : >> { %v8337_v26 = vpop.eup %8336  ;;  %8340 = vrcp.f32 %v6690_v47  ;;  %v6729_v60 = vmul.f32 1.0614054, %v19210_v41  ;;  %v6943_v19 = vmul.f32 %v16267_v15, %v6911_v50  ;;  %v7074_v35 = vmul.f32 %v7042_v5, %v6626_v13 }
 0x6b8   : >> { %v6784_v2 = vadd.f32 -1.4531521, %v6752_v48  ;;  %8342 = vpow2.f32 %v7132_v3  ;;  %v6659_v42 = vmul.f32 0.3275911, %v16316_v32  ;;  %v7262_v7 = vsub.f32 0.0, %v7198_v63  ;;  %v19213_v3 = vld [vmem:[#allocation64_spill] sm:$0xff] }
 0x6b9   : >> { %8344 = vpow2.f32 %v7134_v10  ;;  %v6731_v21 = vmul.f32 1.0614054, %v19211_v18  ;;  %v16326_v16 = vmul.f32 %v7325_v20, %v16197_v17  ;;  %v6975_v33 = vadd.f32 0.2548296, %v6943_v19 }
 0x6ba   : >> { %v6816_v61 = vmul.f32 %v16309_v57, %v6784_v2  ;;  %v6691_v56 = vadd.f32 1.0, %v6659_v42  ;;  %v7294_v14 = vsel %vm7230_vm2, %v7198_v63, %v7262_v7  ;;  %vm7231_vm3 = vcmp.ge.f32.partialorder %v16201_v53, 0.0 }
 0x6bb   : >> { %v6761_v31 = vadd.f32 -1.4531521, %v6729_v60  ;;  %v6763_v49 = vadd.f32 -1.4531521, %v6731_v21  ;;  %v7366_v12 = vpack.c.bf16 %v19213_v3, %v19212_v38  ;;  %v7326_v13 = vadd.f32 1.0, %v7294_v14 }
 0x6bc   : >> { %v7007_v1 = vmul.f32 %v16267_v15, %v6975_v33  ;;  %v6848_v11 = vadd.f32 1.4214138, %v6816_v61  ;;  %8346 = vrcp.f32 %v6691_v56  ;;  %v7136_v17 = vmul.f32 1.442695, %v7074_v35 }
 0x6bd   : >> { %v6793_v39 = vmul.f32 %v19210_v41, %v6761_v31  ;;  %v6795_v5 = vmul.f32 %v19211_v18, %v6763_v49  ;;  %v7369_v62 = vpack.c.bf16 %v16045_v52, %v15977_v27  ;;  %v7043_v47 = vsub.f32 0.0, %v16316_v32  ;;  %v19214_v49 = vld [vmem:[#allocation94_spill] sm:$0xff] }
 0x6be   : >> { %v16339_v20 = vpop.eup %8338  ;;  %v7167_v6 = vmul.f32 %v8337_v26, %v7007_v1  ;;  %v6880_v10 = vmul.f32 %v16309_v57, %v6848_v11  ;;  %v7368_v15 = vpack.c.bf16 %v16022_v40, %v15959_v55  ;;  %v16346_v50 = vmul.f32 %v7326_v13, %v16218_v45 }
 0x6bf   : >> { %v6753_v48 = vmul.f32 1.0614054, %v16339_v20  ;;  %v6825_v63 = vadd.f32 1.4214138, %v6793_v39  ;;  %v6827_v60 = vadd.f32 1.4214138, %v6795_v5  ;;  %v7371_v42 = vpack.c.bf16 %v16108_v30, %v16066_v36 }
 0x6c0   : >> { %v7199_v19 = vsub.f32 1.0, %v7167_v6  ;;  %v6912_v2 = vadd.f32 -0.28449672, %v6880_v10  ;;  %v7075_v6 = vmul.f32 %v7043_v47, %v16316_v32  ;;  %8348 = vpow2.f32 %v7136_v17  ;;  %v19228_v30 = vld [vmem:[#allocation14_spill] sm:$0xff] }
 0x6c1   : >> { %v16353_v7 = vpop.eup %8340  ;;  %v6785_v35 = vadd.f32 -1.4531521, %v6753_v48  ;;  %v6857_v21 = vmul.f32 %v19210_v41, %v6825_v63  ;;  %v6859_v45 = vmul.f32 %v19211_v18, %v6827_v60  ;;  %vm7232_vm6 = vcmp.ge.f32.partialorder %v16237_v37, 0.0 }
 0x6c2   : >> { %v8343_v61 = vpop.eup %8342  ;;  %v7263_v56 = vsub.f32 0.0, %v7199_v19  ;;  %v6944_v14 = vmul.f32 %v16309_v57, %v6912_v2  ;;  %v6754_v31 = vmul.f32 1.0614054, %v16353_v7  ;;  %vm7234_vm7 = vcmp.ge.f32.partialorder %v16293_v8, 0.0 }
 0x6c3   : >> { %v8345_v1 = vpop.eup %8344  ;;  %v6817_v11 = vmul.f32 %v16339_v20, %v6785_v35  ;;  %v6889_v39 = vadd.f32 -0.28449672, %v6857_v21  ;;  %v6891_v5 = vadd.f32 -0.28449672, %v6859_v45  ;;  %vm7233_vm8 = vcmp.ge.f32.partialorder %v16281_v25, 0.0 }
 0x6c4   : >> { %v7295_v10 = vsel %vm7231_vm3, %v7199_v19, %v7263_v56  ;;  %v6976_v48 = vadd.f32 0.2548296, %v6944_v14  ;;  %v6786_v63 = vadd.f32 -1.4531521, %v6754_v31  ;;  %vm7235_vm9 = vcmp.ge.f32.partialorder %v16304_v24, 0.0 }
 0x6c5   : >> { %v7327_v2 = vadd.f32 1.0, %v7295_v10  ;;  %v6849_v33 = vadd.f32 1.4214138, %v6817_v11  ;;  %v6921_v13 = vmul.f32 %v19210_v41, %v6889_v39  ;;  %v6923_v26 = vmul.f32 %v19211_v18, %v6891_v5 }
 0x6c6   : >> { %v8347_v35 = vpop.eup %8346  ;;  %v7008_v21 = vmul.f32 %v16309_v57, %v6976_v48  ;;  %v6818_v45 = vmul.f32 %v16353_v7, %v6786_v63  ;;  %v7138_v63 = vmul.f32 1.442695, %v7075_v6  ;;  %v6561_v38 = vmul.f32 0.5, %v16259_v9 }
 0x6c7   : >> { %v16378_v19 = vmul.f32 %v7327_v2, %v16254_v4  ;;  %v6881_v56 = vmul.f32 %v16339_v20, %v6849_v33  ;;  %v6755_v14 = vmul.f32 1.0614054, %v8347_v35  ;;  %v6953_v31 = vadd.f32 0.2548296, %v6921_v13  ;;  %v19215_v13 = vld [vmem:[#allocation76_spill] sm:$0xff] }
 0x6c8   : >> { %v6850_v11 = vadd.f32 1.4214138, %v6818_v45  ;;  %v6955_v39 = vadd.f32 0.2548296, %v6923_v26  ;;  %v7168_v47 = vmul.f32 %v8343_v61, %v7008_v21  ;;  %v19216_v26 = vld [vmem:[#allocation80_spill] sm:$0xff]  ;;  %8350 = vpow2.f32 %v7138_v63 }
 0x6c9   : >> { %v6913_v5 = vadd.f32 -0.28449672, %v6881_v56  ;;  %v6787_v10 = vadd.f32 -1.4531521, %v6755_v14  ;;  %v6985_v57 = vmul.f32 %v19210_v41, %v6953_v31  ;;  %v6563_v3 = vmul.f32 0.5, %v16297_v23 }
 0x6ca   : >> { %v6882_v48 = vmul.f32 %v16353_v7, %v6850_v11  ;;  %v6987_v4 = vmul.f32 %v19211_v18, %v6955_v39  ;;  %v7200_v31 = vsub.f32 1.0, %v7168_v47  ;;  %v19217_v11 = vld [vmem:[#allocation45_spill] sm:$0xff]  ;;  %v8349_v47 = vpop.eup %8348  ;;  %v19221_v52 = vpack.c.bf16 %v16083_v51, %v16058_v22 }
 0x6cb   : >> { %v6945_v33 = vmul.f32 %v16339_v20, %v6913_v5  ;;  %v6819_v2 = vmul.f32 %v8347_v35, %v6787_v10  ;;  %v7145_v45 = vmul.f32 %v19215_v13, %v6985_v57  ;;  %v6537_v39 = vmul.f32 0.5, %v19217_v11  ;;  %v19218_v5 = vld [vmem:[#allocation47_spill] sm:$0xff] }
 0x6cc   : >> { %v6914_v17 = vadd.f32 -0.28449672, %v6882_v48  ;;  %v7147_v56 = vmul.f32 %v19216_v26, %v6987_v4  ;;  %vm7209_vm4 = vcmp.ge.f32.partialorder %v19218_v5, 0.0  ;;  %v19219_v48 = vld [vmem:[#allocation24_spill] sm:$0xff]  ;;  %v7264_v13 = vsub.f32 0.0, %v7200_v31 }
 0x6cd   : >> { %v6977_v14 = vadd.f32 0.2548296, %v6945_v33  ;;  %v6851_v53 = vadd.f32 1.4214138, %v6819_v2  ;;  %v7177_v41 = vsub.f32 1.0, %v7145_v45  ;;  %vm7211_vm5 = vcmp.ge.f32.partialorder %v19219_v48, 0.0 }
 0x6ce   : >> { %v6946_v32 = vmul.f32 %v16353_v7, %v6914_v17  ;;  %v7179_v61 = vsub.f32 1.0, %v7147_v56  ;;  %v19222_v9 = vpack.c.bf16 %v16250_v34, %v16183_v46  ;;  %v19223_v23 = vpack.c.bf16 %v16204_v54, %v19214_v49  ;;  %v19229_v46 = vld [vmem:[#allocation9_spill] sm:$0xff] }
 0x6cf   : >> { %v7009_v6 = vmul.f32 %v16339_v20, %v6977_v14  ;;  %v6883_v21 = vmul.f32 %v8347_v35, %v6851_v53  ;;  %v7241_v18 = vsub.f32 0.0, %v7177_v41  ;;  %v19220_v20 = vld [vmem:[#allocation60_spill] sm:$0xff]  ;;  %v19224_v55 = vpack.c.bf16 %v16312_v59, %v16276_v58  ;;  %v19230_v58 = vld [vmem:[#allocation15_spill] sm:$0xff] }
 0x6d0   : >> { %v6978_v10 = vadd.f32 0.2548296, %v6946_v32  ;;  %v7243_v57 = vsub.f32 0.0, %v7179_v61  ;;  %v6539_v53 = vmul.f32 0.5, %v19220_v20  ;;  %v19225_v40 = vpack.c.bf16 %v16284_v0, %v16265_v29 }
 0x6d1   : >> { %v7169_v4 = vmul.f32 %v8345_v1, %v7009_v6  ;;  %v6915_v33 = vadd.f32 -0.28449672, %v6883_v21  ;;  %v7273_v2 = vsel %vm7209_vm4, %v7177_v41, %v7241_v18  ;;  %v7296_v1 = vsel %vm7232_vm6, %v7200_v31, %v7264_v13 }
 0x6d2   : >> { %v7010_v63 = vmul.f32 %v16353_v7, %v6978_v10  ;;  %v7275_v45 = vsel %vm7211_vm5, %v7179_v61, %v7243_v57  ;;  %v7305_v17 = vadd.f32 1.0, %v7273_v2  ;;  %v8351_v60 = vpop.eup %8350  ;;  %v7328_v61 = vadd.f32 1.0, %v7296_v1 }
 0x6d3   : >> { %v7201_v26 = vsub.f32 1.0, %v7169_v4  ;;  %v6947_v56 = vmul.f32 %v8347_v35, %v6915_v33  ;;  %v7307_v14 = vadd.f32 1.0, %v7275_v45  ;;  %v6560_v57 = vmul.f32 0.5, %v16229_v44 }
 0x6d4   : >> { %v7170_v11 = vmul.f32 %v8349_v47, %v7010_v63  ;;  %v7337_v5 = vmul.f32 %v7305_v17, %v6537_v39  ;;  %v19226_v22 = vpack.c.bf16 %v16378_v19, %v16326_v16  ;;  %v19227_v36 = vpack.c.bf16 %v16346_v50, %v16319_v43 }
 0x6d5   : >> { %v6979_v32 = vadd.f32 0.2548296, %v6947_v56  ;;  %v7339_v48 = vmul.f32 %v7307_v14, %v6539_v53  ;;  %v7265_v41 = vsub.f32 0.0, %v7201_v26  ;;  %v7360_v8 = vmul.f32 %v7328_v61, %v6560_v57  ;;  %v8001_v14 = vld [vmem:[%s8792_s26 + $0x63] sm:$0xff] }
 0x6d6   : >> { %v7202_v6 = vsub.f32 1.0, %v7170_v11  ;;  %v16439_v54 = vrot.slane %v19229_v46, %v19228_v30  ;;  %v16443_v0 = vrot.slane %v19229_v46, %v19230_v58 }
 0x6d7   : >> { %v7011_v21 = vmul.f32 %v8347_v35, %v6979_v32  ;;  %v7367_v18 = vpack.c.bf16 %v7339_v48, %v7337_v5  ;;  %v7297_v31 = vsel %vm7233_vm8, %v7201_v26, %v7265_v41  ;;  %v6562_v35 = vmul.f32 0.5, %v16273_v28  ;;  %v8002_v5 = vld [vmem:[%s8792_s26 + $0x6b] sm:$0xff] }
 0x6d8   : >> { %v7266_v7 = vsub.f32 0.0, %v7202_v6  ;;  %v7329_v44 = vadd.f32 1.0, %v7297_v31 }
 0x6d9   : >> { %v7171_v10 = vmul.f32 %v8351_v60, %v7011_v21  ;;  %7552 = vmatprep.mubr.bf16.mxu1 %v7367_v18 }
 0x6da   : >> { %v7298_v37 = vsel %vm7234_vm7, %v7202_v6, %v7266_v7  ;;  %7553 = vmatmul.mubr.bf16.vlgmr.msra.gmra.mrb[0].mxu1 %v7366_v12  ;;  %v7361_v28 = vmul.f32 %v7329_v44, %v6561_v38 }
 0x6db   : >> { %v7330_v39 = vadd.f32 1.0, %v7298_v37  ;;  %v7203_v4 = vsub.f32 1.0, %v7171_v10  ;;  %7560 = vmatprep.mubr.bf16.mxu1 %v7369_v62  ;;  %v7999_v62 = vld [vmem:[%s8792_s26 + $0x4b] sm:$0xff]  ;;  %v8003_v37 = vld [vmem:[%s8792_s26 + $0x7b] sm:$0xff] }
 0x6dd   : >> { %v7362_v60 = vmul.f32 %v7330_v39, %v6562_v35  ;;  %v7267_v33 = vsub.f32 0.0, %v7203_v4  ;;  %v8004_v39 = vld [vmem:[%s8792_s26 + $0x83] sm:$0xff] }
 0x6df   : >> { %v7299_v25 = vsel %vm7235_vm9, %v7203_v4, %v7267_v33  ;;  %v7378_v2 = vpack.c.bf16 %v7362_v60, %v7360_v8 }
 0x6e0   : >> { %v7331_v12 = vadd.f32 1.0, %v7299_v25 }
 0x6e2   : >> { %v7363_v47 = vmul.f32 %v7331_v12, %v6563_v3  ;;  %7561 = vmatmul.mubr.bf16.gmra.mrb[4].mxu1 %v7368_v15 }
 0x6e3   : >> { %7568 = vmatprep.mubr.bf16.mxu1 %v7371_v42  ;;  %v8000_v42 = vld [vmem:[%s8792_s26 + $0x53] sm:$0xff] }
 0x6e4   : >> { %v7379_v27 = vpack.c.bf16 %v7363_v47, %v7361_v28  ;;  %v8005_v28 = vld [vmem:[%s8792_s26 + $0x93] sm:$0xff] }
 0x6ea   : >> { %7569 = vmatmul.mubr.bf16.gmra.mrb[8].mxu1 %v19221_v52  ;;  %v8006_v52 = vld [vmem:[%s8792_s26 + $0x9b] sm:$0xff] }
 0x6eb   : >> { %7576 = vmatprep.mubr.bf16.mxu1 %v19222_v9 }
 0x6f2   : >> { %7577 = vmatmul.mubr.bf16.gmra.mrb[12].mxu1 %v19223_v23 }
 0x6f3   : >> { %7584 = vmatprep.mubr.bf16.mxu1 %v19224_v55 }
 0x6fa   : >> { %7585 = vmatmul.mubr.bf16.gmra.mrb[16].mxu1 %v19225_v40 }
 0x6fb   : >> { %7592 = vmatprep.mubr.bf16.mxu1 %v19226_v22 }
 0x702   : >> { %7593 = vmatmul.mubr.bf16.gmra.mrb[20].mxu1 %v19227_v36 }
 0x703   : >> { %7600 = vmatprep.mubr.bf16.mxu1 %v7379_v27 }
 0x70a   : >> { %7601 = vmatmul.mubr.bf16.gmra.mrb[24].mxu1 %v7378_v2 }
 0x77d   : >> { %v8040_v51 = vpop.f32.mrb[32].mxu0 }
 0x77e   : >> { %v8041_v34 = vpop.f32.mrb[33].mxu0 }
 0x77f   : >> { %v8042_v29 = vadd.f32 %v8041_v34, %v8040_v51  ;;  %v8043_v24 = vpop.f32.mrb[34].mxu0 }
 0x780   : >> { %v8044_v59 = vpop.f32.mrb[35].mxu0 }
 0x781   : >> { %v7547_v43 = vadd.f32 %v8042_v29, %v16439_v54  ;;  %v8045_v16 = vadd.f32 %v8044_v59, %v8043_v24  ;;  %v8007_v29 = vld [vmem:[%s8792_s26 + $0xab] sm:$0xff]  ;;  %v8008_v59 = vld [vmem:[%s8792_s26 + $0xb3] sm:$0xff] }
 0x783   : >> { %v7613_v15 = vmul.f32 %v16443_v0, %v7547_v43  ;;  %v7550_v50 = vadd.f32 %v8045_v16, %v16439_v54 }
 0x785   : >> { %v7645_v49 = vadd.f32 %v7999_v62, %v7613_v15  ;;  %v7614_v19 = vmul.f32 %v16443_v0, %v7550_v50 }
 0x787   : >> { %7663 = vst.msk [vmem:[%s16451_s16] sm:$0xff] %vm273_vm0, %v7645_v49  ;;  %v7646_v13 = vadd.f32 %v8000_v42, %v7614_v19 }
 0x789   : >> { %7664 = vst.msk [vmem:[%s16451_s16 + $0x8] sm:$0xff] %vm273_vm0, %v7646_v13 }
 0x7ad   : >> { %v8046_v63 = vpop.f32.mrb[0].mxu1 }
 0x7ae   : >> { %v8047_v45 = vpop.f32.mrb[1].mxu1 }
 0x7af   : >> { %v8048_v17 = vadd.f32 %v8047_v45, %v8046_v63  ;;  %v8049_v20 = vpop.f32.mrb[2].mxu1  ;;  %v8009_v45 = vld [vmem:[%s8792_s26 + $0xc3] sm:$0xff] }
 0x7b0   : >> { %v8050_v53 = vpop.f32.mrb[3].mxu1 }
 0x7b1   : >> { %v7555_v26 = vadd.f32 %v8048_v17, %v16439_v54  ;;  %v8051_v56 = vadd.f32 %v8050_v53, %v8049_v20  ;;  %v8010_v53 = vld [vmem:[%s8792_s26 + $0xcb] sm:$0xff] }
 0x7b3   : >> { %v7615_v11 = vmul.f32 %v16443_v0, %v7555_v26  ;;  %v7558_v32 = vadd.f32 %v8051_v56, %v16439_v54 }
 0x7b5   : >> { %v7647_v48 = vadd.f32 %v8001_v14, %v7615_v11  ;;  %v7616_v1 = vmul.f32 %v16443_v0, %v7558_v32  ;;  %v8052_v6 = vpop.f32.mrb[4].mxu1 }
 0x7b6   : >> { %v8053_v41 = vpop.f32.mrb[5].mxu1 }
 0x7b7   : >> { %7665 = vst.msk [vmem:[%s16451_s16 + $0x10] sm:$0xff] %vm273_vm0, %v7647_v48  ;;  %v7648_v21 = vadd.f32 %v8002_v5, %v7616_v1  ;;  %v8054_v18 = vadd.f32 %v8053_v41, %v8052_v6  ;;  %v8055_v7 = vpop.f32.mrb[6].mxu1 }
 0x7b8   : >> { %v8056_v61 = vpop.f32.mrb[7].mxu1 }
 0x7b9   : >> { %7666 = vst.msk [vmem:[%s16451_s16 + $0x18] sm:$0xff] %vm273_vm0, %v7648_v21  ;;  %v7563_v10 = vadd.f32 %v8054_v18, %v16439_v54  ;;  %v8057_v57 = vadd.f32 %v8056_v61, %v8055_v7  ;;  %v8011_v21 = vld [vmem:[%s8792_s26 + $0xdb] sm:$0xff]  ;;  %v8012_v61 = vld [vmem:[%s8792_s26 + $0xe3] sm:$0xff] }
 0x7bb   : >> { %v7617_v31 = vmul.f32 %v16443_v0, %v7563_v10  ;;  %v7566_v35 = vadd.f32 %v8057_v57, %v16439_v54 }
 0x7bd   : >> { %v7649_v4 = vadd.f32 %v8003_v37, %v7617_v31  ;;  %v7618_v8 = vmul.f32 %v16443_v0, %v7566_v35  ;;  %v8058_v60 = vpop.f32.mrb[8].mxu1 }
 0x7be   : >> { %v8059_v33 = vpop.f32.mrb[9].mxu1 }
 0x7bf   : >> { %7667 = vst.msk [vmem:[%s16451_s16 + $0x20] sm:$0xff] %vm273_vm0, %v7649_v4  ;;  %v7650_v44 = vadd.f32 %v8004_v39, %v7618_v8  ;;  %v8060_v25 = vadd.f32 %v8059_v33, %v8058_v60  ;;  %v8061_v2 = vpop.f32.mrb[10].mxu1 }
 0x7c0   : >> { %v8062_v38 = vpop.f32.mrb[11].mxu1 }
 0x7c1   : >> { %7668 = vst.msk [vmem:[%s16451_s16 + $0x28] sm:$0xff] %vm273_vm0, %v7650_v44  ;;  %v7571_v3 = vadd.f32 %v8060_v25, %v16439_v54  ;;  %v8063_v12 = vadd.f32 %v8062_v38, %v8061_v2  ;;  %v8013_v44 = vld [vmem:[%s8792_s26 + $0xf3] sm:$0xff]  ;;  %v8014_v38 = vld [vmem:[%s8792_s26 + $0xfb] sm:$0xff] }
 0x7c3   : >> { %v7619_v47 = vmul.f32 %v16443_v0, %v7571_v3  ;;  %v7574_v27 = vadd.f32 %v8063_v12, %v16439_v54 }
 0x7c5   : >> { %v7651_v9 = vadd.f32 %v8005_v28, %v7619_v47  ;;  %v7620_v23 = vmul.f32 %v16443_v0, %v7574_v27  ;;  %v8064_v55 = vpop.f32.mrb[12].mxu1 }
 0x7c6   : >> { %v8065_v40 = vpop.f32.mrb[13].mxu1 }
 0x7c7   : >> { %7669 = vst.msk [vmem:[%s16451_s16 + $0x30] sm:$0xff] %vm273_vm0, %v7651_v9  ;;  %v7652_v22 = vadd.f32 %v8006_v52, %v7620_v23  ;;  %v8066_v36 = vadd.f32 %v8065_v40, %v8064_v55  ;;  %v8067_v51 = vpop.f32.mrb[14].mxu1 }
 0x7c8   : >> { %v8068_v30 = vpop.f32.mrb[15].mxu1 }
 0x7c9   : >> { %7670 = vst.msk [vmem:[%s16451_s16 + $0x38] sm:$0xff] %vm273_vm0, %v7652_v22  ;;  %v7579_v46 = vadd.f32 %v8066_v36, %v16439_v54  ;;  %v8069_v34 = vadd.f32 %v8068_v30, %v8067_v51 }
 0x7cb   : >> { %v7621_v58 = vmul.f32 %v16443_v0, %v7579_v46  ;;  %v7582_v24 = vadd.f32 %v8069_v34, %v16439_v54 }
 0x7cd   : >> { %v7653_v43 = vadd.f32 %v8007_v29, %v7621_v58  ;;  %v7622_v16 = vmul.f32 %v16443_v0, %v7582_v24  ;;  %v8070_v62 = vpop.f32.mrb[16].mxu1 }
 0x7ce   : >> { %v8071_v15 = vpop.f32.mrb[17].mxu1 }
 0x7cf   : >> { %7671 = vst.msk [vmem:[%s16451_s16 + $0x40] sm:$0xff] %vm273_vm0, %v7653_v43  ;;  %v7654_v50 = vadd.f32 %v8008_v59, %v7622_v16  ;;  %v8072_v42 = vadd.f32 %v8071_v15, %v8070_v62  ;;  %v8073_v49 = vpop.f32.mrb[18].mxu1 }
 0x7d0   : >> { %v8074_v19 = vpop.f32.mrb[19].mxu1 }
 0x7d1   : >> { %7672 = vst.msk [vmem:[%s16451_s16 + $0x48] sm:$0xff] %vm273_vm0, %v7654_v50  ;;  %v7587_v13 = vadd.f32 %v8072_v42, %v16439_v54  ;;  %v8075_v63 = vadd.f32 %v8074_v19, %v8073_v49 }
 0x7d3   : >> { %v7623_v17 = vmul.f32 %v16443_v0, %v7587_v13  ;;  %v7590_v20 = vadd.f32 %v8075_v63, %v16439_v54 }
 0x7d5   : >> { %v7655_v26 = vadd.f32 %v8009_v45, %v7623_v17  ;;  %v7624_v56 = vmul.f32 %v16443_v0, %v7590_v20  ;;  %v8076_v14 = vpop.f32.mrb[20].mxu1 }
 0x7d6   : >> { %v8077_v11 = vpop.f32.mrb[21].mxu1 }
 0x7d7   : >> { %7673 = vst.msk [vmem:[%s16451_s16 + $0x50] sm:$0xff] %vm273_vm0, %v7655_v26  ;;  %v7656_v32 = vadd.f32 %v8010_v53, %v7624_v56  ;;  %v8078_v5 = vadd.f32 %v8077_v11, %v8076_v14  ;;  %v8079_v48 = vpop.f32.mrb[22].mxu1 }
 0x7d8   : >> { %v8080_v1 = vpop.f32.mrb[23].mxu1 }
 0x7d9   : >> { %7674 = vst.msk [vmem:[%s16451_s16 + $0x58] sm:$0xff] %vm273_vm0, %v7656_v32  ;;  %v7595_v6 = vadd.f32 %v8078_v5, %v16439_v54  ;;  %v8081_v41 = vadd.f32 %v8080_v1, %v8079_v48 }
 0x7db   : >> { %v7625_v18 = vmul.f32 %v16443_v0, %v7595_v6  ;;  %v7598_v7 = vadd.f32 %v8081_v41, %v16439_v54 }
 0x7dd   : >> { %v7657_v10 = vadd.f32 %v8011_v21, %v7625_v18  ;;  %v7626_v57 = vmul.f32 %v16443_v0, %v7598_v7  ;;  %v8082_v37 = vpop.f32.mrb[24].mxu1 }
 0x7de   : >> { %v8083_v31 = vpop.f32.mrb[25].mxu1 }
 0x7df   : >> { %7675 = vst.msk [vmem:[%s16451_s16 + $0x60] sm:$0xff] %vm273_vm0, %v7657_v10  ;;  %v7658_v35 = vadd.f32 %v8012_v61, %v7626_v57  ;;  %v8084_v39 = vadd.f32 %v8083_v31, %v8082_v37  ;;  %v8085_v4 = vpop.f32.mrb[26].mxu1 }
 0x7e0   : >> { %v8086_v8 = vpop.f32.mrb[27].mxu1 }
 0x7e1   : >> { %7676 = vst.msk [vmem:[%s16451_s16 + $0x68] sm:$0xff] %vm273_vm0, %v7658_v35  ;;  %v7603_v60 = vadd.f32 %v8084_v39, %v16439_v54  ;;  %v8087_v33 = vadd.f32 %v8086_v8, %v8085_v4 }
 0x7e3   : >> { %v7627_v25 = vmul.f32 %v16443_v0, %v7603_v60  ;;  %v7606_v2 = vadd.f32 %v8087_v33, %v16439_v54  ;;  %395 = sbr.rel (!%p393_p6) target bundleno = 102 (0x66), region = 106 }
 0x7e5   : >> { %v7659_v3 = vadd.f32 %v8013_v44, %v7627_v25  ;;  %v7628_v12 = vmul.f32 %v16443_v0, %v7606_v2 }
 0x7e7   : >> { %7677 = vst.msk [vmem:[%s16451_s16 + $0x70] sm:$0xff] %vm273_vm0, %v7659_v3  ;;  %v7660_v28 = vadd.f32 %v8014_v38, %v7628_v12 }
 0x7e9   : >> { %7678 = vst.msk [vmem:[%s16451_s16 + $0x78] sm:$0xff] %vm273_vm0, %v7660_v28 }
 0x7ea   : > { %8425 = shalt.err (!%p8422_p4)
}
 0x7eb   : > { %s8426_s20 = scalar_lea.hbm %s16536_s14, 4096  ;;  %s8430_s8 = scalar_lea.hbm %s16589_s6, 8192 }
 0x7ec   : > { %p8427_p5 = scmp.ne.s32.totalorder %s16536_s14, %s8426_s20  ;;  %p8431_p1 = scmp.lt.u32.totalorder %s16536_s14, %s16589_s6 }
 0x7ed   : > { %p8432_p3 = scmp.lt.u32.totalorder %s8430_s8, %s8426_s20  ;;  %p8434_p11 = scmp.lt.u32.totalorder %s8426_s20, %s16536_s14 }
 0x7ee   : > { %p8428_p7 = pnand %p8427_p5, %p19231_p12 }
 0x7ef   : > { %p8433_p6 = por %p8432_p3, %p8431_p1 }
 0x7f0   : > { %p8429_p9 = pneg %p8428_p7 }
 0x7f1   : > { %p8435_p13 = por %p8434_p11, %p8433_p6 }
 0x7f3   : > { %p8436_p8 = pnand %p8435_p13, %p8429_p9 }
 0x7f5   : > { %8439 = shalt.err (!%p8436_p8)
}
 0x7f6   : > { %s8494_s26 = smov 128   ;;  %s8495_s19 = smov 8  }
 0x7f7   : > { %8106 = dma.vmem_to_hbm [thread:$0]  (%p19231_p12), %s16539_s15, 4096, %s16536_s14, %s7680_s17, %s8494_s26, %s8494_s26, %s8495_s19  }
 0x7f8 PF: > { %s7708_s28 = sand.u32 1, %s8470_s21   ;;  %p19232_p10 = scmp.ne.s32.totalorder %s17471_s10, 0 }
 0x7f9   : > { %p19233_p0 = scmp.ge.s32.totalorder %s8482_s24, 2  ;;  %s7709_s11 = scalar_lea.sflag [#allocation5], %s7708_s28 }
 0x7fb   : > { %p8113_p2 = pnand %p19233_p0, %p19232_p10 }
 0x7fd   : > { %8465 = dma.done.wait (!%p8113_p2), %s7709_s11, 4096  }
 0x7fe   : > { %8467 = vsyncadd (!%p8113_p2), %s7709_s11, 4294963200  ;;  %p19_p4 = scmp.ge.s32.totalorder %s8556_s27, 4   ;;  %s19234_s21 = smov %s8474_s22 }
 0x7ff   : > { %s19235_s22 = smov %s8478_s23  ;;  %s19236_s23 = smov %s8568_s30 }
 0x800   : > { %s19237_s24 = smov %s8556_s27  ;;  %21 = sbr.rel (!%p19_p4) target bundleno = 5 (0x5), region = 117 }
 0x807   :  { %7714 = vsyncpa [#allocation4], 1 }
 0x808   :  { %7716 = vsyncpa [#allocation4 + $0x1], 1 }
 0x809   :  { %7717 = vsyncpa [#allocation5], 1 }
 0x80a   :  { %7719 = vsyncpa [#allocation5 + $0x1], 1 }

</bundles_post_ra>
